<compile_context>
chip_gen: v7x
topology: tpu7x:2x2x1
jax: 0.10.0
libtpu: 0.0.40
codegen_flags: <defaults>
</compile_context>

<pallas_src>
import jax
import jax.numpy as jnp
from jax import lax
from jax.experimental import pallas as pl
from jax.experimental.pallas import tpu as pltpu  # noqa: F401

# ---------------- configuration (consistent with the module) ----------------
IN_CHANNELS = 4        # TEECNet in_channels
WIDTH = 8              # TEECNet width (KernelConv in/out channels)
OUT_CHANNELS = 2       # TEECNet out_channels
NUM_TEEC_LAYERS = 4    # TEECNet.num_layers
PSK_LAYERS = 5         # KernelConv num_layers -> PowerSeriesKernel num_layers
NUM_POWERS = 3         # kwargs['num_powers'] for PowerSeriesConv
EDGE_DIM = 5           # in_edge
PSK_HIDDEN = 64        # PowerSeriesKernel hidden width (hard-coded 64 in the module)
DN_H1, DN_H2 = 64, 128 # DenseNet([5, 64, 128, WIDTH**2])
WSQ = WIDTH * WIDTH

N_NODES = 64
N_EDGES = 256

assert WSQ == PSK_HIDDEN, "row-sliced power segments assume W*W == 64"

# ---- packed `vecs` slab ([192, 19]) column map ------------------------------
COL_B0 = 0                      # conv0 bias (p=0 rows pre-scaled by root_param[0])
COL_BM = 1                      # mid-layer biases: COL_BM + l, l = 0..4
COL_BO = 6                      # conv_out bias
COL_R0 = 7                      # conv0 root_param[1:] (rows 64:192)
COL_RM = 8                      # mid-layer root_param[1:]: COL_RM + l
COL_RO = 13                     # conv_out root_param[1:]
COL_BN_G, COL_BN_B = 14, 15     # shared BatchNorm1d gamma / beta   (rows 0:64)
COL_DN_B1, COL_DN_B2, COL_DN_B3 = 16, 17, 18   # DenseNet biases
N_VEC_COLS = 19

# ---- packed `node_w` slab ([104, 8]) row map --------------------------------
NW_FC1W = 0     # rows 0:8,  cols 0:IN_CHANNELS : fc1.weight^T
NW_LINW = 8     # rows 8:16                     : KernelConv.linear.weight^T
NW_ROOT = 16    # rows 16:24                    : root_param^T
NW_FCOW = 24    # rows 24:24+OUT                : fc_out.weight^T
NW_REP = 32     # rows 32:96                    : row-replication matrix [W*W, W]
NW_VEC = 96     # rows 96:104: col0 fc1.bias, col1 KernelConv.bias, col2[:OUT] fc_out.bias
NW_ROWS = 104


# ---------------------------------------------------------------------------
# The single fused kernel
# ---------------------------------------------------------------------------
def teecnet_fused_kernel(
    x_ref,        # [N, C_in] f32   node features (node-major, as the module gives them)
    ei_ref,       # [2, E]    int32 edge_index (row 0 = source j, row 1 = target i)
    ea_ref,       # [E, 5]    f32   edge attributes
    psc_w_ref,    # [6, 192, 64]    PSC mid(5)+out weights^T (p=0 rows pre-scaled by r0)
    w5_ref,       # [256, 5]        rows 0:192 conv0 weight^T, rows 192:256 DenseNet w1^T
    w64b_ref,     # [136, 64]       rows 0:128 DenseNet w2^T, rows 128:136 `red` matrix
    dn_w3T_ref,   # [64, 128]       DenseNet w3^T
    vecs_ref,     # [192, 19]       all bias / root / BN column vectors (see COL_* map)
    node_w_ref,   # [104, 8]        node-pipeline params (see NW_* map)
    outT_ref,     # [OUT, N]
):
    f32 = jnp.float32
    H, W = PSK_HIDDEN, WIDTH
    N = x_ref.shape[0]
    E = ea_ref.shape[0]
    rT = (((1,), (1,)), ((), ()))      # dot_general dims for A @ B.T (rhs transposed)

    def mm(a, b):
        return jnp.dot(a, b, preferred_element_type=f32)

    def mmT(a, b):
        return lax.dot_general(a, b, rT, preferred_element_type=f32)

    ea = ea_ref[...]                                   # [E, 5]

    # ---- PowerSeriesConv on lane-dense [feature, E] slabs ----
    # lin rows 0:H   -> p=0 segment (root_param[0] folded into weight & bias)
    #     rows H:2H  -> p=1 segment: r1 * tanh(lin)
    #     rows 2H:3H -> p=2 segment: r2 * tanh(lin^2)
    def psc(lin, r_col):
        s0 = lin[0:H]
        s1 = jnp.tanh(lin[H:2 * H]) * r_col[H:2 * H]
        t2 = lin[2 * H:3 * H]
        s2 = jnp.tanh(t2 * t2) * r_col[2 * H:3 * H]
        return s0 + s1 + s2                            # [H, E]

    # ---- shared BatchNorm1d(64), training-mode batch statistics ----
    gamma = vecs_ref[0:H, COL_BN_G:COL_BN_G + 1]       # [H, 1]
    beta = vecs_ref[0:H, COL_BN_B:COL_BN_B + 1]
    inv_e = 1.0 / E

    def bnorm(h):
        mean = jnp.sum(h, axis=1, keepdims=True) * inv_e                   # [H, 1]
        var = jnp.sum(h * h, axis=1, keepdims=True) * inv_e - mean * mean  # biased var
        scale = gamma * lax.rsqrt(var + 1e-5)
        shift = beta - mean * scale
        return h * scale + shift

    # ---- PowerSeriesKernel -> weight_k^T, shared by all 4 KernelConv layers ----
    lin = mmT(w5_ref[0:3 * H, :], ea) + vecs_ref[:, COL_B0:COL_B0 + 1]     # [3H, E]
    h = psc(lin, vecs_ref[:, COL_R0:COL_R0 + 1])
    for l in range(PSK_LAYERS):
        lin = mm(psc_w_ref[l], h) + vecs_ref[:, COL_BM + l:COL_BM + l + 1]
        h = psc(lin, vecs_ref[:, COL_RM + l:COL_RM + l + 1])
        h = bnorm(h)
    lin = mm(psc_w_ref[PSK_LAYERS], h) + vecs_ref[:, COL_BO:COL_BO + 1]
    wkT = psc(lin, vecs_ref[:, COL_RO:COL_RO + 1])                         # [W*W, E]

    # ---- DenseNet operator kernel -> weight_op^T ----
    h1 = jnp.maximum(
        mmT(w5_ref[3 * H:3 * H + DN_H1, :], ea)
        + vecs_ref[0:DN_H1, COL_DN_B1:COL_DN_B1 + 1], 0.0)                 # [64, E]
    h2 = jnp.maximum(
        mm(w64b_ref[0:DN_H2, :], h1)
        + vecs_ref[0:DN_H2, COL_DN_B2:COL_DN_B2 + 1], 0.0)                 # [128, E]
    wopT = mm(dn_w3T_ref[...], h2) + vecs_ref[0:WSQ, COL_DN_B3:COL_DN_B3 + 1]  # [64, E]

    # row i*W + o of wsumT holds (weight_k + weight_op)[e, i, o]
    wsumT = wkT + wopT                                                     # [W*W, E]

    # ---- gather / scatter masks built in-kernel from edge_index ----
    ei = ei_ref[...]                                   # [2, E] int32
    src = ei[0:1, :]                                   # j (source)
    dst = ei[1:2, :]                                   # i (target)
    niota = lax.broadcasted_iota(jnp.int32, (N, E), 0)
    src_m = jnp.where(niota == src, 1.0, 0.0).astype(f32)   # [N, E]
    dst_m = jnp.where(niota == dst, 1.0, 0.0).astype(f32)   # [N, E]
    gT = src_m - dst_m                                 # column e gathers (x_j - x_i)

    # ---- node-pipeline parameters (packed slab, static ref slices) ----
    fc1_wT = node_w_ref[NW_FC1W:NW_FC1W + W, 0:IN_CHANNELS]       # [W, C_in]
    lin_wT = node_w_ref[NW_LINW:NW_LINW + W, :]                   # [W, W]
    rootT = node_w_ref[NW_ROOT:NW_ROOT + W, :]                    # [W, W]
    fco_wT = node_w_ref[NW_FCOW:NW_FCOW + OUT_CHANNELS, :]        # [OUT, W]
    rep = node_w_ref[NW_REP:NW_REP + WSQ, :]                      # [W*W, W]
    fc1_b = node_w_ref[NW_VEC:NW_VEC + W, 0:1]                    # [W, 1]
    kcb = node_w_ref[NW_VEC:NW_VEC + W, 1:2]                      # [W, 1]
    fco_b = node_w_ref[NW_VEC:NW_VEC + OUT_CHANNELS, 2:3]         # [OUT, 1]
    red = w64b_ref[DN_H2:DN_H2 + W, :]                            # [W, W*W]

    # ---- fc1 (x consumed node-major via rhs-transposed dot) ----
    xT = mmT(fc1_wT, x_ref[...]) + fc1_b               # [W, N]

    # ---- NUM_TEEC_LAYERS x KernelConv (shared weights, aggr='add') ----
    for _ in range(NUM_TEEC_LAYERS):
        # lin(x_j) - lin(x_i): the Linear bias cancels exactly in the difference.
        x_linT = mm(lin_wT, xT)                        # [W, N]
        dT = mm(x_linT, gT)                            # [W, E]
        # per-edge (1xW)@(WxW) contraction, E on lanes:
        #   expand rows (MXU) -> full-vreg elementwise mul (VPU) -> reduce rows (MXU)
        d_rep = mm(rep, dT)                            # [W*W, E], row i*W+o = d[i]
        msgT = mm(red, d_rep * wsumT)                  # [W, E]
        # scatter-add onto target nodes (i = edge_index[1])
        aggrT = mmT(msgT, dst_m)                       # [W, N]
        # update(): aggr + x @ root + bias   (x = layer input, pre-linear)
        xT = aggrT + mm(rootT, xT) + kcb               # [W, N]

    # ---- fc_out + ReLU ----
    outT_ref[...] = jnp.maximum(mm(fco_wT, xT) + fco_b, 0.0)


# ---------------------------------------------------------------------------
# Parameter init (deterministic, synthetic, PyTorch-like layout)
# ---------------------------------------------------------------------------
def init_params(key):
    keys = iter(jax.random.split(key, 24))

    def w(shape, scale=0.1):
        return jax.random.normal(next(keys), shape, jnp.float32) * scale

    p = {}
    p['fc1_w'] = w((IN_CHANNELS, WIDTH));     p['fc1_b'] = w((WIDTH,))
    p['fcout_w'] = w((WIDTH, OUT_CHANNELS));  p['fcout_b'] = w((OUT_CHANNELS,))
    # KernelConv (linear bias is not materialized: it cancels in x_j - x_i)
    p['lin_w'] = w((WIDTH, WIDTH))
    p['root'] = w((WIDTH, WIDTH));            p['kc_bias'] = w((WIDTH,))
    # PowerSeriesKernel (per-power Linear weights/biases + root_param)
    p['c0_w'] = w((NUM_POWERS, EDGE_DIM, PSK_HIDDEN))
    p['c0_b'] = w((NUM_POWERS, PSK_HIDDEN))
    p['c0_r'] = w((NUM_POWERS, PSK_HIDDEN))
    p['cm_w'] = w((PSK_LAYERS, NUM_POWERS, PSK_HIDDEN, PSK_HIDDEN))
    p['cm_b'] = w((PSK_LAYERS, NUM_POWERS, PSK_HIDDEN))
    p['cm_r'] = w((PSK_LAYERS, NUM_POWERS, PSK_HIDDEN))
    p['bn_g'] = jnp.ones((PSK_HIDDEN,), jnp.float32)
    p['bn_b'] = jnp.zeros((PSK_HIDDEN,), jnp.float32)
    p['co_w'] = w((NUM_POWERS, PSK_HIDDEN, WSQ))
    p['co_b'] = w((NUM_POWERS, WSQ))
    p['co_r'] = w((NUM_POWERS, WSQ))
    # DenseNet operator kernel: [5, 64, 128, W*W]
    p['dn_w1'] = w((EDGE_DIM, DN_H1));  p['dn_b1'] = w((DN_H1,))
    p['dn_w2'] = w((DN_H1, DN_H2));     p['dn_b2'] = w((DN_H2,))
    p['dn_w3'] = w((DN_H2, WSQ));       p['dn_b3'] = w((WSQ,))
    return p


def pack_params(p):
    """Re-layout parameters into 6 kernel-ready slabs (transposed, power-packed)."""
    f32 = jnp.float32
    H, W = PSK_HIDDEN, WIDTH
    P3 = NUM_POWERS * H

    def psc_pack(wt, bt, rt):
        # wt [P, Cin, H], bt [P, H], rt [P, H]; fold rt[0] into the p=0 weights/bias.
        w0 = wt[0] * rt[0][None, :]
        b0 = bt[0] * rt[0]
        wT = jnp.concatenate([w0.T, wt[1].T, wt[2].T], axis=0)             # [3H, Cin]
        b_col = jnp.concatenate([b0, bt[1], bt[2]])[:, None]               # [3H, 1]
        r_col = jnp.concatenate([jnp.zeros_like(rt[0]), rt[1], rt[2]])[:, None]
        return wT, b_col, r_col

    c0 = psc_pack(p['c0_w'], p['c0_b'], p['c0_r'])
    mids = [psc_pack(p['cm_w'][l], p['cm_b'][l], p['cm_r'][l]) for l in range(PSK_LAYERS)]
    outc = psc_pack(p['co_w'], p['co_b'], p['co_r'])

    # constant helper matrices for the lane-dense per-edge contraction
    rep = jnp.repeat(jnp.eye(W, dtype=f32), W, axis=0)      # [W*W, W]: row i*W+o = e_i
    red = jnp.tile(jnp.eye(W, dtype=f32), (1, W))           # [W, W*W]: sums rows i*W+o over i

    def col(v):
        v = jnp.asarray(v, f32).reshape(-1)
        return jnp.concatenate([v, jnp.zeros((P3 - v.shape[0],), f32)])[:, None]

    vec_cols = ([c0[1]] + [m[1] for m in mids] + [outc[1]]
                + [c0[2]] + [m[2] for m in mids] + [outc[2]]
                + [col(p['bn_g']), col(p['bn_b']),
                   col(p['dn_b1']), col(p['dn_b2']), col(p['dn_b3'])])
    vecs = jnp.concatenate(vec_cols, axis=1)                               # [192, 19]
    assert vecs.shape == (P3, N_VEC_COLS)

    node_w = jnp.zeros((NW_ROWS, W), f32)
    node_w = node_w.at[NW_FC1W:NW_FC1W + W, 0:IN_CHANNELS].set(p['fc1_w'].T)
    node_w = node_w.at[NW_LINW:NW_LINW + W, :].set(p['lin_w'].T)
    node_w = node_w.at[NW_ROOT:NW_ROOT + W, :].set(p['root'].T)
    node_w = node_w.at[NW_FCOW:NW_FCOW + OUT_CHANNELS, :].set(p['fcout_w'].T)
    node_w = node_w.at[NW_REP:NW_REP + WSQ, :].set(rep)
    node_w = node_w.at[NW_VEC:NW_VEC + W, 0].set(p['fc1_b'])
    node_w = node_w.at[NW_VEC:NW_VEC + W, 1].set(p['kc_bias'])
    node_w = node_w.at[NW_VEC:NW_VEC + OUT_CHANNELS, 2].set(p['fcout_b'])

    return {
        'psc_w': jnp.stack([m[0] for m in mids] + [outc[0]], axis=0),      # [6, 192, 64]
        'w5': jnp.concatenate([c0[0], p['dn_w1'].T], axis=0),              # [256, 5]
        'w64b': jnp.concatenate([p['dn_w2'].T, red], axis=0),              # [136, 64]
        'dn_w3T': p['dn_w3'].T,                                            # [64, 128]
        'vecs': vecs,                                                      # [192, 19]
        'node_w': node_w,                                                  # [104, 8]
    }


# ---------------------------------------------------------------------------
# Forward: ONE pallas_call; only a trivial [2,N] -> [N,2] transpose outside
# ---------------------------------------------------------------------------
@jax.jit
def teecnet_forward(packed, x, edge_index, edge_attr):
    n = x.shape[0]
    outT = pl.pallas_call(
        teecnet_fused_kernel,
        out_shape=jax.ShapeDtypeStruct((OUT_CHANNELS, n), jnp.float32),
    )(x, edge_index, edge_attr,
      packed['psc_w'], packed['w5'], packed['w64b'],
      packed['dn_w3T'], packed['vecs'], packed['node_w'])
    return outT.T                                        # [N, OUT_CHANNELS]


if __name__ == "__main__":
    key = jax.random.PRNGKey(0)
    k_param, k_x, k_ei, k_ea = jax.random.split(key, 4)
    params = init_params(k_param)
    packed = pack_params(params)

    x = jax.random.normal(k_x, (N_NODES, IN_CHANNELS), jnp.float32)
    edge_index = jax.random.randint(k_ei, (2, N_EDGES), 0, N_NODES, dtype=jnp.int32)
    edge_attr = jax.random.normal(k_ea, (N_EDGES, EDGE_DIM), jnp.float32)

    out = teecnet_forward(packed, x, edge_index, edge_attr)
    jax.block_until_ready(out)
    assert out.shape == (N_NODES, OUT_CHANNELS)
    print("KERNEL_OK")
</pallas_src>

<mosaic_0001>
module attributes {stable_mosaic.version = 11 : i64} {
  func.func @teecnet_fused_kernel(%arg0: memref<64x4xf32, #tpu.memory_space<vmem>>, %arg1: memref<2x256xi32, #tpu.memory_space<vmem>>, %arg2: memref<256x5xf32, #tpu.memory_space<vmem>>, %arg3: memref<6x192x64xf32, #tpu.memory_space<vmem>>, %arg4: memref<256x5xf32, #tpu.memory_space<vmem>>, %arg5: memref<136x64xf32, #tpu.memory_space<vmem>>, %arg6: memref<64x128xf32, #tpu.memory_space<vmem>>, %arg7: memref<192x19xf32, #tpu.memory_space<vmem>>, %arg8: memref<104x8xf32, #tpu.memory_space<vmem>>, %arg9: memref<2x64xf32, #tpu.memory_space<vmem>>) attributes {dimension_semantics = [], scalar_prefetch = 0 : i64, scratch_operands = 0 : i64, tpu.core_type = #tpu.core_type<tc>} {
    %c0 = arith.constant 0 : index
    %c0_0 = arith.constant 0 : index
    %0 = vector.load %arg2[%c0, %c0_0] : memref<256x5xf32, #tpu.memory_space<vmem>>, vector<256x5xf32>
    %c0_1 = arith.constant 0 : index
    %c14 = arith.constant 14 : index
    %1 = vector.load %arg7[%c0_1, %c14] : memref<192x19xf32, #tpu.memory_space<vmem>>, vector<64x1xf32>
    %c0_2 = arith.constant 0 : index
    %c15 = arith.constant 15 : index
    %2 = vector.load %arg7[%c0_2, %c15] : memref<192x19xf32, #tpu.memory_space<vmem>>, vector<64x1xf32>
    %c0_3 = arith.constant 0 : index
    %c0_4 = arith.constant 0 : index
    %3 = vector.load %arg4[%c0_3, %c0_4] : memref<256x5xf32, #tpu.memory_space<vmem>>, vector<192x5xf32>
    %cst = arith.constant dense<0.000000e+00> : vector<192x256xf32>
    %4 = tpu.matmul %3, %0, %cst {dimension_numbers = #tpu.dot_dimension_numbers<[1], [1], [0], [0], [0, 0, 1, 0], [], []>} : vector<192x5xf32>, vector<256x5xf32>, vector<192x256xf32> -> vector<192x256xf32>
    %c0_5 = arith.constant 0 : index
    %c0_6 = arith.constant 0 : index
    %5 = vector.load %arg7[%c0_5, %c0_6] : memref<192x19xf32, #tpu.memory_space<vmem>>, vector<192x1xf32>
    %6 = vector.broadcast %5 : vector<192x1xf32> to vector<192x256xf32>
    %7 = arith.addf %4, %6 : vector<192x256xf32>
    %c0_7 = arith.constant 0 : index
    %c7 = arith.constant 7 : index
    %8 = vector.load %arg7[%c0_7, %c7] : memref<192x19xf32, #tpu.memory_space<vmem>>, vector<192x1xf32>
    %9 = vector.extract_strided_slice %7 {offsets = [0, 0], sizes = [64, 256], strides = [1, 1]} : vector<192x256xf32> to vector<64x256xf32>
    %10 = vector.extract_strided_slice %7 {offsets = [64, 0], sizes = [64, 256], strides = [1, 1]} : vector<192x256xf32> to vector<64x256xf32>
    %11 = math.tanh %10 : vector<64x256xf32>
    %12 = vector.extract_strided_slice %8 {offsets = [64, 0], sizes = [64, 1], strides = [1, 1]} : vector<192x1xf32> to vector<64x1xf32>
    %13 = vector.broadcast %12 : vector<64x1xf32> to vector<64x256xf32>
    %14 = arith.mulf %11, %13 : vector<64x256xf32>
    %15 = vector.extract_strided_slice %7 {offsets = [128, 0], sizes = [64, 256], strides = [1, 1]} : vector<192x256xf32> to vector<64x256xf32>
    %16 = arith.mulf %15, %15 : vector<64x256xf32>
    %17 = math.tanh %16 : vector<64x256xf32>
    %18 = vector.extract_strided_slice %8 {offsets = [128, 0], sizes = [64, 1], strides = [1, 1]} : vector<192x1xf32> to vector<64x1xf32>
    %19 = vector.broadcast %18 : vector<64x1xf32> to vector<64x256xf32>
    %20 = arith.mulf %17, %19 : vector<64x256xf32>
    %21 = arith.addf %9, %14 : vector<64x256xf32>
    %22 = arith.addf %21, %20 : vector<64x256xf32>
    %c0_8 = arith.constant 0 : index
    %c0_9 = arith.constant 0 : index
    %c0_10 = arith.constant 0 : index
    %23 = vector.load %arg3[%c0_8, %c0_9, %c0_10] : memref<6x192x64xf32, #tpu.memory_space<vmem>>, vector<1x192x64xf32>
    %24 = vector.shape_cast %23 : vector<1x192x64xf32> to vector<192x64xf32>
    %cst_11 = arith.constant dense<0.000000e+00> : vector<192x256xf32>
    %25 = tpu.matmul %24, %22, %cst_11 {dimension_numbers = #tpu.dot_dimension_numbers<[1], [0], [0], [1], [0, 0, 1, 1], [], []>} : vector<192x64xf32>, vector<64x256xf32>, vector<192x256xf32> -> vector<192x256xf32>
    %c0_12 = arith.constant 0 : index
    %c1 = arith.constant 1 : index
    %26 = vector.load %arg7[%c0_12, %c1] : memref<192x19xf32, #tpu.memory_space<vmem>>, vector<192x1xf32>
    %27 = vector.broadcast %26 : vector<192x1xf32> to vector<192x256xf32>
    %28 = arith.addf %25, %27 : vector<192x256xf32>
    %c0_13 = arith.constant 0 : index
    %c8 = arith.constant 8 : index
    %29 = vector.load %arg7[%c0_13, %c8] : memref<192x19xf32, #tpu.memory_space<vmem>>, vector<192x1xf32>
    %30 = vector.extract_strided_slice %28 {offsets = [0, 0], sizes = [64, 256], strides = [1, 1]} : vector<192x256xf32> to vector<64x256xf32>
    %31 = vector.extract_strided_slice %28 {offsets = [64, 0], sizes = [64, 256], strides = [1, 1]} : vector<192x256xf32> to vector<64x256xf32>
    %32 = math.tanh %31 : vector<64x256xf32>
    %33 = vector.extract_strided_slice %29 {offsets = [64, 0], sizes = [64, 1], strides = [1, 1]} : vector<192x1xf32> to vector<64x1xf32>
    %34 = vector.broadcast %33 : vector<64x1xf32> to vector<64x256xf32>
    %35 = arith.mulf %32, %34 : vector<64x256xf32>
    %36 = vector.extract_strided_slice %28 {offsets = [128, 0], sizes = [64, 256], strides = [1, 1]} : vector<192x256xf32> to vector<64x256xf32>
    %37 = arith.mulf %36, %36 : vector<64x256xf32>
    %38 = math.tanh %37 : vector<64x256xf32>
    %39 = vector.extract_strided_slice %29 {offsets = [128, 0], sizes = [64, 1], strides = [1, 1]} : vector<192x1xf32> to vector<64x1xf32>
    %40 = vector.broadcast %39 : vector<64x1xf32> to vector<64x256xf32>
    %41 = arith.mulf %38, %40 : vector<64x256xf32>
    %42 = arith.addf %30, %35 : vector<64x256xf32>
    %43 = arith.addf %42, %41 : vector<64x256xf32>
    %cst_14 = arith.constant dense<0.000000e+00> : vector<64xf32>
    %44 = vector.multi_reduction <add>, %43, %cst_14 [1] : vector<64x256xf32> to vector<64xf32>
    %45 = vector.shape_cast %44 : vector<64xf32> to vector<64x1xf32>
    %cst_15 = arith.constant 3.906250e-03 : f32
    %46 = vector.broadcast %cst_15 : f32 to vector<64x1xf32>
    %47 = arith.mulf %45, %46 : vector<64x1xf32>
    %48 = arith.mulf %43, %43 : vector<64x256xf32>
    %cst_16 = arith.constant dense<0.000000e+00> : vector<64xf32>
    %49 = vector.multi_reduction <add>, %48, %cst_16 [1] : vector<64x256xf32> to vector<64xf32>
    %50 = vector.shape_cast %49 : vector<64xf32> to vector<64x1xf32>
    %cst_17 = arith.constant 3.906250e-03 : f32
    %51 = vector.broadcast %cst_17 : f32 to vector<64x1xf32>
    %52 = arith.mulf %50, %51 : vector<64x1xf32>
    %53 = arith.mulf %47, %47 : vector<64x1xf32>
    %54 = arith.subf %52, %53 : vector<64x1xf32>
    %cst_18 = arith.constant 9.99999974E-6 : f32
    %55 = vector.broadcast %cst_18 : f32 to vector<64x1xf32>
    %56 = arith.addf %54, %55 : vector<64x1xf32>
    %57 = math.rsqrt %56 : vector<64x1xf32>
    %58 = arith.mulf %1, %57 : vector<64x1xf32>
    %59 = arith.mulf %47, %58 : vector<64x1xf32>
    %60 = arith.subf %2, %59 : vector<64x1xf32>
    %61 = vector.broadcast %58 : vector<64x1xf32> to vector<64x256xf32>
    %62 = arith.mulf %43, %61 : vector<64x256xf32>
    %63 = vector.broadcast %60 : vector<64x1xf32> to vector<64x256xf32>
    %64 = arith.addf %62, %63 : vector<64x256xf32>
    %c1_19 = arith.constant 1 : index
    %c0_20 = arith.constant 0 : index
    %c0_21 = arith.constant 0 : index
    %65 = vector.load %arg3[%c1_19, %c0_20, %c0_21] : memref<6x192x64xf32, #tpu.memory_space<vmem>>, vector<1x192x64xf32>
    %66 = vector.shape_cast %65 : vector<1x192x64xf32> to vector<192x64xf32>
    %cst_22 = arith.constant dense<0.000000e+00> : vector<192x256xf32>
    %67 = tpu.matmul %66, %64, %cst_22 {dimension_numbers = #tpu.dot_dimension_numbers<[1], [0], [0], [1], [0, 0, 1, 1], [], []>} : vector<192x64xf32>, vector<64x256xf32>, vector<192x256xf32> -> vector<192x256xf32>
    %c0_23 = arith.constant 0 : index
    %c2 = arith.constant 2 : index
    %68 = vector.load %arg7[%c0_23, %c2] : memref<192x19xf32, #tpu.memory_space<vmem>>, vector<192x1xf32>
    %69 = vector.broadcast %68 : vector<192x1xf32> to vector<192x256xf32>
    %70 = arith.addf %67, %69 : vector<192x256xf32>
    %c0_24 = arith.constant 0 : index
    %c9 = arith.constant 9 : index
    %71 = vector.load %arg7[%c0_24, %c9] : memref<192x19xf32, #tpu.memory_space<vmem>>, vector<192x1xf32>
    %72 = vector.extract_strided_slice %70 {offsets = [0, 0], sizes = [64, 256], strides = [1, 1]} : vector<192x256xf32> to vector<64x256xf32>
    %73 = vector.extract_strided_slice %70 {offsets = [64, 0], sizes = [64, 256], strides = [1, 1]} : vector<192x256xf32> to vector<64x256xf32>
    %74 = math.tanh %73 : vector<64x256xf32>
    %75 = vector.extract_strided_slice %71 {offsets = [64, 0], sizes = [64, 1], strides = [1, 1]} : vector<192x1xf32> to vector<64x1xf32>
    %76 = vector.broadcast %75 : vector<64x1xf32> to vector<64x256xf32>
    %77 = arith.mulf %74, %76 : vector<64x256xf32>
    %78 = vector.extract_strided_slice %70 {offsets = [128, 0], sizes = [64, 256], strides = [1, 1]} : vector<192x256xf32> to vector<64x256xf32>
    %79 = arith.mulf %78, %78 : vector<64x256xf32>
    %80 = math.tanh %79 : vector<64x256xf32>
    %81 = vector.extract_strided_slice %71 {offsets = [128, 0], sizes = [64, 1], strides = [1, 1]} : vector<192x1xf32> to vector<64x1xf32>
    %82 = vector.broadcast %81 : vector<64x1xf32> to vector<64x256xf32>
    %83 = arith.mulf %80, %82 : vector<64x256xf32>
    %84 = arith.addf %72, %77 : vector<64x256xf32>
    %85 = arith.addf %84, %83 : vector<64x256xf32>
    %cst_25 = arith.constant dense<0.000000e+00> : vector<64xf32>
    %86 = vector.multi_reduction <add>, %85, %cst_25 [1] : vector<64x256xf32> to vector<64xf32>
    %87 = vector.shape_cast %86 : vector<64xf32> to vector<64x1xf32>
    %cst_26 = arith.constant 3.906250e-03 : f32
    %88 = vector.broadcast %cst_26 : f32 to vector<64x1xf32>
    %89 = arith.mulf %87, %88 : vector<64x1xf32>
    %90 = arith.mulf %85, %85 : vector<64x256xf32>
    %cst_27 = arith.constant dense<0.000000e+00> : vector<64xf32>
    %91 = vector.multi_reduction <add>, %90, %cst_27 [1] : vector<64x256xf32> to vector<64xf32>
    %92 = vector.shape_cast %91 : vector<64xf32> to vector<64x1xf32>
    %cst_28 = arith.constant 3.906250e-03 : f32
    %93 = vector.broadcast %cst_28 : f32 to vector<64x1xf32>
    %94 = arith.mulf %92, %93 : vector<64x1xf32>
    %95 = arith.mulf %89, %89 : vector<64x1xf32>
    %96 = arith.subf %94, %95 : vector<64x1xf32>
    %cst_29 = arith.constant 9.99999974E-6 : f32
    %97 = vector.broadcast %cst_29 : f32 to vector<64x1xf32>
    %98 = arith.addf %96, %97 : vector<64x1xf32>
    %99 = math.rsqrt %98 : vector<64x1xf32>
    %100 = arith.mulf %1, %99 : vector<64x1xf32>
    %101 = arith.mulf %89, %100 : vector<64x1xf32>
    %102 = arith.subf %2, %101 : vector<64x1xf32>
    %103 = vector.broadcast %100 : vector<64x1xf32> to vector<64x256xf32>
    %104 = arith.mulf %85, %103 : vector<64x256xf32>
    %105 = vector.broadcast %102 : vector<64x1xf32> to vector<64x256xf32>
    %106 = arith.addf %104, %105 : vector<64x256xf32>
    %c2_30 = arith.constant 2 : index
    %c0_31 = arith.constant 0 : index
    %c0_32 = arith.constant 0 : index
    %107 = vector.load %arg3[%c2_30, %c0_31, %c0_32] : memref<6x192x64xf32, #tpu.memory_space<vmem>>, vector<1x192x64xf32>
    %108 = vector.shape_cast %107 : vector<1x192x64xf32> to vector<192x64xf32>
    %cst_33 = arith.constant dense<0.000000e+00> : vector<192x256xf32>
    %109 = tpu.matmul %108, %106, %cst_33 {dimension_numbers = #tpu.dot_dimension_numbers<[1], [0], [0], [1], [0, 0, 1, 1], [], []>} : vector<192x64xf32>, vector<64x256xf32>, vector<192x256xf32> -> vector<192x256xf32>
    %c0_34 = arith.constant 0 : index
    %c3 = arith.constant 3 : index
    %110 = vector.load %arg7[%c0_34, %c3] : memref<192x19xf32, #tpu.memory_space<vmem>>, vector<192x1xf32>
    %111 = vector.broadcast %110 : vector<192x1xf32> to vector<192x256xf32>
    %112 = arith.addf %109, %111 : vector<192x256xf32>
    %c0_35 = arith.constant 0 : index
    %c10 = arith.constant 10 : index
    %113 = vector.load %arg7[%c0_35, %c10] : memref<192x19xf32, #tpu.memory_space<vmem>>, vector<192x1xf32>
    %114 = vector.extract_strided_slice %112 {offsets = [0, 0], sizes = [64, 256], strides = [1, 1]} : vector<192x256xf32> to vector<64x256xf32>
    %115 = vector.extract_strided_slice %112 {offsets = [64, 0], sizes = [64, 256], strides = [1, 1]} : vector<192x256xf32> to vector<64x256xf32>
    %116 = math.tanh %115 : vector<64x256xf32>
    %117 = vector.extract_strided_slice %113 {offsets = [64, 0], sizes = [64, 1], strides = [1, 1]} : vector<192x1xf32> to vector<64x1xf32>
    %118 = vector.broadcast %117 : vector<64x1xf32> to vector<64x256xf32>
    %119 = arith.mulf %116, %118 : vector<64x256xf32>
    %120 = vector.extract_strided_slice %112 {offsets = [128, 0], sizes = [64, 256], strides = [1, 1]} : vector<192x256xf32> to vector<64x256xf32>
    %121 = arith.mulf %120, %120 : vector<64x256xf32>
    %122 = math.tanh %121 : vector<64x256xf32>
    %123 = vector.extract_strided_slice %113 {offsets = [128, 0], sizes = [64, 1], strides = [1, 1]} : vector<192x1xf32> to vector<64x1xf32>
    %124 = vector.broadcast %123 : vector<64x1xf32> to vector<64x256xf32>
    %125 = arith.mulf %122, %124 : vector<64x256xf32>
    %126 = arith.addf %114, %119 : vector<64x256xf32>
    %127 = arith.addf %126, %125 : vector<64x256xf32>
    %cst_36 = arith.constant dense<0.000000e+00> : vector<64xf32>
    %128 = vector.multi_reduction <add>, %127, %cst_36 [1] : vector<64x256xf32> to vector<64xf32>
    %129 = vector.shape_cast %128 : vector<64xf32> to vector<64x1xf32>
    %cst_37 = arith.constant 3.906250e-03 : f32
    %130 = vector.broadcast %cst_37 : f32 to vector<64x1xf32>
    %131 = arith.mulf %129, %130 : vector<64x1xf32>
    %132 = arith.mulf %127, %127 : vector<64x256xf32>
    %cst_38 = arith.constant dense<0.000000e+00> : vector<64xf32>
    %133 = vector.multi_reduction <add>, %132, %cst_38 [1] : vector<64x256xf32> to vector<64xf32>
    %134 = vector.shape_cast %133 : vector<64xf32> to vector<64x1xf32>
    %cst_39 = arith.constant 3.906250e-03 : f32
    %135 = vector.broadcast %cst_39 : f32 to vector<64x1xf32>
    %136 = arith.mulf %134, %135 : vector<64x1xf32>
    %137 = arith.mulf %131, %131 : vector<64x1xf32>
    %138 = arith.subf %136, %137 : vector<64x1xf32>
    %cst_40 = arith.constant 9.99999974E-6 : f32
    %139 = vector.broadcast %cst_40 : f32 to vector<64x1xf32>
    %140 = arith.addf %138, %139 : vector<64x1xf32>
    %141 = math.rsqrt %140 : vector<64x1xf32>
    %142 = arith.mulf %1, %141 : vector<64x1xf32>
    %143 = arith.mulf %131, %142 : vector<64x1xf32>
    %144 = arith.subf %2, %143 : vector<64x1xf32>
    %145 = vector.broadcast %142 : vector<64x1xf32> to vector<64x256xf32>
    %146 = arith.mulf %127, %145 : vector<64x256xf32>
    %147 = vector.broadcast %144 : vector<64x1xf32> to vector<64x256xf32>
    %148 = arith.addf %146, %147 : vector<64x256xf32>
    %c3_41 = arith.constant 3 : index
    %c0_42 = arith.constant 0 : index
    %c0_43 = arith.constant 0 : index
    %149 = vector.load %arg3[%c3_41, %c0_42, %c0_43] : memref<6x192x64xf32, #tpu.memory_space<vmem>>, vector<1x192x64xf32>
    %150 = vector.shape_cast %149 : vector<1x192x64xf32> to vector<192x64xf32>
    %cst_44 = arith.constant dense<0.000000e+00> : vector<192x256xf32>
    %151 = tpu.matmul %150, %148, %cst_44 {dimension_numbers = #tpu.dot_dimension_numbers<[1], [0], [0], [1], [0, 0, 1, 1], [], []>} : vector<192x64xf32>, vector<64x256xf32>, vector<192x256xf32> -> vector<192x256xf32>
    %c0_45 = arith.constant 0 : index
    %c4 = arith.constant 4 : index
    %152 = vector.load %arg7[%c0_45, %c4] : memref<192x19xf32, #tpu.memory_space<vmem>>, vector<192x1xf32>
    %153 = vector.broadcast %152 : vector<192x1xf32> to vector<192x256xf32>
    %154 = arith.addf %151, %153 : vector<192x256xf32>
    %c0_46 = arith.constant 0 : index
    %c11 = arith.constant 11 : index
    %155 = vector.load %arg7[%c0_46, %c11] : memref<192x19xf32, #tpu.memory_space<vmem>>, vector<192x1xf32>
    %156 = vector.extract_strided_slice %154 {offsets = [0, 0], sizes = [64, 256], strides = [1, 1]} : vector<192x256xf32> to vector<64x256xf32>
    %157 = vector.extract_strided_slice %154 {offsets = [64, 0], sizes = [64, 256], strides = [1, 1]} : vector<192x256xf32> to vector<64x256xf32>
    %158 = math.tanh %157 : vector<64x256xf32>
    %159 = vector.extract_strided_slice %155 {offsets = [64, 0], sizes = [64, 1], strides = [1, 1]} : vector<192x1xf32> to vector<64x1xf32>
    %160 = vector.broadcast %159 : vector<64x1xf32> to vector<64x256xf32>
    %161 = arith.mulf %158, %160 : vector<64x256xf32>
    %162 = vector.extract_strided_slice %154 {offsets = [128, 0], sizes = [64, 256], strides = [1, 1]} : vector<192x256xf32> to vector<64x256xf32>
    %163 = arith.mulf %162, %162 : vector<64x256xf32>
    %164 = math.tanh %163 : vector<64x256xf32>
    %165 = vector.extract_strided_slice %155 {offsets = [128, 0], sizes = [64, 1], strides = [1, 1]} : vector<192x1xf32> to vector<64x1xf32>
    %166 = vector.broadcast %165 : vector<64x1xf32> to vector<64x256xf32>
    %167 = arith.mulf %164, %166 : vector<64x256xf32>
    %168 = arith.addf %156, %161 : vector<64x256xf32>
    %169 = arith.addf %168, %167 : vector<64x256xf32>
    %cst_47 = arith.constant dense<0.000000e+00> : vector<64xf32>
    %170 = vector.multi_reduction <add>, %169, %cst_47 [1] : vector<64x256xf32> to vector<64xf32>
    %171 = vector.shape_cast %170 : vector<64xf32> to vector<64x1xf32>
    %cst_48 = arith.constant 3.906250e-03 : f32
    %172 = vector.broadcast %cst_48 : f32 to vector<64x1xf32>
    %173 = arith.mulf %171, %172 : vector<64x1xf32>
    %174 = arith.mulf %169, %169 : vector<64x256xf32>
    %cst_49 = arith.constant dense<0.000000e+00> : vector<64xf32>
    %175 = vector.multi_reduction <add>, %174, %cst_49 [1] : vector<64x256xf32> to vector<64xf32>
    %176 = vector.shape_cast %175 : vector<64xf32> to vector<64x1xf32>
    %cst_50 = arith.constant 3.906250e-03 : f32
    %177 = vector.broadcast %cst_50 : f32 to vector<64x1xf32>
    %178 = arith.mulf %176, %177 : vector<64x1xf32>
    %179 = arith.mulf %173, %173 : vector<64x1xf32>
    %180 = arith.subf %178, %179 : vector<64x1xf32>
    %cst_51 = arith.constant 9.99999974E-6 : f32
    %181 = vector.broadcast %cst_51 : f32 to vector<64x1xf32>
    %182 = arith.addf %180, %181 : vector<64x1xf32>
    %183 = math.rsqrt %182 : vector<64x1xf32>
    %184 = arith.mulf %1, %183 : vector<64x1xf32>
    %185 = arith.mulf %173, %184 : vector<64x1xf32>
    %186 = arith.subf %2, %185 : vector<64x1xf32>
    %187 = vector.broadcast %184 : vector<64x1xf32> to vector<64x256xf32>
    %188 = arith.mulf %169, %187 : vector<64x256xf32>
    %189 = vector.broadcast %186 : vector<64x1xf32> to vector<64x256xf32>
    %190 = arith.addf %188, %189 : vector<64x256xf32>
    %c4_52 = arith.constant 4 : index
    %c0_53 = arith.constant 0 : index
    %c0_54 = arith.constant 0 : index
    %191 = vector.load %arg3[%c4_52, %c0_53, %c0_54] : memref<6x192x64xf32, #tpu.memory_space<vmem>>, vector<1x192x64xf32>
    %192 = vector.shape_cast %191 : vector<1x192x64xf32> to vector<192x64xf32>
    %cst_55 = arith.constant dense<0.000000e+00> : vector<192x256xf32>
    %193 = tpu.matmul %192, %190, %cst_55 {dimension_numbers = #tpu.dot_dimension_numbers<[1], [0], [0], [1], [0, 0, 1, 1], [], []>} : vector<192x64xf32>, vector<64x256xf32>, vector<192x256xf32> -> vector<192x256xf32>
    %c0_56 = arith.constant 0 : index
    %c5 = arith.constant 5 : index
    %194 = vector.load %arg7[%c0_56, %c5] : memref<192x19xf32, #tpu.memory_space<vmem>>, vector<192x1xf32>
    %195 = vector.broadcast %194 : vector<192x1xf32> to vector<192x256xf32>
    %196 = arith.addf %193, %195 : vector<192x256xf32>
    %c0_57 = arith.constant 0 : index
    %c12 = arith.constant 12 : index
    %197 = vector.load %arg7[%c0_57, %c12] : memref<192x19xf32, #tpu.memory_space<vmem>>, vector<192x1xf32>
    %198 = vector.extract_strided_slice %196 {offsets = [0, 0], sizes = [64, 256], strides = [1, 1]} : vector<192x256xf32> to vector<64x256xf32>
    %199 = vector.extract_strided_slice %196 {offsets = [64, 0], sizes = [64, 256], strides = [1, 1]} : vector<192x256xf32> to vector<64x256xf32>
    %200 = math.tanh %199 : vector<64x256xf32>
    %201 = vector.extract_strided_slice %197 {offsets = [64, 0], sizes = [64, 1], strides = [1, 1]} : vector<192x1xf32> to vector<64x1xf32>
    %202 = vector.broadcast %201 : vector<64x1xf32> to vector<64x256xf32>
    %203 = arith.mulf %200, %202 : vector<64x256xf32>
    %204 = vector.extract_strided_slice %196 {offsets = [128, 0], sizes = [64, 256], strides = [1, 1]} : vector<192x256xf32> to vector<64x256xf32>
    %205 = arith.mulf %204, %204 : vector<64x256xf32>
    %206 = math.tanh %205 : vector<64x256xf32>
    %207 = vector.extract_strided_slice %197 {offsets = [128, 0], sizes = [64, 1], strides = [1, 1]} : vector<192x1xf32> to vector<64x1xf32>
    %208 = vector.broadcast %207 : vector<64x1xf32> to vector<64x256xf32>
    %209 = arith.mulf %206, %208 : vector<64x256xf32>
    %210 = arith.addf %198, %203 : vector<64x256xf32>
    %211 = arith.addf %210, %209 : vector<64x256xf32>
    %cst_58 = arith.constant dense<0.000000e+00> : vector<64xf32>
    %212 = vector.multi_reduction <add>, %211, %cst_58 [1] : vector<64x256xf32> to vector<64xf32>
    %213 = vector.shape_cast %212 : vector<64xf32> to vector<64x1xf32>
    %cst_59 = arith.constant 3.906250e-03 : f32
    %214 = vector.broadcast %cst_59 : f32 to vector<64x1xf32>
    %215 = arith.mulf %213, %214 : vector<64x1xf32>
    %216 = arith.mulf %211, %211 : vector<64x256xf32>
    %cst_60 = arith.constant dense<0.000000e+00> : vector<64xf32>
    %217 = vector.multi_reduction <add>, %216, %cst_60 [1] : vector<64x256xf32> to vector<64xf32>
    %218 = vector.shape_cast %217 : vector<64xf32> to vector<64x1xf32>
    %cst_61 = arith.constant 3.906250e-03 : f32
    %219 = vector.broadcast %cst_61 : f32 to vector<64x1xf32>
    %220 = arith.mulf %218, %219 : vector<64x1xf32>
    %221 = arith.mulf %215, %215 : vector<64x1xf32>
    %222 = arith.subf %220, %221 : vector<64x1xf32>
    %cst_62 = arith.constant 9.99999974E-6 : f32
    %223 = vector.broadcast %cst_62 : f32 to vector<64x1xf32>
    %224 = arith.addf %222, %223 : vector<64x1xf32>
    %225 = math.rsqrt %224 : vector<64x1xf32>
    %226 = arith.mulf %1, %225 : vector<64x1xf32>
    %227 = arith.mulf %215, %226 : vector<64x1xf32>
    %228 = arith.subf %2, %227 : vector<64x1xf32>
    %229 = vector.broadcast %226 : vector<64x1xf32> to vector<64x256xf32>
    %230 = arith.mulf %211, %229 : vector<64x256xf32>
    %231 = vector.broadcast %228 : vector<64x1xf32> to vector<64x256xf32>
    %232 = arith.addf %230, %231 : vector<64x256xf32>
    %c5_63 = arith.constant 5 : index
    %c0_64 = arith.constant 0 : index
    %c0_65 = arith.constant 0 : index
    %233 = vector.load %arg3[%c5_63, %c0_64, %c0_65] : memref<6x192x64xf32, #tpu.memory_space<vmem>>, vector<1x192x64xf32>
    %234 = vector.shape_cast %233 : vector<1x192x64xf32> to vector<192x64xf32>
    %cst_66 = arith.constant dense<0.000000e+00> : vector<192x256xf32>
    %235 = tpu.matmul %234, %232, %cst_66 {dimension_numbers = #tpu.dot_dimension_numbers<[1], [0], [0], [1], [0, 0, 1, 1], [], []>} : vector<192x64xf32>, vector<64x256xf32>, vector<192x256xf32> -> vector<192x256xf32>
    %c0_67 = arith.constant 0 : index
    %c6 = arith.constant 6 : index
    %236 = vector.load %arg7[%c0_67, %c6] : memref<192x19xf32, #tpu.memory_space<vmem>>, vector<192x1xf32>
    %237 = vector.broadcast %236 : vector<192x1xf32> to vector<192x256xf32>
    %238 = arith.addf %235, %237 : vector<192x256xf32>
    %c0_68 = arith.constant 0 : index
    %c13 = arith.constant 13 : index
    %239 = vector.load %arg7[%c0_68, %c13] : memref<192x19xf32, #tpu.memory_space<vmem>>, vector<192x1xf32>
    %240 = vector.extract_strided_slice %238 {offsets = [0, 0], sizes = [64, 256], strides = [1, 1]} : vector<192x256xf32> to vector<64x256xf32>
    %241 = vector.extract_strided_slice %238 {offsets = [64, 0], sizes = [64, 256], strides = [1, 1]} : vector<192x256xf32> to vector<64x256xf32>
    %242 = math.tanh %241 : vector<64x256xf32>
    %243 = vector.extract_strided_slice %239 {offsets = [64, 0], sizes = [64, 1], strides = [1, 1]} : vector<192x1xf32> to vector<64x1xf32>
    %244 = vector.broadcast %243 : vector<64x1xf32> to vector<64x256xf32>
    %245 = arith.mulf %242, %244 : vector<64x256xf32>
    %246 = vector.extract_strided_slice %238 {offsets = [128, 0], sizes = [64, 256], strides = [1, 1]} : vector<192x256xf32> to vector<64x256xf32>
    %247 = arith.mulf %246, %246 : vector<64x256xf32>
    %248 = math.tanh %247 : vector<64x256xf32>
    %249 = vector.extract_strided_slice %239 {offsets = [128, 0], sizes = [64, 1], strides = [1, 1]} : vector<192x1xf32> to vector<64x1xf32>
    %250 = vector.broadcast %249 : vector<64x1xf32> to vector<64x256xf32>
    %251 = arith.mulf %248, %250 : vector<64x256xf32>
    %252 = arith.addf %240, %245 : vector<64x256xf32>
    %253 = arith.addf %252, %251 : vector<64x256xf32>
    %c192 = arith.constant 192 : index
    %c0_69 = arith.constant 0 : index
    %254 = vector.load %arg4[%c192, %c0_69] : memref<256x5xf32, #tpu.memory_space<vmem>>, vector<64x5xf32>
    %cst_70 = arith.constant dense<0.000000e+00> : vector<64x256xf32>
    %255 = tpu.matmul %254, %0, %cst_70 {dimension_numbers = #tpu.dot_dimension_numbers<[1], [1], [0], [0], [0, 0, 1, 0], [], []>} : vector<64x5xf32>, vector<256x5xf32>, vector<64x256xf32> -> vector<64x256xf32>
    %c0_71 = arith.constant 0 : index
    %c16 = arith.constant 16 : index
    %256 = vector.load %arg7[%c0_71, %c16] : memref<192x19xf32, #tpu.memory_space<vmem>>, vector<64x1xf32>
    %257 = vector.broadcast %256 : vector<64x1xf32> to vector<64x256xf32>
    %258 = arith.addf %255, %257 : vector<64x256xf32>
    %cst_72 = arith.constant 0.000000e+00 : f32
    %259 = vector.broadcast %cst_72 : f32 to vector<64x256xf32>
    %260 = arith.maximumf %258, %259 : vector<64x256xf32>
    %c0_73 = arith.constant 0 : index
    %c0_74 = arith.constant 0 : index
    %261 = vector.load %arg5[%c0_73, %c0_74] : memref<136x64xf32, #tpu.memory_space<vmem>>, vector<128x64xf32>
    %cst_75 = arith.constant dense<0.000000e+00> : vector<128x256xf32>
    %262 = tpu.matmul %261, %260, %cst_75 {dimension_numbers = #tpu.dot_dimension_numbers<[1], [0], [0], [1], [0, 0, 1, 1], [], []>} : vector<128x64xf32>, vector<64x256xf32>, vector<128x256xf32> -> vector<128x256xf32>
    %c0_76 = arith.constant 0 : index
    %c17 = arith.constant 17 : index
    %263 = vector.load %arg7[%c0_76, %c17] : memref<192x19xf32, #tpu.memory_space<vmem>>, vector<128x1xf32>
    %264 = vector.broadcast %263 : vector<128x1xf32> to vector<128x256xf32>
    %265 = arith.addf %262, %264 : vector<128x256xf32>
    %cst_77 = arith.constant 0.000000e+00 : f32
    %266 = vector.broadcast %cst_77 : f32 to vector<128x256xf32>
    %267 = arith.maximumf %265, %266 : vector<128x256xf32>
    %c0_78 = arith.constant 0 : index
    %c0_79 = arith.constant 0 : index
    %268 = vector.load %arg6[%c0_78, %c0_79] : memref<64x128xf32, #tpu.memory_space<vmem>>, vector<64x128xf32>
    %cst_80 = arith.constant dense<0.000000e+00> : vector<64x256xf32>
    %269 = tpu.matmul %268, %267, %cst_80 {dimension_numbers = #tpu.dot_dimension_numbers<[1], [0], [0], [1], [0, 0, 1, 1], [], []>} : vector<64x128xf32>, vector<128x256xf32>, vector<64x256xf32> -> vector<64x256xf32>
    %c0_81 = arith.constant 0 : index
    %c18 = arith.constant 18 : index
    %270 = vector.load %arg7[%c0_81, %c18] : memref<192x19xf32, #tpu.memory_space<vmem>>, vector<64x1xf32>
    %271 = vector.broadcast %270 : vector<64x1xf32> to vector<64x256xf32>
    %272 = arith.addf %269, %271 : vector<64x256xf32>
    %273 = arith.addf %253, %272 : vector<64x256xf32>
    %c0_82 = arith.constant 0 : index
    %c0_83 = arith.constant 0 : index
    %274 = vector.load %arg1[%c0_82, %c0_83] : memref<2x256xi32, #tpu.memory_space<vmem>>, vector<2x256xi32>
    %275 = vector.extract_strided_slice %274 {offsets = [0, 0], sizes = [1, 256], strides = [1, 1]} : vector<2x256xi32> to vector<1x256xi32>
    %276 = vector.extract_strided_slice %274 {offsets = [1, 0], sizes = [1, 256], strides = [1, 1]} : vector<2x256xi32> to vector<1x256xi32>
    %277 = tpu.iota {dimensions = array<i32: 0>} : vector<64x256xi32>
    %278 = vector.broadcast %275 : vector<1x256xi32> to vector<64x256xi32>
    %279 = arith.cmpi eq, %277, %278 : vector<64x256xi32>
    %cst_84 = arith.constant 1.000000e+00 : f32
    %cst_85 = arith.constant 0.000000e+00 : f32
    %280 = vector.broadcast %cst_84 : f32 to vector<64x256xf32>
    %281 = vector.broadcast %cst_85 : f32 to vector<64x256xf32>
    %282 = arith.select %279, %280, %281 : vector<64x256xi1>, vector<64x256xf32>
    %283 = vector.broadcast %276 : vector<1x256xi32> to vector<64x256xi32>
    %284 = arith.cmpi eq, %277, %283 : vector<64x256xi32>
    %cst_86 = arith.constant 1.000000e+00 : f32
    %cst_87 = arith.constant 0.000000e+00 : f32
    %285 = vector.broadcast %cst_86 : f32 to vector<64x256xf32>
    %286 = vector.broadcast %cst_87 : f32 to vector<64x256xf32>
    %287 = arith.select %284, %285, %286 : vector<64x256xi1>, vector<64x256xf32>
    %288 = arith.subf %282, %287 : vector<64x256xf32>
    %c0_88 = arith.constant 0 : index
    %c0_89 = arith.constant 0 : index
    %289 = vector.load %arg8[%c0_88, %c0_89] : memref<104x8xf32, #tpu.memory_space<vmem>>, vector<8x4xf32>
    %c8_90 = arith.constant 8 : index
    %c0_91 = arith.constant 0 : index
    %290 = vector.load %arg8[%c8_90, %c0_91] : memref<104x8xf32, #tpu.memory_space<vmem>>, vector<8x8xf32>
    %c16_92 = arith.constant 16 : index
    %c0_93 = arith.constant 0 : index
    %291 = vector.load %arg8[%c16_92, %c0_93] : memref<104x8xf32, #tpu.memory_space<vmem>>, vector<8x8xf32>
    %c24 = arith.constant 24 : index
    %c0_94 = arith.constant 0 : index
    %292 = vector.load %arg8[%c24, %c0_94] : memref<104x8xf32, #tpu.memory_space<vmem>>, vector<2x8xf32>
    %c32 = arith.constant 32 : index
    %c0_95 = arith.constant 0 : index
    %293 = vector.load %arg8[%c32, %c0_95] : memref<104x8xf32, #tpu.memory_space<vmem>>, vector<64x8xf32>
    %c96 = arith.constant 96 : index
    %c0_96 = arith.constant 0 : index
    %294 = vector.load %arg8[%c96, %c0_96] : memref<104x8xf32, #tpu.memory_space<vmem>>, vector<8x1xf32>
    %c96_97 = arith.constant 96 : index
    %c1_98 = arith.constant 1 : index
    %295 = vector.load %arg8[%c96_97, %c1_98] : memref<104x8xf32, #tpu.memory_space<vmem>>, vector<8x1xf32>
    %c96_99 = arith.constant 96 : index
    %c2_100 = arith.constant 2 : index
    %296 = vector.load %arg8[%c96_99, %c2_100] : memref<104x8xf32, #tpu.memory_space<vmem>>, vector<2x1xf32>
    %c128 = arith.constant 128 : index
    %c0_101 = arith.constant 0 : index
    %297 = vector.load %arg5[%c128, %c0_101] : memref<136x64xf32, #tpu.memory_space<vmem>>, vector<8x64xf32>
    %c0_102 = arith.constant 0 : index
    %c0_103 = arith.constant 0 : index
    %298 = vector.load %arg0[%c0_102, %c0_103] : memref<64x4xf32, #tpu.memory_space<vmem>>, vector<64x4xf32>
    %cst_104 = arith.constant dense<0.000000e+00> : vector<8x64xf32>
    %299 = tpu.matmul %289, %298, %cst_104 {dimension_numbers = #tpu.dot_dimension_numbers<[1], [1], [0], [0], [0, 0, 1, 0], [], []>} : vector<8x4xf32>, vector<64x4xf32>, vector<8x64xf32> -> vector<8x64xf32>
    %300 = vector.broadcast %294 : vector<8x1xf32> to vector<8x64xf32>
    %301 = arith.addf %299, %300 : vector<8x64xf32>
    %cst_105 = arith.constant dense<0.000000e+00> : vector<8x64xf32>
    %302 = tpu.matmul %290, %301, %cst_105 {dimension_numbers = #tpu.dot_dimension_numbers<[1], [0], [0], [1], [0, 0, 1, 1], [], []>} : vector<8x8xf32>, vector<8x64xf32>, vector<8x64xf32> -> vector<8x64xf32>
    %cst_106 = arith.constant dense<0.000000e+00> : vector<8x256xf32>
    %303 = tpu.matmul %302, %288, %cst_106 {dimension_numbers = #tpu.dot_dimension_numbers<[1], [0], [0], [1], [0, 0, 1, 1], [], []>} : vector<8x64xf32>, vector<64x256xf32>, vector<8x256xf32> -> vector<8x256xf32>
    %cst_107 = arith.constant dense<0.000000e+00> : vector<64x256xf32>
    %304 = tpu.matmul %293, %303, %cst_107 {dimension_numbers = #tpu.dot_dimension_numbers<[1], [0], [0], [1], [0, 0, 1, 1], [], []>} : vector<64x8xf32>, vector<8x256xf32>, vector<64x256xf32> -> vector<64x256xf32>
    %305 = arith.mulf %304, %273 : vector<64x256xf32>
    %cst_108 = arith.constant dense<0.000000e+00> : vector<8x256xf32>
    %306 = tpu.matmul %297, %305, %cst_108 {dimension_numbers = #tpu.dot_dimension_numbers<[1], [0], [0], [1], [0, 0, 1, 1], [], []>} : vector<8x64xf32>, vector<64x256xf32>, vector<8x256xf32> -> vector<8x256xf32>
    %cst_109 = arith.constant dense<0.000000e+00> : vector<8x64xf32>
    %307 = tpu.matmul %306, %287, %cst_109 {dimension_numbers = #tpu.dot_dimension_numbers<[1], [1], [0], [0], [0, 0, 1, 0], [], []>} : vector<8x256xf32>, vector<64x256xf32>, vector<8x64xf32> -> vector<8x64xf32>
    %cst_110 = arith.constant dense<0.000000e+00> : vector<8x64xf32>
    %308 = tpu.matmul %291, %301, %cst_110 {dimension_numbers = #tpu.dot_dimension_numbers<[1], [0], [0], [1], [0, 0, 1, 1], [], []>} : vector<8x8xf32>, vector<8x64xf32>, vector<8x64xf32> -> vector<8x64xf32>
    %309 = arith.addf %307, %308 : vector<8x64xf32>
    %310 = vector.broadcast %295 : vector<8x1xf32> to vector<8x64xf32>
    %311 = arith.addf %309, %310 : vector<8x64xf32>
    %cst_111 = arith.constant dense<0.000000e+00> : vector<8x64xf32>
    %312 = tpu.matmul %290, %311, %cst_111 {dimension_numbers = #tpu.dot_dimension_numbers<[1], [0], [0], [1], [0, 0, 1, 1], [], []>} : vector<8x8xf32>, vector<8x64xf32>, vector<8x64xf32> -> vector<8x64xf32>
    %cst_112 = arith.constant dense<0.000000e+00> : vector<8x256xf32>
    %313 = tpu.matmul %312, %288, %cst_112 {dimension_numbers = #tpu.dot_dimension_numbers<[1], [0], [0], [1], [0, 0, 1, 1], [], []>} : vector<8x64xf32>, vector<64x256xf32>, vector<8x256xf32> -> vector<8x256xf32>
    %cst_113 = arith.constant dense<0.000000e+00> : vector<64x256xf32>
    %314 = tpu.matmul %293, %313, %cst_113 {dimension_numbers = #tpu.dot_dimension_numbers<[1], [0], [0], [1], [0, 0, 1, 1], [], []>} : vector<64x8xf32>, vector<8x256xf32>, vector<64x256xf32> -> vector<64x256xf32>
    %315 = arith.mulf %314, %273 : vector<64x256xf32>
    %cst_114 = arith.constant dense<0.000000e+00> : vector<8x256xf32>
    %316 = tpu.matmul %297, %315, %cst_114 {dimension_numbers = #tpu.dot_dimension_numbers<[1], [0], [0], [1], [0, 0, 1, 1], [], []>} : vector<8x64xf32>, vector<64x256xf32>, vector<8x256xf32> -> vector<8x256xf32>
    %cst_115 = arith.constant dense<0.000000e+00> : vector<8x64xf32>
    %317 = tpu.matmul %316, %287, %cst_115 {dimension_numbers = #tpu.dot_dimension_numbers<[1], [1], [0], [0], [0, 0, 1, 0], [], []>} : vector<8x256xf32>, vector<64x256xf32>, vector<8x64xf32> -> vector<8x64xf32>
    %cst_116 = arith.constant dense<0.000000e+00> : vector<8x64xf32>
    %318 = tpu.matmul %291, %311, %cst_116 {dimension_numbers = #tpu.dot_dimension_numbers<[1], [0], [0], [1], [0, 0, 1, 1], [], []>} : vector<8x8xf32>, vector<8x64xf32>, vector<8x64xf32> -> vector<8x64xf32>
    %319 = arith.addf %317, %318 : vector<8x64xf32>
    %320 = vector.broadcast %295 : vector<8x1xf32> to vector<8x64xf32>
    %321 = arith.addf %319, %320 : vector<8x64xf32>
    %cst_117 = arith.constant dense<0.000000e+00> : vector<8x64xf32>
    %322 = tpu.matmul %290, %321, %cst_117 {dimension_numbers = #tpu.dot_dimension_numbers<[1], [0], [0], [1], [0, 0, 1, 1], [], []>} : vector<8x8xf32>, vector<8x64xf32>, vector<8x64xf32> -> vector<8x64xf32>
    %cst_118 = arith.constant dense<0.000000e+00> : vector<8x256xf32>
    %323 = tpu.matmul %322, %288, %cst_118 {dimension_numbers = #tpu.dot_dimension_numbers<[1], [0], [0], [1], [0, 0, 1, 1], [], []>} : vector<8x64xf32>, vector<64x256xf32>, vector<8x256xf32> -> vector<8x256xf32>
    %cst_119 = arith.constant dense<0.000000e+00> : vector<64x256xf32>
    %324 = tpu.matmul %293, %323, %cst_119 {dimension_numbers = #tpu.dot_dimension_numbers<[1], [0], [0], [1], [0, 0, 1, 1], [], []>} : vector<64x8xf32>, vector<8x256xf32>, vector<64x256xf32> -> vector<64x256xf32>
    %325 = arith.mulf %324, %273 : vector<64x256xf32>
    %cst_120 = arith.constant dense<0.000000e+00> : vector<8x256xf32>
    %326 = tpu.matmul %297, %325, %cst_120 {dimension_numbers = #tpu.dot_dimension_numbers<[1], [0], [0], [1], [0, 0, 1, 1], [], []>} : vector<8x64xf32>, vector<64x256xf32>, vector<8x256xf32> -> vector<8x256xf32>
    %cst_121 = arith.constant dense<0.000000e+00> : vector<8x64xf32>
    %327 = tpu.matmul %326, %287, %cst_121 {dimension_numbers = #tpu.dot_dimension_numbers<[1], [1], [0], [0], [0, 0, 1, 0], [], []>} : vector<8x256xf32>, vector<64x256xf32>, vector<8x64xf32> -> vector<8x64xf32>
    %cst_122 = arith.constant dense<0.000000e+00> : vector<8x64xf32>
    %328 = tpu.matmul %291, %321, %cst_122 {dimension_numbers = #tpu.dot_dimension_numbers<[1], [0], [0], [1], [0, 0, 1, 1], [], []>} : vector<8x8xf32>, vector<8x64xf32>, vector<8x64xf32> -> vector<8x64xf32>
    %329 = arith.addf %327, %328 : vector<8x64xf32>
    %330 = vector.broadcast %295 : vector<8x1xf32> to vector<8x64xf32>
    %331 = arith.addf %329, %330 : vector<8x64xf32>
    %cst_123 = arith.constant dense<0.000000e+00> : vector<8x64xf32>
    %332 = tpu.matmul %290, %331, %cst_123 {dimension_numbers = #tpu.dot_dimension_numbers<[1], [0], [0], [1], [0, 0, 1, 1], [], []>} : vector<8x8xf32>, vector<8x64xf32>, vector<8x64xf32> -> vector<8x64xf32>
    %cst_124 = arith.constant dense<0.000000e+00> : vector<8x256xf32>
    %333 = tpu.matmul %332, %288, %cst_124 {dimension_numbers = #tpu.dot_dimension_numbers<[1], [0], [0], [1], [0, 0, 1, 1], [], []>} : vector<8x64xf32>, vector<64x256xf32>, vector<8x256xf32> -> vector<8x256xf32>
    %cst_125 = arith.constant dense<0.000000e+00> : vector<64x256xf32>
    %334 = tpu.matmul %293, %333, %cst_125 {dimension_numbers = #tpu.dot_dimension_numbers<[1], [0], [0], [1], [0, 0, 1, 1], [], []>} : vector<64x8xf32>, vector<8x256xf32>, vector<64x256xf32> -> vector<64x256xf32>
    %335 = arith.mulf %334, %273 : vector<64x256xf32>
    %cst_126 = arith.constant dense<0.000000e+00> : vector<8x256xf32>
    %336 = tpu.matmul %297, %335, %cst_126 {dimension_numbers = #tpu.dot_dimension_numbers<[1], [0], [0], [1], [0, 0, 1, 1], [], []>} : vector<8x64xf32>, vector<64x256xf32>, vector<8x256xf32> -> vector<8x256xf32>
    %cst_127 = arith.constant dense<0.000000e+00> : vector<8x64xf32>
    %337 = tpu.matmul %336, %287, %cst_127 {dimension_numbers = #tpu.dot_dimension_numbers<[1], [1], [0], [0], [0, 0, 1, 0], [], []>} : vector<8x256xf32>, vector<64x256xf32>, vector<8x64xf32> -> vector<8x64xf32>
    %cst_128 = arith.constant dense<0.000000e+00> : vector<8x64xf32>
    %338 = tpu.matmul %291, %331, %cst_128 {dimension_numbers = #tpu.dot_dimension_numbers<[1], [0], [0], [1], [0, 0, 1, 1], [], []>} : vector<8x8xf32>, vector<8x64xf32>, vector<8x64xf32> -> vector<8x64xf32>
    %339 = arith.addf %337, %338 : vector<8x64xf32>
    %340 = vector.broadcast %295 : vector<8x1xf32> to vector<8x64xf32>
    %341 = arith.addf %339, %340 : vector<8x64xf32>
    %cst_129 = arith.constant dense<0.000000e+00> : vector<2x64xf32>
    %342 = tpu.matmul %292, %341, %cst_129 {dimension_numbers = #tpu.dot_dimension_numbers<[1], [0], [0], [1], [0, 0, 1, 1], [], []>} : vector<2x8xf32>, vector<8x64xf32>, vector<2x64xf32> -> vector<2x64xf32>
    %343 = vector.broadcast %296 : vector<2x1xf32> to vector<2x64xf32>
    %344 = arith.addf %342, %343 : vector<2x64xf32>
    %cst_130 = arith.constant 0.000000e+00 : f32
    %345 = vector.broadcast %cst_130 : f32 to vector<2x64xf32>
    %346 = arith.maximumf %344, %345 : vector<2x64xf32>
    %c0_131 = arith.constant 0 : index
    %c0_132 = arith.constant 0 : index
    %347 = vector.load %arg9[%c0_131, %c0_132] : memref<2x64xf32, #tpu.memory_space<vmem>>, vector<2x64xf32>
    tpu.vector_store %arg9[%c0_131, %c0_132], %346 {strides = array<i32>} : memref<2x64xf32, #tpu.memory_space<vmem>>, vector<2x64xf32>,
    return
  }
}

</mosaic_0001>

<bundles_post_ra>
// kernel: teecnet_forward.1
= control target key start
LH: loop header
LB: loop body
LE: loop exit
PB: predicated region body
PF: predicated region fallthrough
CT: control target
= control target key end

     0   :  { %vm233_vm0 = vcmask 39936   ;;  %v16061_v4 = vmov 0  ;;  %v15978_v7 = vmov 0   ;;  %s15968_s0 = inlined_call_operand.vmem [shape: f32[64,4], index: 0, kind: input, shape index: {}]   ;;  %s15969_s1 = inlined_call_operand.vmem [shape: s32[2,256], index: 1, kind: input, shape index: {}]   ;;  %s15970_s2 = inlined_call_operand.vmem [shape: f32[256,5], index: 2, kind: input, shape index: {}]   ;;  %s15971_s3 = inlined_call_operand.vmem [shape: f32[6,192,64], index: 3, kind: input, shape index: {}]   ;;  %s15972_s4 = inlined_call_operand.vmem [shape: f32[256,5], index: 4, kind: input, shape index: {}]   ;;  %s15973_s5 = inlined_call_operand.vmem [shape: f32[136,64], index: 5, kind: input, shape index: {}]   ;;  %s15974_s6 = inlined_call_operand.vmem [shape: f32[64,128], index: 6, kind: input, shape index: {}]   ;;  %s15975_s7 = inlined_call_operand.vmem [shape: f32[192,19], index: 7, kind: input, shape index: {}]   ;;  %s15976_s8 = inlined_call_operand.vmem [shape: f32[104,8], index: 8, kind: input, shape index: {}]   ;;  %s15977_s9 = inlined_call_operand.hbm [shape: f32[2,64], index: 9, kind: output, shape index: {}]  }
   0x1   :  { %v49_v0 = vld [vmem:[%s15970_s2 + $0x80] sm:$0xff]  ;;  %v50_v1 = vld [vmem:[%s15970_s2 + $0x88] sm:$0xff]  ;;  %vm10842_vm1 = vmpackc.low %vm233_vm0, %vm233_vm0  ;;  %9962 = vset.pattern.permute.xlu1 %v15978_v7  ;;  %9961 = vset.pattern.permute.xlu0 %v15978_v7 }
   0x2   :  { %v33_v2 = vld [vmem:[%s15970_s2] sm:$0xff]  ;;  %v10838_v3 = vpack.c.bf16 %v50_v1, %v49_v0  ;;  %v16062_v4 = vsel %vm10842_vm1, 4294967295, %v16061_v4  ;;  %v34_v5 = vld [vmem:[%s15970_s2 + $0x8] sm:$0xff]  ;;  %v51_v6 = vld [vmem:[%s15970_s2 + $0x90] sm:$0xff] }
   0x3   :  { %16063 = vst [vmem:[#allocation6_spill] sm:$0xff] %v16062_v4  ;;  %v10854_v8 = vpack.c.bf16 %v34_v5, %v33_v2  ;;  %v52_v9 = vld [vmem:[%s15970_s2 + $0x98] sm:$0xff]  ;;  %v35_v11 = vld [vmem:[%s15970_s2 + $0x10] sm:$0xff]  ;;  %v53_v13 = vld [vmem:[%s15970_s2 + $0xa0] sm:$0xff] }
   0x4   :  { %16060 = vst [vmem:[#allocation5_spill] sm:$0xff] %v10838_v3  ;;  %9410 = vmatprep.subr.msk.bf16.mxu0 %vm10842_vm1, %v10838_v3  ;;  %v10862_v10 = vpack.c.bf16 %v52_v9, %v51_v6  ;;  %v36_v12 = vld [vmem:[%s15970_s2 + $0x18] sm:$0xff]  ;;  %v54_v14 = vld [vmem:[%s15970_s2 + $0xa8] sm:$0xff]  ;;  %v10889_v17 = vld [vmem:[%s15972_s4] sm:$0xff] }
   0x5   :  { %16064 = vst [vmem:[#allocation7_spill] sm:$0xff] %v10854_v8  ;;  %9413 = vmatpush3.bf16.xpose.msk.msra.mxu0 %vm10842_vm1, %v10854_v8  ;;  %v10882_v15 = vpack.c.bf16 %v36_v12, %v35_v11  ;;  %v10884_v16 = vpack.c.bf16 %v54_v14, %v53_v13  ;;  %9221 = vmatprep.mubr.msk.f32.mxu0 %vm233_vm0, %v10889_v17  ;;  %v37_v18 = vld [vmem:[%s15970_s2 + $0x20] sm:$0xff]  ;;  %v38_v19 = vld [vmem:[%s15970_s2 + $0x28] sm:$0xff]  ;;  %v55_v21 = vld [vmem:[%s15970_s2 + $0xb0] sm:$0xff] }
   0x6   :  { %16065 = vst [vmem:[#allocation8_spill] sm:$0xff] %v10862_v10  ;;  %9416 = vmatprep.subr.msk.bf16.mxu0 %vm10842_vm1, %v10862_v10  ;;  %v10908_v20 = vld [vmem:[%s15975_s7 + $0x80] sm:$0xff]  ;;  %v56_v22 = vld [vmem:[%s15970_s2 + $0xb8] sm:$0xff]  ;;  %v10920_v23 = vld [vmem:[%s15975_s7 + $0x88] sm:$0xff]  ;;  %v10922_v24 = vpack.c.bf16 %v38_v19, %v37_v18 }
   0x7   :  { %16066 = vst [vmem:[#allocation9_spill] sm:$0xff] %v10882_v15  ;;  %16067 = vst [vmem:[#allocation10_spill] sm:$0xff] %v10884_v16  ;;  %195 = vperm.xlu1 %9962, %v10908_v20   ;;  %v10924_v25 = vpack.c.bf16 %v56_v22, %v55_v21  ;;  %v10930_v26 = vld [vmem:[%s15975_s7 + $0x40] sm:$0xff]  ;;  %v10935_v27 = vld [vmem:[%s15975_s7 + $0x58] sm:$0xff] }
   0x8   :  { %16068 = vst [vmem:[#allocation11_spill] sm:$0xff] %v10922_v24  ;;  %155 = vperm.xlu0 %9961, %v10930_v26   ;;  %v10944_v28 = vld [vmem:[%s15975_s7 + $0x48] sm:$0xff]  ;;  %v39_v29 = vld [vmem:[%s15970_s2 + $0x30] sm:$0xff]  ;;  %v40_v30 = vld [vmem:[%s15970_s2 + $0x38] sm:$0xff] }
   0x9   :  { %16069 = vst [vmem:[#allocation12_spill] sm:$0xff] %v10924_v25  ;;  %v57_v31 = vld [vmem:[%s15970_s2 + $0xc0] sm:$0xff]  ;;  %v58_v32 = vld [vmem:[%s15970_s2 + $0xc8] sm:$0xff]  ;;  %v10965_v33 = vld [vmem:[%s15975_s7 + $0x98] sm:$0xff]  ;;  %v10968_v34 = vpack.c.bf16 %v40_v30, %v39_v29 }
   0xa   :  { %16070 = vst [vmem:[#allocation13_spill] sm:$0xff] %v10965_v33  ;;  %v10973_v35 = vld [vmem:[%s15975_s7 + $0x50] sm:$0xff]  ;;  %v10975_v36 = vpack.c.bf16 %v58_v32, %v57_v31 }
   0xb   :  { %200 = vperm.xlu1 %9962, %v10920_v23   ;;  %16071 = vst [vmem:[#allocation14_spill] sm:$0xff] %v10968_v34 }
   0xc   :  { %160 = vperm.xlu0 %9961, %v10944_v28   ;;  %16072 = vst [vmem:[#allocation15_spill] sm:$0xff] %v10975_v36 }
   0xd   :  { %9419 = vmatpush3.bf16.xpose.msk.msra.mxu0 %vm10842_vm1, %v10882_v15 }
   0xe   :  { %9422 = vmatprep.subr.msk.bf16.mxu0 %vm10842_vm1, %v10884_v16 }
   0xf   :  { %170 = vperm.xlu1 %9962, %v10935_v27  }
  0x15   :  { %9425 = vmatpush3.bf16.xpose.msk.msra.mxu0 %vm10842_vm1, %v10922_v24 }
  0x16   :  { %9428 = vmatprep.subr.msk.bf16.mxu0 %vm10842_vm1, %v10924_v25 }
  0x17   :  { %14 = vsyncpa [#allocation3], 0  ;;  %210 = vperm.xlu1 %9962, %v10965_v33   ;;  %v10981_v37 = vld [vmem:[%s15975_s7 + $0x68] sm:$0xff]  ;;  %165 = vperm.xlu0 %9961, %v10973_v35   ;;  %v10990_v38 = vld [vmem:[%s15975_s7 + $0x90] sm:$0xff]  ;;  %v10755_v2 = vmov 7   ;;  %vm907_vm2 = vcmask 523264  }
  0x18   :  { %16073 = vst [vmem:[#allocation16_spill] sm:$0xff] %v10981_v37  ;;  %v41_v39 = vld [vmem:[%s15970_s2 + $0x40] sm:$0xff]  ;;  %v42_v40 = vld [vmem:[%s15970_s2 + $0x48] sm:$0xff]  ;;  %v59_v41 = vld [vmem:[%s15970_s2 + $0xd0] sm:$0xff]  ;;  %s10760_s25 = smov 1   ;;  %vm6520_vm3 = vcmask 31744  }
  0x19   :  { %v60_v42 = vld [vmem:[%s15970_s2 + $0xd8] sm:$0xff]  ;;  %v11011_v43 = vld [vmem:[%s15975_s7 + $0xa8] sm:$0xff]  ;;  %v11014_v44 = vpack.c.bf16 %v42_v40, %v41_v39  ;;  %v11019_v45 = vld [vmem:[%s15975_s7 + $0x60] sm:$0xff]  ;;  %vm16034_vm5 = vmmov 0   ;;  %s10778_s29 = smov [#allocation2]  }
  0x1a   :  { %16074 = vst [vmem:[#allocation17_spill] sm:$0xff] %v11011_v43  ;;  %16076 = vst [vmem:[#allocation19_spill] sm:$0xff] %v11019_v45  ;;  %v11021_v46 = vpack.c.bf16 %v60_v42, %v59_v41  ;;  %v11027_v47 = vld [vmem:[%s15975_s7 + $0x78] sm:$0xff]  ;;  %v11036_v48 = vld [vmem:[%s15975_s7 + $0xa0] sm:$0xff] }
  0x1b   :  { %180 = vperm.xlu1 %9962, %v10981_v37   ;;  %205 = vperm.xlu0 %9961, %v10990_v38   ;;  %16075 = vst [vmem:[#allocation18_spill] sm:$0xff] %v11014_v44  ;;  %16078 = vst [vmem:[#allocation21_spill] sm:$0xff] %v11027_v47  ;;  %v43_v49 = vld [vmem:[%s15970_s2 + $0x50] sm:$0xff]  ;;  %v44_v50 = vld [vmem:[%s15970_s2 + $0x58] sm:$0xff] }
  0x1c   :  { %16077 = vst [vmem:[#allocation20_spill] sm:$0xff] %v11021_v46  ;;  %v61_v51 = vld [vmem:[%s15970_s2 + $0xe0] sm:$0xff]  ;;  %v62_v52 = vld [vmem:[%s15970_s2 + $0xe8] sm:$0xff]  ;;  %v11057_v53 = vld [vmem:[%s15975_s7 + $0xb8] sm:$0xff]  ;;  %v11060_v54 = vpack.c.bf16 %v44_v50, %v43_v49 }
  0x1d   :  { %9431 = vmatpush3.bf16.xpose.msk.msra.mxu0 %vm10842_vm1, %v10968_v34  ;;  %16079 = vst [vmem:[#allocation22_spill] sm:$0xff] %v11057_v53  ;;  %v11065_v55 = vld [vmem:[%s15975_s7 + $0x70] sm:$0xff]  ;;  %v11067_v56 = vpack.c.bf16 %v62_v52, %v61_v51  ;;  %v11073_v57 = vld [vmem:[%s15975_s7 + $0x8] sm:$0xff]  ;;  %v45_v59 = vld [vmem:[%s15970_s2 + $0x60] sm:$0xff] }
  0x1e   :  { %9434 = vmatprep.subr.msk.bf16.mxu0 %vm10842_vm1, %v10975_v36  ;;  %16080 = vst [vmem:[#allocation23_spill] sm:$0xff] %v11060_v54  ;;  %16081 = vst [vmem:[#allocation24_spill] sm:$0xff] %v11065_v55  ;;  %v11082_v58 = vld [vmem:[%s15975_s7 + $0xb0] sm:$0xff]  ;;  %v46_v60 = vld [vmem:[%s15970_s2 + $0x68] sm:$0xff] }
  0x1f   :  { %220 = vperm.xlu1 %9962, %v11011_v43   ;;  %175 = vperm.xlu0 %9961, %v11019_v45   ;;  %16082 = vst [vmem:[#allocation25_spill] sm:$0xff] %v11067_v56  ;;  %v63_v61 = vld [vmem:[%s15970_s2 + $0xf0] sm:$0xff]  ;;  %v64_v62 = vld [vmem:[%s15970_s2 + $0xf8] sm:$0xff]  ;;  %v11101_v63 = vpack.c.bf16 %v46_v60, %v45_v59  ;;  %v11106_v0 = vld [vmem:[%s15975_s7] sm:$0xff] }
  0x20   :  { %v11108_v1 = vpack.c.bf16 %v64_v62, %v63_v61  ;;  %v11119_v5 = vld [vmem:[%s15975_s7 + $0x18] sm:$0xff]  ;;  %v47_v6 = vld [vmem:[%s15970_s2 + $0x70] sm:$0xff]  ;;  %v11137_v12 = vld [vmem:[%s15975_s7 + $0x28] sm:$0xff] }
  0x21   :  { %16083 = vst [vmem:[#allocation26_spill] sm:$0xff] %v11101_v63  ;;  %v48_v9 = vld [vmem:[%s15970_s2 + $0x78] sm:$0xff]  ;;  %v11142_v13 = vld [vmem:[%s15975_s7 + $0x10] sm:$0xff]  ;;  %v74_v18 = vld [vmem:[%s15972_s4 + $0x8] sm:$0xff] }
  0x22   :  { %16084 = vst [vmem:[#allocation27_spill] sm:$0xff] %v11108_v1  ;;  %v11132_v11 = vpack.c.bf16 %v48_v9, %v47_v6  ;;  %v11153_v14 = vld [vmem:[%s15975_s7 + $0x38] sm:$0xff]  ;;  %v75_v19 = vld [vmem:[%s15972_s4 + $0x10] sm:$0xff]  ;;  %v11181_v21 = vld [vmem:[%s15975_s7 + $0x20] sm:$0xff] }
  0x23   :  { %190 = vperm.xlu1 %9962, %v11027_v47   ;;  %215 = vperm.xlu0 %9961, %v11036_v48   ;;  %16086 = vst [vmem:[#allocation29_spill] sm:$0xff] %v11181_v21  ;;  %v77_v22 = vld [vmem:[%s15972_s4 + $0x20] sm:$0xff]  ;;  %v78_v29 = vld [vmem:[%s15972_s4 + $0x28] sm:$0xff]  ;;  %v79_v30 = vld [vmem:[%s15972_s4 + $0x30] sm:$0xff] }
  0x24   :  { %16085 = vst [vmem:[#allocation28_spill] sm:$0xff] %v11132_v11  ;;  %v80_v31 = vld [vmem:[%s15972_s4 + $0x38] sm:$0xff]  ;;  %v81_v32 = vld [vmem:[%s15972_s4 + $0x40] sm:$0xff]  ;;  %v11219_v39 = vld [vmem:[%s15975_s7 + $0x30] sm:$0xff] }
  0x25   :  { %9437 = vmatpush3.bf16.xpose.msk.msra.mxu0 %vm10842_vm1, %v11014_v44  ;;  %16087 = vst [vmem:[#allocation30_spill] sm:$0xff] %v11219_v39  ;;  %v82_v40 = vld [vmem:[%s15972_s4 + $0x48] sm:$0xff]  ;;  %v83_v41 = vld [vmem:[%s15972_s4 + $0x50] sm:$0xff]  ;;  %v84_v42 = vld [vmem:[%s15972_s4 + $0x58] sm:$0xff] }
  0x26   :  { %9440 = vmatprep.subr.msk.bf16.mxu0 %vm10842_vm1, %v11021_v46  ;;  %v85_v49 = vld [vmem:[%s15972_s4 + $0x60] sm:$0xff]  ;;  %v86_v50 = vld [vmem:[%s15972_s4 + $0x68] sm:$0xff]  ;;  %v87_v51 = vld [vmem:[%s15972_s4 + $0x70] sm:$0xff] }
  0x27   :  { %230 = vperm.xlu1 %9962, %v11057_v53   ;;  %185 = vperm.xlu0 %9961, %v11065_v55   ;;  %v88_v52 = vld [vmem:[%s15972_s4 + $0x78] sm:$0xff]  ;;  %v89_v59 = vld [vmem:[%s15972_s4 + $0x80] sm:$0xff]  ;;  %v90_v60 = vld [vmem:[%s15972_s4 + $0x88] sm:$0xff] }
  0x28   :  { %v91_v61 = vld [vmem:[%s15972_s4 + $0x90] sm:$0xff]  ;;  %v92_v62 = vld [vmem:[%s15972_s4 + $0x98] sm:$0xff]  ;;  %v94_v6 = vld [vmem:[%s15972_s4 + $0xa8] sm:$0xff] }
  0x29   :  { %v95_v9 = vld [vmem:[%s15972_s4 + $0xb0] sm:$0xff]  ;;  %vm14962_vm4 = vmpackc.low %vm6520_vm3, %vm6520_vm3 }
  0x2b   :  { %120 = vperm.xlu1 %9962, %v11073_v57   ;;  %225 = vperm.xlu0 %9961, %v11082_v58  }
  0x2d   :  { %9443 = vmatpush3.bf16.xpose.msk.msra.mxu0 %vm10842_vm1, %v11060_v54 }
  0x2e   :  { %9446 = vmatprep.subr.msk.bf16.mxu0 %vm10842_vm1, %v11067_v56 }
  0x2f   :  { %9963 = vset.pattern.permute.xlu1 %v10755_v2  ;;  %115 = vperm.xlu0 %9961, %v11106_v0  }
  0x30   :  { %632 = vperm.xlu1 %9963, %v10944_v28  }
  0x33   :  { %130 = vperm.xlu0 %9961, %v11119_v5  }
  0x34   :  { %708 = vperm.xlu1 %9963, %v10908_v20  }
  0x35   :  { %9449 = vmatpush3.bf16.xpose.msk.msra.mxu0 %vm10842_vm1, %v11101_v63 }
  0x36   :  { %9452 = vmatprep.subr.msk.bf16.mxu0 %vm10842_vm1, %v11108_v1  ;;  %v15989_v1 = vmov 1  }
  0x37   :  { %140 = vperm.xlu0 %9961, %v11137_v12  }
  0x38   :  { %9964 = vset.pattern.permute.xlu1 %v15978_v7 }
  0x39   :  { %125 = vperm.xlu1 %9964, %v11142_v13  }
  0x3b   :  { %150 = vperm.xlu0 %9961, %v11153_v14  }
  0x3d   :  { %9455 = vmatpush3.bf16.xpose.msk.msra.mxu0 %vm10842_vm1, %v11132_v11  ;;  %9965 = vset.pattern.permute.xlu1 %v10755_v2 }
  0x3e   :  { %636 = vperm.xlu1 %9965, %v10973_v35  }
  0x3f   :  { %9969 = vset.pattern.permute.xlu0 %v10755_v2 }
  0x40   :  { %628 = vperm.xlu0 %9969, %v10930_v26  }
  0x42   :  { %640 = vperm.xlu1 %9965, %v10935_v27  }
  0x44   :  { %9222 = vmatmul.mubr.msk.f32.vlgmr.msra.gmra.mrb[0].mxu0 %vm233_vm0, %v10889_v17  ;;  %712 = vperm.xlu0 %9969, %v10920_v23   ;;  %v76_v17 = vld [vmem:[%s15972_s4 + $0x18] sm:$0xff] }
  0x45   :  { %9223 = vmatprep.mubr.msk.f32.mxu0 %vm233_vm0, %v74_v18 }
  0x46   :  { %720 = vperm.xlu1 %9965, %v10965_v33  }
  0x48   :  { %9224 = vmatmul.mubr.msk.f32.gmra.mrb[2].mxu0 %vm233_vm0, %v74_v18  ;;  %716 = vperm.xlu0 %9969, %v10990_v38   ;;  %v96_v18 = vld [vmem:[%s15972_s4 + $0xb8] sm:$0xff] }
  0x49   :  { %9225 = vmatprep.mubr.msk.f32.mxu0 %vm233_vm0, %v75_v19 }
  0x4a   :  { %9966 = vset.pattern.permute.xlu1 %v15978_v7 }
  0x4b   :  { %135 = vperm.xlu1 %9966, %v11181_v21  }
  0x4c   :  { %9226 = vmatmul.mubr.msk.f32.gmra.mrb[4].mxu0 %vm233_vm0, %v75_v19  ;;  %724 = vperm.xlu0 %9969, %v11036_v48  }
  0x4d   :  { %9227 = vmatprep.mubr.msk.f32.mxu0 %vm233_vm0, %v76_v17 }
  0x4f   :  { %9967 = vset.pattern.permute.xlu1 %v10755_v2 }
  0x50   :  { %9228 = vmatmul.mubr.msk.f32.gmra.mrb[6].mxu0 %vm233_vm0, %v76_v17  ;;  %644 = vperm.xlu1 %9967, %v11019_v45  }
  0x51   :  { %9229 = vmatprep.mubr.msk.f32.mxu0 %vm233_vm0, %v77_v22  ;;  %732 = vperm.xlu0 %9969, %v11082_v58  }
  0x54   :  { %9230 = vmatmul.mubr.msk.f32.gmra.mrb[8].mxu0 %vm233_vm0, %v77_v22  ;;  %648 = vperm.xlu1 %9967, %v10981_v37  }
  0x55   :  { %9231 = vmatprep.mubr.msk.f32.mxu0 %vm233_vm0, %v78_v29  ;;  %9972 = vset.pattern.permute.xlu0 %v15989_v1 }
  0x56   :  { %848 = vperm.xlu0 %9972, %v10944_v28  }
  0x58   :  { %9232 = vmatmul.mubr.msk.f32.gmra.mrb[10].mxu0 %vm233_vm0, %v78_v29  ;;  %728 = vperm.xlu1 %9967, %v11011_v43  }
  0x59   :  { %9233 = vmatprep.mubr.msk.f32.mxu0 %vm233_vm0, %v79_v30 }
  0x5a   :  { %852 = vperm.xlu0 %9972, %v10973_v35  }
  0x5c   :  { %9234 = vmatmul.mubr.msk.f32.gmra.mrb[12].mxu0 %vm233_vm0, %v79_v30  ;;  %9968 = vset.pattern.permute.xlu1 %v15978_v7 }
  0x5d   :  { %9235 = vmatprep.mubr.msk.f32.mxu0 %vm233_vm0, %v80_v31  ;;  %145 = vperm.xlu1 %9968, %v11219_v39  }
  0x5e   :  { %884 = vperm.xlu0 %9972, %v10990_v38  }
  0x60   :  { %9236 = vmatmul.mubr.msk.f32.gmra.mrb[14].mxu0 %vm233_vm0, %v80_v31 }
  0x61   :  { %9237 = vmatprep.mubr.msk.f32.mxu0 %vm233_vm0, %v81_v32  ;;  %9970 = vset.pattern.permute.xlu1 %v10755_v2  ;;  %v93_v2 = vld [vmem:[%s15972_s4 + $0xa0] sm:$0xff] }
  0x62   :  { %652 = vperm.xlu1 %9970, %v11065_v55   ;;  %860 = vperm.xlu0 %9972, %v11019_v45  }
  0x64   :  { %9238 = vmatmul.mubr.msk.f32.gmra.mrb[16].mxu0 %vm233_vm0, %v81_v32 }
  0x65   :  { %9239 = vmatprep.mubr.msk.f32.mxu0 %vm233_vm0, %v82_v40 }
  0x66   :  { %656 = vperm.xlu1 %9970, %v11027_v47   ;;  %892 = vperm.xlu0 %9972, %v11036_v48  }
  0x68   :  { %9240 = vmatmul.mubr.msk.f32.gmra.mrb[18].mxu0 %vm233_vm0, %v82_v40 }
  0x69   :  { %9241 = vmatprep.mubr.msk.f32.mxu0 %vm233_vm0, %v83_v41 }
  0x6a   :  { %736 = vperm.xlu1 %9970, %v11057_v53   ;;  %868 = vperm.xlu0 %9972, %v11065_v55  }
  0x6c   :  { %9242 = vmatmul.mubr.msk.f32.gmra.mrb[20].mxu0 %vm233_vm0, %v83_v41 }
  0x6d   :  { %9243 = vmatprep.mubr.msk.f32.mxu0 %vm233_vm0, %v84_v42 }
  0x6e   :  { %9971 = vset.pattern.permute.xlu1 %v15989_v1  ;;  %900 = vperm.xlu0 %9972, %v11082_v58  }
  0x6f   :  { %844 = vperm.xlu1 %9971, %v10930_v26  }
  0x70   :  { %9244 = vmatmul.mubr.msk.f32.gmra.mrb[22].mxu0 %vm233_vm0, %v84_v42 }
  0x71   :  { %9245 = vmatprep.mubr.msk.f32.mxu0 %vm233_vm0, %v85_v49 }
  0x72   :  { %812 = vperm.xlu0 %9972, %v11106_v0  }
  0x73   :  { %876 = vperm.xlu1 %9971, %v10908_v20  }
  0x74   :  { %9246 = vmatmul.mubr.msk.f32.gmra.mrb[24].mxu0 %vm233_vm0, %v85_v49  ;;  %v15979_v49 = vmov 0.0  }
  0x75   :  { %9247 = vmatprep.mubr.msk.f32.mxu0 %vm233_vm0, %v86_v50  ;;  %1044 = vmatprep.mubr.f32.mxu1 %v15979_v49 }
  0x76   :  { %824 = vperm.xlu0 %9972, %v11119_v5  }
  0x77   :  { %880 = vperm.xlu1 %9971, %v10920_v23  }
  0x78   :  { %9248 = vmatmul.mubr.msk.f32.gmra.mrb[26].mxu0 %vm233_vm0, %v86_v50 }
  0x79   :  { %9249 = vmatprep.mubr.msk.f32.mxu0 %vm233_vm0, %v87_v51 }
  0x7a   :  { %832 = vperm.xlu0 %9972, %v11137_v12  }
  0x7b   :  { %856 = vperm.xlu1 %9971, %v10935_v27  }
  0x7c   :  { %9250 = vmatmul.mubr.msk.f32.gmra.mrb[28].mxu0 %vm233_vm0, %v87_v51 }
  0x7d   :  { %9251 = vmatprep.mubr.msk.f32.mxu0 %vm233_vm0, %v88_v52 }
  0x7e   :  { %840 = vperm.xlu0 %9972, %v11153_v14  }
  0x7f   :  { %888 = vperm.xlu1 %9971, %v10965_v33  }
  0x80   :  { %9252 = vmatmul.mubr.msk.f32.gmra.mrb[30].mxu0 %vm233_vm0, %v88_v52 }
  0x81   :  { %9253 = vmatprep.mubr.msk.f32.mxu0 %vm233_vm0, %v89_v59 }
  0x83   :  { %864 = vperm.xlu1 %9971, %v10981_v37  }
  0x84   :  { %9254 = vmatmul.mubr.msk.f32.gmra.mrb[32].mxu0 %vm233_vm0, %v89_v59 }
  0x85   :  { %9255 = vmatprep.mubr.msk.f32.mxu0 %vm233_vm0, %v90_v60 }
  0x86   :  { %v11305_v19 = vpop.permute.xlu1 %195 }
  0x87   :  { %v156_v32 = vpop.permute.xlu0 %155  ;;  %896 = vperm.xlu1 %9971, %v11011_v43  }
  0x88   :  { %9256 = vmatmul.mubr.msk.f32.gmra.mrb[34].mxu0 %vm233_vm0, %v90_v60 }
  0x89   :  { %9257 = vmatprep.mubr.msk.f32.mxu0 %vm233_vm0, %v91_v61 }
  0x8a   :  { %v11307_v17 = vpop.permute.xlu1 %200 }
  0x8b   :  { %v11319_v41 = vpop.permute.xlu0 %160  ;;  %872 = vperm.xlu1 %9971, %v11027_v47  }
  0x8c   :  { %9258 = vmatmul.mubr.msk.f32.gmra.mrb[36].mxu0 %vm233_vm0, %v91_v61 }
  0x8d   :  { %9259 = vmatprep.mubr.msk.f32.mxu0 %vm233_vm0, %v92_v62 }
  0x8e   :  { %v11309_v22 = vpop.permute.xlu1 %170 }
  0x8f   :  { %904 = vperm.xlu1 %9971, %v11057_v53  }
  0x90   :  { %9260 = vmatmul.mubr.msk.f32.gmra.mrb[38].mxu0 %vm233_vm0, %v92_v62 }
  0x91   :  { %9261 = vmatprep.mubr.msk.f32.mxu0 %vm233_vm0, %v93_v2 }
  0x93   :  { %816 = vperm.xlu1 %9971, %v11073_v57  }
  0x94   :  { %9262 = vmatmul.mubr.msk.f32.gmra.mrb[40].mxu0 %vm233_vm0, %v93_v2 }
  0x95   :  { %9263 = vmatprep.mubr.msk.f32.mxu0 %vm233_vm0, %v94_v6 }
  0x96   :  { %v11311_v29 = vpop.permute.xlu1 %210  ;;  %v11325_v50 = vpop.permute.xlu0 %165 }
  0x97   :  { %16088 = vst [vmem:[#allocation31_spill] sm:$0xff] %v11311_v29 }
  0x98   :  { %9264 = vmatmul.mubr.msk.f32.gmra.mrb[42].mxu0 %vm233_vm0, %v94_v6 }
  0x99   :  { %9265 = vmatprep.mubr.msk.f32.mxu0 %vm233_vm0, %v95_v9 }
  0x9a   :  { %v11313_v30 = vpop.permute.xlu1 %180  ;;  %v11329_v52 = vpop.permute.xlu0 %205 }
  0x9c   :  { %9266 = vmatmul.mubr.msk.f32.gmra.mrb[44].mxu0 %vm233_vm0, %v95_v9 }
  0x9d   :  { %9267 = vmatprep.mubr.msk.f32.mxu0 %vm233_vm0, %v96_v18 }
  0x9e   :  { %v11315_v31 = vpop.permute.xlu1 %220  ;;  %v11337_v62 = vpop.permute.xlu0 %175 }
  0x9f   :  { %16089 = vst [vmem:[#allocation32_spill] sm:$0xff] %v11315_v31 }
  0xa0   :  { %9268 = vmatmul.mubr.msk.f32.gmra.mrb[46].mxu0 %vm233_vm0, %v96_v18 }
  0xa1   :  { %2760 = vmatprep.mubr.f32.mxu0 %v15979_v49 }
  0xa2   :  { %v11317_v40 = vpop.permute.xlu1 %190  ;;  %v11347_v7 = vpop.permute.xlu0 %215 }
  0xa3   :  { %16092 = vst [vmem:[#allocation35_spill] sm:$0xff] %v11347_v7 }
  0xa6   :  { %v11321_v42 = vpop.permute.xlu1 %230  ;;  %v11361_v54 = vpop.permute.xlu0 %185 }
  0xa7   :  { %16090 = vst [vmem:[#allocation33_spill] sm:$0xff] %v11321_v42 }
  0xaa   :  { %v11327_v51 = vpop.permute.xlu1 %120  ;;  %v11373_v34 = vpop.permute.xlu0 %225 }
  0xab   :  { %16093 = vst [vmem:[#allocation36_spill] sm:$0xff] %v11373_v34 }
  0xae   :  { %v116_v10 = vpop.permute.xlu0 %115 }
  0xaf   :  { %v11333_v60 = vpop.permute.xlu1 %632 }
  0xb2   :  { %v11395_v39 = vpop.permute.xlu0 %130 }
  0xb3   :  { %v11343_v9 = vpop.permute.xlu1 %708 }
  0xb4   :  { %16091 = vst [vmem:[#allocation34_spill] sm:$0xff] %v11343_v9 }
  0xb6   :  { %v11399_v21 = vpop.permute.xlu0 %140 }
  0xb8   :  { %v11355_v63 = vpop.permute.xlu1 %125 }
  0xba   :  { %v11407_v37 = vpop.permute.xlu0 %150 }
  0xbd   :  { %v11369_v36 = vpop.permute.xlu1 %636 }
  0xbf   :  { %v629_v55 = vpop.permute.xlu0 %628 }
  0xc1   :  { %v11381_v16 = vpop.permute.xlu1 %640 }
  0xc5   :  { %v11393_v3 = vpop.permute.xlu1 %720 }
  0xc6   :  { %16095 = vst [vmem:[#allocation38_spill] sm:$0xff] %v11393_v3 }
  0xca   :  { %v11401_v9 = vpop.permute.xlu1 %135 }
 0x117   :  { %v11331_v59 = vpop.f32.mrb[0].mxu0 }
 0x118   :  { %v11335_v61 = vpop.f32.mrb[1].mxu0  ;;  %v469_v47 = vadd.f32 %v11331_v59, %v116_v10 }
 0x11b   :  { %v11339_v2 = vpop.f32.mrb[2].mxu0 }
 0x11c   :  { %v11341_v6 = vpop.f32.mrb[3].mxu0 }
 0x11d   :  { %v477_v59 = vadd.f32 %v11341_v6, %v11327_v51 }
 0x11f   :  { %v11345_v18 = vpop.f32.mrb[4].mxu0 }
 0x120   :  { %v11349_v49 = vpop.f32.mrb[5].mxu0 }
 0x121   :  { %v483_v6 = vadd.f32 %v11349_v49, %v11355_v63 }
 0x123   :  { %v11351_v11 = vpop.f32.mrb[6].mxu0 }
 0x124   :  { %v11357_v56 = vpop.f32.mrb[7].mxu0 }
 0x127   :  { %v11363_v46 = vpop.f32.mrb[8].mxu0 }
 0x128   :  { %v11365_v44 = vpop.f32.mrb[9].mxu0 }
 0x12b   :  { %v11371_v1 = vpop.f32.mrb[10].mxu0 }
 0x12c   :  { %v11375_v25 = vpop.f32.mrb[11].mxu0 }
 0x12f   :  { %v11379_v24 = vpop.f32.mrb[12].mxu0 }
 0x130   :  { %v11383_v15 = vpop.f32.mrb[13].mxu0 }
 0x133   :  { %v11387_v8 = vpop.f32.mrb[14].mxu0 }
 0x134   :  { %v11389_v4 = vpop.f32.mrb[15].mxu0 }
 0x135   :  { %16094 = vst [vmem:[#allocation37_spill] sm:$0xff] %v11389_v4 }
 0x137   :  { %v516_v42 = vpop.f32.mrb[16].mxu0 }
 0x138   :  { %v517_v34 = vadd.f32 %v516_v42, %v156_v32  ;;  %v518_v31 = vpop.f32.mrb[17].mxu0 }
 0x139   :  { %v519_v45 = vadd.f32 %v518_v31, %v156_v32  ;;  %v11413_v32 = vpop.permute.xlu1 %644 }
 0x13a   :  { %10082 = vtanh.f32 %v517_v34 }
 0x13b   :  { %10084 = vtanh.f32 %v519_v45  ;;  %v522_v7 = vpop.f32.mrb[18].mxu0 }
 0x13c   :  { %v523_v29 = vadd.f32 %v522_v7, %v11319_v41  ;;  %v524_v3 = vpop.f32.mrb[19].mxu0 }
 0x13d   :  { %v525_v42 = vadd.f32 %v524_v3, %v11319_v41  ;;  %v11423_v33 = vpop.permute.xlu1 %648 }
 0x13e   :  { %10086 = vtanh.f32 %v523_v29 }
 0x13f   :  { %10088 = vtanh.f32 %v525_v42  ;;  %v528_v31 = vpop.f32.mrb[20].mxu0 }
 0x140   :  { %v529_v34 = vadd.f32 %v528_v31, %v11325_v50  ;;  %v530_v45 = vpop.f32.mrb[21].mxu0 }
 0x141   :  { %v531_v7 = vadd.f32 %v530_v45, %v11325_v50  ;;  %v471_v45 = vadd.f32 %v11335_v61, %v116_v10  ;;  %v475_v10 = vadd.f32 %v11339_v2, %v11327_v51  ;;  %v10758_v2 = vmov 8  }
 0x142   :  { %10090 = vtanh.f32 %v529_v34  ;;  %9973 = vset.pattern.permute.xlu1 %v10758_v2  ;;  %9979 = vset.pattern.permute.xlu0 %v10758_v2 }
 0x143   :  { %10092 = vtanh.f32 %v531_v7  ;;  %v534_v3 = vpop.f32.mrb[22].mxu0  ;;  %1210 = vperm.xlu1 %9973, %v10944_v28   ;;  %1206 = vperm.xlu0 %9979, %v10930_v26   ;;  %v493_v26 = vadd.f32 %v11363_v46, %v11401_v9 }
 0x144   :  { %v10083_v41 = vpop.eup %10082  ;;  %v535_v29 = vadd.f32 %v534_v3, %v11309_v22  ;;  %v536_v42 = vpop.f32.mrb[23].mxu0 }
 0x145   :  { %v10085_v31 = vpop.eup %10084  ;;  %v659_v0 = vmul.f32 %v10083_v41, %v629_v55  ;;  %v537_v50 = vadd.f32 %v536_v42, %v11309_v22 }
 0x146   :  { %10094 = vtanh.f32 %v535_v29  ;;  %v660_v34 = vmul.f32 %v10085_v31, %v629_v55 }
 0x147   :  { %10096 = vtanh.f32 %v537_v50  ;;  %v540_v7 = vpop.f32.mrb[24].mxu0  ;;  %v11421_v43 = vadd.f32 %v659_v0, %v469_v47  ;;  %v11451_v0 = vpop.permute.xlu1 %728  ;;  %1286 = vperm.xlu1 %9973, %v10908_v20   ;;  %1290 = vperm.xlu0 %9979, %v10920_v23  }
 0x148   :  { %v10087_v3 = vpop.eup %10086  ;;  %v541_v53 = vadd.f32 %v540_v7, %v11337_v62  ;;  %v542_v5 = vpop.f32.mrb[25].mxu0  ;;  %v11426_v4 = vadd.f32 %v660_v34, %v471_v45 }
 0x149   :  { %v10089_v22 = vpop.eup %10088  ;;  %v543_v55 = vadd.f32 %v542_v5, %v11337_v62  ;;  %v661_v47 = vmul.f32 %v10087_v3, %v11333_v60  ;;  %v489_v3 = vadd.f32 %v11357_v56, %v11395_v39 }
 0x14a   :  { %10098 = vtanh.f32 %v541_v53  ;;  %v662_v61 = vmul.f32 %v10089_v22, %v11333_v60  ;;  %v481_v53 = vadd.f32 %v11345_v18, %v11355_v63  ;;  %v487_v63 = vadd.f32 %v11351_v11, %v11395_v39 }
 0x14b   :  { %10100 = vtanh.f32 %v543_v55  ;;  %v546_v41 = vpop.f32.mrb[26].mxu0  ;;  %v11437_v29 = vadd.f32 %v661_v47, %v475_v10  ;;  %v146_v11 = vpop.permute.xlu1 %145  ;;  %1294 = vperm.xlu0 %9979, %v10990_v38  }
 0x14c   :  { %v10091_v57 = vpop.eup %10090  ;;  %v547_v12 = vadd.f32 %v546_v41, %v11313_v30  ;;  %v548_v42 = vpop.f32.mrb[27].mxu0  ;;  %v11440_v31 = vadd.f32 %v662_v61, %v477_v59  ;;  %v495_v61 = vadd.f32 %v11365_v44, %v11401_v9  ;;  %v499_v44 = vadd.f32 %v11371_v1, %v11399_v21 }
 0x14d   :  { %v10093_v62 = vpop.eup %10092  ;;  %v549_v51 = vadd.f32 %v548_v42, %v11313_v30  ;;  %v663_v60 = vmul.f32 %v10091_v57, %v11369_v36 }
 0x14e   :  { %10102 = vtanh.f32 %v547_v12  ;;  %v664_v50 = vmul.f32 %v10093_v62, %v11369_v36 }
 0x14f   :  { %10104 = vtanh.f32 %v549_v51  ;;  %v552_v14 = vpop.f32.mrb[28].mxu0  ;;  %v11454_v45 = vadd.f32 %v663_v60, %v481_v53  ;;  %v653_v62 = vpop.permute.xlu1 %652  ;;  %1302 = vperm.xlu0 %9979, %v11036_v48  }
 0x150   :  { %v10095_v34 = vpop.eup %10094  ;;  %v553_v18 = vadd.f32 %v552_v14, %v11361_v54  ;;  %v554_v30 = vpop.f32.mrb[29].mxu0  ;;  %v11457_v7 = vadd.f32 %v664_v50, %v483_v6 }
 0x151   :  { %v10097_v28 = vpop.eup %10096  ;;  %v555_v49 = vadd.f32 %v554_v30, %v11361_v54  ;;  %v665_v36 = vmul.f32 %v10095_v34, %v11381_v16  ;;  %v507_v30 = vadd.f32 %v11383_v15, %v146_v11  ;;  %v511_v15 = vadd.f32 %v11387_v8, %v11407_v37  ;;  %v16099_v8 = vld [vmem:[#allocation31_spill] sm:$0xff] }
 0x152   :  { %10106 = vtanh.f32 %v553_v18  ;;  %v666_v5 = vmul.f32 %v10097_v28, %v11381_v16  ;;  %v16096_v16 = vmov 1  }
 0x153   :  { %10108 = vtanh.f32 %v555_v49  ;;  %v558_v22 = vpop.f32.mrb[30].mxu0  ;;  %v11469_v10 = vadd.f32 %v665_v36, %v487_v63  ;;  %9974 = vset.pattern.permute.xlu1 %v16096_v16  ;;  %v657_v63 = vpop.permute.xlu1 %656  ;;  %1310 = vperm.xlu0 %9979, %v11082_v58  }
 0x154   :  { %v10099_v55 = vpop.eup %10098  ;;  %v559_v54 = vadd.f32 %v558_v22, %v11317_v40  ;;  %v560_v47 = vpop.f32.mrb[31].mxu0  ;;  %v11472_v59 = vadd.f32 %v666_v5, %v489_v3  ;;  %820 = vperm.xlu1 %9974, %v11142_v13   ;;  %v501_v13 = vadd.f32 %v11375_v25, %v11399_v21  ;;  %v505_v25 = vadd.f32 %v11379_v24, %v146_v11 }
 0x155   :  { %v10101_v20 = vpop.eup %10100  ;;  %v561_v56 = vadd.f32 %v560_v47, %v11317_v40  ;;  %v667_v39 = vmul.f32 %v10099_v55, %v11413_v32 }
 0x156   :  { %10110 = vtanh.f32 %v559_v54  ;;  %v668_v41 = vmul.f32 %v10101_v20, %v11413_v32  ;;  %v16097_v54 = vld [vmem:[#allocation37_spill] sm:$0xff] }
 0x157   :  { %10112 = vtanh.f32 %v561_v56  ;;  %v564_v57 = vpop.f32.mrb[32].mxu0  ;;  %v11484_v12 = vadd.f32 %v667_v39, %v493_v26 }
 0x158   :  { %v10103_v46 = vpop.eup %10102  ;;  %v565_v40 = vadd.f32 %v564_v57, %v11305_v19  ;;  %v566_v42 = vpop.f32.mrb[33].mxu0  ;;  %v11487_v53 = vadd.f32 %v668_v41, %v495_v61  ;;  %9975 = vset.pattern.permute.xlu1 %v10758_v2  ;;  %v16098_v61 = vld [vmem:[#allocation13_spill] sm:$0xff] }
 0x159   :  { %v10105_v23 = vpop.eup %10104  ;;  %v567_v9 = vadd.f32 %v566_v42, %v11305_v19  ;;  %v669_v32 = vmul.f32 %v10103_v46, %v11423_v33  ;;  %1214 = vperm.xlu1 %9975, %v10973_v35  }
 0x15a   :  { %v675_v51 = vmul.f32 %v565_v40, %v565_v40  ;;  %v670_v60 = vmul.f32 %v10105_v23, %v11423_v33  ;;  %v16100_v23 = vld [vmem:[#allocation34_spill] sm:$0xff] }
 0x15b   :  { %v676_v6 = vmul.f32 %v567_v9, %v567_v9  ;;  %v570_v50 = vpop.f32.mrb[34].mxu0  ;;  %v11498_v14 = vadd.f32 %v669_v32, %v499_v44  ;;  %v713_v9 = vpop.permute.xlu0 %712  ;;  %v16101_v32 = vld [vmem:[#allocation35_spill] sm:$0xff] }
 0x15c   :  { %v10107_v1 = vpop.eup %10106  ;;  %10114 = vtanh.f32 %v675_v51  ;;  %v571_v19 = vadd.f32 %v570_v50, %v11307_v17  ;;  %v572_v34 = vpop.f32.mrb[35].mxu0  ;;  %v11502_v38 = vadd.f32 %v670_v60, %v501_v13 }
 0x15d   :  { %v10109_v18 = vpop.eup %10108  ;;  %10116 = vtanh.f32 %v676_v6  ;;  %v671_v33 = vmul.f32 %v10107_v1, %v653_v62  ;;  %v573_v21 = vadd.f32 %v572_v34, %v11307_v17  ;;  %1218 = vperm.xlu1 %9975, %v10935_v27   ;;  %v513_v27 = vadd.f32 %v16097_v54, %v11407_v37  ;;  %v16102_v6 = vld [vmem:[#allocation29_spill] sm:$0xff] }
 0x15e   :  { %v677_v28 = vmul.f32 %v571_v19, %v571_v19  ;;  %v672_v35 = vmul.f32 %v10109_v18, %v653_v62 }
 0x15f   :  { %v11508_v49 = vadd.f32 %v671_v33, %v505_v25  ;;  %v678_v36 = vmul.f32 %v573_v21, %v573_v21  ;;  %v576_v3 = vpop.f32.mrb[36].mxu0 }
 0x160   :  { %v10111_v5 = vpop.eup %10110  ;;  %10118 = vtanh.f32 %v677_v28  ;;  %v11511_v24 = vadd.f32 %v672_v35, %v507_v30  ;;  %v577_v22 = vadd.f32 %v576_v3, %v11329_v52  ;;  %v578_v17 = vpop.f32.mrb[37].mxu0  ;;  %v16103_v35 = vld [vmem:[#allocation32_spill] sm:$0xff] }
 0x161   :  { %v10113_v55 = vpop.eup %10112  ;;  %10120 = vtanh.f32 %v678_v36  ;;  %v673_v48 = vmul.f32 %v10111_v5, %v657_v63  ;;  %v579_v11 = vadd.f32 %v578_v17, %v11329_v52  ;;  %1298 = vperm.xlu1 %9975, %v16098_v61   ;;  %v16104_v5 = vld [vmem:[#allocation19_spill] sm:$0xff] }
 0x162   :  { %v679_v47 = vmul.f32 %v577_v22, %v577_v22  ;;  %v674_v20 = vmul.f32 %v10113_v55, %v657_v63 }
 0x163   :  { %v11520_v26 = vadd.f32 %v673_v48, %v511_v15  ;;  %v680_v56 = vmul.f32 %v579_v11, %v579_v11  ;;  %v582_v39 = vpop.f32.mrb[38].mxu0 }
 0x164   :  { %10122 = vtanh.f32 %v679_v47  ;;  %v11523_v41 = vadd.f32 %v674_v20, %v513_v27  ;;  %v583_v57 = vadd.f32 %v582_v39, %v16099_v8  ;;  %v584_v46 = vpop.f32.mrb[39].mxu0  ;;  %v16105_v20 = vld [vmem:[#allocation36_spill] sm:$0xff] }
 0x165   :  { %10124 = vtanh.f32 %v680_v56  ;;  %v585_v58 = vadd.f32 %v584_v46, %v16099_v8  ;;  %9976 = vset.pattern.permute.xlu1 %v16096_v16 }
 0x166   :  { %v10115_v52 = vpop.eup %10114  ;;  %v681_v40 = vmul.f32 %v583_v57, %v583_v57  ;;  %828 = vperm.xlu1 %9976, %v16102_v6   ;;  %v16106_v57 = vld [vmem:[#allocation16_spill] sm:$0xff] }
 0x167   :  { %v10117_v37 = vpop.eup %10116  ;;  %v682_v42 = vmul.f32 %v585_v58, %v585_v58  ;;  %v588_v62 = vpop.f32.mrb[40].mxu0  ;;  %v739_v44 = vmul.f32 %v10115_v52, %v16100_v23 }
 0x168   :  { %10126 = vtanh.f32 %v681_v40  ;;  %v589_v13 = vadd.f32 %v588_v62, %v16101_v32  ;;  %v590_v51 = vpop.f32.mrb[41].mxu0  ;;  %v740_v60 = vmul.f32 %v10117_v37, %v16100_v23  ;;  %v16108_v23 = vld [vmem:[#allocation33_spill] sm:$0xff] }
 0x169   :  { %10128 = vtanh.f32 %v682_v42  ;;  %v591_v50 = vadd.f32 %v590_v51, %v16101_v32  ;;  %v771_v1 = vadd.f32 %v11421_v43, %v739_v44  ;;  %v16107_v42 = vld [vmem:[#allocation38_spill] sm:$0xff] }
 0x16a   :  { %v10119_v19 = vpop.eup %10118  ;;  %v683_v34 = vmul.f32 %v589_v13, %v589_v13  ;;  %v772_v18 = vadd.f32 %v11426_v4, %v740_v60  ;;  %9977 = vset.pattern.permute.xlu1 %v10758_v2  ;;  %v717_v4 = vpop.permute.xlu0 %716 }
 0x16b   :  { %v10121_v25 = vpop.eup %10120  ;;  %v741_v33 = vmul.f32 %v10119_v19, %v713_v9  ;;  %v684_v21 = vmul.f32 %v591_v50, %v591_v50  ;;  %v594_v30 = vpop.f32.mrb[42].mxu0  ;;  %1222 = vperm.xlu1 %9977, %v16104_v5  }
 0x16c   :  { %v742_v28 = vmul.f32 %v10121_v25, %v713_v9  ;;  %10130 = vtanh.f32 %v683_v34  ;;  %v595_v63 = vadd.f32 %v594_v30, %v16103_v35  ;;  %v596_v36 = vpop.f32.mrb[43].mxu0 }
 0x16d   :  { %10132 = vtanh.f32 %v684_v21  ;;  %v597_v3 = vadd.f32 %v596_v36, %v16103_v35  ;;  %v773_v43 = vadd.f32 %v11437_v29, %v741_v33 }
 0x16e   :  { %v10123_v22 = vpop.eup %10122  ;;  %v685_v17 = vmul.f32 %v595_v63, %v595_v63  ;;  %v774_v55 = vadd.f32 %v11440_v31, %v742_v28  ;;  %v725_v60 = vpop.permute.xlu0 %724  ;;  %v16110_v28 = vld [vmem:[#allocation30_spill] sm:$0xff] }
 0x16f   :  { %v10125_v15 = vpop.eup %10124  ;;  %v743_v48 = vmul.f32 %v10123_v22, %v717_v4  ;;  %v686_v11 = vmul.f32 %v597_v3, %v597_v3  ;;  %v600_v54 = vpop.f32.mrb[44].mxu0  ;;  %v9458_v27 = vpack.c.bf16 %v773_v43, %v771_v1  ;;  %1226 = vperm.xlu1 %9977, %v16106_v57   ;;  %v793_v57 = vld [vmem:[%s15971_s3 + $0x30] sm:$0xff] }
 0x170   :  { %v744_v47 = vmul.f32 %v10125_v15, %v717_v4  ;;  %10134 = vtanh.f32 %v685_v17  ;;  %v601_v56 = vadd.f32 %v600_v54, %v16105_v20  ;;  %v602_v39 = vpop.f32.mrb[45].mxu0  ;;  %v9456_v61 = vpack.c.bf16 %v774_v55, %v772_v18  ;;  %v16111_v4 = vld [vmem:[#allocation24_spill] sm:$0xff] }
 0x171   :  { %v775_v29 = vadd.f32 %v11454_v45, %v743_v48  ;;  %10136 = vtanh.f32 %v686_v11  ;;  %v603_v8 = vadd.f32 %v602_v39, %v16105_v20  ;;  %v737_v11 = vpop.permute.xlu1 %736 }
 0x172   :  { %v10127_v46 = vpop.eup %10126  ;;  %v776_v31 = vadd.f32 %v11457_v7, %v744_v47  ;;  %v687_v58 = vmul.f32 %v601_v56, %v601_v56  ;;  %9457 = vmatprep.subr.bf16.mxu1 %v9456_v61  ;;  %v16109_v7 = vld [vmem:[#allocation17_spill] sm:$0xff]  ;;  %v733_v43 = vpop.permute.xlu0 %732  ;;  %v16113_v56 = vld [vmem:[#allocation22_spill] sm:$0xff]  ;;  %v790_v61 = vld [vmem:[%s15971_s3 + $0x18] sm:$0xff] }
 0x173   :  { %v10129_v52 = vpop.eup %10128  ;;  %v688_v40 = vmul.f32 %v603_v8, %v603_v8  ;;  %v606_v37 = vpop.f32.mrb[46].mxu0  ;;  %9459 = vmatpush1.bf16.msra.mxu1 %v9458_v27  ;;  %v745_v62 = vmul.f32 %v10127_v46, %v16107_v42  ;;  %1306 = vperm.xlu1 %9977, %v16109_v7   ;;  %v792_v8 = vld [vmem:[%s15971_s3 + $0x28] sm:$0xff]  ;;  %v794_v46 = vld [vmem:[%s15971_s3 + $0x38] sm:$0xff] }
 0x174   :  { %10138 = vtanh.f32 %v687_v58  ;;  %v607_v44 = vadd.f32 %v606_v37, %v16108_v23  ;;  %v608_v45 = vpop.f32.mrb[47].mxu0  ;;  %v746_v9 = vmul.f32 %v10129_v52, %v16107_v42  ;;  %v796_v58 = vld [vmem:[%s15971_s3 + $0x48] sm:$0xff]  ;;  %v797_v52 = vld [vmem:[%s15971_s3 + $0x50] sm:$0xff]  ;;  %v799_v37 = vld [vmem:[%s15971_s3 + $0x60] sm:$0xff] }
 0x175   :  { %10140 = vtanh.f32 %v688_v40  ;;  %v609_v32 = vadd.f32 %v608_v45, %v16108_v23  ;;  %v777_v13 = vadd.f32 %v11469_v10, %v745_v62  ;;  %v798_v40 = vld [vmem:[%s15971_s3 + $0x58] sm:$0xff]  ;;  %v800_v42 = vld [vmem:[%s15971_s3 + $0x68] sm:$0xff]  ;;  %v801_v62 = vld [vmem:[%s15971_s3 + $0x70] sm:$0xff] }
 0x176   :  { %v10131_v51 = vpop.eup %10130  ;;  %v689_v6 = vmul.f32 %v607_v44, %v607_v44  ;;  %v778_v50 = vadd.f32 %v11472_v59, %v746_v9  ;;  %v802_v23 = vld [vmem:[%s15971_s3 + $0x78] sm:$0xff]  ;;  %v803_v44 = vld [vmem:[%s15971_s3 + $0x80] sm:$0xff]  ;;  %v804_v45 = vld [vmem:[%s15971_s3 + $0x88] sm:$0xff] }
 0x177   :  { %v10133_v1 = vpop.eup %10132  ;;  %v747_v19 = vmul.f32 %v10131_v51, %v725_v60  ;;  %v690_v34 = vmul.f32 %v609_v32, %v609_v32  ;;  %v9462_v18 = vpack.c.bf16 %v777_v13, %v775_v29  ;;  %9978 = vset.pattern.permute.xlu1 %v16096_v16  ;;  %v791_v29 = vld [vmem:[%s15971_s3 + $0x20] sm:$0xff]  ;;  %v805_v9 = vld [vmem:[%s15971_s3 + $0x90] sm:$0xff]  ;;  %v806_v32 = vld [vmem:[%s15971_s3 + $0x98] sm:$0xff] }
 0x178   :  { %v748_v25 = vmul.f32 %v10133_v1, %v725_v60  ;;  %10142 = vtanh.f32 %v689_v6  ;;  %v9460_v33 = vpack.c.bf16 %v778_v50, %v776_v31  ;;  %836 = vperm.xlu1 %9978, %v16110_v28   ;;  %v795_v31 = vld [vmem:[%s15971_s3 + $0x40] sm:$0xff]  ;;  %v808_v7 = vld [vmem:[%s15971_s3 + $0xa8] sm:$0xff]  ;;  %v809_v51 = vld [vmem:[%s15971_s3 + $0xb0] sm:$0xff]  ;;  %v845_v6 = vpop.permute.xlu1 %844 }
 0x179   :  { %v779_v21 = vadd.f32 %v11484_v12, %v747_v19  ;;  %10144 = vtanh.f32 %v690_v34  ;;  %v807_v13 = vld [vmem:[%s15971_s3 + $0xa0] sm:$0xff]  ;;  %v810_v60 = vld [vmem:[%s15971_s3 + $0xb8] sm:$0xff]  ;;  %v14651_v16 = vld [vmem:[%s15975_s7 + $0x50] sm:$0xff] }
 0x17a   :  { %v10135_v10 = vpop.eup %10134  ;;  %v780_v30 = vadd.f32 %v11487_v53, %v748_v25  ;;  %9461 = vmatprep.subr.bf16.mxu1 %v9460_v33 }
 0x17b   :  { %v10137_v35 = vpop.eup %10136  ;;  %9463 = vmatpush1.bf16.msra.mxu1 %v9462_v18  ;;  %v749_v59 = vmul.f32 %v10135_v10, %v11451_v0 }
 0x17c   :  { %v750_v63 = vmul.f32 %v10137_v35, %v11451_v0  ;;  %9980 = vset.pattern.permute.xlu1 %v10758_v2  ;;  %v11689_v50 = vpop.permute.xlu1 %876 }
 0x17d   :  { %v781_v36 = vadd.f32 %v11498_v14, %v749_v59  ;;  %1230 = vperm.xlu1 %9980, %v16111_v4  }
 0x17e   :  { %v10139_v3 = vpop.eup %10138  ;;  %v782_v12 = vadd.f32 %v11502_v38, %v750_v63  ;;  %v16112_v38 = vld [vmem:[#allocation21_spill] sm:$0xff] }
 0x17f   :  { %v10141_v5 = vpop.eup %10140  ;;  %v751_v22 = vmul.f32 %v10139_v3, %v733_v43  ;;  %v9466_v53 = vpack.c.bf16 %v781_v36, %v779_v21  ;;  %v849_v21 = vpop.permute.xlu0 %848 }
 0x180   :  { %v752_v17 = vmul.f32 %v10141_v5, %v733_v43  ;;  %v9464_v55 = vpack.c.bf16 %v782_v12, %v780_v30  ;;  %v11691_v1 = vpop.permute.xlu1 %880 }
 0x181   :  { %v783_v15 = vadd.f32 %v11508_v49, %v751_v22  ;;  %1234 = vperm.xlu1 %9980, %v16112_v38   ;;  %v787_v49 = vld [vmem:[%s15971_s3] sm:$0xff] }
 0x182   :  { %v10143_v48 = vpop.eup %10142  ;;  %v784_v0 = vadd.f32 %v11511_v24, %v752_v17  ;;  %9465 = vmatprep.subr.bf16.mxu1 %v9464_v55  ;;  %v16114_v24 = vmov 0.0  }
 0x183   :  { %v10145_v14 = vpop.eup %10144  ;;  %v753_v54 = vmul.f32 %v10143_v48, %v737_v11  ;;  %9467 = vmatpush1.bf16.msra.mxu1 %v9466_v53  ;;  %v853_v30 = vpop.permute.xlu0 %852 }
 0x184   :  { %v754_v2 = vmul.f32 %v10145_v14, %v737_v11  ;;  %v11693_v19 = vpop.permute.xlu1 %856 }
 0x185   :  { %v785_v27 = vadd.f32 %v11520_v26, %v753_v54  ;;  %1314 = vperm.xlu1 %9980, %v16113_v56   ;;  %v788_v26 = vld [vmem:[%s15971_s3 + $0x8] sm:$0xff] }
 0x186   :  { %v786_v47 = vadd.f32 %v11523_v41, %v754_v2  ;;  %v789_v41 = vld [vmem:[%s15971_s3 + $0x10] sm:$0xff] }
 0x187   :  { %v9470_v20 = vpack.c.bf16 %v785_v27, %v783_v15  ;;  %v11707_v35 = vpop.permute.xlu0 %884 }
 0x188   :  { %v9468_v39 = vpack.c.bf16 %v786_v47, %v784_v0  ;;  %v11695_v34 = vpop.permute.xlu1 %888 }
 0x18a   :  { %9469 = vmatprep.subr.bf16.mxu1 %v9468_v39 }
 0x18b   :  { %9471 = vmatpush1.bf16.msra.mxu1 %v9470_v20  ;;  %v11711_v3 = vpop.permute.xlu0 %860 }
 0x18c   :  { %v11697_v18 = vpop.permute.xlu1 %864 }
 0x18e   :  { %8747 = vmatmul.mubr.msk.f32.vlgmr.msra.gmra.mrb[0].mxu1 %vm907_vm2, %v787_v49 }
 0x18f   :  { %1050 = vmatprep.mubr.f32.mxu1 %v16114_v24  ;;  %v11721_v53 = vpop.permute.xlu0 %892 }
 0x190   :  { %v11699_v25 = vpop.permute.xlu1 %896 }
 0x192   :  { %8748 = vmatmul.mubr.msk.f32.gmra.mrb[2].mxu1 %vm907_vm2, %v788_v26 }
 0x193   :  { %1056 = vmatprep.mubr.f32.mxu1 %v16114_v24  ;;  %v11731_v48 = vpop.permute.xlu0 %868 }
 0x194   :  { %v11701_v33 = vpop.permute.xlu1 %872 }
 0x196   :  { %8749 = vmatmul.mubr.msk.f32.gmra.mrb[4].mxu1 %vm907_vm2, %v789_v41 }
 0x197   :  { %1062 = vmatprep.mubr.f32.mxu1 %v16114_v24  ;;  %v11741_v38 = vpop.permute.xlu0 %900 }
 0x198   :  { %v11703_v10 = vpop.permute.xlu1 %904 }
 0x19a   :  { %8750 = vmatmul.mubr.msk.f32.gmra.mrb[6].mxu1 %vm907_vm2, %v790_v61 }
 0x19b   :  { %1068 = vmatprep.mubr.f32.mxu1 %v16114_v24  ;;  %v813_v56 = vpop.permute.xlu0 %812 }
 0x19c   :  { %v11705_v28 = vpop.permute.xlu1 %816 }
 0x19e   :  { %8751 = vmatmul.mubr.msk.f32.gmra.mrb[8].mxu1 %vm907_vm2, %v791_v29 }
 0x19f   :  { %1074 = vmatprep.mubr.f32.mxu1 %v16114_v24  ;;  %v11757_v41 = vpop.permute.xlu0 %824 }
 0x1a2   :  { %8752 = vmatmul.mubr.msk.f32.gmra.mrb[10].mxu1 %vm907_vm2, %v792_v8 }
 0x1a3   :  { %1080 = vmatprep.mubr.f32.mxu1 %v16114_v24 }
 0x1a6   :  { %8753 = vmatmul.mubr.msk.f32.gmra.mrb[12].mxu1 %vm907_vm2, %v793_v57 }
 0x1a7   :  { %1086 = vmatprep.mubr.f32.mxu1 %v16114_v24 }
 0x1aa   :  { %8754 = vmatmul.mubr.msk.f32.gmra.mrb[14].mxu1 %vm907_vm2, %v794_v46  ;;  %v11759_v46 = vpop.permute.xlu0 %832 }
 0x1ab   :  { %1092 = vmatprep.mubr.f32.mxu1 %v16114_v24 }
 0x1ae   :  { %8755 = vmatmul.mubr.msk.f32.gmra.mrb[16].mxu1 %vm907_vm2, %v795_v31 }
 0x1af   :  { %1098 = vmatprep.mubr.f32.mxu1 %v16114_v24 }
 0x1b2   :  { %8756 = vmatmul.mubr.msk.f32.gmra.mrb[18].mxu1 %vm907_vm2, %v796_v58 }
 0x1b3   :  { %1104 = vmatprep.mubr.f32.mxu1 %v16114_v24 }
 0x1b6   :  { %8757 = vmatmul.mubr.msk.f32.gmra.mrb[20].mxu1 %vm907_vm2, %v797_v52 }
 0x1b7   :  { %1110 = vmatprep.mubr.f32.mxu1 %v16114_v24 }
 0x1ba   :  { %8758 = vmatmul.mubr.msk.f32.gmra.mrb[22].mxu1 %vm907_vm2, %v798_v40 }
 0x1bb   :  { %1116 = vmatprep.mubr.f32.mxu1 %v16114_v24 }
 0x1be   :  { %8759 = vmatmul.mubr.msk.f32.gmra.mrb[24].mxu1 %vm907_vm2, %v799_v37 }
 0x1bf   :  { %1122 = vmatprep.mubr.f32.mxu1 %v16114_v24 }
 0x1c2   :  { %8760 = vmatmul.mubr.msk.f32.gmra.mrb[26].mxu1 %vm907_vm2, %v800_v42  ;;  %v11709_v63 = vpop.permute.xlu1 %1210  ;;  %v11763_v42 = vpop.permute.xlu0 %840 }
 0x1c3   :  { %1128 = vmatprep.mubr.f32.mxu1 %v16114_v24 }
 0x1c6   :  { %8761 = vmatmul.mubr.msk.f32.gmra.mrb[28].mxu1 %vm907_vm2, %v801_v62  ;;  %v11717_v5 = vpop.permute.xlu1 %1286 }
 0x1c7   :  { %1134 = vmatprep.mubr.f32.mxu1 %v16114_v24 }
 0x1ca   :  { %8762 = vmatmul.mubr.msk.f32.gmra.mrb[30].mxu1 %vm907_vm2, %v802_v23 }
 0x1cb   :  { %1140 = vmatprep.mubr.f32.mxu1 %v16114_v24 }
 0x1ce   :  { %8763 = vmatmul.mubr.msk.f32.gmra.mrb[32].mxu1 %vm907_vm2, %v803_v44 }
 0x1cf   :  { %1146 = vmatprep.mubr.f32.mxu1 %v16114_v24 }
 0x1d2   :  { %8764 = vmatmul.mubr.msk.f32.gmra.mrb[34].mxu1 %vm907_vm2, %v804_v45 }
 0x1d3   :  { %1152 = vmatprep.mubr.f32.mxu1 %v16114_v24  ;;  %v11727_v55 = vpop.permute.xlu1 %820 }
 0x1d6   :  { %8765 = vmatmul.mubr.msk.f32.gmra.mrb[36].mxu1 %vm907_vm2, %v805_v9 }
 0x1d7   :  { %1158 = vmatprep.mubr.f32.mxu1 %v16114_v24 }
 0x1d8   :  { %v11737_v14 = vpop.permute.xlu1 %1214 }
 0x1da   :  { %8766 = vmatmul.mubr.msk.f32.gmra.mrb[38].mxu1 %vm907_vm2, %v806_v32  ;;  %v1207_v32 = vpop.permute.xlu0 %1206 }
 0x1db   :  { %1164 = vmatprep.mubr.f32.mxu1 %v16114_v24 }
 0x1dc   :  { %v11747_v47 = vpop.permute.xlu1 %1218 }
 0x1de   :  { %8767 = vmatmul.mubr.msk.f32.gmra.mrb[40].mxu1 %vm907_vm2, %v807_v13 }
 0x1df   :  { %1170 = vmatprep.mubr.f32.mxu1 %v16114_v24 }
 0x1e0   :  { %v11755_v26 = vpop.permute.xlu1 %1298 }
 0x1e2   :  { %8768 = vmatmul.mubr.msk.f32.gmra.mrb[42].mxu1 %vm907_vm2, %v808_v7 }
 0x1e3   :  { %1176 = vmatprep.mubr.f32.mxu1 %v16114_v24 }
 0x1e5   :  { %v11761_v58 = vpop.permute.xlu1 %828 }
 0x1e6   :  { %8769 = vmatmul.mubr.msk.f32.gmra.mrb[44].mxu1 %vm907_vm2, %v809_v51 }
 0x1e7   :  { %1182 = vmatprep.mubr.f32.mxu1 %v16114_v24 }
 0x1ea   :  { %8770 = vmatmul.mubr.msk.f32.gmra.mrb[46].mxu1 %vm907_vm2, %v810_v60  ;;  %v11765_v9 = vpop.permute.xlu1 %1222 }
 0x1eb   :  { %1902 = vmatprep.mubr.f32.mxu1 %v16114_v24 }
 0x261   :  { %v1046_v59 = vpop.f32.mrb[0].mxu1 }
 0x262   :  { %v1048_v36 = vpop.f32.mrb[1].mxu1 }
 0x265   :  { %v11713_v43 = vpop.f32.mrb[2].mxu1 }
 0x266   :  { %v11715_v12 = vpop.f32.mrb[3].mxu1 }
 0x269   :  { %v11719_v22 = vpop.f32.mrb[4].mxu1 }
 0x26a   :  { %v11723_v4 = vpop.f32.mrb[5].mxu1 }
 0x26d   :  { %v11725_v17 = vpop.f32.mrb[6].mxu1 }
 0x26e   :  { %v11729_v15 = vpop.f32.mrb[7].mxu1 }
 0x271   :  { %v11733_v0 = vpop.f32.mrb[8].mxu1 }
 0x272   :  { %v11735_v11 = vpop.f32.mrb[9].mxu1 }
 0x275   :  { %v11739_v54 = vpop.f32.mrb[10].mxu1 }
 0x276   :  { %v11743_v2 = vpop.f32.mrb[11].mxu1 }
 0x279   :  { %v11745_v27 = vpop.f32.mrb[12].mxu1 }
 0x27a   :  { %v11749_v20 = vpop.f32.mrb[13].mxu1 }
 0x27d   :  { %v11751_v39 = vpop.f32.mrb[14].mxu1 }
 0x27e   :  { %v11753_v49 = vpop.f32.mrb[15].mxu1 }
 0x281   :  { %v1094_v61 = vpop.f32.mrb[16].mxu1 }
 0x282   :  { %v1095_v29 = vadd.f32 %v1094_v61, %v845_v6  ;;  %v1096_v8 = vpop.f32.mrb[17].mxu1 }
 0x283   :  { %v1097_v57 = vadd.f32 %v1096_v8, %v845_v6  ;;  %v1049_v8 = vadd.f32 %v1048_v36, %v813_v56 }
 0x284   :  { %10146 = vtanh.f32 %v1095_v29 }
 0x285   :  { %10148 = vtanh.f32 %v1097_v57  ;;  %v1100_v31 = vpop.f32.mrb[18].mxu1 }
 0x286   :  { %v1101_v52 = vadd.f32 %v1100_v31, %v849_v21  ;;  %v1102_v40 = vpop.f32.mrb[19].mxu1 }
 0x287   :  { %v1103_v37 = vadd.f32 %v1102_v40, %v849_v21  ;;  %v1047_v21 = vadd.f32 %v1046_v59, %v813_v56  ;;  %v11771_v40 = vpop.permute.xlu1 %1226  ;;  %v1053_v59 = vadd.f32 %v11713_v43, %v11705_v28  ;;  %v1055_v56 = vadd.f32 %v11715_v12, %v11705_v28 }
 0x288   :  { %10150 = vtanh.f32 %v1101_v52 }
 0x289   :  { %10152 = vtanh.f32 %v1103_v37  ;;  %v1106_v62 = vpop.f32.mrb[20].mxu1 }
 0x28a   :  { %v1107_v23 = vadd.f32 %v1106_v62, %v853_v30  ;;  %v1108_v44 = vpop.f32.mrb[21].mxu1 }
 0x28b   :  { %v1109_v45 = vadd.f32 %v1108_v44, %v853_v30  ;;  %v11794_v12 = vpop.permute.xlu1 %1306 }
 0x28c   :  { %10154 = vtanh.f32 %v1107_v23 }
 0x28d   :  { %10156 = vtanh.f32 %v1109_v45  ;;  %v1112_v13 = vpop.f32.mrb[22].mxu1 }
 0x28e   :  { %v10147_v7 = vpop.eup %10146  ;;  %v1113_v51 = vadd.f32 %v1112_v13, %v11693_v19  ;;  %v1114_v60 = vpop.f32.mrb[23].mxu1 }
 0x28f   :  { %v10149_v6 = vpop.eup %10148  ;;  %v1237_v61 = vmul.f32 %v10147_v7, %v1207_v32  ;;  %v1115_v29 = vadd.f32 %v1114_v60, %v11693_v19 }
 0x290   :  { %10158 = vtanh.f32 %v1113_v51  ;;  %v1238_v57 = vmul.f32 %v10149_v6, %v1207_v32 }
 0x291   :  { %v11769_v31 = vadd.f32 %v1237_v61, %v1047_v21  ;;  %10160 = vtanh.f32 %v1115_v29  ;;  %v1118_v30 = vpop.f32.mrb[24].mxu1 }
 0x292   :  { %v10151_v52 = vpop.eup %10150  ;;  %v11773_v37 = vadd.f32 %v1238_v57, %v1049_v8  ;;  %v1119_v62 = vadd.f32 %v1118_v30, %v11711_v3  ;;  %v1120_v23 = vpop.f32.mrb[25].mxu1 }
 0x293   :  { %v10153_v44 = vpop.eup %10152  ;;  %v1121_v19 = vadd.f32 %v1120_v23, %v11711_v3  ;;  %v1239_v36 = vmul.f32 %v10151_v52, %v11709_v63  ;;  %v1059_v3 = vadd.f32 %v11719_v22, %v11727_v55 }
 0x294   :  { %10162 = vtanh.f32 %v1119_v62  ;;  %v1240_v45 = vmul.f32 %v10153_v44, %v11709_v63  ;;  %v1061_v63 = vadd.f32 %v11723_v4, %v11727_v55  ;;  %v1065_v62 = vadd.f32 %v11725_v17, %v11757_v41 }
 0x295   :  { %10164 = vtanh.f32 %v1121_v19  ;;  %v1124_v32 = vpop.f32.mrb[26].mxu1  ;;  %v11783_v13 = vadd.f32 %v1239_v36, %v1053_v59  ;;  %v837_v36 = vpop.permute.xlu1 %836 }
 0x296   :  { %v10155_v7 = vpop.eup %10154  ;;  %v1125_v51 = vadd.f32 %v1124_v32, %v11697_v18  ;;  %v1126_v60 = vpop.f32.mrb[27].mxu1  ;;  %v11786_v6 = vadd.f32 %v1240_v45, %v1055_v56 }
 0x297   :  { %v10157_v43 = vpop.eup %10156  ;;  %v1127_v21 = vadd.f32 %v1126_v60, %v11697_v18  ;;  %v1241_v28 = vmul.f32 %v10155_v7, %v11737_v14 }
 0x298   :  { %10166 = vtanh.f32 %v1125_v51  ;;  %v1242_v61 = vmul.f32 %v10157_v43, %v11737_v14  ;;  %v1067_v14 = vadd.f32 %v11729_v15, %v11757_v41  ;;  %v1073_v41 = vadd.f32 %v11735_v11, %v11761_v58 }
 0x299   :  { %10168 = vtanh.f32 %v1127_v21  ;;  %v1130_v29 = vpop.f32.mrb[28].mxu1  ;;  %v11797_v8 = vadd.f32 %v1241_v28, %v1059_v3  ;;  %v1231_v28 = vpop.permute.xlu1 %1230 }
 0x29a   :  { %v10159_v57 = vpop.eup %10158  ;;  %v1131_v30 = vadd.f32 %v1130_v29, %v11731_v48  ;;  %v1132_v22 = vpop.f32.mrb[29].mxu1  ;;  %v11800_v52 = vadd.f32 %v1242_v61, %v1061_v63  ;;  %v1077_v63 = vadd.f32 %v11739_v54, %v11759_v46 }
 0x29b   :  { %v10161_v18 = vpop.eup %10160  ;;  %v1243_v4 = vmul.f32 %v10159_v57, %v11747_v47  ;;  %v1133_v55 = vadd.f32 %v1132_v22, %v11731_v48  ;;  %v1071_v48 = vadd.f32 %v11733_v0, %v11761_v58 }
 0x29c   :  { %v1244_v23 = vmul.f32 %v10161_v18, %v11747_v47  ;;  %10170 = vtanh.f32 %v1131_v30 }
 0x29d   :  { %10172 = vtanh.f32 %v1133_v55  ;;  %v1136_v44 = vpop.f32.mrb[30].mxu1  ;;  %v11809_v59 = vadd.f32 %v1243_v4, %v1065_v62 }
 0x29e   :  { %v10163_v19 = vpop.eup %10162  ;;  %v1137_v56 = vadd.f32 %v1136_v44, %v11701_v33  ;;  %v1138_v45 = vpop.f32.mrb[31].mxu1  ;;  %v11812_v17 = vadd.f32 %v1244_v23, %v1067_v14 }
 0x29f   :  { %v10165_v32 = vpop.eup %10164  ;;  %v1139_v15 = vadd.f32 %v1138_v45, %v11701_v33  ;;  %v1245_v47 = vmul.f32 %v10163_v19, %v11765_v9  ;;  %v1235_v44 = vpop.permute.xlu1 %1234 }
 0x2a0   :  { %10174 = vtanh.f32 %v1137_v56  ;;  %v1246_v7 = vmul.f32 %v10165_v32, %v11765_v9  ;;  %v1079_v9 = vadd.f32 %v11743_v2, %v11759_v46  ;;  %v1085_v46 = vadd.f32 %v11749_v20, %v837_v36 }
 0x2a1   :  { %10176 = vtanh.f32 %v1139_v15  ;;  %v1142_v51 = vpop.f32.mrb[32].mxu1  ;;  %v11821_v60 = vadd.f32 %v1245_v47, %v1071_v48 }
 0x2a2   :  { %v10167_v43 = vpop.eup %10166  ;;  %v1143_v3 = vadd.f32 %v1142_v51, %v11689_v50  ;;  %v1144_v21 = vpop.f32.mrb[33].mxu1  ;;  %v11824_v0 = vadd.f32 %v1246_v7, %v1073_v41  ;;  %v1091_v41 = vadd.f32 %v11753_v49, %v11763_v42 }
 0x2a3   :  { %v10169_v33 = vpop.eup %10168  ;;  %v1247_v11 = vmul.f32 %v10167_v43, %v11771_v40  ;;  %v1145_v58 = vadd.f32 %v1144_v21, %v11689_v50  ;;  %v1083_v50 = vadd.f32 %v11745_v27, %v837_v36 }
 0x2a4   :  { %v1248_v61 = vmul.f32 %v10169_v33, %v11771_v40  ;;  %v1253_v29 = vmul.f32 %v1143_v3, %v1143_v3 }
 0x2a5   :  { %v1254_v57 = vmul.f32 %v1145_v58, %v1145_v58  ;;  %v1148_v30 = vpop.f32.mrb[34].mxu1  ;;  %v11833_v22 = vadd.f32 %v1247_v11, %v1077_v63 }
 0x2a6   :  { %v10171_v18 = vpop.eup %10170  ;;  %10178 = vtanh.f32 %v1253_v29  ;;  %v1149_v62 = vadd.f32 %v1148_v30, %v11691_v1  ;;  %v1150_v4 = vpop.f32.mrb[35].mxu1  ;;  %v11836_v54 = vadd.f32 %v1248_v61, %v1079_v9 }
 0x2a7   :  { %v10173_v55 = vpop.eup %10172  ;;  %10180 = vtanh.f32 %v1254_v57  ;;  %v1249_v14 = vmul.f32 %v10171_v18, %v1231_v28  ;;  %v1151_v2 = vadd.f32 %v1150_v4, %v11691_v1  ;;  %v1089_v1 = vadd.f32 %v11751_v39, %v11763_v42  ;;  %v1291_v61 = vpop.permute.xlu0 %1290 }
 0x2a8   :  { %v1255_v40 = vmul.f32 %v1149_v62, %v1149_v62  ;;  %v1250_v23 = vmul.f32 %v10173_v55, %v1231_v28 }
 0x2a9   :  { %v11841_v19 = vadd.f32 %v1249_v14, %v1083_v50  ;;  %v1256_v56 = vmul.f32 %v1151_v2, %v1151_v2  ;;  %v1154_v45 = vpop.f32.mrb[36].mxu1 }
 0x2aa   :  { %v10175_v32 = vpop.eup %10174  ;;  %10182 = vtanh.f32 %v1255_v40  ;;  %v11843_v48 = vadd.f32 %v1250_v23, %v1085_v46  ;;  %v1155_v15 = vadd.f32 %v1154_v45, %v11707_v35  ;;  %v1156_v27 = vpop.f32.mrb[37].mxu1 }
 0x2ab   :  { %v10177_v47 = vpop.eup %10176  ;;  %10184 = vtanh.f32 %v1256_v56  ;;  %v1251_v20 = vmul.f32 %v10175_v32, %v1235_v44  ;;  %v1157_v36 = vadd.f32 %v1156_v27, %v11707_v35  ;;  %v1295_v32 = vpop.permute.xlu0 %1294 }
 0x2ac   :  { %v1257_v7 = vmul.f32 %v1155_v15, %v1155_v15  ;;  %v1252_v51 = vmul.f32 %v10177_v47, %v1235_v44 }
 0x2ad   :  { %v11851_v43 = vadd.f32 %v1251_v20, %v1089_v1  ;;  %v1258_v3 = vmul.f32 %v1157_v36, %v1157_v36  ;;  %v1160_v21 = vpop.f32.mrb[38].mxu1 }
 0x2ae   :  { %10186 = vtanh.f32 %v1257_v7  ;;  %v11853_v28 = vadd.f32 %v1252_v51, %v1091_v41  ;;  %v1161_v33 = vadd.f32 %v1160_v21, %v11695_v34  ;;  %v1162_v63 = vpop.f32.mrb[39].mxu1 }
 0x2af   :  { %10188 = vtanh.f32 %v1258_v3  ;;  %v1163_v39 = vadd.f32 %v1162_v63, %v11695_v34 }
 0x2b0   :  { %v10179_v11 = vpop.eup %10178  ;;  %v1259_v35 = vmul.f32 %v1161_v33, %v1161_v33 }
 0x2b1   :  { %v10181_v58 = vpop.eup %10180  ;;  %v1260_v9 = vmul.f32 %v1163_v39, %v1163_v39  ;;  %v1166_v49 = vpop.f32.mrb[40].mxu1  ;;  %v1317_v42 = vmul.f32 %v10179_v11, %v11717_v5 }
 0x2b2   :  { %10190 = vtanh.f32 %v1259_v35  ;;  %v1167_v29 = vadd.f32 %v1166_v49, %v11721_v53  ;;  %v1168_v57 = vpop.f32.mrb[41].mxu1  ;;  %v1318_v30 = vmul.f32 %v10181_v58, %v11717_v5 }
 0x2b3   :  { %10192 = vtanh.f32 %v1260_v9  ;;  %v1169_v18 = vadd.f32 %v1168_v57, %v11721_v53  ;;  %v11862_v62 = vadd.f32 %v11769_v31, %v1317_v42 }
 0x2b4   :  { %v10183_v34 = vpop.eup %10182  ;;  %v1261_v4 = vmul.f32 %v1167_v29, %v1167_v29  ;;  %v11865_v55 = vadd.f32 %v11773_v37, %v1318_v30 }
 0x2b5   :  { %v10185_v50 = vpop.eup %10184  ;;  %v1262_v14 = vmul.f32 %v1169_v18, %v1169_v18  ;;  %v1172_v2 = vpop.f32.mrb[42].mxu1  ;;  %v1397_v46 = vmul.f32 %v11862_v62, %v11862_v62  ;;  %v1319_v40 = vmul.f32 %v10183_v34, %v1291_v61 }
 0x2b6   :  { %10194 = vtanh.f32 %v1261_v4  ;;  %v1173_v5 = vadd.f32 %v1172_v2, %v11699_v25  ;;  %v1174_v23 = vpop.f32.mrb[43].mxu1  ;;  %v1365_v53 = vadd.f32 %v11865_v55, %v11862_v62  ;;  %v1398_v31 = vmul.f32 %v11865_v55, %v11865_v55  ;;  %v1303_v18 = vpop.permute.xlu0 %1302 }
 0x2b7   :  { %10196 = vtanh.f32 %v1262_v14  ;;  %v1175_v37 = vadd.f32 %v1174_v23, %v11699_v25  ;;  %v1320_v44 = vmul.f32 %v10185_v50, %v1291_v61  ;;  %v11876_v56 = vadd.f32 %v11783_v13, %v1319_v40 }
 0x2b8   :  { %v10187_v45 = vpop.eup %10186  ;;  %v1263_v15 = vmul.f32 %v1173_v5, %v1173_v5  ;;  %1366 = vadd.xlane.f32.xlu1 %v1365_v53  ;;  %v1413_v27 = vadd.f32 %v1398_v31, %v1397_v46 }
 0x2b9   :  { %v10189_v47 = vpop.eup %10188  ;;  %v1264_v1 = vmul.f32 %v1175_v37, %v1175_v37  ;;  %v1178_v20 = vpop.f32.mrb[44].mxu1  ;;  %v11879_v36 = vadd.f32 %v11786_v6, %v1320_v44  ;;  %v1399_v41 = vmul.f32 %v11876_v56, %v11876_v56  ;;  %v1321_v7 = vmul.f32 %v10187_v45, %v1295_v32 }
 0x2ba   :  { %10198 = vtanh.f32 %v1263_v15  ;;  %v1179_v25 = vadd.f32 %v1178_v20, %v11741_v38  ;;  %v1180_v13 = vpop.f32.mrb[45].mxu1  ;;  %1414 = vadd.xlane.f32.xlu0 %v1413_v27  ;;  %v1322_v51 = vmul.f32 %v10189_v47, %v1295_v32  ;;  %v1311_v47 = vpop.permute.xlu0 %1310 }
 0x2bb   :  { %10200 = vtanh.f32 %v1264_v1  ;;  %v1181_v3 = vadd.f32 %v1180_v13, %v11741_v38  ;;  %v1400_v21 = vmul.f32 %v11879_v36, %v11879_v36  ;;  %v1368_v6 = vadd.f32 %v11879_v36, %v11876_v56 }
 0x2bc   :  { %v10191_v33 = vpop.eup %10190  ;;  %v1265_v63 = vmul.f32 %v1179_v25, %v1179_v25  ;;  %v11890_v39 = vadd.f32 %v11797_v8, %v1321_v7  ;;  %v11893_v11 = vadd.f32 %v11800_v52, %v1322_v51 }
 0x2bd   :  { %v10193_v35 = vpop.eup %10192  ;;  %v1266_v58 = vmul.f32 %v1181_v3, %v1181_v3  ;;  %v1184_v9 = vpop.f32.mrb[46].mxu1  ;;  %v1416_v49 = vadd.f32 %v1400_v21, %v1399_v41  ;;  %v1323_v38 = vmul.f32 %v10191_v33, %v11755_v26 }
 0x2be   :  { %10202 = vtanh.f32 %v1265_v63  ;;  %v1185_v42 = vadd.f32 %v1184_v9, %v11703_v10  ;;  %v1186_v61 = vpop.f32.mrb[47].mxu1  ;;  %1369 = vadd.xlane.f32.xlu0 %v1368_v6  ;;  %v1324_v29 = vmul.f32 %v10193_v35, %v11755_v26  ;;  %v1371_v52 = vadd.f32 %v11893_v11, %v11890_v39  ;;  %v1315_v3 = vpop.permute.xlu1 %1314 }
 0x2bf   :  { %10204 = vtanh.f32 %v1266_v58  ;;  %v1187_v8 = vadd.f32 %v1186_v61, %v11703_v10  ;;  %1417 = vadd.xlane.f32.xlu1 %v1416_v49  ;;  %v11902_v57 = vadd.f32 %v11809_v59, %v1323_v38  ;;  %v1401_v50 = vmul.f32 %v11890_v39, %v11890_v39 }
 0x2c0   :  { %v10195_v30 = vpop.eup %10194  ;;  %v1267_v34 = vmul.f32 %v1185_v42, %v1185_v42  ;;  %v11905_v4 = vadd.f32 %v11812_v17, %v1324_v29  ;;  %v1402_v26 = vmul.f32 %v11893_v11, %v11893_v11 }
 0x2c1   :  { %v10197_v10 = vpop.eup %10196  ;;  %v1268_v14 = vmul.f32 %v1187_v8, %v1187_v8  ;;  %v1325_v2 = vmul.f32 %v10195_v30, %v1303_v18  ;;  %v1403_v46 = vmul.f32 %v11902_v57, %v11902_v57  ;;  %v10759_v8 = vmov 14  }
 0x2c2   :  { %10206 = vtanh.f32 %v1267_v34  ;;  %1372 = vadd.xlane.f32.xlu0 %v1371_v52  ;;  %v1374_v59 = vadd.f32 %v11905_v4, %v11902_v57  ;;  %v1404_v17 = vmul.f32 %v11905_v4, %v11905_v4  ;;  %v1326_v40 = vmul.f32 %v10197_v10, %v1303_v18  ;;  %9981 = vset.pattern.permute.xlu1 %v10759_v8 }
 0x2c3   :  { %10208 = vtanh.f32 %v1268_v14  ;;  %v11918_v5 = vadd.f32 %v11821_v60, %v1325_v2  ;;  %v1419_v53 = vadd.f32 %v1402_v26, %v1401_v50  ;;  %9982 = vset.pattern.permute.xlu0 %v10759_v8 }
 0x2c4   :  { %v10199_v23 = vpop.eup %10198  ;;  %1375 = vadd.xlane.f32.xlu1 %v1374_v59  ;;  %v11921_v37 = vadd.f32 %v11824_v0, %v1326_v40  ;;  %v1422_v45 = vadd.f32 %v1404_v17, %v1403_v46 }
 0x2c5   :  { %v10201_v31 = vpop.eup %10200  ;;  %v1327_v44 = vmul.f32 %v10199_v23, %v11794_v12  ;;  %v1405_v0 = vmul.f32 %v11918_v5, %v11918_v5 }
 0x2c6   :  { %1420 = vadd.xlane.f32.xlu0 %v1419_v53  ;;  %v1328_v32 = vmul.f32 %v10201_v31, %v11794_v12  ;;  %v1377_v60 = vadd.f32 %v11921_v37, %v11918_v5  ;;  %v1406_v20 = vmul.f32 %v11921_v37, %v11921_v37 }
 0x2c7   :  { %v11926_v15 = vadd.f32 %v11833_v22, %v1327_v44 }
 0x2c8   :  { %v10203_v27 = vpop.eup %10202  ;;  %1423 = vadd.xlane.f32.xlu1 %v1422_v45  ;;  %v11931_v1 = vadd.f32 %v11836_v54, %v1328_v32  ;;  %v1425_v21 = vadd.f32 %v1406_v20, %v1405_v0 }
 0x2c9   :  { %v10205_v41 = vpop.eup %10204  ;;  %v1329_v12 = vmul.f32 %v10203_v27, %v1311_v47  ;;  %v1407_v7 = vmul.f32 %v11926_v15, %v11926_v15 }
 0x2ca   :  { %1378 = vadd.xlane.f32.xlu0 %v1377_v60  ;;  %v1380_v22 = vadd.f32 %v11931_v1, %v11926_v15  ;;  %v1408_v25 = vmul.f32 %v11931_v1, %v11931_v1  ;;  %v1330_v54 = vmul.f32 %v10205_v41, %v1311_v47 }
 0x2cb   :  { %v11944_v13 = vadd.f32 %v11841_v19, %v1329_v12 }
 0x2cc   :  { %v10207_v51 = vpop.eup %10206  ;;  %1381 = vadd.xlane.f32.xlu1 %v1380_v22  ;;  %v11947_v33 = vadd.f32 %v11843_v48, %v1330_v54  ;;  %v1428_v58 = vadd.f32 %v1408_v25, %v1407_v7 }
 0x2cd   :  { %v10209_v63 = vpop.eup %10208  ;;  %v1331_v6 = vmul.f32 %v10207_v51, %v1315_v3  ;;  %v1409_v38 = vmul.f32 %v11944_v13, %v11944_v13 }
 0x2ce   :  { %v1332_v35 = vmul.f32 %v10209_v63, %v1315_v3  ;;  %1426 = vadd.xlane.f32.xlu0 %v1425_v21  ;;  %v1383_v19 = vadd.f32 %v11947_v33, %v11944_v13  ;;  %v1410_v48 = vmul.f32 %v11947_v33, %v11947_v33  ;;  %v11972_v3 = vld [vmem:[%s15975_s7] sm:$0xff] }
 0x2cf   :  { %v11950_v9 = vadd.f32 %v11851_v43, %v1331_v6 }
 0x2d0   :  { %v11953_v49 = vadd.f32 %v11853_v28, %v1332_v35  ;;  %1429 = vadd.xlane.f32.xlu1 %v1428_v58  ;;  %v1431_v61 = vadd.f32 %v1410_v48, %v1409_v38 }
 0x2d1   :  { %v1411_v43 = vmul.f32 %v11950_v9, %v11950_v9 }
 0x2d2   :  { %1384 = vadd.xlane.f32.xlu0 %v1383_v19  ;;  %v1386_v42 = vadd.f32 %v11953_v49, %v11950_v9  ;;  %v1412_v28 = vmul.f32 %v11953_v49, %v11953_v49 }
 0x2d4   :  { %1387 = vadd.xlane.f32.xlu1 %v1386_v42  ;;  %v1434_v29 = vadd.f32 %v1412_v28, %v1411_v43 }
 0x2d6   :  { %1432 = vadd.xlane.f32.xlu0 %v1431_v61 }
 0x2d8   :  { %1435 = vadd.xlane.f32.xlu1 %v1434_v29 }
 0x345   :  { %v1367_v52 = vpop.xlane.xlu1 %1366 }
 0x346   :  { %v1389_v30 = vmul.f32 0.00390625, %v1367_v52  ;;  %v11982_v52 = vld [vmem:[%s15975_s7 + $0x8] sm:$0xff] }
 0x347   :  { %v1415_v18 = vpop.xlane.xlu0 %1414 }
 0x348   :  { %v1445_v34 = vmul.f32 %v1389_v30, %v1389_v30  ;;  %v1437_v50 = vmul.f32 0.00390625, %v1415_v18 }
 0x34a   :  { %v1453_v26 = vsub.f32 %v1437_v50, %v1445_v34 }
 0x34b   :  { %v1370_v10 = vpop.xlane.xlu0 %1369 }
 0x34c   :  { %v1461_v14 = vadd.f32 1e-05, %v1453_v26  ;;  %v1390_v2 = vmul.f32 0.00390625, %v1370_v10  ;;  %v1418_v59 = vpop.xlane.xlu1 %1417 }
 0x34d   :  { %v1438_v17 = vmul.f32 0.00390625, %v1418_v59 }
 0x34e   :  { %10210 = vrsqrt.f32 %v1461_v14  ;;  %v1446_v46 = vmul.f32 %v1390_v2, %v1390_v2 }
 0x34f   :  { %v1373_v40 = vpop.xlane.xlu0 %1372 }
 0x350   :  { %v1454_v23 = vsub.f32 %v1438_v17, %v1446_v46  ;;  %v1391_v53 = vmul.f32 0.00390625, %v1373_v40 }
 0x351   :  { %v1376_v31 = vpop.xlane.xlu1 %1375 }
 0x352   :  { %v1462_v44 = vadd.f32 1e-05, %v1454_v23  ;;  %v1392_v45 = vmul.f32 0.00390625, %v1376_v31  ;;  %v1447_v27 = vmul.f32 %v1391_v53, %v1391_v53 }
 0x353   :  { %v1421_v32 = vpop.xlane.xlu0 %1420 }
 0x354   :  { %10212 = vrsqrt.f32 %v1462_v44  ;;  %v1439_v47 = vmul.f32 0.00390625, %v1421_v32  ;;  %v1448_v0 = vmul.f32 %v1392_v45, %v1392_v45  ;;  %v11989_v44 = vld [vmem:[%s15975_s7 + $0x10] sm:$0xff] }
 0x355   :  { %v1424_v60 = vpop.xlane.xlu1 %1423 }
 0x356   :  { %v1455_v20 = vsub.f32 %v1439_v47, %v1447_v27  ;;  %v1440_v41 = vmul.f32 0.00390625, %v1424_v60 }
 0x357   :  { %v1379_v12 = vpop.xlane.xlu0 %1378 }
 0x358   :  { %v10211_v22 = vpop.eup %10210  ;;  %v1463_v7 = vadd.f32 1e-05, %v1455_v20  ;;  %v1456_v25 = vsub.f32 %v1440_v41, %v1448_v0  ;;  %v1393_v54 = vmul.f32 0.00390625, %v1379_v12  ;;  %v11995_v20 = vld [vmem:[%s15975_s7 + $0x18] sm:$0xff] }
 0x359   :  { %v1382_v51 = vpop.xlane.xlu1 %1381  ;;  %v11975_v21 = vmul.f32 %v11972_v3, %v10211_v22 }
 0x35a   :  { %10214 = vrsqrt.f32 %v1463_v7  ;;  %v1464_v63 = vadd.f32 1e-05, %v1456_v25  ;;  %v1394_v6 = vmul.f32 0.00390625, %v1382_v51  ;;  %v1449_v19 = vmul.f32 %v1393_v54, %v1393_v54 }
 0x35b   :  { %v1427_v35 = vpop.xlane.xlu0 %1426  ;;  %v1485_v58 = vmul.f32 %v11975_v21, %v1389_v30 }
 0x35c   :  { %10216 = vrsqrt.f32 %v1464_v63  ;;  %v1441_v38 = vmul.f32 0.00390625, %v1427_v35  ;;  %v1450_v43 = vmul.f32 %v1394_v6, %v1394_v6 }
 0x35d   :  { %1501 = vrot.lane.b32.xlu0 %v1485_v58, %s10760_s25  ;;  %v1430_v48 = vpop.xlane.xlu1 %1429 }
 0x35e   :  { %v10213_v42 = vpop.eup %10212  ;;  %v1457_v28 = vsub.f32 %v1441_v38, %v1449_v19  ;;  %v1442_v61 = vmul.f32 0.00390625, %v1430_v48  ;;  %v12009_v19 = vld [vmem:[%s15975_s7 + $0x28] sm:$0xff] }
 0x35f   :  { %v1385_v29 = vpop.xlane.xlu0 %1384  ;;  %v1478_v18 = vmul.f32 %v11982_v52, %v10213_v42  ;;  %v12017_v42 = vld [vmem:[%s15975_s7 + $0x30] sm:$0xff] }
 0x360   :  { %v1465_v30 = vadd.f32 1e-05, %v1457_v28  ;;  %v1458_v34 = vsub.f32 %v1442_v61, %v1450_v43  ;;  %v1395_v50 = vmul.f32 0.00390625, %v1385_v29  ;;  %v12023_v61 = vld [vmem:[%s15975_s7 + $0x38] sm:$0xff] }
 0x361   :  { %v1388_v26 = vpop.xlane.xlu1 %1387  ;;  %v1486_v10 = vmul.f32 %v1478_v18, %v1390_v2 }
 0x362   :  { %10218 = vrsqrt.f32 %v1465_v30  ;;  %v1466_v14 = vadd.f32 1e-05, %v1458_v34  ;;  %v1396_v59 = vmul.f32 0.00390625, %v1388_v26  ;;  %v1451_v40 = vmul.f32 %v1395_v50, %v1395_v50 }
 0x363   :  { %v1433_v46 = vpop.xlane.xlu0 %1432  ;;  %1503 = vrot.lane.b32.xlu1 %v1486_v10, %s10760_s25  ;;  %v10761_v30 = vmov 15  }
 0x364   :  { %v10215_v17 = vpop.eup %10214  ;;  %10220 = vrsqrt.f32 %v1466_v14  ;;  %v1443_v23 = vmul.f32 0.00390625, %v1433_v46  ;;  %v1452_v2 = vmul.f32 %v1396_v59, %v1396_v59 }
 0x365   :  { %v1436_v31 = vpop.xlane.xlu1 %1435  ;;  %v1479_v32 = vmul.f32 %v11989_v44, %v10215_v17 }
 0x366   :  { %v10217_v27 = vpop.eup %10216  ;;  %v1459_v47 = vsub.f32 %v1443_v23, %v1451_v40  ;;  %v1444_v60 = vmul.f32 0.00390625, %v1436_v31 }
 0x367   :  { %v1487_v0 = vmul.f32 %v1479_v32, %v1391_v53  ;;  %v1480_v41 = vmul.f32 %v11995_v20, %v10217_v27  ;;  %v12003_v53 = vld [vmem:[%s15975_s7 + $0x20] sm:$0xff] }
 0x368   :  { %v1467_v12 = vadd.f32 1e-05, %v1459_v47  ;;  %v1460_v22 = vsub.f32 %v1444_v60, %v1452_v2  ;;  %v16017_v47 = vmov 2   ;;  %v10618_v60 = vld [vmem:[%s15975_s7 + $0x40] sm:$0xff] }
 0x369   :  { %1505 = vrot.lane.b32.xlu1 %v1487_v0, %s10760_s25  ;;  %v1488_v7 = vmul.f32 %v1480_v41, %v1392_v45  ;;  %v10619_v0 = vld [vmem:[%s15975_s7 + $0x48] sm:$0xff] }
 0x36a   :  { %10222 = vrsqrt.f32 %v1467_v12  ;;  %v1468_v25 = vadd.f32 1e-05, %v1460_v22  ;;  %v10621_v12 = vld [vmem:[%s15975_s7 + $0x50] sm:$0xff]  ;;  %v10622_v22 = vld [vmem:[%s15975_s7 + $0x88] sm:$0xff] }
 0x36b   :  { %1507 = vrot.lane.b32.xlu0 %v1488_v7, %s10760_s25  ;;  %v10623_v7 = vld [vmem:[%s15975_s7 + $0x90] sm:$0xff] }
 0x36c   :  { %v10219_v51 = vpop.eup %10218  ;;  %10224 = vrsqrt.f32 %v1468_v25  ;;  %v10624_v25 = vld [vmem:[%s15975_s7 + $0x58] sm:$0xff] }
 0x36d   :  { %v1481_v63 = vmul.f32 %v12003_v53, %v10219_v51  ;;  %v10625_v51 = vld [vmem:[%s15975_s7 + $0x60] sm:$0xff] }
 0x36e   :  { %v10221_v35 = vpop.eup %10220 }
 0x36f   :  { %v1489_v58 = vmul.f32 %v1481_v63, %v1393_v54  ;;  %v1482_v45 = vmul.f32 %v12009_v19, %v10221_v35  ;;  %v10627_v35 = vld [vmem:[%s15975_s7 + $0xa0] sm:$0xff] }
 0x371   :  { %1509 = vrot.lane.b32.xlu1 %v1489_v58, %s10760_s25  ;;  %v1490_v38 = vmul.f32 %v1482_v45, %v1394_v6  ;;  %v10628_v58 = vld [vmem:[%s15975_s7 + $0x68] sm:$0xff] }
 0x373   :  { %1511 = vrot.lane.b32.xlu0 %v1490_v38, %s10760_s25  ;;  %v10630_v38 = vld [vmem:[%s15975_s7 + $0xa8] sm:$0xff] }
 0x374   :  { %v10223_v48 = vpop.eup %10222 }
 0x375   :  { %v1483_v54 = vmul.f32 %v12017_v42, %v10223_v48  ;;  %v10631_v48 = vld [vmem:[%s15975_s7 + $0xb0] sm:$0xff] }
 0x376   :  { %v10225_v43 = vpop.eup %10224 }
 0x377   :  { %v1491_v28 = vmul.f32 %v1483_v54, %v1395_v50  ;;  %v1484_v29 = vmul.f32 %v12023_v61, %v10225_v43  ;;  %v12100_v43 = vld [vmem:[%s15975_s7 + $0xb8] sm:$0xff] }
 0x379   :  { %1513 = vrot.lane.b32.xlu1 %v1491_v28, %s10760_s25  ;;  %v1492_v6 = vmul.f32 %v1484_v29, %v1396_v59  ;;  %v10763_v28 = vmov 9  }
 0x37b   :  { %1515 = vrot.lane.b32.xlu0 %v1492_v6, %s10760_s25 }
 0x37d   :  { %1535 = vperm.xlu1 %9981, %v11975_v21  }
 0x37f   :  { %1540 = vperm.xlu0 %9982, %v1478_v18  }
 0x381   :  { %1550 = vperm.xlu1 %9981, %v1480_v41   ;;  %v10620_v41 = vld [vmem:[%s15975_s7 + $0x80] sm:$0xff] }
 0x383   :  { %1545 = vperm.xlu0 %9982, %v1479_v32  }
 0x385   :  { %1555 = vperm.xlu1 %9981, %v1481_v63   ;;  %v10626_v63 = vld [vmem:[%s15975_s7 + $0x98] sm:$0xff] }
 0x387   :  { %1560 = vperm.xlu0 %9982, %v1482_v45   ;;  %v12081_v45 = vld [vmem:[%s15975_s7 + $0x70] sm:$0xff] }
 0x389   :  { %9983 = vset.pattern.permute.xlu1 %v10761_v30 }
 0x38b   :  { %9984 = vset.pattern.permute.xlu0 %v10761_v30 }
 0x3cf   :  { %v1502_v34 = vpop.permute.xlu0 %1501 }
 0x3d0   :  { %v1525_v50 = vsub.f32 %v11972_v3, %v1502_v34 }
 0x3d2   :  { %1591 = vperm.xlu1 %9983, %v1525_v50  }
 0x3d5   :  { %v1504_v26 = vpop.permute.xlu1 %1503 }
 0x3d6   :  { %v1526_v10 = vsub.f32 %v11982_v52, %v1504_v26 }
 0x3d8   :  { %1596 = vperm.xlu1 %9983, %v1526_v10  }
 0x3db   :  { %v1506_v14 = vpop.permute.xlu1 %1505 }
 0x3dc   :  { %v1527_v21 = vsub.f32 %v11989_v44, %v1506_v14  ;;  %9986 = vset.pattern.permute.xlu1 %v10759_v8 }
 0x3dd   :  { %v1508_v18 = vpop.permute.xlu0 %1507  ;;  %1570 = vperm.xlu1 %9986, %v1484_v29  }
 0x3de   :  { %1601 = vperm.xlu0 %9984, %v1527_v21   ;;  %v1528_v59 = vsub.f32 %v11995_v20, %v1508_v18 }
 0x3e1   :  { %9987 = vset.pattern.permute.xlu1 %v10761_v30 }
 0x3e2   :  { %1606 = vperm.xlu1 %9987, %v1528_v59   ;;  %9985 = vset.pattern.permute.xlu0 %v10759_v8 }
 0x3e3   :  { %1565 = vperm.xlu0 %9985, %v1483_v54   ;;  %v1510_v46 = vpop.permute.xlu1 %1509  ;;  %v12093_v54 = vld [vmem:[%s15975_s7 + $0x78] sm:$0xff] }
 0x3e4   :  { %v1529_v17 = vsub.f32 %v12003_v53, %v1510_v46 }
 0x3e5   :  { %v1512_v40 = vpop.permute.xlu0 %1511 }
 0x3e6   :  { %1611 = vperm.xlu1 %9987, %v1529_v17   ;;  %v1530_v23 = vsub.f32 %v12009_v19, %v1512_v40 }
 0x3e7   :  { %9988 = vset.pattern.permute.xlu0 %v10761_v30 }
 0x3ea   :  { %1616 = vperm.xlu1 %9987, %v1530_v23  }
 0x3eb   :  { %v1514_v31 = vpop.permute.xlu1 %1513 }
 0x3ec   :  { %v1531_v32 = vsub.f32 %v12017_v42, %v1514_v31 }
 0x3ed   :  { %v1516_v27 = vpop.permute.xlu0 %1515 }
 0x3ee   :  { %v1532_v2 = vsub.f32 %v12023_v61, %v1516_v27  ;;  %1621 = vperm.xlu0 %9988, %v1531_v32  }
 0x3f0   :  { %1626 = vperm.xlu1 %9987, %v1532_v2  }
 0x3f2   :  { %9990 = vset.pattern.permute.xlu0 %v16017_v47 }
 0x3f3   :  { %1707 = vperm.xlu0 %9990, %v10619_v0  }
 0x3f4   :  { %9989 = vset.pattern.permute.xlu1 %v16017_v47 }
 0x3f5   :  { %1703 = vperm.xlu1 %9989, %v10618_v60  }
 0x3f7   :  { %1711 = vperm.xlu0 %9990, %v10621_v12  }
 0x3f9   :  { %1735 = vperm.xlu1 %9989, %v10620_v41  }
 0x3fb   :  { %1743 = vperm.xlu0 %9990, %v10623_v7  }
 0x3fd   :  { %1739 = vperm.xlu1 %9989, %v10622_v22  }
 0x3ff   :  { %1719 = vperm.xlu0 %9990, %v10625_v51  }
 0x401   :  { %1715 = vperm.xlu1 %9989, %v10624_v25  }
 0x403   :  { %1751 = vperm.xlu0 %9990, %v10627_v35  }
 0x405   :  { %1747 = vperm.xlu1 %9989, %v10626_v63  }
 0x407   :  { %1727 = vperm.xlu0 %9990, %v12081_v45  }
 0x409   :  { %1723 = vperm.xlu1 %9989, %v10628_v58  }
 0x40b   :  { %1759 = vperm.xlu0 %9990, %v10631_v48  }
 0x40d   :  { %1755 = vperm.xlu1 %9989, %v10630_v38  }
 0x40f   :  { %1671 = vperm.xlu0 %9990, %v11972_v3   ;;  %v1536_v3 = vpop.permute.xlu1 %1535 }
 0x410   :  { %v1573_v29 = vmul.f32 %v1536_v3, %v11862_v62  ;;  %v1574_v6 = vmul.f32 %v1536_v3, %v11865_v55 }
 0x411   :  { %1731 = vperm.xlu1 %9989, %v12093_v54  }
 0x413   :  { %1683 = vperm.xlu0 %9990, %v11995_v20   ;;  %v1541_v20 = vpop.permute.xlu0 %1540 }
 0x414   :  { %v1575_v34 = vmul.f32 %v1541_v20, %v11876_v56  ;;  %v1576_v50 = vmul.f32 %v1541_v20, %v11879_v36 }
 0x415   :  { %1763 = vperm.xlu1 %9989, %v12100_v43  }
 0x417   :  { %1691 = vperm.xlu0 %9990, %v12009_v19  }
 0x419   :  { %1675 = vperm.xlu1 %9989, %v11982_v52   ;;  %v1551_v52 = vpop.permute.xlu1 %1550 }
 0x41a   :  { %v1579_v56 = vmul.f32 %v1551_v52, %v11902_v57  ;;  %v1580_v36 = vmul.f32 %v1551_v52, %v11905_v4 }
 0x41b   :  { %1699 = vperm.xlu0 %9990, %v12023_v61  }
 0x41d   :  { %9991 = vset.pattern.permute.xlu1 %v10763_v28  ;;  %v1556_v19 = vpop.permute.xlu1 %1555 }
 0x41e   :  { %2068 = vperm.xlu1 %9991, %v10619_v0   ;;  %v1581_v57 = vmul.f32 %v1556_v19, %v11918_v5 }
 0x41f   :  { %9997 = vset.pattern.permute.xlu0 %v10763_v28 }
 0x420   :  { %2064 = vperm.xlu0 %9997, %v10618_v60  }
 0x422   :  { %2144 = vperm.xlu1 %9991, %v10620_v41  }
 0x424   :  { %2148 = vperm.xlu0 %9997, %v10622_v22  }
 0x426   :  { %9992 = vset.pattern.permute.xlu1 %v16017_v47 }
 0x427   :  { %1679 = vperm.xlu1 %9992, %v11989_v44   ;;  %v1546_v44 = vpop.permute.xlu0 %1545 }
 0x428   :  { %2152 = vperm.xlu0 %9997, %v10623_v7   ;;  %v1577_v17 = vmul.f32 %v1546_v44, %v11890_v39  ;;  %v1578_v40 = vmul.f32 %v1546_v44, %v11893_v11  ;;  %v1582_v39 = vmul.f32 %v1556_v19, %v11921_v37  ;;  %v8777_v19 = vld [vmem:[%s15971_s3 + $0xf0] sm:$0xff]  ;;  %v8779_v44 = vld [vmem:[%s15971_s3 + $0x100] sm:$0xff] }
 0x42b   :  { %9993 = vset.pattern.permute.xlu1 %v10763_v28  ;;  %v1561_v46 = vpop.permute.xlu0 %1560 }
 0x42c   :  { %2072 = vperm.xlu1 %9993, %v10621_v12   ;;  %2160 = vperm.xlu0 %9997, %v10627_v35   ;;  %v1583_v11 = vmul.f32 %v1561_v46, %v11926_v15  ;;  %v1584_v4 = vmul.f32 %v1561_v46, %v11931_v1  ;;  %v8791_v46 = vld [vmem:[%s15971_s3 + $0x160] sm:$0xff] }
 0x430   :  { %2076 = vperm.xlu1 %9993, %v10624_v25   ;;  %2168 = vperm.xlu0 %9997, %v10631_v48  }
 0x434   :  { %2156 = vperm.xlu1 %9993, %v10626_v63   ;;  %10000 = vset.pattern.permute.xlu0 %v10759_v8 }
 0x438   :  { %9994 = vset.pattern.permute.xlu1 %v16017_v47 }
 0x439   :  { %1687 = vperm.xlu1 %9994, %v12003_v53  }
 0x43d   :  { %9995 = vset.pattern.permute.xlu1 %v10763_v28 }
 0x43e   :  { %2080 = vperm.xlu1 %9995, %v10625_v51  }
 0x442   :  { %2084 = vperm.xlu1 %9995, %v10628_v58  }
 0x446   :  { %2164 = vperm.xlu1 %9995, %v10630_v38  }
 0x44a   :  { %9996 = vset.pattern.permute.xlu1 %v16017_v47 }
 0x44b   :  { %1695 = vperm.xlu1 %9996, %v12017_v42  }
 0x44f   :  { %9998 = vset.pattern.permute.xlu1 %v10763_v28 }
 0x450   :  { %2088 = vperm.xlu1 %9998, %v12081_v45  }
 0x451   :  { %v1592_v61 = vpop.permute.xlu1 %1591 }
 0x452   :  { %v1629_v10 = vadd.f32 %v1592_v61, %v1573_v29  ;;  %v1630_v14 = vadd.f32 %v1592_v61, %v1574_v6  ;;  %v8778_v61 = vld [vmem:[%s15971_s3 + $0xf8] sm:$0xff]  ;;  %v8780_v29 = vld [vmem:[%s15971_s3 + $0x108] sm:$0xff]  ;;  %v8781_v6 = vld [vmem:[%s15971_s3 + $0x110] sm:$0xff] }
 0x454   :  { %2092 = vperm.xlu1 %9998, %v12093_v54   ;;  %v8775_v54 = vld [vmem:[%s15971_s3 + $0xe0] sm:$0xff] }
 0x457   :  { %v1597_v26 = vpop.permute.xlu1 %1596 }
 0x458   :  { %v1631_v21 = vadd.f32 %v1597_v26, %v1575_v34  ;;  %v1632_v18 = vadd.f32 %v1597_v26, %v1576_v50  ;;  %2172 = vperm.xlu1 %9998, %v12100_v43   ;;  %v8776_v43 = vld [vmem:[%s15971_s3 + $0xe8] sm:$0xff]  ;;  %v8782_v34 = vld [vmem:[%s15971_s3 + $0x118] sm:$0xff]  ;;  %v8783_v50 = vld [vmem:[%s15971_s3 + $0x120] sm:$0xff] }
 0x459   :  { %v8784_v26 = vld [vmem:[%s15971_s3 + $0x128] sm:$0xff] }
 0x45a   :  { %v9474_v59 = vpack.c.bf16 %v1631_v21, %v1629_v10  ;;  %v9472_v53 = vpack.c.bf16 %v1632_v18, %v1630_v14  ;;  %v8785_v10 = vld [vmem:[%s15971_s3 + $0x130] sm:$0xff]  ;;  %v8786_v14 = vld [vmem:[%s15971_s3 + $0x138] sm:$0xff]  ;;  %v8787_v21 = vld [vmem:[%s15971_s3 + $0x140] sm:$0xff] }
 0x45b   :  { %v8788_v18 = vld [vmem:[%s15971_s3 + $0x148] sm:$0xff] }
 0x45c   :  { %9473 = vmatprep.subr.bf16.mxu1 %v9472_v53  ;;  %v1571_v62 = vpop.permute.xlu1 %1570  ;;  %9999 = vset.pattern.permute.xlu1 %v10759_v8  ;;  %v8790_v53 = vld [vmem:[%s15971_s3 + $0x158] sm:$0xff] }
 0x45d   :  { %9475 = vmatpush1.bf16.msra.mxu1 %v9474_v59  ;;  %v1602_v55 = vpop.permute.xlu0 %1601  ;;  %v1587_v5 = vmul.f32 %v1571_v62, %v11950_v9  ;;  %v1588_v37 = vmul.f32 %v1571_v62, %v11953_v49  ;;  %v8771_v9 = vld [vmem:[%s15971_s3 + $0xc0] sm:$0xff]  ;;  %v8774_v49 = vld [vmem:[%s15971_s3 + $0xd8] sm:$0xff]  ;;  %v8789_v59 = vld [vmem:[%s15971_s3 + $0x150] sm:$0xff] }
 0x45e   :  { %v1633_v31 = vadd.f32 %v1602_v55, %v1577_v17  ;;  %v1634_v32 = vadd.f32 %v1602_v55, %v1578_v40  ;;  %v8792_v62 = vld [vmem:[%s15971_s3 + $0x168] sm:$0xff]  ;;  %v8793_v55 = vld [vmem:[%s15971_s3 + $0x170] sm:$0xff] }
 0x461   :  { %v1607_v23 = vpop.permute.xlu1 %1606 }
 0x462   :  { %v1635_v27 = vadd.f32 %v1607_v23, %v1579_v56  ;;  %v1636_v2 = vadd.f32 %v1607_v23, %v1580_v36  ;;  %v1566_v12 = vpop.permute.xlu0 %1565  ;;  %v8794_v56 = vld [vmem:[%s15971_s3 + $0x178] sm:$0xff] }
 0x463   :  { %v1585_v15 = vmul.f32 %v1566_v12, %v11944_v13  ;;  %v1586_v1 = vmul.f32 %v1566_v12, %v11947_v33  ;;  %v8772_v13 = vld [vmem:[%s15971_s3 + $0xc8] sm:$0xff]  ;;  %v8773_v33 = vld [vmem:[%s15971_s3 + $0xd0] sm:$0xff] }
 0x464   :  { %v9478_v60 = vpack.c.bf16 %v1635_v27, %v1633_v31  ;;  %v9476_v0 = vpack.c.bf16 %v1636_v2, %v1634_v32 }
 0x465   :  { %v1612_v41 = vpop.permute.xlu1 %1611 }
 0x466   :  { %9477 = vmatprep.subr.bf16.mxu1 %v9476_v0  ;;  %v1637_v7 = vadd.f32 %v1612_v41, %v1581_v57  ;;  %v1638_v25 = vadd.f32 %v1612_v41, %v1582_v39 }
 0x467   :  { %9479 = vmatpush1.bf16.msra.mxu1 %v9478_v60 }
 0x469   :  { %v1617_v22 = vpop.permute.xlu1 %1616 }
 0x46a   :  { %v1639_v42 = vadd.f32 %v1617_v22, %v1583_v11  ;;  %v1640_v51 = vadd.f32 %v1617_v22, %v1584_v4 }
 0x46c   :  { %v9482_v63 = vpack.c.bf16 %v1639_v42, %v1637_v7  ;;  %v9480_v35 = vpack.c.bf16 %v1640_v51, %v1638_v25 }
 0x46d   :  { %v1622_v58 = vpop.permute.xlu0 %1621 }
 0x46e   :  { %9481 = vmatprep.subr.bf16.mxu1 %v9480_v35  ;;  %v1641_v38 = vadd.f32 %v1622_v58, %v1585_v15  ;;  %v1642_v48 = vadd.f32 %v1622_v58, %v1586_v1 }
 0x46f   :  { %9483 = vmatpush1.bf16.msra.mxu1 %v9482_v63  ;;  %v1627_v45 = vpop.permute.xlu1 %1626 }
 0x470   :  { %v1643_v28 = vadd.f32 %v1627_v45, %v1587_v5  ;;  %v1644_v3 = vadd.f32 %v1627_v45, %v1588_v37 }
 0x472   :  { %v9486_v52 = vpack.c.bf16 %v1643_v28, %v1641_v38  ;;  %v9484_v20 = vpack.c.bf16 %v1644_v3, %v1642_v48  ;;  %v1708_v60 = vpop.permute.xlu0 %1707 }
 0x474   :  { %9485 = vmatprep.subr.bf16.mxu1 %v9484_v20  ;;  %v1704_v36 = vpop.permute.xlu1 %1703 }
 0x475   :  { %9487 = vmatpush1.bf16.msra.mxu1 %v9486_v52 }
 0x476   :  { %v1712_v41 = vpop.permute.xlu0 %1711 }
 0x478   :  { %8795 = vmatmul.mubr.msk.f32.vlgmr.msra.gmra.mrb[48].mxu1 %vm907_vm2, %v8771_v9  ;;  %v12259_v17 = vpop.permute.xlu1 %1735 }
 0x479   :  { %1908 = vmatprep.mubr.f32.mxu1 %v16114_v24 }
 0x47a   :  { %v12277_v39 = vpop.permute.xlu0 %1743 }
 0x47c   :  { %8796 = vmatmul.mubr.msk.f32.gmra.mrb[50].mxu1 %vm907_vm2, %v8772_v13  ;;  %v12261_v40 = vpop.permute.xlu1 %1739 }
 0x47d   :  { %1914 = vmatprep.mubr.f32.mxu1 %v16114_v24 }
 0x47e   :  { %v12281_v22 = vpop.permute.xlu0 %1719 }
 0x480   :  { %8797 = vmatmul.mubr.msk.f32.gmra.mrb[52].mxu1 %vm907_vm2, %v8773_v33  ;;  %v12263_v23 = vpop.permute.xlu1 %1715 }
 0x481   :  { %1920 = vmatprep.mubr.f32.mxu1 %v16114_v24 }
 0x482   :  { %v12291_v63 = vpop.permute.xlu0 %1751 }
 0x484   :  { %8798 = vmatmul.mubr.msk.f32.gmra.mrb[54].mxu1 %vm907_vm2, %v8774_v49  ;;  %v12265_v31 = vpop.permute.xlu1 %1747 }
 0x485   :  { %1926 = vmatprep.mubr.f32.mxu1 %v16114_v24 }
 0x486   :  { %v12301_v15 = vpop.permute.xlu0 %1727 }
 0x488   :  { %8799 = vmatmul.mubr.msk.f32.gmra.mrb[56].mxu1 %vm907_vm2, %v8775_v54  ;;  %v12267_v32 = vpop.permute.xlu1 %1723 }
 0x489   :  { %1932 = vmatprep.mubr.f32.mxu1 %v16114_v24 }
 0x48a   :  { %v12311_v28 = vpop.permute.xlu0 %1759 }
 0x48c   :  { %8800 = vmatmul.mubr.msk.f32.gmra.mrb[58].mxu1 %vm907_vm2, %v8776_v43  ;;  %v12269_v27 = vpop.permute.xlu1 %1755 }
 0x48d   :  { %1938 = vmatprep.mubr.f32.mxu1 %v16114_v24 }
 0x48e   :  { %v1672_v13 = vpop.permute.xlu0 %1671 }
 0x490   :  { %8801 = vmatmul.mubr.msk.f32.gmra.mrb[60].mxu1 %vm907_vm2, %v8777_v19  ;;  %v12271_v2 = vpop.permute.xlu1 %1731 }
 0x491   :  { %1944 = vmatprep.mubr.f32.mxu1 %v16114_v24 }
 0x492   :  { %v12327_v43 = vpop.permute.xlu0 %1683 }
 0x494   :  { %8802 = vmatmul.mubr.msk.f32.gmra.mrb[62].mxu1 %vm907_vm2, %v8778_v61  ;;  %v12273_v0 = vpop.permute.xlu1 %1763 }
 0x495   :  { %1950 = vmatprep.mubr.f32.mxu1 %v16114_v24 }
 0x498   :  { %8803 = vmatmul.mubr.msk.f32.gmra.mrb[64].mxu1 %vm907_vm2, %v8779_v44  ;;  %v12275_v57 = vpop.permute.xlu1 %1675 }
 0x499   :  { %1956 = vmatprep.mubr.f32.mxu1 %v16114_v24 }
 0x49c   :  { %8804 = vmatmul.mubr.msk.f32.gmra.mrb[66].mxu1 %vm907_vm2, %v8780_v29 }
 0x49d   :  { %1962 = vmatprep.mubr.f32.mxu1 %v16114_v24  ;;  %v12279_v4 = vpop.permute.xlu1 %2068 }
 0x4a0   :  { %8805 = vmatmul.mubr.msk.f32.gmra.mrb[68].mxu1 %vm907_vm2, %v8781_v6  ;;  %v12329_v6 = vpop.permute.xlu0 %1691 }
 0x4a1   :  { %1968 = vmatprep.mubr.f32.mxu1 %v16114_v24  ;;  %v12287_v42 = vpop.permute.xlu1 %2144 }
 0x4a4   :  { %8806 = vmatmul.mubr.msk.f32.gmra.mrb[70].mxu1 %vm907_vm2, %v8782_v34 }
 0x4a5   :  { %1974 = vmatprep.mubr.f32.mxu1 %v16114_v24 }
 0x4a6   :  { %v12297_v5 = vpop.permute.xlu1 %1679 }
 0x4a8   :  { %8807 = vmatmul.mubr.msk.f32.gmra.mrb[72].mxu1 %vm907_vm2, %v8783_v50 }
 0x4a9   :  { %1980 = vmatprep.mubr.f32.mxu1 %v16114_v24 }
 0x4ab   :  { %v12307_v38 = vpop.permute.xlu1 %2072 }
 0x4ac   :  { %8808 = vmatmul.mubr.msk.f32.gmra.mrb[74].mxu1 %vm907_vm2, %v8784_v26 }
 0x4ad   :  { %1986 = vmatprep.mubr.f32.mxu1 %v16114_v24 }
 0x4af   :  { %v12317_v20 = vpop.permute.xlu1 %2076 }
 0x4b0   :  { %8809 = vmatmul.mubr.msk.f32.gmra.mrb[76].mxu1 %vm907_vm2, %v8785_v10 }
 0x4b1   :  { %1992 = vmatprep.mubr.f32.mxu1 %v16114_v24 }
 0x4b3   :  { %v12325_v54 = vpop.permute.xlu1 %2156 }
 0x4b4   :  { %8810 = vmatmul.mubr.msk.f32.gmra.mrb[78].mxu1 %vm907_vm2, %v8786_v14 }
 0x4b5   :  { %1998 = vmatprep.mubr.f32.mxu1 %v16114_v24 }
 0x4b8   :  { %8811 = vmatmul.mubr.msk.f32.gmra.mrb[80].mxu1 %vm907_vm2, %v8787_v21  ;;  %v12331_v50 = vpop.permute.xlu1 %1687  ;;  %v12333_v21 = vpop.permute.xlu0 %1699 }
 0x4b9   :  { %2004 = vmatprep.mubr.f32.mxu1 %v16114_v24 }
 0x4bc   :  { %8812 = vmatmul.mubr.msk.f32.gmra.mrb[82].mxu1 %vm907_vm2, %v8788_v18 }
 0x4bd   :  { %2010 = vmatprep.mubr.f32.mxu1 %v16114_v24 }
 0x4c0   :  { %8813 = vmatmul.mubr.msk.f32.gmra.mrb[84].mxu1 %vm907_vm2, %v8789_v59 }
 0x4c1   :  { %2016 = vmatprep.mubr.f32.mxu1 %v16114_v24 }
 0x4c4   :  { %8814 = vmatmul.mubr.msk.f32.gmra.mrb[86].mxu1 %vm907_vm2, %v8790_v53 }
 0x4c5   :  { %2022 = vmatprep.mubr.f32.mxu1 %v16114_v24 }
 0x4c8   :  { %8815 = vmatmul.mubr.msk.f32.gmra.mrb[88].mxu1 %vm907_vm2, %v8791_v46 }
 0x4c9   :  { %2028 = vmatprep.mubr.f32.mxu1 %v16114_v24 }
 0x4cc   :  { %8816 = vmatmul.mubr.msk.f32.gmra.mrb[90].mxu1 %vm907_vm2, %v8792_v62  ;;  %v12335_v62 = vpop.permute.xlu1 %2080 }
 0x4cd   :  { %2034 = vmatprep.mubr.f32.mxu1 %v16114_v24 }
 0x4d0   :  { %8817 = vmatmul.mubr.msk.f32.gmra.mrb[92].mxu1 %vm907_vm2, %v8793_v55  ;;  %v2065_v55 = vpop.permute.xlu0 %2064 }
 0x4d1   :  { %2040 = vmatprep.mubr.f32.mxu1 %v16114_v24 }
 0x4d4   :  { %8818 = vmatmul.mubr.msk.f32.gmra.mrb[94].mxu1 %vm907_vm2, %v8794_v56 }
 0x4d5   :  { %3618 = vmatprep.mubr.f32.mxu1 %v16114_v24 }
 0x54b   :  { %v1904_v11 = vpop.f32.mrb[48].mxu1 }
 0x54c   :  { %v1906_v12 = vpop.f32.mrb[49].mxu1 }
 0x54f   :  { %v12283_v7 = vpop.f32.mrb[50].mxu1 }
 0x550   :  { %v12285_v25 = vpop.f32.mrb[51].mxu1 }
 0x553   :  { %v12289_v51 = vpop.f32.mrb[52].mxu1 }
 0x554   :  { %v12293_v35 = vpop.f32.mrb[53].mxu1 }
 0x557   :  { %v12295_v58 = vpop.f32.mrb[54].mxu1 }
 0x558   :  { %v12299_v37 = vpop.f32.mrb[55].mxu1 }
 0x55b   :  { %v12303_v1 = vpop.f32.mrb[56].mxu1 }
 0x55c   :  { %v12305_v45 = vpop.f32.mrb[57].mxu1 }
 0x55f   :  { %v12309_v48 = vpop.f32.mrb[58].mxu1 }
 0x560   :  { %v12313_v3 = vpop.f32.mrb[59].mxu1 }
 0x563   :  { %v12315_v52 = vpop.f32.mrb[60].mxu1 }
 0x564   :  { %v12319_v9 = vpop.f32.mrb[61].mxu1 }
 0x567   :  { %v12321_v33 = vpop.f32.mrb[62].mxu1 }
 0x568   :  { %v12323_v49 = vpop.f32.mrb[63].mxu1 }
 0x56b   :  { %v1952_v19 = vpop.f32.mrb[64].mxu1 }
 0x56c   :  { %v1953_v61 = vadd.f32 %v1952_v19, %v1704_v36  ;;  %v1954_v44 = vpop.f32.mrb[65].mxu1 }
 0x56d   :  { %v1955_v29 = vadd.f32 %v1954_v44, %v1704_v36 }
 0x56e   :  { %10226 = vtanh.f32 %v1953_v61 }
 0x56f   :  { %10228 = vtanh.f32 %v1955_v29  ;;  %v1958_v34 = vpop.f32.mrb[66].mxu1 }
 0x570   :  { %v1959_v26 = vadd.f32 %v1958_v34, %v1708_v60  ;;  %v1960_v10 = vpop.f32.mrb[67].mxu1 }
 0x571   :  { %v1961_v14 = vadd.f32 %v1960_v10, %v1708_v60  ;;  %v1905_v60 = vadd.f32 %v1904_v11, %v1672_v13  ;;  %v1911_v11 = vadd.f32 %v12283_v7, %v12275_v57 }
 0x572   :  { %10230 = vtanh.f32 %v1959_v26  ;;  %v1907_v26 = vadd.f32 %v1906_v12, %v1672_v13  ;;  %v1913_v13 = vadd.f32 %v12285_v25, %v12275_v57 }
 0x573   :  { %10232 = vtanh.f32 %v1961_v14  ;;  %v1964_v18 = vpop.f32.mrb[68].mxu1 }
 0x574   :  { %v1965_v59 = vadd.f32 %v1964_v18, %v1712_v41  ;;  %v1966_v53 = vpop.f32.mrb[69].mxu1 }
 0x575   :  { %v1967_v46 = vadd.f32 %v1966_v53, %v1712_v41 }
 0x576   :  { %10234 = vtanh.f32 %v1965_v59  ;;  %v12341_v59 = vpop.permute.xlu1 %2084 }
 0x577   :  { %10236 = vtanh.f32 %v1967_v46  ;;  %v1970_v56 = vpop.f32.mrb[70].mxu1 }
 0x578   :  { %v10227_v36 = vpop.eup %10226  ;;  %v1971_v19 = vadd.f32 %v1970_v56, %v12263_v23  ;;  %v1972_v61 = vpop.f32.mrb[71].mxu1 }
 0x579   :  { %v10229_v44 = vpop.eup %10228  ;;  %v2095_v29 = vmul.f32 %v10227_v36, %v2065_v55  ;;  %v1973_v34 = vadd.f32 %v1972_v61, %v12263_v23 }
 0x57a   :  { %10238 = vtanh.f32 %v1971_v19  ;;  %v2096_v10 = vmul.f32 %v10229_v44, %v2065_v55 }
 0x57b   :  { %v12339_v14 = vadd.f32 %v2095_v29, %v1905_v60  ;;  %10240 = vtanh.f32 %v1973_v34  ;;  %v1976_v41 = vpop.f32.mrb[72].mxu1 }
 0x57c   :  { %v10231_v18 = vpop.eup %10230  ;;  %v12343_v53 = vadd.f32 %v2096_v10, %v1907_v26  ;;  %v1977_v46 = vadd.f32 %v1976_v41, %v12281_v22  ;;  %v1978_v56 = vpop.f32.mrb[73].mxu1 }
 0x57d   :  { %v10233_v47 = vpop.eup %10232  ;;  %v2097_v23 = vmul.f32 %v10231_v18, %v12279_v4  ;;  %v1979_v12 = vadd.f32 %v1978_v56, %v12281_v22  ;;  %v1917_v22 = vadd.f32 %v12289_v51, %v12297_v5 }
 0x57e   :  { %v2098_v55 = vmul.f32 %v10233_v47, %v12279_v4  ;;  %10242 = vtanh.f32 %v1977_v46  ;;  %v1919_v47 = vadd.f32 %v12293_v35, %v12297_v5  ;;  %v12364_v4 = vpop.permute.xlu1 %2164 }
 0x57f   :  { %10244 = vtanh.f32 %v1979_v12  ;;  %v1982_v36 = vpop.f32.mrb[74].mxu1  ;;  %v12353_v19 = vadd.f32 %v2097_v23, %v1911_v11 }
 0x580   :  { %v10235_v61 = vpop.eup %10234  ;;  %v1983_v44 = vadd.f32 %v1982_v36, %v12267_v32  ;;  %v1984_v60 = vpop.f32.mrb[75].mxu1  ;;  %v12356_v29 = vadd.f32 %v2098_v55, %v1913_v13 }
 0x581   :  { %v10237_v7 = vpop.eup %10236  ;;  %v2099_v34 = vmul.f32 %v10235_v61, %v12307_v38  ;;  %v1985_v57 = vadd.f32 %v1984_v60, %v12267_v32  ;;  %v1923_v32 = vadd.f32 %v12295_v58, %v12327_v43 }
 0x582   :  { %v2100_v25 = vmul.f32 %v10237_v7, %v12307_v38  ;;  %10246 = vtanh.f32 %v1983_v44  ;;  %v1925_v38 = vadd.f32 %v12299_v37, %v12327_v43  ;;  %v1696_v55 = vpop.permute.xlu1 %1695  ;;  %v1931_v43 = vadd.f32 %v12305_v45, %v12331_v50 }
 0x583   :  { %10248 = vtanh.f32 %v1985_v57  ;;  %v1988_v26 = vpop.f32.mrb[76].mxu1  ;;  %v12367_v10 = vadd.f32 %v2099_v34, %v1917_v22 }
 0x584   :  { %v10239_v41 = vpop.eup %10238  ;;  %v1989_v18 = vadd.f32 %v1988_v26, %v12301_v15  ;;  %v1990_v51 = vpop.f32.mrb[77].mxu1  ;;  %v12370_v46 = vadd.f32 %v2100_v25, %v1919_v47 }
 0x585   :  { %v10241_v56 = vpop.eup %10240  ;;  %v2101_v35 = vmul.f32 %v10239_v41, %v12317_v20  ;;  %v1991_v5 = vadd.f32 %v1990_v51, %v12301_v15  ;;  %v1929_v15 = vadd.f32 %v12303_v1, %v12331_v50 }
 0x586   :  { %v2102_v11 = vmul.f32 %v10241_v56, %v12317_v20  ;;  %10250 = vtanh.f32 %v1989_v18  ;;  %v2089_v25 = vpop.permute.xlu1 %2088 }
 0x587   :  { %10252 = vtanh.f32 %v1991_v5  ;;  %v1994_v23 = vpop.f32.mrb[78].mxu1  ;;  %v12379_v12 = vadd.f32 %v2101_v35, %v1923_v32 }
 0x588   :  { %v10243_v13 = vpop.eup %10242  ;;  %v1995_v36 = vadd.f32 %v1994_v23, %v12271_v2  ;;  %v1996_v61 = vpop.f32.mrb[79].mxu1  ;;  %v12382_v58 = vadd.f32 %v2102_v11, %v1925_v38 }
 0x589   :  { %v10245_v44 = vpop.eup %10244  ;;  %v2103_v37 = vmul.f32 %v10243_v13, %v12335_v62  ;;  %v1997_v20 = vadd.f32 %v1996_v61, %v12271_v2  ;;  %v1935_v2 = vadd.f32 %v12309_v48, %v12329_v6 }
 0x58a   :  { %v2104_v60 = vmul.f32 %v10245_v44, %v12335_v62  ;;  %10254 = vtanh.f32 %v1995_v36  ;;  %v1937_v62 = vadd.f32 %v12313_v3, %v12329_v6  ;;  %v2093_v36 = vpop.permute.xlu1 %2092 }
 0x58b   :  { %10256 = vtanh.f32 %v1997_v20  ;;  %v2000_v7 = vpop.f32.mrb[80].mxu1  ;;  %v12391_v22 = vadd.f32 %v2103_v37, %v1929_v15 }
 0x58c   :  { %v10247_v34 = vpop.eup %10246  ;;  %v2001_v57 = vadd.f32 %v2000_v7, %v12259_v17  ;;  %v2002_v47 = vpop.f32.mrb[81].mxu1  ;;  %v12394_v1 = vadd.f32 %v2104_v60, %v1931_v43  ;;  %v1949_v7 = vadd.f32 %v12323_v49, %v12333_v21 }
 0x58d   :  { %v10249_v26 = vpop.eup %10248  ;;  %v2105_v45 = vmul.f32 %v10247_v34, %v12341_v59  ;;  %v2003_v50 = vadd.f32 %v2002_v47, %v12259_v17  ;;  %v1941_v17 = vadd.f32 %v12315_v52, %v1696_v55 }
 0x58e   :  { %v2106_v41 = vmul.f32 %v10249_v26, %v12341_v59  ;;  %v2111_v18 = vmul.f32 %v2001_v57, %v2001_v57  ;;  %v1943_v59 = vadd.f32 %v12319_v9, %v1696_v55 }
 0x58f   :  { %v2112_v51 = vmul.f32 %v2003_v50, %v2003_v50  ;;  %v2006_v56 = vpop.f32.mrb[82].mxu1  ;;  %v12403_v32 = vadd.f32 %v2105_v45, %v1935_v2 }
 0x590   :  { %v10251_v35 = vpop.eup %10250  ;;  %10258 = vtanh.f32 %v2111_v18  ;;  %v2007_v5 = vadd.f32 %v2006_v56, %v12261_v40  ;;  %v2008_v38 = vpop.f32.mrb[83].mxu1  ;;  %v12406_v48 = vadd.f32 %v2106_v41, %v1937_v62 }
 0x591   :  { %v10253_v11 = vpop.eup %10252  ;;  %10260 = vtanh.f32 %v2112_v51  ;;  %v2009_v3 = vadd.f32 %v2008_v38, %v12261_v40  ;;  %v2107_v6 = vmul.f32 %v10251_v35, %v2089_v25  ;;  %v1947_v40 = vadd.f32 %v12321_v33, %v12333_v21  ;;  %v2149_v51 = vpop.permute.xlu0 %2148 }
 0x592   :  { %v2113_v23 = vmul.f32 %v2007_v5, %v2007_v5  ;;  %v2108_v13 = vmul.f32 %v10253_v11, %v2089_v25 }
 0x593   :  { %v2114_v61 = vmul.f32 %v2009_v3, %v2009_v3  ;;  %v12411_v44 = vadd.f32 %v2107_v6, %v1941_v17  ;;  %v2012_v15 = vpop.f32.mrb[84].mxu1 }
 0x594   :  { %v10255_v37 = vpop.eup %10254  ;;  %10262 = vtanh.f32 %v2113_v23  ;;  %v12413_v20 = vadd.f32 %v2108_v13, %v1943_v59  ;;  %v2013_v43 = vadd.f32 %v2012_v15, %v12277_v39  ;;  %v2014_v52 = vpop.f32.mrb[85].mxu1 }
 0x595   :  { %v10257_v60 = vpop.eup %10256  ;;  %10264 = vtanh.f32 %v2114_v61  ;;  %v2015_v9 = vadd.f32 %v2014_v52, %v12277_v39  ;;  %v2109_v55 = vmul.f32 %v10255_v37, %v2093_v36  ;;  %v2153_v52 = vpop.permute.xlu0 %2152 }
 0x596   :  { %v2115_v34 = vmul.f32 %v2013_v43, %v2013_v43  ;;  %v2110_v57 = vmul.f32 %v10257_v60, %v2093_v36 }
 0x597   :  { %v2116_v47 = vmul.f32 %v2015_v9, %v2015_v9  ;;  %v12421_v25 = vadd.f32 %v2109_v55, %v1947_v40  ;;  %v2018_v26 = vpop.f32.mrb[86].mxu1 }
 0x598   :  { %10266 = vtanh.f32 %v2115_v34  ;;  %v12423_v2 = vadd.f32 %v2110_v57, %v1949_v7  ;;  %v2019_v45 = vadd.f32 %v2018_v26, %v12265_v31  ;;  %v2020_v50 = vpop.f32.mrb[87].mxu1 }
 0x599   :  { %10268 = vtanh.f32 %v2116_v47  ;;  %v2021_v33 = vadd.f32 %v2020_v50, %v12265_v31 }
 0x59a   :  { %v10259_v39 = vpop.eup %10258  ;;  %v2117_v62 = vmul.f32 %v2019_v45, %v2019_v45 }
 0x59b   :  { %v10261_v41 = vpop.eup %10260  ;;  %v2118_v18 = vmul.f32 %v2021_v33, %v2021_v33  ;;  %v2024_v49 = vpop.f32.mrb[88].mxu1  ;;  %v2175_v21 = vmul.f32 %v10259_v39, %v12287_v42 }
 0x59c   :  { %10270 = vtanh.f32 %v2117_v62  ;;  %v2025_v56 = vadd.f32 %v2024_v49, %v12291_v63  ;;  %v2026_v35 = vpop.f32.mrb[89].mxu1  ;;  %v2176_v5 = vmul.f32 %v10261_v41, %v12287_v42 }
 0x59d   :  { %10272 = vtanh.f32 %v2118_v18  ;;  %v2027_v38 = vadd.f32 %v2026_v35, %v12291_v63  ;;  %v12432_v11 = vadd.f32 %v12339_v14, %v2175_v21 }
 0x59e   :  { %v10263_v31 = vpop.eup %10262  ;;  %v2119_v17 = vmul.f32 %v2025_v56, %v2025_v56  ;;  %v12435_v3 = vadd.f32 %v12343_v53, %v2176_v5 }
 0x59f   :  { %v10265_v6 = vpop.eup %10264  ;;  %v2120_v59 = vmul.f32 %v2027_v38, %v2027_v38  ;;  %v2030_v23 = vpop.f32.mrb[90].mxu1  ;;  %v2255_v13 = vmul.f32 %v12432_v11, %v12432_v11  ;;  %v2177_v36 = vmul.f32 %v10263_v31, %v2149_v51 }
 0x5a0   :  { %10274 = vtanh.f32 %v2119_v17  ;;  %v2031_v42 = vadd.f32 %v2030_v23, %v12269_v27  ;;  %v2032_v61 = vpop.f32.mrb[91].mxu1  ;;  %v2223_v63 = vadd.f32 %v12435_v3, %v12432_v11  ;;  %v2256_v14 = vmul.f32 %v12435_v3, %v12435_v3  ;;  %v2161_v17 = vpop.permute.xlu0 %2160 }
 0x5a1   :  { %10276 = vtanh.f32 %v2120_v59  ;;  %v2033_v53 = vadd.f32 %v2032_v61, %v12269_v27  ;;  %v2178_v15 = vmul.f32 %v10265_v6, %v2149_v51  ;;  %v12446_v37 = vadd.f32 %v12353_v19, %v2177_v36 }
 0x5a2   :  { %v10267_v43 = vpop.eup %10266  ;;  %v2121_v60 = vmul.f32 %v2031_v42, %v2031_v42  ;;  %2224 = vadd.xlane.f32.xlu1 %v2223_v63  ;;  %v2271_v40 = vadd.f32 %v2256_v14, %v2255_v13 }
 0x5a3   :  { %v10269_v9 = vpop.eup %10268  ;;  %v2122_v55 = vmul.f32 %v2033_v53, %v2033_v53  ;;  %v2036_v7 = vpop.f32.mrb[92].mxu1  ;;  %v12449_v34 = vadd.f32 %v12356_v29, %v2178_v15  ;;  %v2257_v57 = vmul.f32 %v12446_v37, %v12446_v37  ;;  %v2179_v47 = vmul.f32 %v10267_v43, %v2153_v52 }
 0x5a4   :  { %10278 = vtanh.f32 %v2121_v60  ;;  %v2037_v27 = vadd.f32 %v2036_v7, %v12311_v28  ;;  %v2038_v19 = vpop.f32.mrb[93].mxu1  ;;  %2272 = vadd.xlane.f32.xlu0 %v2271_v40  ;;  %v2180_v26 = vmul.f32 %v10269_v9, %v2153_v52  ;;  %v2169_v7 = vpop.permute.xlu0 %2168 }
 0x5a5   :  { %10280 = vtanh.f32 %v2122_v55  ;;  %v2039_v45 = vadd.f32 %v2038_v19, %v12311_v28  ;;  %v2258_v50 = vmul.f32 %v12449_v34, %v12449_v34  ;;  %v2226_v29 = vadd.f32 %v12449_v34, %v12446_v37 }
 0x5a6   :  { %v10271_v33 = vpop.eup %10270  ;;  %v2123_v39 = vmul.f32 %v2037_v27, %v2037_v27  ;;  %v12460_v62 = vadd.f32 %v12367_v10, %v2179_v47  ;;  %v12463_v41 = vadd.f32 %v12370_v46, %v2180_v26 }
 0x5a7   :  { %v10273_v18 = vpop.eup %10272  ;;  %v2124_v49 = vmul.f32 %v2039_v45, %v2039_v45  ;;  %v2042_v21 = vpop.f32.mrb[94].mxu1  ;;  %v2274_v51 = vadd.f32 %v2258_v50, %v2257_v57  ;;  %v2181_v28 = vmul.f32 %v10271_v33, %v12325_v54 }
 0x5a8   :  { %10282 = vtanh.f32 %v2123_v39  ;;  %v2043_v56 = vadd.f32 %v2042_v21, %v12273_v0  ;;  %v2044_v35 = vpop.f32.mrb[95].mxu1  ;;  %2227 = vadd.xlane.f32.xlu0 %v2226_v29  ;;  %v2182_v5 = vmul.f32 %v10273_v18, %v12325_v54  ;;  %v2229_v46 = vadd.f32 %v12463_v41, %v12460_v62  ;;  %v2173_v33 = vpop.permute.xlu1 %2172 }
 0x5a9   :  { %10284 = vtanh.f32 %v2124_v49  ;;  %v2045_v10 = vadd.f32 %v2044_v35, %v12273_v0  ;;  %2275 = vadd.xlane.f32.xlu1 %v2274_v51  ;;  %v12472_v38 = vadd.f32 %v12379_v12, %v2181_v28  ;;  %v2259_v23 = vmul.f32 %v12460_v62, %v12460_v62 }
 0x5aa   :  { %v10275_v31 = vpop.eup %10274  ;;  %v2125_v6 = vmul.f32 %v2043_v56, %v2043_v56  ;;  %v12475_v59 = vadd.f32 %v12382_v58, %v2182_v5  ;;  %v2260_v54 = vmul.f32 %v12463_v41, %v12463_v41 }
 0x5ab   :  { %v10277_v0 = vpop.eup %10276  ;;  %v2126_v13 = vmul.f32 %v2045_v10, %v2045_v10  ;;  %v2183_v36 = vmul.f32 %v10275_v31, %v2161_v17  ;;  %v2261_v42 = vmul.f32 %v12472_v38, %v12472_v38 }
 0x5ac   :  { %10286 = vtanh.f32 %v2125_v6  ;;  %2230 = vadd.xlane.f32.xlu0 %v2229_v46  ;;  %v2232_v12 = vadd.f32 %v12475_v59, %v12472_v38  ;;  %v2262_v58 = vmul.f32 %v12475_v59, %v12475_v59  ;;  %v2184_v61 = vmul.f32 %v10277_v0, %v2161_v17 }
 0x5ad   :  { %10288 = vtanh.f32 %v2126_v13  ;;  %v12488_v63 = vadd.f32 %v12391_v22, %v2183_v36  ;;  %v2277_v53 = vadd.f32 %v2260_v54, %v2259_v23 }
 0x5ae   :  { %v10279_v14 = vpop.eup %10278  ;;  %2233 = vadd.xlane.f32.xlu1 %v2232_v12  ;;  %v12491_v43 = vadd.f32 %v12394_v1, %v2184_v61  ;;  %v2280_v60 = vadd.f32 %v2262_v58, %v2261_v42 }
 0x5af   :  { %v10281_v15 = vpop.eup %10280  ;;  %v2185_v52 = vmul.f32 %v10279_v14, %v12364_v4  ;;  %v2263_v1 = vmul.f32 %v12488_v63, %v12488_v63 }
 0x5b0   :  { %2278 = vadd.xlane.f32.xlu0 %v2277_v53  ;;  %v2186_v40 = vmul.f32 %v10281_v15, %v12364_v4  ;;  %v2235_v22 = vadd.f32 %v12491_v43, %v12488_v63  ;;  %v2264_v47 = vmul.f32 %v12491_v43, %v12491_v43 }
 0x5b1   :  { %v12496_v9 = vadd.f32 %v12403_v32, %v2185_v52 }
 0x5b2   :  { %v10283_v55 = vpop.eup %10282  ;;  %2281 = vadd.xlane.f32.xlu1 %v2280_v60  ;;  %v12501_v57 = vadd.f32 %v12406_v48, %v2186_v40  ;;  %v2283_v39 = vadd.f32 %v2264_v47, %v2263_v1 }
 0x5b3   :  { %v10285_v27 = vpop.eup %10284  ;;  %v2187_v4 = vmul.f32 %v10283_v55, %v2169_v7  ;;  %v2265_v19 = vmul.f32 %v12496_v9, %v12496_v9 }
 0x5b4   :  { %2236 = vadd.xlane.f32.xlu0 %v2235_v22  ;;  %v2238_v32 = vadd.f32 %v12501_v57, %v12496_v9  ;;  %v2266_v26 = vmul.f32 %v12501_v57, %v12501_v57  ;;  %v2188_v48 = vmul.f32 %v10285_v27, %v2169_v7 }
 0x5b5   :  { %v12514_v45 = vadd.f32 %v12411_v44, %v2187_v4 }
 0x5b6   :  { %v10287_v50 = vpop.eup %10286  ;;  %2239 = vadd.xlane.f32.xlu1 %v2238_v32  ;;  %v12517_v29 = vadd.f32 %v12413_v20, %v2188_v48  ;;  %v2286_v51 = vadd.f32 %v2266_v26, %v2265_v19 }
 0x5b7   :  { %v10289_v18 = vpop.eup %10288  ;;  %v2189_v49 = vmul.f32 %v10287_v50, %v2173_v33  ;;  %v2267_v35 = vmul.f32 %v12514_v45, %v12514_v45 }
 0x5b8   :  { %v2190_v21 = vmul.f32 %v10289_v18, %v2173_v33  ;;  %2284 = vadd.xlane.f32.xlu0 %v2283_v39  ;;  %v2241_v44 = vadd.f32 %v12517_v29, %v12514_v45  ;;  %v2268_v20 = vmul.f32 %v12517_v29, %v12517_v29  ;;  %v12540_v39 = vld [vmem:[%s15975_s7] sm:$0xff] }
 0x5b9   :  { %v12520_v28 = vadd.f32 %v12421_v25, %v2189_v49 }
 0x5ba   :  { %v12523_v56 = vadd.f32 %v12423_v2, %v2190_v21  ;;  %2287 = vadd.xlane.f32.xlu1 %v2286_v51  ;;  %v2289_v10 = vadd.f32 %v2268_v20, %v2267_v35 }
 0x5bb   :  { %v2269_v25 = vmul.f32 %v12520_v28, %v12520_v28 }
 0x5bc   :  { %2242 = vadd.xlane.f32.xlu0 %v2241_v44  ;;  %v2244_v5 = vadd.f32 %v12523_v56, %v12520_v28  ;;  %v2270_v2 = vmul.f32 %v12523_v56, %v12523_v56 }
 0x5be   :  { %2245 = vadd.xlane.f32.xlu1 %v2244_v5  ;;  %v2292_v46 = vadd.f32 %v2270_v2, %v2269_v25 }
 0x5c0   :  { %2290 = vadd.xlane.f32.xlu0 %v2289_v10 }
 0x5c2   :  { %2293 = vadd.xlane.f32.xlu1 %v2292_v46 }
 0x62f   :  { %v2225_v31 = vpop.xlane.xlu1 %2224 }
 0x630   :  { %v2247_v17 = vmul.f32 0.00390625, %v2225_v31 }
 0x631   :  { %v2273_v6 = vpop.xlane.xlu0 %2272 }
 0x632   :  { %v2303_v23 = vmul.f32 %v2247_v17, %v2247_v17  ;;  %v2295_v54 = vmul.f32 0.00390625, %v2273_v6  ;;  %v12550_v6 = vld [vmem:[%s15975_s7 + $0x8] sm:$0xff] }
 0x634   :  { %v2311_v0 = vsub.f32 %v2295_v54, %v2303_v23 }
 0x635   :  { %v2228_v13 = vpop.xlane.xlu0 %2227 }
 0x636   :  { %v2319_v36 = vadd.f32 1e-05, %v2311_v0  ;;  %v2248_v12 = vmul.f32 0.00390625, %v2228_v13  ;;  %v2276_v42 = vpop.xlane.xlu1 %2275 }
 0x637   :  { %v2296_v61 = vmul.f32 0.00390625, %v2276_v42 }
 0x638   :  { %10290 = vrsqrt.f32 %v2319_v36  ;;  %v2304_v58 = vmul.f32 %v2248_v12, %v2248_v12 }
 0x639   :  { %v2231_v14 = vpop.xlane.xlu0 %2230 }
 0x63a   :  { %v2312_v53 = vsub.f32 %v2296_v61, %v2304_v58  ;;  %v2249_v15 = vmul.f32 0.00390625, %v2231_v14 }
 0x63b   :  { %v2234_v52 = vpop.xlane.xlu1 %2233 }
 0x63c   :  { %v2320_v60 = vadd.f32 1e-05, %v2312_v53  ;;  %v2250_v40 = vmul.f32 0.00390625, %v2234_v52  ;;  %v2305_v7 = vmul.f32 %v2249_v15, %v2249_v15 }
 0x63d   :  { %v2279_v55 = vpop.xlane.xlu0 %2278 }
 0x63e   :  { %10292 = vrsqrt.f32 %v2320_v60  ;;  %v2297_v22 = vmul.f32 0.00390625, %v2279_v55  ;;  %v2306_v47 = vmul.f32 %v2250_v40, %v2250_v40  ;;  %v12557_v55 = vld [vmem:[%s15975_s7 + $0x10] sm:$0xff] }
 0x63f   :  { %v2282_v1 = vpop.xlane.xlu1 %2281 }
 0x640   :  { %v2313_v27 = vsub.f32 %v2297_v22, %v2305_v7  ;;  %v2298_v4 = vmul.f32 0.00390625, %v2282_v1 }
 0x641   :  { %v2237_v32 = vpop.xlane.xlu0 %2236 }
 0x642   :  { %v10291_v19 = vpop.eup %10290  ;;  %v2321_v26 = vadd.f32 1e-05, %v2313_v27  ;;  %v2314_v48 = vsub.f32 %v2298_v4, %v2306_v47  ;;  %v2251_v50 = vmul.f32 0.00390625, %v2237_v32  ;;  %v12563_v4 = vld [vmem:[%s15975_s7 + $0x18] sm:$0xff] }
 0x643   :  { %v2240_v33 = vpop.xlane.xlu1 %2239  ;;  %v12543_v18 = vmul.f32 %v12540_v39, %v10291_v19 }
 0x644   :  { %10294 = vrsqrt.f32 %v2321_v26  ;;  %v2322_v49 = vadd.f32 1e-05, %v2314_v48  ;;  %v2252_v21 = vmul.f32 0.00390625, %v2240_v33  ;;  %v2307_v35 = vmul.f32 %v2251_v50, %v2251_v50 }
 0x645   :  { %v2285_v51 = vpop.xlane.xlu0 %2284  ;;  %v2343_v44 = vmul.f32 %v12543_v18, %v2247_v17 }
 0x646   :  { %10296 = vrsqrt.f32 %v2322_v49  ;;  %v2299_v20 = vmul.f32 0.00390625, %v2285_v51  ;;  %v2308_v2 = vmul.f32 %v2252_v21, %v2252_v21 }
 0x647   :  { %2359 = vrot.lane.b32.xlu0 %v2343_v44, %s10760_s25  ;;  %v2288_v5 = vpop.xlane.xlu1 %2287 }
 0x648   :  { %v10293_v25 = vpop.eup %10292  ;;  %v2315_v10 = vsub.f32 %v2299_v20, %v2307_v35  ;;  %v2300_v46 = vmul.f32 0.00390625, %v2288_v5  ;;  %v12577_v20 = vld [vmem:[%s15975_s7 + $0x28] sm:$0xff] }
 0x649   :  { %v2243_v31 = vpop.xlane.xlu0 %2242  ;;  %v2336_v23 = vmul.f32 %v12550_v6, %v10293_v25 }
 0x64a   :  { %v2323_v54 = vadd.f32 1e-05, %v2315_v10  ;;  %v2316_v17 = vsub.f32 %v2300_v46, %v2308_v2  ;;  %v2253_v0 = vmul.f32 0.00390625, %v2243_v31  ;;  %v12585_v2 = vld [vmem:[%s15975_s7 + $0x30] sm:$0xff]  ;;  %v12591_v31 = vld [vmem:[%s15975_s7 + $0x38] sm:$0xff] }
 0x64b   :  { %v2246_v13 = vpop.xlane.xlu1 %2245  ;;  %v2344_v36 = vmul.f32 %v2336_v23, %v2248_v12 }
 0x64c   :  { %10298 = vrsqrt.f32 %v2323_v54  ;;  %v2324_v42 = vadd.f32 1e-05, %v2316_v17  ;;  %v2254_v58 = vmul.f32 0.00390625, %v2246_v13  ;;  %v2309_v53 = vmul.f32 %v2253_v0, %v2253_v0 }
 0x64d   :  { %v2291_v61 = vpop.xlane.xlu0 %2290  ;;  %2361 = vrot.lane.b32.xlu1 %v2344_v36, %s10760_s25 }
 0x64e   :  { %v10295_v14 = vpop.eup %10294  ;;  %10300 = vrsqrt.f32 %v2324_v42  ;;  %v2301_v52 = vmul.f32 0.00390625, %v2291_v61  ;;  %v2310_v12 = vmul.f32 %v2254_v58, %v2254_v58 }
 0x64f   :  { %v2294_v60 = vpop.xlane.xlu1 %2293  ;;  %v2337_v7 = vmul.f32 %v12557_v55, %v10295_v14 }
 0x650   :  { %v10297_v22 = vpop.eup %10296  ;;  %v2317_v1 = vsub.f32 %v2301_v52, %v2309_v53  ;;  %v2302_v47 = vmul.f32 0.00390625, %v2294_v60 }
 0x651   :  { %v2345_v27 = vmul.f32 %v2337_v7, %v2249_v15  ;;  %v2338_v32 = vmul.f32 %v12563_v4, %v10297_v22  ;;  %v12571_v15 = vld [vmem:[%s15975_s7 + $0x20] sm:$0xff] }
 0x652   :  { %v2325_v19 = vadd.f32 1e-05, %v2317_v1  ;;  %v2318_v26 = vsub.f32 %v2302_v47, %v2310_v12  ;;  %v10764_v1 = vmov 3   ;;  %v10642_v47 = vld [vmem:[%s15975_s7 + $0x40] sm:$0xff] }
 0x653   :  { %2363 = vrot.lane.b32.xlu1 %v2345_v27, %s10760_s25  ;;  %v2346_v48 = vmul.f32 %v2338_v32, %v2250_v40  ;;  %v10643_v27 = vld [vmem:[%s15975_s7 + $0x48] sm:$0xff] }
 0x654   :  { %10302 = vrsqrt.f32 %v2325_v19  ;;  %v2326_v33 = vadd.f32 1e-05, %v2318_v26  ;;  %v10645_v19 = vld [vmem:[%s15975_s7 + $0x50] sm:$0xff]  ;;  %v10646_v26 = vld [vmem:[%s15975_s7 + $0x88] sm:$0xff] }
 0x655   :  { %2365 = vrot.lane.b32.xlu0 %v2346_v48, %s10760_s25  ;;  %v10647_v48 = vld [vmem:[%s15975_s7 + $0x90] sm:$0xff] }
 0x656   :  { %v10299_v49 = vpop.eup %10298  ;;  %10304 = vrsqrt.f32 %v2326_v33  ;;  %v10648_v33 = vld [vmem:[%s15975_s7 + $0x58] sm:$0xff] }
 0x657   :  { %v2339_v51 = vmul.f32 %v12571_v15, %v10299_v49  ;;  %v10649_v49 = vld [vmem:[%s15975_s7 + $0x60] sm:$0xff] }
 0x658   :  { %v10301_v44 = vpop.eup %10300 }
 0x659   :  { %v2347_v35 = vmul.f32 %v2339_v51, %v2251_v50  ;;  %v2340_v40 = vmul.f32 %v12577_v20, %v10301_v44  ;;  %v10651_v44 = vld [vmem:[%s15975_s7 + $0xa0] sm:$0xff] }
 0x65b   :  { %2367 = vrot.lane.b32.xlu1 %v2347_v35, %s10760_s25  ;;  %v2348_v5 = vmul.f32 %v2340_v40, %v2252_v21  ;;  %v10652_v35 = vld [vmem:[%s15975_s7 + $0x68] sm:$0xff] }
 0x65d   :  { %2369 = vrot.lane.b32.xlu0 %v2348_v5, %s10760_s25  ;;  %v10654_v5 = vld [vmem:[%s15975_s7 + $0xa8] sm:$0xff] }
 0x65e   :  { %v10303_v25 = vpop.eup %10302 }
 0x65f   :  { %v2341_v50 = vmul.f32 %v12585_v2, %v10303_v25  ;;  %v10655_v25 = vld [vmem:[%s15975_s7 + $0xb0] sm:$0xff] }
 0x660   :  { %v10305_v10 = vpop.eup %10304 }
 0x661   :  { %v2349_v46 = vmul.f32 %v2341_v50, %v2253_v0  ;;  %v2342_v54 = vmul.f32 %v12591_v31, %v10305_v10  ;;  %v12668_v10 = vld [vmem:[%s15975_s7 + $0xb8] sm:$0xff] }
 0x663   :  { %2371 = vrot.lane.b32.xlu1 %v2349_v46, %s10760_s25  ;;  %v2350_v21 = vmul.f32 %v2342_v54, %v2254_v58  ;;  %v10765_v46 = vmov 10  }
 0x665   :  { %2373 = vrot.lane.b32.xlu0 %v2350_v21, %s10760_s25 }
 0x667   :  { %2393 = vperm.xlu1 %9999, %v12543_v18  }
 0x669   :  { %2398 = vperm.xlu0 %10000, %v2336_v23  }
 0x66b   :  { %2408 = vperm.xlu1 %9999, %v2338_v32   ;;  %v10644_v32 = vld [vmem:[%s15975_s7 + $0x80] sm:$0xff] }
 0x66d   :  { %2403 = vperm.xlu0 %10000, %v2337_v7  }
 0x66f   :  { %2413 = vperm.xlu1 %9999, %v2339_v51   ;;  %v10650_v51 = vld [vmem:[%s15975_s7 + $0x98] sm:$0xff] }
 0x671   :  { %2418 = vperm.xlu0 %10000, %v2340_v40   ;;  %v12649_v40 = vld [vmem:[%s15975_s7 + $0x70] sm:$0xff] }
 0x673   :  { %10001 = vset.pattern.permute.xlu1 %v10761_v30 }
 0x675   :  { %10002 = vset.pattern.permute.xlu0 %v10761_v30 }
 0x6b9   :  { %v2360_v17 = vpop.permute.xlu0 %2359 }
 0x6ba   :  { %v2383_v0 = vsub.f32 %v12540_v39, %v2360_v17 }
 0x6bc   :  { %2449 = vperm.xlu1 %10001, %v2383_v0  }
 0x6bf   :  { %v2362_v13 = vpop.permute.xlu1 %2361 }
 0x6c0   :  { %v2384_v36 = vsub.f32 %v12550_v6, %v2362_v13 }
 0x6c2   :  { %2454 = vperm.xlu1 %10001, %v2384_v36  }
 0x6c5   :  { %v2364_v42 = vpop.permute.xlu1 %2363 }
 0x6c6   :  { %v2385_v18 = vsub.f32 %v12557_v55, %v2364_v42  ;;  %10004 = vset.pattern.permute.xlu1 %v10759_v8 }
 0x6c7   :  { %v2366_v23 = vpop.permute.xlu0 %2365  ;;  %2428 = vperm.xlu1 %10004, %v2342_v54  }
 0x6c8   :  { %2459 = vperm.xlu0 %10002, %v2385_v18   ;;  %v2386_v58 = vsub.f32 %v12563_v4, %v2366_v23 }
 0x6cb   :  { %10005 = vset.pattern.permute.xlu1 %v10761_v30 }
 0x6cc   :  { %2464 = vperm.xlu1 %10005, %v2386_v58   ;;  %10003 = vset.pattern.permute.xlu0 %v10759_v8 }
 0x6cd   :  { %2423 = vperm.xlu0 %10003, %v2341_v50   ;;  %v2368_v61 = vpop.permute.xlu1 %2367  ;;  %v12661_v50 = vld [vmem:[%s15975_s7 + $0x78] sm:$0xff] }
 0x6ce   :  { %v2387_v14 = vsub.f32 %v12571_v15, %v2368_v61 }
 0x6cf   :  { %v2370_v53 = vpop.permute.xlu0 %2369 }
 0x6d0   :  { %2469 = vperm.xlu1 %10005, %v2387_v14   ;;  %v2388_v52 = vsub.f32 %v12577_v20, %v2370_v53 }
 0x6d1   :  { %10006 = vset.pattern.permute.xlu0 %v10761_v30 }
 0x6d4   :  { %2474 = vperm.xlu1 %10005, %v2388_v52  }
 0x6d5   :  { %v2372_v60 = vpop.permute.xlu1 %2371 }
 0x6d6   :  { %v2389_v7 = vsub.f32 %v12585_v2, %v2372_v60 }
 0x6d7   :  { %v2374_v22 = vpop.permute.xlu0 %2373 }
 0x6d8   :  { %v2390_v12 = vsub.f32 %v12591_v31, %v2374_v22  ;;  %2479 = vperm.xlu0 %10006, %v2389_v7  }
 0x6da   :  { %2484 = vperm.xlu1 %10005, %v2390_v12  }
 0x6dc   :  { %10008 = vset.pattern.permute.xlu0 %v10764_v1 }
 0x6dd   :  { %2565 = vperm.xlu0 %10008, %v10643_v27  }
 0x6de   :  { %10007 = vset.pattern.permute.xlu1 %v10764_v1 }
 0x6df   :  { %2561 = vperm.xlu1 %10007, %v10642_v47  }
 0x6e1   :  { %2569 = vperm.xlu0 %10008, %v10645_v19  }
 0x6e3   :  { %2593 = vperm.xlu1 %10007, %v10644_v32  }
 0x6e5   :  { %2601 = vperm.xlu0 %10008, %v10647_v48  }
 0x6e7   :  { %2597 = vperm.xlu1 %10007, %v10646_v26  }
 0x6e9   :  { %2577 = vperm.xlu0 %10008, %v10649_v49  }
 0x6eb   :  { %2573 = vperm.xlu1 %10007, %v10648_v33  }
 0x6ed   :  { %2609 = vperm.xlu0 %10008, %v10651_v44  }
 0x6ef   :  { %2605 = vperm.xlu1 %10007, %v10650_v51  }
 0x6f1   :  { %2585 = vperm.xlu0 %10008, %v12649_v40  }
 0x6f3   :  { %2581 = vperm.xlu1 %10007, %v10652_v35  }
 0x6f5   :  { %2617 = vperm.xlu0 %10008, %v10655_v25  }
 0x6f7   :  { %2613 = vperm.xlu1 %10007, %v10654_v5  }
 0x6f9   :  { %2529 = vperm.xlu0 %10008, %v12540_v39   ;;  %v2394_v39 = vpop.permute.xlu1 %2393 }
 0x6fa   :  { %v2431_v54 = vmul.f32 %v2394_v39, %v12432_v11  ;;  %v2432_v21 = vmul.f32 %v2394_v39, %v12435_v3 }
 0x6fb   :  { %2589 = vperm.xlu1 %10007, %v12661_v50  }
 0x6fd   :  { %2541 = vperm.xlu0 %10008, %v12563_v4   ;;  %v2399_v4 = vpop.permute.xlu0 %2398 }
 0x6fe   :  { %v2433_v17 = vmul.f32 %v2399_v4, %v12446_v37  ;;  %v2434_v0 = vmul.f32 %v2399_v4, %v12449_v34  ;;  %v8825_v4 = vld [vmem:[%s15971_s3 + $0x1b0] sm:$0xff] }
 0x6ff   :  { %2621 = vperm.xlu1 %10007, %v12668_v10  }
 0x701   :  { %2549 = vperm.xlu0 %10008, %v12577_v20  }
 0x703   :  { %2533 = vperm.xlu1 %10007, %v12550_v6   ;;  %v2409_v6 = vpop.permute.xlu1 %2408 }
 0x704   :  { %v2437_v37 = vmul.f32 %v2409_v6, %v12472_v38  ;;  %v2438_v34 = vmul.f32 %v2409_v6, %v12475_v59 }
 0x705   :  { %2557 = vperm.xlu0 %10008, %v12591_v31  }
 0x707   :  { %10009 = vset.pattern.permute.xlu1 %v10765_v46  ;;  %v2414_v20 = vpop.permute.xlu1 %2413 }
 0x708   :  { %2926 = vperm.xlu1 %10009, %v10643_v27   ;;  %v2439_v38 = vmul.f32 %v2414_v20, %v12488_v63 }
 0x709   :  { %10015 = vset.pattern.permute.xlu0 %v10765_v46 }
 0x70a   :  { %2922 = vperm.xlu0 %10015, %v10642_v47  }
 0x70c   :  { %3002 = vperm.xlu1 %10009, %v10644_v32  }
 0x70e   :  { %3006 = vperm.xlu0 %10015, %v10646_v26  }
 0x710   :  { %10010 = vset.pattern.permute.xlu1 %v10764_v1 }
 0x711   :  { %2537 = vperm.xlu1 %10010, %v12557_v55   ;;  %v2404_v55 = vpop.permute.xlu0 %2403 }
 0x712   :  { %3010 = vperm.xlu0 %10015, %v10647_v48   ;;  %v2435_v14 = vmul.f32 %v2404_v55, %v12460_v62  ;;  %v2436_v53 = vmul.f32 %v2404_v55, %v12463_v41  ;;  %v2440_v62 = vmul.f32 %v2414_v20, %v12491_v43  ;;  %v8826_v20 = vld [vmem:[%s15971_s3 + $0x1b8] sm:$0xff]  ;;  %v8828_v55 = vld [vmem:[%s15971_s3 + $0x1c8] sm:$0xff] }
 0x715   :  { %10011 = vset.pattern.permute.xlu1 %v10765_v46  ;;  %v2419_v61 = vpop.permute.xlu0 %2418 }
 0x716   :  { %2930 = vperm.xlu1 %10011, %v10645_v19   ;;  %3018 = vperm.xlu0 %10015, %v10651_v44   ;;  %v2441_v41 = vmul.f32 %v2419_v61, %v12496_v9  ;;  %v2442_v59 = vmul.f32 %v2419_v61, %v12501_v57  ;;  %v8840_v61 = vld [vmem:[%s15971_s3 + $0x228] sm:$0xff] }
 0x71a   :  { %2934 = vperm.xlu1 %10011, %v10648_v33   ;;  %3026 = vperm.xlu0 %10015, %v10655_v25  }
 0x71e   :  { %3014 = vperm.xlu1 %10011, %v10650_v51   ;;  %10018 = vset.pattern.permute.xlu0 %v10759_v8 }
 0x722   :  { %10012 = vset.pattern.permute.xlu1 %v10764_v1 }
 0x723   :  { %2545 = vperm.xlu1 %10012, %v12571_v15  }
 0x727   :  { %10013 = vset.pattern.permute.xlu1 %v10765_v46 }
 0x728   :  { %2938 = vperm.xlu1 %10013, %v10649_v49  }
 0x72c   :  { %2942 = vperm.xlu1 %10013, %v10652_v35  }
 0x730   :  { %3022 = vperm.xlu1 %10013, %v10654_v5  }
 0x734   :  { %10014 = vset.pattern.permute.xlu1 %v10764_v1 }
 0x735   :  { %2553 = vperm.xlu1 %10014, %v12585_v2  }
 0x739   :  { %10016 = vset.pattern.permute.xlu1 %v10765_v46 }
 0x73a   :  { %2946 = vperm.xlu1 %10016, %v12649_v40  }
 0x73b   :  { %v2450_v31 = vpop.permute.xlu1 %2449 }
 0x73c   :  { %v2487_v36 = vadd.f32 %v2450_v31, %v2431_v54  ;;  %v2488_v42 = vadd.f32 %v2450_v31, %v2432_v21  ;;  %v8827_v31 = vld [vmem:[%s15971_s3 + $0x1c0] sm:$0xff]  ;;  %v8829_v54 = vld [vmem:[%s15971_s3 + $0x1d0] sm:$0xff]  ;;  %v8830_v21 = vld [vmem:[%s15971_s3 + $0x1d8] sm:$0xff] }
 0x73e   :  { %2950 = vperm.xlu1 %10016, %v12661_v50   ;;  %v8823_v50 = vld [vmem:[%s15971_s3 + $0x1a0] sm:$0xff] }
 0x741   :  { %v2455_v13 = vpop.permute.xlu1 %2454 }
 0x742   :  { %v2489_v18 = vadd.f32 %v2455_v13, %v2433_v17  ;;  %v2490_v23 = vadd.f32 %v2455_v13, %v2434_v0  ;;  %3030 = vperm.xlu1 %10016, %v12668_v10   ;;  %v8824_v10 = vld [vmem:[%s15971_s3 + $0x1a8] sm:$0xff]  ;;  %v8831_v17 = vld [vmem:[%s15971_s3 + $0x1e0] sm:$0xff]  ;;  %v8833_v13 = vld [vmem:[%s15971_s3 + $0x1f0] sm:$0xff] }
 0x743   :  { %v8832_v0 = vld [vmem:[%s15971_s3 + $0x1e8] sm:$0xff] }
 0x744   :  { %v9490_v58 = vpack.c.bf16 %v2489_v18, %v2487_v36  ;;  %v9488_v15 = vpack.c.bf16 %v2490_v23, %v2488_v42  ;;  %v8834_v36 = vld [vmem:[%s15971_s3 + $0x1f8] sm:$0xff]  ;;  %v8835_v42 = vld [vmem:[%s15971_s3 + $0x200] sm:$0xff]  ;;  %v8836_v18 = vld [vmem:[%s15971_s3 + $0x208] sm:$0xff] }
 0x745   :  { %v8837_v23 = vld [vmem:[%s15971_s3 + $0x210] sm:$0xff] }
 0x746   :  { %9489 = vmatprep.subr.bf16.mxu0 %v9488_v15  ;;  %v2429_v11 = vpop.permute.xlu1 %2428  ;;  %10017 = vset.pattern.permute.xlu1 %v10759_v8  ;;  %v8839_v15 = vld [vmem:[%s15971_s3 + $0x220] sm:$0xff] }
 0x747   :  { %9491 = vmatpush1.bf16.msra.mxu0 %v9490_v58  ;;  %v2460_v3 = vpop.permute.xlu0 %2459  ;;  %v2445_v63 = vmul.f32 %v2429_v11, %v12520_v28  ;;  %v2446_v43 = vmul.f32 %v2429_v11, %v12523_v56  ;;  %v8819_v28 = vld [vmem:[%s15971_s3 + $0x180] sm:$0xff]  ;;  %v8822_v56 = vld [vmem:[%s15971_s3 + $0x198] sm:$0xff]  ;;  %v8841_v11 = vld [vmem:[%s15971_s3 + $0x230] sm:$0xff] }
 0x748   :  { %v2491_v60 = vadd.f32 %v2460_v3, %v2435_v14  ;;  %v2492_v7 = vadd.f32 %v2460_v3, %v2436_v53  ;;  %v8838_v58 = vld [vmem:[%s15971_s3 + $0x218] sm:$0xff] }
 0x749   :  { %v8842_v3 = vld [vmem:[%s15971_s3 + $0x238] sm:$0xff] }
 0x74b   :  { %v2465_v52 = vpop.permute.xlu1 %2464 }
 0x74c   :  { %v2493_v22 = vadd.f32 %v2465_v52, %v2437_v37  ;;  %v2494_v12 = vadd.f32 %v2465_v52, %v2438_v34  ;;  %v2424_v19 = vpop.permute.xlu0 %2423 }
 0x74d   :  { %v2443_v9 = vmul.f32 %v2424_v19, %v12514_v45  ;;  %v2444_v57 = vmul.f32 %v2424_v19, %v12517_v29  ;;  %v8820_v45 = vld [vmem:[%s15971_s3 + $0x188] sm:$0xff]  ;;  %v8821_v29 = vld [vmem:[%s15971_s3 + $0x190] sm:$0xff] }
 0x74e   :  { %v9494_v47 = vpack.c.bf16 %v2493_v22, %v2491_v60  ;;  %v9492_v27 = vpack.c.bf16 %v2494_v12, %v2492_v7 }
 0x74f   :  { %v2470_v32 = vpop.permute.xlu1 %2469 }
 0x750   :  { %9493 = vmatprep.subr.bf16.mxu0 %v9492_v27  ;;  %v2495_v1 = vadd.f32 %v2470_v32, %v2439_v38  ;;  %v2496_v48 = vadd.f32 %v2470_v32, %v2440_v62 }
 0x751   :  { %9495 = vmatpush1.bf16.msra.mxu0 %v9494_v47 }
 0x753   :  { %v2475_v26 = vpop.permute.xlu1 %2474 }
 0x754   :  { %v2497_v2 = vadd.f32 %v2475_v26, %v2441_v41  ;;  %v2498_v33 = vadd.f32 %v2475_v26, %v2442_v59 }
 0x756   :  { %v9498_v49 = vpack.c.bf16 %v2497_v2, %v2495_v1  ;;  %v9496_v51 = vpack.c.bf16 %v2498_v33, %v2496_v48 }
 0x757   :  { %v2480_v44 = vpop.permute.xlu0 %2479 }
 0x758   :  { %9497 = vmatprep.subr.bf16.mxu0 %v9496_v51  ;;  %v2499_v40 = vadd.f32 %v2480_v44, %v2443_v9  ;;  %v2500_v5 = vadd.f32 %v2480_v44, %v2444_v57 }
 0x759   :  { %9499 = vmatpush1.bf16.msra.mxu0 %v9498_v49  ;;  %v2485_v35 = vpop.permute.xlu1 %2484 }
 0x75a   :  { %v2501_v25 = vadd.f32 %v2485_v35, %v2445_v63  ;;  %v2502_v46 = vadd.f32 %v2485_v35, %v2446_v43 }
 0x75c   :  { %v9502_v39 = vpack.c.bf16 %v2501_v25, %v2499_v40  ;;  %v9500_v6 = vpack.c.bf16 %v2502_v46, %v2500_v5  ;;  %v2566_v12 = vpop.permute.xlu0 %2565 }
 0x75e   :  { %9501 = vmatprep.subr.bf16.mxu0 %v9500_v6  ;;  %v2562_v37 = vpop.permute.xlu1 %2561 }
 0x75f   :  { %9503 = vmatpush1.bf16.msra.mxu0 %v9502_v39 }
 0x760   :  { %v2570_v27 = vpop.permute.xlu0 %2569 }
 0x762   :  { %8843 = vmatmul.mubr.msk.f32.vlgmr.msra.gmra.mrb[48].mxu0 %vm907_vm2, %v8819_v28  ;;  %v12827_v34 = vpop.permute.xlu1 %2593 }
 0x763   :  { %2766 = vmatprep.mubr.f32.mxu0 %v16114_v24 }
 0x764   :  { %v12845_v38 = vpop.permute.xlu0 %2601 }
 0x766   :  { %8844 = vmatmul.mubr.msk.f32.gmra.mrb[50].mxu0 %vm907_vm2, %v8820_v45  ;;  %v12829_v14 = vpop.permute.xlu1 %2597 }
 0x767   :  { %2772 = vmatprep.mubr.f32.mxu0 %v16114_v24 }
 0x768   :  { %v12849_v19 = vpop.permute.xlu0 %2577 }
 0x76a   :  { %8845 = vmatmul.mubr.msk.f32.gmra.mrb[52].mxu0 %vm907_vm2, %v8821_v29  ;;  %v12831_v53 = vpop.permute.xlu1 %2573 }
 0x76b   :  { %2778 = vmatprep.mubr.f32.mxu0 %v16114_v24 }
 0x76c   :  { %v12859_v33 = vpop.permute.xlu0 %2609 }
 0x76e   :  { %8846 = vmatmul.mubr.msk.f32.gmra.mrb[54].mxu0 %vm907_vm2, %v8822_v56  ;;  %v12833_v52 = vpop.permute.xlu1 %2605 }
 0x76f   :  { %2784 = vmatprep.mubr.f32.mxu0 %v16114_v24 }
 0x770   :  { %v12869_v43 = vpop.permute.xlu0 %2585 }
 0x772   :  { %8847 = vmatmul.mubr.msk.f32.gmra.mrb[56].mxu0 %vm907_vm2, %v8823_v50  ;;  %v12835_v60 = vpop.permute.xlu1 %2581 }
 0x773   :  { %2790 = vmatprep.mubr.f32.mxu0 %v16114_v24 }
 0x774   :  { %v12879_v5 = vpop.permute.xlu0 %2617 }
 0x776   :  { %8848 = vmatmul.mubr.msk.f32.gmra.mrb[58].mxu0 %vm907_vm2, %v8824_v10  ;;  %v12837_v7 = vpop.permute.xlu1 %2613 }
 0x777   :  { %2796 = vmatprep.mubr.f32.mxu0 %v16114_v24 }
 0x778   :  { %v2530_v28 = vpop.permute.xlu0 %2529 }
 0x77a   :  { %8849 = vmatmul.mubr.msk.f32.gmra.mrb[60].mxu0 %vm907_vm2, %v8825_v4  ;;  %v12839_v22 = vpop.permute.xlu1 %2589 }
 0x77b   :  { %2802 = vmatprep.mubr.f32.mxu0 %v16114_v24 }
 0x77c   :  { %v12895_v50 = vpop.permute.xlu0 %2541 }
 0x77e   :  { %8850 = vmatmul.mubr.msk.f32.gmra.mrb[62].mxu0 %vm907_vm2, %v8826_v20  ;;  %v12841_v47 = vpop.permute.xlu1 %2621 }
 0x77f   :  { %2808 = vmatprep.mubr.f32.mxu0 %v16114_v24 }
 0x782   :  { %8851 = vmatmul.mubr.msk.f32.gmra.mrb[64].mxu0 %vm907_vm2, %v8827_v31  ;;  %v12843_v32 = vpop.permute.xlu1 %2533 }
 0x783   :  { %2814 = vmatprep.mubr.f32.mxu0 %v16114_v24 }
 0x786   :  { %8852 = vmatmul.mubr.msk.f32.gmra.mrb[66].mxu0 %vm907_vm2, %v8828_v55  ;;  %v12897_v55 = vpop.permute.xlu0 %2549 }
 0x787   :  { %2820 = vmatprep.mubr.f32.mxu0 %v16114_v24  ;;  %v12847_v41 = vpop.permute.xlu1 %2926 }
 0x78a   :  { %8853 = vmatmul.mubr.msk.f32.gmra.mrb[68].mxu0 %vm907_vm2, %v8829_v54 }
 0x78b   :  { %2826 = vmatprep.mubr.f32.mxu0 %v16114_v24  ;;  %v12855_v48 = vpop.permute.xlu1 %3002 }
 0x78e   :  { %8854 = vmatmul.mubr.msk.f32.gmra.mrb[70].mxu0 %vm907_vm2, %v8830_v21 }
 0x78f   :  { %2832 = vmatprep.mubr.f32.mxu0 %v16114_v24 }
 0x790   :  { %v12865_v44 = vpop.permute.xlu1 %2537 }
 0x792   :  { %8855 = vmatmul.mubr.msk.f32.gmra.mrb[72].mxu0 %vm907_vm2, %v8831_v17 }
 0x793   :  { %2838 = vmatprep.mubr.f32.mxu0 %v16114_v24 }
 0x795   :  { %v12875_v35 = vpop.permute.xlu1 %2930 }
 0x796   :  { %8856 = vmatmul.mubr.msk.f32.gmra.mrb[74].mxu0 %vm907_vm2, %v8832_v0 }
 0x797   :  { %2844 = vmatprep.mubr.f32.mxu0 %v16114_v24 }
 0x799   :  { %v12885_v39 = vpop.permute.xlu1 %2934 }
 0x79a   :  { %8857 = vmatmul.mubr.msk.f32.gmra.mrb[76].mxu0 %vm907_vm2, %v8833_v13 }
 0x79b   :  { %2850 = vmatprep.mubr.f32.mxu0 %v16114_v24 }
 0x79d   :  { %v12893_v56 = vpop.permute.xlu1 %3014 }
 0x79e   :  { %8858 = vmatmul.mubr.msk.f32.gmra.mrb[78].mxu0 %vm907_vm2, %v8834_v36  ;;  %v12901_v36 = vpop.permute.xlu0 %2557 }
 0x79f   :  { %2856 = vmatprep.mubr.f32.mxu0 %v16114_v24 }
 0x7a2   :  { %8859 = vmatmul.mubr.msk.f32.gmra.mrb[80].mxu0 %vm907_vm2, %v8835_v42  ;;  %v12899_v21 = vpop.permute.xlu1 %2545 }
 0x7a3   :  { %2862 = vmatprep.mubr.f32.mxu0 %v16114_v24 }
 0x7a6   :  { %8860 = vmatmul.mubr.msk.f32.gmra.mrb[82].mxu0 %vm907_vm2, %v8836_v18 }
 0x7a7   :  { %2868 = vmatprep.mubr.f32.mxu0 %v16114_v24 }
 0x7aa   :  { %8861 = vmatmul.mubr.msk.f32.gmra.mrb[84].mxu0 %vm907_vm2, %v8837_v23 }
 0x7ab   :  { %2874 = vmatprep.mubr.f32.mxu0 %v16114_v24 }
 0x7ae   :  { %8862 = vmatmul.mubr.msk.f32.gmra.mrb[86].mxu0 %vm907_vm2, %v8838_v58 }
 0x7af   :  { %2880 = vmatprep.mubr.f32.mxu0 %v16114_v24 }
 0x7b2   :  { %8863 = vmatmul.mubr.msk.f32.gmra.mrb[88].mxu0 %vm907_vm2, %v8839_v15  ;;  %v12903_v15 = vpop.permute.xlu1 %2938 }
 0x7b3   :  { %2886 = vmatprep.mubr.f32.mxu0 %v16114_v24 }
 0x7b6   :  { %8864 = vmatmul.mubr.msk.f32.gmra.mrb[90].mxu0 %vm907_vm2, %v8840_v61  ;;  %v2923_v61 = vpop.permute.xlu0 %2922 }
 0x7b7   :  { %2892 = vmatprep.mubr.f32.mxu0 %v16114_v24 }
 0x7ba   :  { %8865 = vmatmul.mubr.msk.f32.gmra.mrb[92].mxu0 %vm907_vm2, %v8841_v11 }
 0x7bb   :  { %2898 = vmatprep.mubr.f32.mxu0 %v16114_v24 }
 0x7be   :  { %8866 = vmatmul.mubr.msk.f32.gmra.mrb[94].mxu0 %vm907_vm2, %v8842_v3 }
 0x7bf   :  { %4476 = vmatprep.mubr.f32.mxu0 %v16114_v24 }
 0x835   :  { %v2762_v62 = vpop.f32.mrb[48].mxu0 }
 0x836   :  { %v2764_v59 = vpop.f32.mrb[49].mxu0 }
 0x839   :  { %v12851_v26 = vpop.f32.mrb[50].mxu0 }
 0x83a   :  { %v12853_v1 = vpop.f32.mrb[51].mxu0 }
 0x83d   :  { %v12857_v2 = vpop.f32.mrb[52].mxu0 }
 0x83e   :  { %v12861_v49 = vpop.f32.mrb[53].mxu0 }
 0x841   :  { %v12863_v51 = vpop.f32.mrb[54].mxu0 }
 0x842   :  { %v12867_v63 = vpop.f32.mrb[55].mxu0 }
 0x845   :  { %v12871_v9 = vpop.f32.mrb[56].mxu0 }
 0x846   :  { %v12873_v57 = vpop.f32.mrb[57].mxu0 }
 0x849   :  { %v12877_v40 = vpop.f32.mrb[58].mxu0 }
 0x84a   :  { %v12881_v25 = vpop.f32.mrb[59].mxu0 }
 0x84d   :  { %v12883_v46 = vpop.f32.mrb[60].mxu0 }
 0x84e   :  { %v12887_v6 = vpop.f32.mrb[61].mxu0 }
 0x851   :  { %v12889_v45 = vpop.f32.mrb[62].mxu0 }
 0x852   :  { %v12891_v29 = vpop.f32.mrb[63].mxu0 }
 0x855   :  { %v2810_v10 = vpop.f32.mrb[64].mxu0 }
 0x856   :  { %v2811_v4 = vadd.f32 %v2810_v10, %v2562_v37  ;;  %v2812_v20 = vpop.f32.mrb[65].mxu0 }
 0x857   :  { %v2813_v31 = vadd.f32 %v2812_v20, %v2562_v37 }
 0x858   :  { %10306 = vtanh.f32 %v2811_v4 }
 0x859   :  { %10308 = vtanh.f32 %v2813_v31  ;;  %v2816_v54 = vpop.f32.mrb[66].mxu0 }
 0x85a   :  { %v2817_v17 = vadd.f32 %v2816_v54, %v2566_v12  ;;  %v2818_v0 = vpop.f32.mrb[67].mxu0  ;;  %v2765_v54 = vadd.f32 %v2764_v59, %v2530_v28 }
 0x85b   :  { %v2819_v13 = vadd.f32 %v2818_v0, %v2566_v12  ;;  %v2763_v12 = vadd.f32 %v2762_v62, %v2530_v28  ;;  %v2769_v62 = vadd.f32 %v12851_v26, %v12843_v32  ;;  %v2771_v28 = vadd.f32 %v12853_v1, %v12843_v32 }
 0x85c   :  { %10310 = vtanh.f32 %v2817_v17 }
 0x85d   :  { %10312 = vtanh.f32 %v2819_v13  ;;  %v2822_v42 = vpop.f32.mrb[68].mxu0 }
 0x85e   :  { %v2823_v18 = vadd.f32 %v2822_v42, %v2570_v27  ;;  %v2824_v23 = vpop.f32.mrb[69].mxu0  ;;  %v12909_v42 = vpop.permute.xlu1 %2942 }
 0x85f   :  { %v2825_v58 = vadd.f32 %v2824_v23, %v2570_v27 }
 0x860   :  { %10314 = vtanh.f32 %v2823_v18 }
 0x861   :  { %10316 = vtanh.f32 %v2825_v58  ;;  %v2828_v11 = vpop.f32.mrb[70].mxu0 }
 0x862   :  { %v10307_v3 = vpop.eup %10306  ;;  %v2829_v37 = vadd.f32 %v2828_v11, %v12831_v53  ;;  %v2830_v10 = vpop.f32.mrb[71].mxu0 }
 0x863   :  { %v10309_v4 = vpop.eup %10308  ;;  %v2953_v20 = vmul.f32 %v10307_v3, %v2923_v61  ;;  %v2831_v31 = vadd.f32 %v2830_v10, %v12831_v53  ;;  %v12932_v1 = vpop.permute.xlu1 %3022 }
 0x864   :  { %10318 = vtanh.f32 %v2829_v37  ;;  %v2954_v17 = vmul.f32 %v10309_v4, %v2923_v61 }
 0x865   :  { %v12907_v0 = vadd.f32 %v2953_v20, %v2763_v12  ;;  %10320 = vtanh.f32 %v2831_v31  ;;  %v2834_v27 = vpop.f32.mrb[72].mxu0 }
 0x866   :  { %v10311_v13 = vpop.eup %10310  ;;  %v12911_v18 = vadd.f32 %v2954_v17, %v2765_v54  ;;  %v2835_v23 = vadd.f32 %v2834_v27, %v12849_v19  ;;  %v2836_v58 = vpop.f32.mrb[73].mxu0 }
 0x867   :  { %v10313_v11 = vpop.eup %10312  ;;  %v2955_v53 = vmul.f32 %v10311_v13, %v12847_v41  ;;  %v2837_v59 = vadd.f32 %v2836_v58, %v12849_v19  ;;  %v2775_v19 = vadd.f32 %v12857_v2, %v12865_v44 }
 0x868   :  { %v2956_v61 = vmul.f32 %v10313_v11, %v12847_v41  ;;  %10322 = vtanh.f32 %v2835_v23  ;;  %v2777_v41 = vadd.f32 %v12861_v49, %v12865_v44 }
 0x869   :  { %10324 = vtanh.f32 %v2837_v59  ;;  %v2840_v3 = vpop.f32.mrb[74].mxu0  ;;  %v12921_v37 = vadd.f32 %v2955_v53, %v2769_v62 }
 0x86a   :  { %v10315_v10 = vpop.eup %10314  ;;  %v2841_v4 = vadd.f32 %v2840_v3, %v12835_v60  ;;  %v2842_v12 = vpop.f32.mrb[75].mxu0  ;;  %v12924_v20 = vadd.f32 %v2956_v61, %v2771_v28 }
 0x86b   :  { %v10317_v26 = vpop.eup %10316  ;;  %v2957_v31 = vmul.f32 %v10315_v10, %v12875_v35  ;;  %v2843_v32 = vadd.f32 %v2842_v12, %v12835_v60  ;;  %v2781_v60 = vadd.f32 %v12863_v51, %v12895_v50  ;;  %v2554_v61 = vpop.permute.xlu1 %2553 }
 0x86c   :  { %v2958_v54 = vmul.f32 %v10317_v26, %v12875_v35  ;;  %10326 = vtanh.f32 %v2841_v4  ;;  %v2783_v35 = vadd.f32 %v12867_v63, %v12895_v50  ;;  %v2789_v50 = vadd.f32 %v12873_v57, %v12899_v21 }
 0x86d   :  { %10328 = vtanh.f32 %v2843_v32  ;;  %v2846_v17 = vpop.f32.mrb[76].mxu0  ;;  %v12935_v27 = vadd.f32 %v2957_v31, %v2775_v19 }
 0x86e   :  { %v10319_v13 = vpop.eup %10318  ;;  %v2847_v23 = vadd.f32 %v2846_v17, %v12869_v43  ;;  %v2848_v2 = vpop.f32.mrb[77].mxu0  ;;  %v12938_v58 = vadd.f32 %v2958_v54, %v2777_v41 }
 0x86f   :  { %v10321_v11 = vpop.eup %10320  ;;  %v2959_v49 = vmul.f32 %v10319_v13, %v12885_v39  ;;  %v2849_v44 = vadd.f32 %v2848_v2, %v12869_v43  ;;  %v2787_v43 = vadd.f32 %v12871_v9, %v12899_v21  ;;  %v2947_v54 = vpop.permute.xlu1 %2946 }
 0x870   :  { %v2960_v62 = vmul.f32 %v10321_v11, %v12885_v39  ;;  %10330 = vtanh.f32 %v2847_v23 }
 0x871   :  { %10332 = vtanh.f32 %v2849_v44  ;;  %v2852_v53 = vpop.f32.mrb[78].mxu0  ;;  %v12947_v59 = vadd.f32 %v2959_v49, %v2781_v60 }
 0x872   :  { %v10323_v28 = vpop.eup %10322  ;;  %v2853_v3 = vadd.f32 %v2852_v53, %v12839_v22  ;;  %v2854_v10 = vpop.f32.mrb[79].mxu0  ;;  %v12950_v51 = vadd.f32 %v2960_v62, %v2783_v35 }
 0x873   :  { %v10325_v4 = vpop.eup %10324  ;;  %v2961_v63 = vmul.f32 %v10323_v28, %v12903_v15  ;;  %v2855_v39 = vadd.f32 %v2854_v10, %v12839_v22  ;;  %v2793_v22 = vadd.f32 %v12877_v40, %v12897_v55 }
 0x874   :  { %v2962_v12 = vmul.f32 %v10325_v4, %v12903_v15  ;;  %10334 = vtanh.f32 %v2853_v3  ;;  %v2795_v15 = vadd.f32 %v12881_v25, %v12897_v55  ;;  %v2951_v3 = vpop.permute.xlu1 %2950 }
 0x875   :  { %10336 = vtanh.f32 %v2855_v39  ;;  %v2858_v26 = vpop.f32.mrb[80].mxu0  ;;  %v12959_v19 = vadd.f32 %v2961_v63, %v2787_v43 }
 0x876   :  { %v10327_v31 = vpop.eup %10326  ;;  %v2859_v32 = vadd.f32 %v2858_v26, %v12827_v34  ;;  %v2860_v41 = vpop.f32.mrb[81].mxu0  ;;  %v12962_v9 = vadd.f32 %v2962_v12, %v2789_v50  ;;  %v2807_v26 = vadd.f32 %v12891_v29, %v12901_v36 }
 0x877   :  { %v10329_v17 = vpop.eup %10328  ;;  %v2963_v57 = vmul.f32 %v10327_v31, %v12909_v42  ;;  %v2861_v21 = vadd.f32 %v2860_v41, %v12827_v34  ;;  %v2799_v34 = vadd.f32 %v12883_v46, %v2554_v61 }
 0x878   :  { %v2964_v13 = vmul.f32 %v10329_v17, %v12909_v42  ;;  %v2969_v23 = vmul.f32 %v2859_v32, %v2859_v32  ;;  %v2801_v42 = vadd.f32 %v12887_v6, %v2554_v61 }
 0x879   :  { %v2970_v2 = vmul.f32 %v2861_v21, %v2861_v21  ;;  %v2864_v11 = vpop.f32.mrb[82].mxu0  ;;  %v12971_v60 = vadd.f32 %v2963_v57, %v2793_v22 }
 0x87a   :  { %v10331_v49 = vpop.eup %10330  ;;  %10338 = vtanh.f32 %v2969_v23  ;;  %v2865_v44 = vadd.f32 %v2864_v11, %v12829_v14  ;;  %v2866_v35 = vpop.f32.mrb[83].mxu0  ;;  %v12974_v40 = vadd.f32 %v2964_v13, %v2795_v15 }
 0x87b   :  { %v10333_v62 = vpop.eup %10332  ;;  %10340 = vtanh.f32 %v2970_v2  ;;  %v2867_v25 = vadd.f32 %v2866_v35, %v12829_v14  ;;  %v2965_v55 = vmul.f32 %v10331_v49, %v2947_v54  ;;  %v2805_v14 = vadd.f32 %v12889_v45, %v12901_v36  ;;  %v3007_v2 = vpop.permute.xlu0 %3006 }
 0x87c   :  { %v2971_v53 = vmul.f32 %v2865_v44, %v2865_v44  ;;  %v2966_v28 = vmul.f32 %v10333_v62, %v2947_v54 }
 0x87d   :  { %v2972_v10 = vmul.f32 %v2867_v25, %v2867_v25  ;;  %v12979_v4 = vadd.f32 %v2965_v55, %v2799_v34  ;;  %v2870_v43 = vpop.f32.mrb[84].mxu0 }
 0x87e   :  { %v10335_v63 = vpop.eup %10334  ;;  %10342 = vtanh.f32 %v2971_v53  ;;  %v12981_v39 = vadd.f32 %v2966_v28, %v2801_v42  ;;  %v2871_v50 = vadd.f32 %v2870_v43, %v12845_v38  ;;  %v2872_v46 = vpop.f32.mrb[85].mxu0 }
 0x87f   :  { %v10337_v12 = vpop.eup %10336  ;;  %10344 = vtanh.f32 %v2972_v10  ;;  %v2873_v6 = vadd.f32 %v2872_v46, %v12845_v38  ;;  %v2967_v61 = vmul.f32 %v10335_v63, %v2951_v3  ;;  %v3011_v46 = vpop.permute.xlu0 %3010 }
 0x880   :  { %v2973_v31 = vmul.f32 %v2871_v50, %v2871_v50  ;;  %v2968_v32 = vmul.f32 %v10337_v12, %v2951_v3 }
 0x881   :  { %v2974_v41 = vmul.f32 %v2873_v6, %v2873_v6  ;;  %v12989_v54 = vadd.f32 %v2967_v61, %v2805_v14  ;;  %v2876_v17 = vpop.f32.mrb[86].mxu0 }
 0x882   :  { %10346 = vtanh.f32 %v2973_v31  ;;  %v12991_v22 = vadd.f32 %v2968_v32, %v2807_v26  ;;  %v2877_v57 = vadd.f32 %v2876_v17, %v12833_v52  ;;  %v2878_v21 = vpop.f32.mrb[87].mxu0 }
 0x883   :  { %10348 = vtanh.f32 %v2974_v41  ;;  %v2879_v45 = vadd.f32 %v2878_v21, %v12833_v52 }
 0x884   :  { %v10339_v38 = vpop.eup %10338  ;;  %v2975_v15 = vmul.f32 %v2877_v57, %v2877_v57 }
 0x885   :  { %v10341_v13 = vpop.eup %10340  ;;  %v2976_v23 = vmul.f32 %v2879_v45, %v2879_v45  ;;  %v2882_v29 = vpop.f32.mrb[88].mxu0  ;;  %v3033_v36 = vmul.f32 %v10339_v38, %v12855_v48 }
 0x886   :  { %10350 = vtanh.f32 %v2975_v15  ;;  %v2883_v11 = vadd.f32 %v2882_v29, %v12859_v33  ;;  %v2884_v49 = vpop.f32.mrb[89].mxu0  ;;  %v3034_v44 = vmul.f32 %v10341_v13, %v12855_v48 }
 0x887   :  { %10352 = vtanh.f32 %v2976_v23  ;;  %v2885_v35 = vadd.f32 %v2884_v49, %v12859_v33  ;;  %v13000_v62 = vadd.f32 %v12907_v0, %v3033_v36 }
 0x888   :  { %v10343_v52 = vpop.eup %10342  ;;  %v2977_v34 = vmul.f32 %v2883_v11, %v2883_v11  ;;  %v13003_v25 = vadd.f32 %v12911_v18, %v3034_v44 }
 0x889   :  { %v10345_v55 = vpop.eup %10344  ;;  %v2978_v42 = vmul.f32 %v2885_v35, %v2885_v35  ;;  %v2888_v53 = vpop.f32.mrb[90].mxu0  ;;  %v3113_v28 = vmul.f32 %v13000_v62, %v13000_v62  ;;  %v3035_v3 = vmul.f32 %v10343_v52, %v3007_v2 }
 0x88a   :  { %10354 = vtanh.f32 %v2977_v34  ;;  %v2889_v48 = vadd.f32 %v2888_v53, %v12837_v7  ;;  %v2890_v10 = vpop.f32.mrb[91].mxu0  ;;  %v3081_v33 = vadd.f32 %v13003_v25, %v13000_v62  ;;  %v3114_v0 = vmul.f32 %v13003_v25, %v13003_v25  ;;  %v3019_v34 = vpop.permute.xlu0 %3018 }
 0x88b   :  { %10356 = vtanh.f32 %v2978_v42  ;;  %v2891_v18 = vadd.f32 %v2890_v10, %v12837_v7  ;;  %v3036_v43 = vmul.f32 %v10345_v55, %v3007_v2  ;;  %v13014_v63 = vadd.f32 %v12921_v37, %v3035_v3 }
 0x88c   :  { %v10347_v50 = vpop.eup %10346  ;;  %v2979_v12 = vmul.f32 %v2889_v48, %v2889_v48  ;;  %3082 = vadd.xlane.f32.xlu1 %v3081_v33  ;;  %v3129_v14 = vadd.f32 %v3114_v0, %v3113_v28 }
 0x88d   :  { %v10349_v6 = vpop.eup %10348  ;;  %v2980_v61 = vmul.f32 %v2891_v18, %v2891_v18  ;;  %v2894_v26 = vpop.f32.mrb[92].mxu0  ;;  %v13017_v31 = vadd.f32 %v12924_v20, %v3036_v43  ;;  %v3115_v32 = vmul.f32 %v13014_v63, %v13014_v63  ;;  %v3037_v41 = vmul.f32 %v10347_v50, %v3011_v46 }
 0x88e   :  { %10358 = vtanh.f32 %v2979_v12  ;;  %v2895_v7 = vadd.f32 %v2894_v26, %v12879_v5  ;;  %v2896_v37 = vpop.f32.mrb[93].mxu0  ;;  %3130 = vadd.xlane.f32.xlu0 %v3129_v14  ;;  %v3038_v17 = vmul.f32 %v10349_v6, %v3011_v46  ;;  %v3027_v26 = vpop.permute.xlu0 %3026 }
 0x88f   :  { %10360 = vtanh.f32 %v2980_v61  ;;  %v2897_v57 = vadd.f32 %v2896_v37, %v12879_v5  ;;  %v3116_v21 = vmul.f32 %v13017_v31, %v13017_v31  ;;  %v3084_v20 = vadd.f32 %v13017_v31, %v13014_v63 }
 0x890   :  { %v10351_v45 = vpop.eup %10350  ;;  %v2981_v38 = vmul.f32 %v2895_v7, %v2895_v7  ;;  %v13028_v15 = vadd.f32 %v12935_v27, %v3037_v41  ;;  %v13031_v13 = vadd.f32 %v12938_v58, %v3038_v17 }
 0x891   :  { %v10353_v23 = vpop.eup %10352  ;;  %v2982_v29 = vmul.f32 %v2897_v57, %v2897_v57  ;;  %v2900_v36 = vpop.f32.mrb[94].mxu0  ;;  %v3132_v2 = vadd.f32 %v3116_v21, %v3115_v32  ;;  %v3039_v5 = vmul.f32 %v10351_v45, %v12893_v56 }
 0x892   :  { %10362 = vtanh.f32 %v2981_v38  ;;  %v2901_v11 = vadd.f32 %v2900_v36, %v12841_v47  ;;  %v2902_v49 = vpop.f32.mrb[95].mxu0  ;;  %3085 = vadd.xlane.f32.xlu0 %v3084_v20  ;;  %v3040_v44 = vmul.f32 %v10353_v23, %v12893_v56  ;;  %v3087_v58 = vadd.f32 %v13031_v13, %v13028_v15  ;;  %v3031_v45 = vpop.permute.xlu1 %3030 }
 0x893   :  { %10364 = vtanh.f32 %v2982_v29  ;;  %v2903_v27 = vadd.f32 %v2902_v49, %v12841_v47  ;;  %3133 = vadd.xlane.f32.xlu1 %v3132_v2  ;;  %v13040_v35 = vadd.f32 %v12947_v59, %v3039_v5  ;;  %v3117_v53 = vmul.f32 %v13028_v15, %v13028_v15 }
 0x894   :  { %v10355_v52 = vpop.eup %10354  ;;  %v2983_v55 = vmul.f32 %v2901_v11, %v2901_v11  ;;  %v13043_v42 = vadd.f32 %v12950_v51, %v3040_v44  ;;  %v3118_v56 = vmul.f32 %v13031_v13, %v13031_v13 }
 0x895   :  { %v10357_v47 = vpop.eup %10356  ;;  %v2984_v28 = vmul.f32 %v2903_v27, %v2903_v27  ;;  %v3041_v3 = vmul.f32 %v10355_v52, %v3019_v34  ;;  %v3119_v48 = vmul.f32 %v13040_v35, %v13040_v35 }
 0x896   :  { %10366 = vtanh.f32 %v2983_v55  ;;  %3088 = vadd.xlane.f32.xlu0 %v3087_v58  ;;  %v3090_v59 = vadd.f32 %v13043_v42, %v13040_v35  ;;  %v3120_v51 = vmul.f32 %v13043_v42, %v13043_v42  ;;  %v3042_v10 = vmul.f32 %v10357_v47, %v3019_v34 }
 0x897   :  { %10368 = vtanh.f32 %v2984_v28  ;;  %v13056_v33 = vadd.f32 %v12959_v19, %v3041_v3  ;;  %v3135_v18 = vadd.f32 %v3118_v56, %v3117_v53 }
 0x898   :  { %v10359_v0 = vpop.eup %10358  ;;  %3091 = vadd.xlane.f32.xlu1 %v3090_v59  ;;  %v13059_v50 = vadd.f32 %v12962_v9, %v3042_v10  ;;  %v3138_v12 = vadd.f32 %v3120_v51, %v3119_v48 }
 0x899   :  { %v10361_v43 = vpop.eup %10360  ;;  %v3043_v46 = vmul.f32 %v10359_v0, %v12932_v1  ;;  %v3121_v9 = vmul.f32 %v13056_v33, %v13056_v33 }
 0x89a   :  { %3136 = vadd.xlane.f32.xlu0 %v3135_v18  ;;  %v3044_v14 = vmul.f32 %v10361_v43, %v12932_v1  ;;  %v3093_v19 = vadd.f32 %v13059_v50, %v13056_v33  ;;  %v3122_v41 = vmul.f32 %v13059_v50, %v13059_v50 }
 0x89b   :  { %v13064_v6 = vadd.f32 %v12971_v60, %v3043_v46 }
 0x89c   :  { %v10363_v61 = vpop.eup %10362  ;;  %3139 = vadd.xlane.f32.xlu1 %v3138_v12  ;;  %v13069_v32 = vadd.f32 %v12974_v40, %v3044_v14  ;;  %v3141_v38 = vadd.f32 %v3122_v41, %v3121_v9 }
 0x89d   :  { %v10365_v7 = vpop.eup %10364  ;;  %v3045_v1 = vmul.f32 %v10363_v61, %v3027_v26  ;;  %v3123_v37 = vmul.f32 %v13064_v6, %v13064_v6 }
 0x89e   :  { %3094 = vadd.xlane.f32.xlu0 %v3093_v19  ;;  %v3096_v60 = vadd.f32 %v13069_v32, %v13064_v6  ;;  %v3124_v17 = vmul.f32 %v13069_v32, %v13069_v32  ;;  %v3046_v40 = vmul.f32 %v10365_v7, %v3027_v26 }
 0x89f   :  { %v13082_v57 = vadd.f32 %v12979_v4, %v3045_v1 }
 0x8a0   :  { %v10367_v21 = vpop.eup %10366  ;;  %3097 = vadd.xlane.f32.xlu1 %v3096_v60  ;;  %v13085_v20 = vadd.f32 %v12981_v39, %v3046_v40  ;;  %v3144_v2 = vadd.f32 %v3124_v17, %v3123_v37 }
 0x8a1   :  { %v10369_v23 = vpop.eup %10368  ;;  %v3047_v29 = vmul.f32 %v10367_v21, %v3031_v45  ;;  %v3125_v49 = vmul.f32 %v13082_v57, %v13082_v57 }
 0x8a2   :  { %v3048_v36 = vmul.f32 %v10369_v23, %v3031_v45  ;;  %3142 = vadd.xlane.f32.xlu0 %v3141_v38  ;;  %v3099_v4 = vadd.f32 %v13085_v20, %v13082_v57  ;;  %v3126_v39 = vmul.f32 %v13085_v20, %v13085_v20  ;;  %v13108_v38 = vld [vmem:[%s15975_s7] sm:$0xff] }
 0x8a3   :  { %v13088_v5 = vadd.f32 %v12989_v54, %v3047_v29 }
 0x8a4   :  { %v13091_v11 = vadd.f32 %v12991_v22, %v3048_v36  ;;  %3145 = vadd.xlane.f32.xlu1 %v3144_v2  ;;  %v3147_v27 = vadd.f32 %v3126_v39, %v3125_v49 }
 0x8a5   :  { %v3127_v54 = vmul.f32 %v13088_v5, %v13088_v5 }
 0x8a6   :  { %3100 = vadd.xlane.f32.xlu0 %v3099_v4  ;;  %v3102_v44 = vadd.f32 %v13091_v11, %v13088_v5  ;;  %v3128_v22 = vmul.f32 %v13091_v11, %v13091_v11 }
 0x8a8   :  { %3103 = vadd.xlane.f32.xlu1 %v3102_v44  ;;  %v3150_v58 = vadd.f32 %v3128_v22, %v3127_v54 }
 0x8aa   :  { %3148 = vadd.xlane.f32.xlu0 %v3147_v27 }
 0x8ac   :  { %3151 = vadd.xlane.f32.xlu1 %v3150_v58 }
 0x919   :  { %v3083_v52 = vpop.xlane.xlu1 %3082 }
 0x91a   :  { %v3105_v34 = vmul.f32 0.00390625, %v3083_v52 }
 0x91b   :  { %v3131_v55 = vpop.xlane.xlu0 %3130 }
 0x91c   :  { %v3161_v53 = vmul.f32 %v3105_v34, %v3105_v34  ;;  %v3153_v56 = vmul.f32 0.00390625, %v3131_v55  ;;  %v13118_v55 = vld [vmem:[%s15975_s7 + $0x8] sm:$0xff] }
 0x91e   :  { %v3169_v47 = vsub.f32 %v3153_v56, %v3161_v53 }
 0x91f   :  { %v3086_v28 = vpop.xlane.xlu0 %3085 }
 0x920   :  { %v3177_v3 = vadd.f32 1e-05, %v3169_v47  ;;  %v3106_v59 = vmul.f32 0.00390625, %v3086_v28  ;;  %v3134_v48 = vpop.xlane.xlu1 %3133 }
 0x921   :  { %v3154_v10 = vmul.f32 0.00390625, %v3134_v48 }
 0x922   :  { %10370 = vrsqrt.f32 %v3177_v3  ;;  %v3162_v51 = vmul.f32 %v3106_v59, %v3106_v59 }
 0x923   :  { %v3089_v0 = vpop.xlane.xlu0 %3088 }
 0x924   :  { %v3170_v18 = vsub.f32 %v3154_v10, %v3162_v51  ;;  %v3107_v43 = vmul.f32 0.00390625, %v3089_v0 }
 0x925   :  { %v3092_v46 = vpop.xlane.xlu1 %3091 }
 0x926   :  { %v3178_v12 = vadd.f32 1e-05, %v3170_v18  ;;  %v3108_v14 = vmul.f32 0.00390625, %v3092_v46  ;;  %v3163_v26 = vmul.f32 %v3107_v43, %v3107_v43 }
 0x927   :  { %v3137_v61 = vpop.xlane.xlu0 %3136 }
 0x928   :  { %10372 = vrsqrt.f32 %v3178_v12  ;;  %v3155_v19 = vmul.f32 0.00390625, %v3137_v61  ;;  %v3164_v41 = vmul.f32 %v3108_v14, %v3108_v14  ;;  %v13125_v61 = vld [vmem:[%s15975_s7 + $0x10] sm:$0xff] }
 0x929   :  { %v3140_v9 = vpop.xlane.xlu1 %3139 }
 0x92a   :  { %v3171_v7 = vsub.f32 %v3155_v19, %v3163_v26  ;;  %v3156_v1 = vmul.f32 0.00390625, %v3140_v9 }
 0x92b   :  { %v3095_v60 = vpop.xlane.xlu0 %3094 }
 0x92c   :  { %v10371_v37 = vpop.eup %10370  ;;  %v3179_v17 = vadd.f32 1e-05, %v3171_v7  ;;  %v3172_v40 = vsub.f32 %v3156_v1, %v3164_v41  ;;  %v3109_v21 = vmul.f32 0.00390625, %v3095_v60  ;;  %v13131_v1 = vld [vmem:[%s15975_s7 + $0x18] sm:$0xff] }
 0x92d   :  { %v3098_v45 = vpop.xlane.xlu1 %3097  ;;  %v13111_v23 = vmul.f32 %v13108_v38, %v10371_v37 }
 0x92e   :  { %10374 = vrsqrt.f32 %v3179_v17  ;;  %v3180_v29 = vadd.f32 1e-05, %v3172_v40  ;;  %v3110_v36 = vmul.f32 0.00390625, %v3098_v45  ;;  %v3165_v49 = vmul.f32 %v3109_v21, %v3109_v21 }
 0x92f   :  { %v3143_v2 = vpop.xlane.xlu0 %3142  ;;  %v3201_v4 = vmul.f32 %v13111_v23, %v3105_v34 }
 0x930   :  { %10376 = vrsqrt.f32 %v3180_v29  ;;  %v3157_v39 = vmul.f32 0.00390625, %v3143_v2  ;;  %v3166_v22 = vmul.f32 %v3110_v36, %v3110_v36 }
 0x931   :  { %3217 = vrot.lane.b32.xlu0 %v3201_v4, %s10760_s25  ;;  %v3146_v44 = vpop.xlane.xlu1 %3145 }
 0x932   :  { %v10373_v54 = vpop.eup %10372  ;;  %v3173_v27 = vsub.f32 %v3157_v39, %v3165_v49  ;;  %v3158_v58 = vmul.f32 0.00390625, %v3146_v44  ;;  %v13145_v39 = vld [vmem:[%s15975_s7 + $0x28] sm:$0xff] }
 0x933   :  { %v3101_v52 = vpop.xlane.xlu0 %3100  ;;  %v3194_v53 = vmul.f32 %v13118_v55, %v10373_v54 }
 0x934   :  { %v3181_v56 = vadd.f32 1e-05, %v3173_v27  ;;  %v3174_v34 = vsub.f32 %v3158_v58, %v3166_v22  ;;  %v3111_v47 = vmul.f32 0.00390625, %v3101_v52  ;;  %v13153_v22 = vld [vmem:[%s15975_s7 + $0x30] sm:$0xff]  ;;  %v13159_v52 = vld [vmem:[%s15975_s7 + $0x38] sm:$0xff] }
 0x935   :  { %v3104_v28 = vpop.xlane.xlu1 %3103  ;;  %v3202_v3 = vmul.f32 %v3194_v53, %v3106_v59 }
 0x936   :  { %10378 = vrsqrt.f32 %v3181_v56  ;;  %v3182_v48 = vadd.f32 1e-05, %v3174_v34  ;;  %v3112_v51 = vmul.f32 0.00390625, %v3104_v28  ;;  %v3167_v18 = vmul.f32 %v3111_v47, %v3111_v47 }
 0x937   :  { %v3149_v10 = vpop.xlane.xlu0 %3148  ;;  %3219 = vrot.lane.b32.xlu1 %v3202_v3, %s10760_s25 }
 0x938   :  { %v10375_v0 = vpop.eup %10374  ;;  %10380 = vrsqrt.f32 %v3182_v48  ;;  %v3159_v46 = vmul.f32 0.00390625, %v3149_v10  ;;  %v3168_v59 = vmul.f32 %v3112_v51, %v3112_v51 }
 0x939   :  { %v3152_v12 = vpop.xlane.xlu1 %3151  ;;  %v3195_v26 = vmul.f32 %v13125_v61, %v10375_v0 }
 0x93a   :  { %v10377_v19 = vpop.eup %10376  ;;  %v3175_v9 = vsub.f32 %v3159_v46, %v3167_v18  ;;  %v3160_v41 = vmul.f32 0.00390625, %v3152_v12 }
 0x93b   :  { %v3203_v7 = vmul.f32 %v3195_v26, %v3107_v43  ;;  %v3196_v60 = vmul.f32 %v13131_v1, %v10377_v19  ;;  %v13139_v43 = vld [vmem:[%s15975_s7 + $0x20] sm:$0xff] }
 0x93c   :  { %v3183_v37 = vadd.f32 1e-05, %v3175_v9  ;;  %v3176_v17 = vsub.f32 %v3160_v41, %v3168_v59  ;;  %v10766_v9 = vmov 4   ;;  %v10666_v41 = vld [vmem:[%s15975_s7 + $0x40] sm:$0xff] }
 0x93d   :  { %3221 = vrot.lane.b32.xlu1 %v3203_v7, %s10760_s25  ;;  %v3204_v40 = vmul.f32 %v3196_v60, %v3108_v14  ;;  %v10667_v7 = vld [vmem:[%s15975_s7 + $0x48] sm:$0xff] }
 0x93e   :  { %10382 = vrsqrt.f32 %v3183_v37  ;;  %v3184_v45 = vadd.f32 1e-05, %v3176_v17  ;;  %v10669_v37 = vld [vmem:[%s15975_s7 + $0x50] sm:$0xff]  ;;  %v10670_v17 = vld [vmem:[%s15975_s7 + $0x88] sm:$0xff] }
 0x93f   :  { %3223 = vrot.lane.b32.xlu0 %v3204_v40, %s10760_s25  ;;  %v10671_v40 = vld [vmem:[%s15975_s7 + $0x90] sm:$0xff] }
 0x940   :  { %v10379_v29 = vpop.eup %10378  ;;  %10384 = vrsqrt.f32 %v3184_v45  ;;  %v10672_v45 = vld [vmem:[%s15975_s7 + $0x58] sm:$0xff] }
 0x941   :  { %v3197_v2 = vmul.f32 %v13139_v43, %v10379_v29  ;;  %v10673_v29 = vld [vmem:[%s15975_s7 + $0x60] sm:$0xff] }
 0x942   :  { %v10381_v4 = vpop.eup %10380 }
 0x943   :  { %v3205_v49 = vmul.f32 %v3197_v2, %v3109_v21  ;;  %v3198_v14 = vmul.f32 %v13145_v39, %v10381_v4  ;;  %v10675_v4 = vld [vmem:[%s15975_s7 + $0xa0] sm:$0xff] }
 0x945   :  { %3225 = vrot.lane.b32.xlu1 %v3205_v49, %s10760_s25  ;;  %v3206_v44 = vmul.f32 %v3198_v14, %v3110_v36  ;;  %v10676_v49 = vld [vmem:[%s15975_s7 + $0x68] sm:$0xff] }
 0x947   :  { %3227 = vrot.lane.b32.xlu0 %v3206_v44, %s10760_s25  ;;  %v10678_v44 = vld [vmem:[%s15975_s7 + $0xa8] sm:$0xff] }
 0x948   :  { %v10383_v54 = vpop.eup %10382 }
 0x949   :  { %v3199_v21 = vmul.f32 %v13153_v22, %v10383_v54  ;;  %v10679_v54 = vld [vmem:[%s15975_s7 + $0xb0] sm:$0xff] }
 0x94a   :  { %v10385_v27 = vpop.eup %10384 }
 0x94b   :  { %v3207_v58 = vmul.f32 %v3199_v21, %v3111_v47  ;;  %v3200_v56 = vmul.f32 %v13159_v52, %v10385_v27  ;;  %v13236_v27 = vld [vmem:[%s15975_s7 + $0xb8] sm:$0xff] }
 0x94d   :  { %3229 = vrot.lane.b32.xlu1 %v3207_v58, %s10760_s25  ;;  %v3208_v36 = vmul.f32 %v3200_v56, %v3112_v51  ;;  %v10767_v58 = vmov 11  }
 0x94f   :  { %3231 = vrot.lane.b32.xlu0 %v3208_v36, %s10760_s25 }
 0x951   :  { %3251 = vperm.xlu1 %10017, %v13111_v23  }
 0x953   :  { %3256 = vperm.xlu0 %10018, %v3194_v53  }
 0x955   :  { %3266 = vperm.xlu1 %10017, %v3196_v60   ;;  %v10668_v60 = vld [vmem:[%s15975_s7 + $0x80] sm:$0xff] }
 0x957   :  { %3261 = vperm.xlu0 %10018, %v3195_v26  }
 0x959   :  { %3271 = vperm.xlu1 %10017, %v3197_v2   ;;  %v10674_v2 = vld [vmem:[%s15975_s7 + $0x98] sm:$0xff] }
 0x95b   :  { %3276 = vperm.xlu0 %10018, %v3198_v14   ;;  %v13217_v14 = vld [vmem:[%s15975_s7 + $0x70] sm:$0xff] }
 0x95d   :  { %10019 = vset.pattern.permute.xlu1 %v10761_v30 }
 0x95f   :  { %10020 = vset.pattern.permute.xlu0 %v10761_v30 }
 0x9a3   :  { %v3218_v34 = vpop.permute.xlu0 %3217 }
 0x9a4   :  { %v3241_v47 = vsub.f32 %v13108_v38, %v3218_v34 }
 0x9a6   :  { %3307 = vperm.xlu1 %10019, %v3241_v47  }
 0x9a9   :  { %v3220_v28 = vpop.permute.xlu1 %3219 }
 0x9aa   :  { %v3242_v3 = vsub.f32 %v13118_v55, %v3220_v28 }
 0x9ac   :  { %3312 = vperm.xlu1 %10019, %v3242_v3  }
 0x9af   :  { %v3222_v48 = vpop.permute.xlu1 %3221 }
 0x9b0   :  { %v3243_v23 = vsub.f32 %v13125_v61, %v3222_v48  ;;  %10022 = vset.pattern.permute.xlu1 %v10759_v8 }
 0x9b1   :  { %v3224_v53 = vpop.permute.xlu0 %3223  ;;  %3286 = vperm.xlu1 %10022, %v3200_v56  }
 0x9b2   :  { %3317 = vperm.xlu0 %10020, %v3243_v23   ;;  %v3244_v51 = vsub.f32 %v13131_v1, %v3224_v53 }
 0x9b5   :  { %10023 = vset.pattern.permute.xlu1 %v10761_v30 }
 0x9b6   :  { %3322 = vperm.xlu1 %10023, %v3244_v51   ;;  %10021 = vset.pattern.permute.xlu0 %v10759_v8 }
 0x9b7   :  { %3281 = vperm.xlu0 %10021, %v3199_v21   ;;  %v3226_v10 = vpop.permute.xlu1 %3225  ;;  %v13229_v21 = vld [vmem:[%s15975_s7 + $0x78] sm:$0xff] }
 0x9b8   :  { %v3245_v0 = vsub.f32 %v13139_v43, %v3226_v10 }
 0x9b9   :  { %v3228_v18 = vpop.permute.xlu0 %3227 }
 0x9ba   :  { %3327 = vperm.xlu1 %10023, %v3245_v0   ;;  %v3246_v46 = vsub.f32 %v13145_v39, %v3228_v18 }
 0x9bb   :  { %10024 = vset.pattern.permute.xlu0 %v10761_v30 }
 0x9be   :  { %3332 = vperm.xlu1 %10023, %v3246_v46  }
 0x9bf   :  { %v3230_v12 = vpop.permute.xlu1 %3229 }
 0x9c0   :  { %v3247_v26 = vsub.f32 %v13153_v22, %v3230_v12 }
 0x9c1   :  { %v3232_v19 = vpop.permute.xlu0 %3231 }
 0x9c2   :  { %v3248_v59 = vsub.f32 %v13159_v52, %v3232_v19  ;;  %3337 = vperm.xlu0 %10024, %v3247_v26  }
 0x9c4   :  { %3342 = vperm.xlu1 %10023, %v3248_v59  }
 0x9c6   :  { %10026 = vset.pattern.permute.xlu0 %v10766_v9 }
 0x9c7   :  { %3423 = vperm.xlu0 %10026, %v10667_v7  }
 0x9c8   :  { %10025 = vset.pattern.permute.xlu1 %v10766_v9 }
 0x9c9   :  { %3419 = vperm.xlu1 %10025, %v10666_v41  }
 0x9cb   :  { %3427 = vperm.xlu0 %10026, %v10669_v37  }
 0x9cd   :  { %3451 = vperm.xlu1 %10025, %v10668_v60  }
 0x9cf   :  { %3459 = vperm.xlu0 %10026, %v10671_v40  }
 0x9d1   :  { %3455 = vperm.xlu1 %10025, %v10670_v17  }
 0x9d3   :  { %3435 = vperm.xlu0 %10026, %v10673_v29  }
 0x9d5   :  { %3431 = vperm.xlu1 %10025, %v10672_v45  }
 0x9d7   :  { %3467 = vperm.xlu0 %10026, %v10675_v4  }
 0x9d9   :  { %3463 = vperm.xlu1 %10025, %v10674_v2  }
 0x9db   :  { %3443 = vperm.xlu0 %10026, %v13217_v14  }
 0x9dd   :  { %3439 = vperm.xlu1 %10025, %v10676_v49  }
 0x9df   :  { %3475 = vperm.xlu0 %10026, %v10679_v54  }
 0x9e1   :  { %3471 = vperm.xlu1 %10025, %v10678_v44  }
 0x9e3   :  { %3387 = vperm.xlu0 %10026, %v13108_v38   ;;  %v3252_v38 = vpop.permute.xlu1 %3251 }
 0x9e4   :  { %v3289_v56 = vmul.f32 %v3252_v38, %v13000_v62  ;;  %v3290_v36 = vmul.f32 %v3252_v38, %v13003_v25 }
 0x9e5   :  { %3447 = vperm.xlu1 %10025, %v13229_v21  }
 0x9e7   :  { %3399 = vperm.xlu0 %10026, %v13131_v1   ;;  %v3257_v1 = vpop.permute.xlu0 %3256 }
 0x9e8   :  { %v3291_v34 = vmul.f32 %v3257_v1, %v13014_v63  ;;  %v3292_v47 = vmul.f32 %v3257_v1, %v13017_v31  ;;  %v8873_v1 = vld [vmem:[%s15971_s3 + $0x270] sm:$0xff] }
 0x9e9   :  { %3479 = vperm.xlu1 %10025, %v13236_v27  }
 0x9eb   :  { %3407 = vperm.xlu0 %10026, %v13145_v39  }
 0x9ed   :  { %3391 = vperm.xlu1 %10025, %v13118_v55   ;;  %v3267_v55 = vpop.permute.xlu1 %3266 }
 0x9ee   :  { %v3295_v63 = vmul.f32 %v3267_v55, %v13040_v35  ;;  %v3296_v31 = vmul.f32 %v3267_v55, %v13043_v42 }
 0x9ef   :  { %3415 = vperm.xlu0 %10026, %v13159_v52  }
 0x9f1   :  { %10027 = vset.pattern.permute.xlu1 %v10767_v58  ;;  %v3272_v39 = vpop.permute.xlu1 %3271 }
 0x9f2   :  { %3784 = vperm.xlu1 %10027, %v10667_v7   ;;  %v3297_v35 = vmul.f32 %v3272_v39, %v13056_v33 }
 0x9f3   :  { %10033 = vset.pattern.permute.xlu0 %v10767_v58 }
 0x9f4   :  { %3780 = vperm.xlu0 %10033, %v10666_v41  }
 0x9f6   :  { %3860 = vperm.xlu1 %10027, %v10668_v60  }
 0x9f8   :  { %3864 = vperm.xlu0 %10033, %v10670_v17  }
 0x9fa   :  { %10028 = vset.pattern.permute.xlu1 %v10766_v9 }
 0x9fb   :  { %3395 = vperm.xlu1 %10028, %v13125_v61   ;;  %v3262_v61 = vpop.permute.xlu0 %3261 }
 0x9fc   :  { %3868 = vperm.xlu0 %10033, %v10671_v40   ;;  %v3293_v0 = vmul.f32 %v3262_v61, %v13028_v15  ;;  %v3294_v18 = vmul.f32 %v3262_v61, %v13031_v13  ;;  %v3298_v15 = vmul.f32 %v3272_v39, %v13059_v50  ;;  %v8874_v39 = vld [vmem:[%s15971_s3 + $0x278] sm:$0xff]  ;;  %v8876_v61 = vld [vmem:[%s15971_s3 + $0x288] sm:$0xff] }
 0x9ff   :  { %10029 = vset.pattern.permute.xlu1 %v10767_v58  ;;  %v3277_v10 = vpop.permute.xlu0 %3276 }
 0xa00   :  { %3788 = vperm.xlu1 %10029, %v10669_v37   ;;  %3876 = vperm.xlu0 %10033, %v10675_v4   ;;  %v3299_v13 = vmul.f32 %v3277_v10, %v13064_v6  ;;  %v3300_v42 = vmul.f32 %v3277_v10, %v13069_v32  ;;  %v8888_v10 = vld [vmem:[%s15971_s3 + $0x2e8] sm:$0xff] }
 0xa04   :  { %3792 = vperm.xlu1 %10029, %v10672_v45   ;;  %3884 = vperm.xlu0 %10033, %v10679_v54  }
 0xa08   :  { %3872 = vperm.xlu1 %10029, %v10674_v2   ;;  %10036 = vset.pattern.permute.xlu0 %v10759_v8 }
 0xa0c   :  { %10030 = vset.pattern.permute.xlu1 %v10766_v9 }
 0xa0d   :  { %3403 = vperm.xlu1 %10030, %v13139_v43  }
 0xa11   :  { %10031 = vset.pattern.permute.xlu1 %v10767_v58 }
 0xa12   :  { %3796 = vperm.xlu1 %10031, %v10673_v29  }
 0xa16   :  { %3800 = vperm.xlu1 %10031, %v10676_v49  }
 0xa1a   :  { %3880 = vperm.xlu1 %10031, %v10678_v44  }
 0xa1e   :  { %10032 = vset.pattern.permute.xlu1 %v10766_v9 }
 0xa1f   :  { %3411 = vperm.xlu1 %10032, %v13153_v22  }
 0xa23   :  { %10034 = vset.pattern.permute.xlu1 %v10767_v58 }
 0xa24   :  { %3804 = vperm.xlu1 %10034, %v13217_v14  }
 0xa25   :  { %v3308_v52 = vpop.permute.xlu1 %3307 }
 0xa26   :  { %v3345_v3 = vadd.f32 %v3308_v52, %v3289_v56  ;;  %v3346_v48 = vadd.f32 %v3308_v52, %v3290_v36  ;;  %v8875_v52 = vld [vmem:[%s15971_s3 + $0x280] sm:$0xff]  ;;  %v8877_v56 = vld [vmem:[%s15971_s3 + $0x290] sm:$0xff]  ;;  %v8878_v36 = vld [vmem:[%s15971_s3 + $0x298] sm:$0xff] }
 0xa28   :  { %3808 = vperm.xlu1 %10034, %v13229_v21   ;;  %v8871_v21 = vld [vmem:[%s15971_s3 + $0x260] sm:$0xff] }
 0xa2b   :  { %v3313_v28 = vpop.permute.xlu1 %3312 }
 0xa2c   :  { %v3347_v23 = vadd.f32 %v3313_v28, %v3291_v34  ;;  %v3348_v53 = vadd.f32 %v3313_v28, %v3292_v47  ;;  %3888 = vperm.xlu1 %10034, %v13236_v27   ;;  %v8872_v27 = vld [vmem:[%s15971_s3 + $0x268] sm:$0xff]  ;;  %v8879_v34 = vld [vmem:[%s15971_s3 + $0x2a0] sm:$0xff]  ;;  %v8881_v28 = vld [vmem:[%s15971_s3 + $0x2b0] sm:$0xff] }
 0xa2d   :  { %v8880_v47 = vld [vmem:[%s15971_s3 + $0x2a8] sm:$0xff] }
 0xa2e   :  { %v9506_v51 = vpack.c.bf16 %v3347_v23, %v3345_v3  ;;  %v9504_v43 = vpack.c.bf16 %v3348_v53, %v3346_v48  ;;  %v8882_v3 = vld [vmem:[%s15971_s3 + $0x2b8] sm:$0xff]  ;;  %v8883_v48 = vld [vmem:[%s15971_s3 + $0x2c0] sm:$0xff]  ;;  %v8884_v23 = vld [vmem:[%s15971_s3 + $0x2c8] sm:$0xff] }
 0xa2f   :  { %v8885_v53 = vld [vmem:[%s15971_s3 + $0x2d0] sm:$0xff] }
 0xa30   :  { %9505 = vmatprep.subr.bf16.mxu1 %v9504_v43  ;;  %v3287_v62 = vpop.permute.xlu1 %3286  ;;  %10035 = vset.pattern.permute.xlu1 %v10759_v8  ;;  %v8887_v43 = vld [vmem:[%s15971_s3 + $0x2e0] sm:$0xff] }
 0xa31   :  { %9507 = vmatpush1.bf16.msra.mxu1 %v9506_v51  ;;  %v3318_v25 = vpop.permute.xlu0 %3317  ;;  %v3303_v33 = vmul.f32 %v3287_v62, %v13088_v5  ;;  %v3304_v50 = vmul.f32 %v3287_v62, %v13091_v11  ;;  %v8867_v5 = vld [vmem:[%s15971_s3 + $0x240] sm:$0xff]  ;;  %v8870_v11 = vld [vmem:[%s15971_s3 + $0x258] sm:$0xff]  ;;  %v8889_v62 = vld [vmem:[%s15971_s3 + $0x2f0] sm:$0xff] }
 0xa32   :  { %v3349_v12 = vadd.f32 %v3318_v25, %v3293_v0  ;;  %v3350_v26 = vadd.f32 %v3318_v25, %v3294_v18  ;;  %v8886_v51 = vld [vmem:[%s15971_s3 + $0x2d8] sm:$0xff] }
 0xa33   :  { %v8890_v25 = vld [vmem:[%s15971_s3 + $0x2f8] sm:$0xff] }
 0xa35   :  { %v3323_v46 = vpop.permute.xlu1 %3322 }
 0xa36   :  { %v3351_v19 = vadd.f32 %v3323_v46, %v3295_v63  ;;  %v3352_v59 = vadd.f32 %v3323_v46, %v3296_v31  ;;  %v3282_v37 = vpop.permute.xlu0 %3281 }
 0xa37   :  { %v3301_v6 = vmul.f32 %v3282_v37, %v13082_v57  ;;  %v3302_v32 = vmul.f32 %v3282_v37, %v13085_v20  ;;  %v8868_v57 = vld [vmem:[%s15971_s3 + $0x248] sm:$0xff]  ;;  %v8869_v20 = vld [vmem:[%s15971_s3 + $0x250] sm:$0xff] }
 0xa38   :  { %v9510_v41 = vpack.c.bf16 %v3351_v19, %v3349_v12  ;;  %v9508_v7 = vpack.c.bf16 %v3352_v59, %v3350_v26 }
 0xa39   :  { %v3328_v60 = vpop.permute.xlu1 %3327 }
 0xa3a   :  { %9509 = vmatprep.subr.bf16.mxu1 %v9508_v7  ;;  %v3353_v9 = vadd.f32 %v3328_v60, %v3297_v35  ;;  %v3354_v40 = vadd.f32 %v3328_v60, %v3298_v15 }
 0xa3b   :  { %9511 = vmatpush1.bf16.msra.mxu1 %v9510_v41 }
 0xa3d   :  { %v3333_v17 = vpop.permute.xlu1 %3332 }
 0xa3e   :  { %v3355_v22 = vadd.f32 %v3333_v17, %v3299_v13  ;;  %v3356_v45 = vadd.f32 %v3333_v17, %v3300_v42 }
 0xa40   :  { %v9514_v29 = vpack.c.bf16 %v3355_v22, %v3353_v9  ;;  %v9512_v2 = vpack.c.bf16 %v3356_v45, %v3354_v40 }
 0xa41   :  { %v3338_v4 = vpop.permute.xlu0 %3337 }
 0xa42   :  { %9513 = vmatprep.subr.bf16.mxu1 %v9512_v2  ;;  %v3357_v14 = vadd.f32 %v3338_v4, %v3301_v6  ;;  %v3358_v44 = vadd.f32 %v3338_v4, %v3302_v32 }
 0xa43   :  { %9515 = vmatpush1.bf16.msra.mxu1 %v9514_v29  ;;  %v3343_v49 = vpop.permute.xlu1 %3342 }
 0xa44   :  { %v3359_v54 = vadd.f32 %v3343_v49, %v3303_v33  ;;  %v3360_v58 = vadd.f32 %v3343_v49, %v3304_v50 }
 0xa46   :  { %v9518_v38 = vpack.c.bf16 %v3359_v54, %v3357_v14  ;;  %v9516_v55 = vpack.c.bf16 %v3360_v58, %v3358_v44  ;;  %v3424_v59 = vpop.permute.xlu0 %3423 }
 0xa48   :  { %9517 = vmatprep.subr.bf16.mxu1 %v9516_v55  ;;  %v3420_v63 = vpop.permute.xlu1 %3419 }
 0xa49   :  { %9519 = vmatpush1.bf16.msra.mxu1 %v9518_v38 }
 0xa4a   :  { %v3428_v7 = vpop.permute.xlu0 %3427 }
 0xa4c   :  { %8891 = vmatmul.mubr.msk.f32.vlgmr.msra.gmra.mrb[96].mxu1 %vm907_vm2, %v8867_v5  ;;  %v13395_v31 = vpop.permute.xlu1 %3451 }
 0xa4d   :  { %3624 = vmatprep.mubr.f32.mxu1 %v16114_v24 }
 0xa4e   :  { %v13413_v35 = vpop.permute.xlu0 %3459 }
 0xa50   :  { %8892 = vmatmul.mubr.msk.f32.gmra.mrb[98].mxu1 %vm907_vm2, %v8868_v57  ;;  %v13397_v0 = vpop.permute.xlu1 %3455 }
 0xa51   :  { %3630 = vmatprep.mubr.f32.mxu1 %v16114_v24 }
 0xa52   :  { %v13417_v37 = vpop.permute.xlu0 %3435 }
 0xa54   :  { %8893 = vmatmul.mubr.msk.f32.gmra.mrb[100].mxu1 %vm907_vm2, %v8869_v20  ;;  %v13399_v18 = vpop.permute.xlu1 %3431 }
 0xa55   :  { %3636 = vmatprep.mubr.f32.mxu1 %v16114_v24 }
 0xa56   :  { %v13427_v45 = vpop.permute.xlu0 %3467 }
 0xa58   :  { %8894 = vmatmul.mubr.msk.f32.gmra.mrb[102].mxu1 %vm907_vm2, %v8870_v11  ;;  %v13401_v46 = vpop.permute.xlu1 %3463 }
 0xa59   :  { %3642 = vmatprep.mubr.f32.mxu1 %v16114_v24 }
 0xa5a   :  { %v13437_v50 = vpop.permute.xlu0 %3443 }
 0xa5c   :  { %8895 = vmatmul.mubr.msk.f32.gmra.mrb[104].mxu1 %vm907_vm2, %v8871_v21  ;;  %v13403_v12 = vpop.permute.xlu1 %3439 }
 0xa5d   :  { %3648 = vmatprep.mubr.f32.mxu1 %v16114_v24 }
 0xa5e   :  { %v13447_v44 = vpop.permute.xlu0 %3475 }
 0xa60   :  { %8896 = vmatmul.mubr.msk.f32.gmra.mrb[106].mxu1 %vm907_vm2, %v8872_v27  ;;  %v13405_v26 = vpop.permute.xlu1 %3471 }
 0xa61   :  { %3654 = vmatprep.mubr.f32.mxu1 %v16114_v24 }
 0xa62   :  { %v3388_v5 = vpop.permute.xlu0 %3387 }
 0xa64   :  { %8897 = vmatmul.mubr.msk.f32.gmra.mrb[108].mxu1 %vm907_vm2, %v8873_v1  ;;  %v13407_v19 = vpop.permute.xlu1 %3447 }
 0xa65   :  { %3660 = vmatprep.mubr.f32.mxu1 %v16114_v24 }
 0xa66   :  { %v13463_v21 = vpop.permute.xlu0 %3399 }
 0xa68   :  { %8898 = vmatmul.mubr.msk.f32.gmra.mrb[110].mxu1 %vm907_vm2, %v8874_v39  ;;  %v13409_v41 = vpop.permute.xlu1 %3479 }
 0xa69   :  { %3666 = vmatprep.mubr.f32.mxu1 %v16114_v24 }
 0xa6c   :  { %8899 = vmatmul.mubr.msk.f32.gmra.mrb[112].mxu1 %vm907_vm2, %v8875_v52  ;;  %v13411_v60 = vpop.permute.xlu1 %3391 }
 0xa6d   :  { %3672 = vmatprep.mubr.f32.mxu1 %v16114_v24 }
 0xa70   :  { %8900 = vmatmul.mubr.msk.f32.gmra.mrb[114].mxu1 %vm907_vm2, %v8876_v61  ;;  %v13465_v61 = vpop.permute.xlu0 %3407 }
 0xa71   :  { %3678 = vmatprep.mubr.f32.mxu1 %v16114_v24  ;;  %v13415_v13 = vpop.permute.xlu1 %3784 }
 0xa74   :  { %8901 = vmatmul.mubr.msk.f32.gmra.mrb[116].mxu1 %vm907_vm2, %v8877_v56 }
 0xa75   :  { %3684 = vmatprep.mubr.f32.mxu1 %v16114_v24  ;;  %v13423_v40 = vpop.permute.xlu1 %3860 }
 0xa78   :  { %8902 = vmatmul.mubr.msk.f32.gmra.mrb[118].mxu1 %vm907_vm2, %v8878_v36 }
 0xa79   :  { %3690 = vmatprep.mubr.f32.mxu1 %v16114_v24 }
 0xa7a   :  { %v13433_v4 = vpop.permute.xlu1 %3395 }
 0xa7c   :  { %8903 = vmatmul.mubr.msk.f32.gmra.mrb[120].mxu1 %vm907_vm2, %v8879_v34 }
 0xa7d   :  { %3696 = vmatprep.mubr.f32.mxu1 %v16114_v24 }
 0xa7f   :  { %v13443_v49 = vpop.permute.xlu1 %3788 }
 0xa80   :  { %8904 = vmatmul.mubr.msk.f32.gmra.mrb[122].mxu1 %vm907_vm2, %v8880_v47 }
 0xa81   :  { %3702 = vmatprep.mubr.f32.mxu1 %v16114_v24 }
 0xa83   :  { %v13453_v38 = vpop.permute.xlu1 %3792 }
 0xa84   :  { %8905 = vmatmul.mubr.msk.f32.gmra.mrb[124].mxu1 %vm907_vm2, %v8881_v28 }
 0xa85   :  { %3708 = vmatprep.mubr.f32.mxu1 %v16114_v24 }
 0xa87   :  { %v13461_v11 = vpop.permute.xlu1 %3872 }
 0xa88   :  { %8906 = vmatmul.mubr.msk.f32.gmra.mrb[126].mxu1 %vm907_vm2, %v8882_v3  ;;  %v13469_v3 = vpop.permute.xlu0 %3415 }
 0xa89   :  { %3714 = vmatprep.mubr.f32.mxu1 %v16114_v24 }
 0xa8c   :  { %8907 = vmatmul.mubr.msk.f32.gmra.mrb[128].mxu1 %vm907_vm2, %v8883_v48  ;;  %v13467_v36 = vpop.permute.xlu1 %3403 }
 0xa8d   :  { %3720 = vmatprep.mubr.f32.mxu1 %v16114_v24 }
 0xa90   :  { %8908 = vmatmul.mubr.msk.f32.gmra.mrb[130].mxu1 %vm907_vm2, %v8884_v23 }
 0xa91   :  { %3726 = vmatprep.mubr.f32.mxu1 %v16114_v24 }
 0xa94   :  { %8909 = vmatmul.mubr.msk.f32.gmra.mrb[132].mxu1 %vm907_vm2, %v8885_v53 }
 0xa95   :  { %3732 = vmatprep.mubr.f32.mxu1 %v16114_v24 }
 0xa98   :  { %8910 = vmatmul.mubr.msk.f32.gmra.mrb[134].mxu1 %vm907_vm2, %v8886_v51 }
 0xa99   :  { %3738 = vmatprep.mubr.f32.mxu1 %v16114_v24 }
 0xa9c   :  { %8911 = vmatmul.mubr.msk.f32.gmra.mrb[136].mxu1 %vm907_vm2, %v8887_v43  ;;  %v13471_v43 = vpop.permute.xlu1 %3796 }
 0xa9d   :  { %3744 = vmatprep.mubr.f32.mxu1 %v16114_v24 }
 0xaa0   :  { %8912 = vmatmul.mubr.msk.f32.gmra.mrb[138].mxu1 %vm907_vm2, %v8888_v10  ;;  %v3781_v10 = vpop.permute.xlu0 %3780 }
 0xaa1   :  { %3750 = vmatprep.mubr.f32.mxu1 %v16114_v24 }
 0xaa4   :  { %8913 = vmatmul.mubr.msk.f32.gmra.mrb[140].mxu1 %vm907_vm2, %v8889_v62 }
 0xaa5   :  { %3756 = vmatprep.mubr.f32.mxu1 %v16114_v24 }
 0xaa8   :  { %8914 = vmatmul.mubr.msk.f32.gmra.mrb[142].mxu1 %vm907_vm2, %v8890_v25 }
 0xaa9   :  { %5334 = vmatprep.mubr.f32.mxu1 %v16114_v24 }
 0xb1f   :  { %v3620_v15 = vpop.f32.mrb[96].mxu1 }
 0xb20   :  { %v3622_v42 = vpop.f32.mrb[97].mxu1 }
 0xb23   :  { %v13419_v17 = vpop.f32.mrb[98].mxu1 }
 0xb24   :  { %v13421_v9 = vpop.f32.mrb[99].mxu1 }
 0xb27   :  { %v13425_v22 = vpop.f32.mrb[100].mxu1 }
 0xb28   :  { %v13429_v29 = vpop.f32.mrb[101].mxu1 }
 0xb2b   :  { %v13431_v2 = vpop.f32.mrb[102].mxu1 }
 0xb2c   :  { %v13435_v33 = vpop.f32.mrb[103].mxu1 }
 0xb2f   :  { %v13439_v6 = vpop.f32.mrb[104].mxu1 }
 0xb30   :  { %v13441_v32 = vpop.f32.mrb[105].mxu1 }
 0xb33   :  { %v13445_v14 = vpop.f32.mrb[106].mxu1 }
 0xb34   :  { %v13449_v54 = vpop.f32.mrb[107].mxu1 }
 0xb37   :  { %v13451_v58 = vpop.f32.mrb[108].mxu1 }
 0xb38   :  { %v13455_v55 = vpop.f32.mrb[109].mxu1 }
 0xb3b   :  { %v13457_v57 = vpop.f32.mrb[110].mxu1 }
 0xb3c   :  { %v13459_v20 = vpop.f32.mrb[111].mxu1 }
 0xb3f   :  { %v3668_v27 = vpop.f32.mrb[112].mxu1 }
 0xb40   :  { %v3669_v1 = vadd.f32 %v3668_v27, %v3420_v63  ;;  %v3670_v39 = vpop.f32.mrb[113].mxu1 }
 0xb41   :  { %v3671_v52 = vadd.f32 %v3670_v39, %v3420_v63 }
 0xb42   :  { %10386 = vtanh.f32 %v3669_v1 }
 0xb43   :  { %10388 = vtanh.f32 %v3671_v52  ;;  %v3674_v56 = vpop.f32.mrb[114].mxu1 }
 0xb44   :  { %v3675_v34 = vadd.f32 %v3674_v56, %v3424_v59  ;;  %v3676_v47 = vpop.f32.mrb[115].mxu1  ;;  %v3623_v56 = vadd.f32 %v3622_v42, %v3388_v5 }
 0xb45   :  { %v3677_v28 = vadd.f32 %v3676_v47, %v3424_v59  ;;  %v3621_v59 = vadd.f32 %v3620_v15, %v3388_v5  ;;  %v3627_v15 = vadd.f32 %v13419_v17, %v13411_v60  ;;  %v3629_v5 = vadd.f32 %v13421_v9, %v13411_v60 }
 0xb46   :  { %10390 = vtanh.f32 %v3675_v34 }
 0xb47   :  { %10392 = vtanh.f32 %v3677_v28  ;;  %v3680_v48 = vpop.f32.mrb[116].mxu1 }
 0xb48   :  { %v3681_v23 = vadd.f32 %v3680_v48, %v3428_v7  ;;  %v3682_v53 = vpop.f32.mrb[117].mxu1  ;;  %v13477_v48 = vpop.permute.xlu1 %3800 }
 0xb49   :  { %v3683_v51 = vadd.f32 %v3682_v53, %v3428_v7 }
 0xb4a   :  { %10394 = vtanh.f32 %v3681_v23 }
 0xb4b   :  { %10396 = vtanh.f32 %v3683_v51  ;;  %v3686_v62 = vpop.f32.mrb[118].mxu1 }
 0xb4c   :  { %v10387_v25 = vpop.eup %10386  ;;  %v3687_v63 = vadd.f32 %v3686_v62, %v13399_v18  ;;  %v3688_v27 = vpop.f32.mrb[119].mxu1 }
 0xb4d   :  { %v10389_v1 = vpop.eup %10388  ;;  %v3811_v39 = vmul.f32 %v10387_v25, %v3781_v10  ;;  %v3689_v52 = vadd.f32 %v3688_v27, %v13399_v18  ;;  %v13500_v9 = vpop.permute.xlu1 %3880 }
 0xb4e   :  { %10398 = vtanh.f32 %v3687_v63  ;;  %v3812_v34 = vmul.f32 %v10389_v1, %v3781_v10 }
 0xb4f   :  { %v13475_v47 = vadd.f32 %v3811_v39, %v3621_v59  ;;  %10400 = vtanh.f32 %v3689_v52  ;;  %v3692_v7 = vpop.f32.mrb[120].mxu1 }
 0xb50   :  { %v10391_v28 = vpop.eup %10390  ;;  %v13479_v23 = vadd.f32 %v3812_v34, %v3623_v56  ;;  %v3693_v53 = vadd.f32 %v3692_v7, %v13417_v37  ;;  %v3694_v51 = vpop.f32.mrb[121].mxu1 }
 0xb51   :  { %v10393_v62 = vpop.eup %10392  ;;  %v3813_v18 = vmul.f32 %v10391_v28, %v13415_v13  ;;  %v3695_v42 = vadd.f32 %v3694_v51, %v13417_v37  ;;  %v3633_v37 = vadd.f32 %v13425_v22, %v13433_v4 }
 0xb52   :  { %v3814_v10 = vmul.f32 %v10393_v62, %v13415_v13  ;;  %10402 = vtanh.f32 %v3693_v53  ;;  %v3635_v13 = vadd.f32 %v13429_v29, %v13433_v4 }
 0xb53   :  { %10404 = vtanh.f32 %v3695_v42  ;;  %v3698_v25 = vpop.f32.mrb[122].mxu1  ;;  %v13489_v63 = vadd.f32 %v3813_v18, %v3627_v15 }
 0xb54   :  { %v10395_v27 = vpop.eup %10394  ;;  %v3699_v1 = vadd.f32 %v3698_v25, %v13403_v12  ;;  %v3700_v59 = vpop.f32.mrb[123].mxu1  ;;  %v13492_v39 = vadd.f32 %v3814_v10, %v3629_v5 }
 0xb55   :  { %v10397_v17 = vpop.eup %10396  ;;  %v3815_v52 = vmul.f32 %v10395_v27, %v13443_v49  ;;  %v3701_v60 = vadd.f32 %v3700_v59, %v13403_v12  ;;  %v3639_v12 = vadd.f32 %v13431_v2, %v13463_v21  ;;  %v3412_v10 = vpop.permute.xlu1 %3411 }
 0xb56   :  { %v3816_v56 = vmul.f32 %v10397_v17, %v13443_v49  ;;  %10406 = vtanh.f32 %v3699_v1  ;;  %v3641_v49 = vadd.f32 %v13435_v33, %v13463_v21  ;;  %v3647_v21 = vadd.f32 %v13441_v32, %v13467_v36 }
 0xb57   :  { %10408 = vtanh.f32 %v3701_v60  ;;  %v3704_v34 = vpop.f32.mrb[124].mxu1  ;;  %v13503_v7 = vadd.f32 %v3815_v52, %v3633_v37 }
 0xb58   :  { %v10399_v28 = vpop.eup %10398  ;;  %v3705_v53 = vadd.f32 %v3704_v34, %v13437_v50  ;;  %v3706_v22 = vpop.f32.mrb[125].mxu1  ;;  %v13506_v51 = vadd.f32 %v3816_v56, %v3635_v13 }
 0xb59   :  { %v10401_v62 = vpop.eup %10400  ;;  %v3817_v29 = vmul.f32 %v10399_v28, %v13453_v38  ;;  %v3707_v4 = vadd.f32 %v3706_v22, %v13437_v50  ;;  %v3645_v50 = vadd.f32 %v13439_v6, %v13467_v36  ;;  %v3805_v56 = vpop.permute.xlu1 %3804 }
 0xb5a   :  { %v3818_v15 = vmul.f32 %v10401_v62, %v13453_v38  ;;  %10410 = vtanh.f32 %v3705_v53 }
 0xb5b   :  { %10412 = vtanh.f32 %v3707_v4  ;;  %v3710_v18 = vpop.f32.mrb[126].mxu1  ;;  %v13515_v42 = vadd.f32 %v3817_v29, %v3639_v12 }
 0xb5c   :  { %v10403_v5 = vpop.eup %10402  ;;  %v3711_v25 = vadd.f32 %v3710_v18, %v13407_v19  ;;  %v3712_v27 = vpop.f32.mrb[127].mxu1  ;;  %v13518_v2 = vadd.f32 %v3818_v15, %v3641_v49 }
 0xb5d   :  { %v10405_v1 = vpop.eup %10404  ;;  %v3819_v33 = vmul.f32 %v10403_v5, %v13471_v43  ;;  %v3713_v38 = vadd.f32 %v3712_v27, %v13407_v19  ;;  %v3651_v19 = vadd.f32 %v13445_v14, %v13465_v61 }
 0xb5e   :  { %v3820_v59 = vmul.f32 %v10405_v1, %v13471_v43  ;;  %10414 = vtanh.f32 %v3711_v25  ;;  %v3653_v43 = vadd.f32 %v13449_v54, %v13465_v61  ;;  %v3809_v25 = vpop.permute.xlu1 %3808 }
 0xb5f   :  { %10416 = vtanh.f32 %v3713_v38  ;;  %v3716_v17 = vpop.f32.mrb[128].mxu1  ;;  %v13527_v37 = vadd.f32 %v3819_v33, %v3645_v50 }
 0xb60   :  { %v10407_v52 = vpop.eup %10406  ;;  %v3717_v60 = vadd.f32 %v3716_v17, %v13395_v31  ;;  %v3718_v13 = vpop.f32.mrb[129].mxu1  ;;  %v13530_v6 = vadd.f32 %v3820_v59, %v3647_v21  ;;  %v3665_v17 = vadd.f32 %v13459_v20, %v13469_v3 }
 0xb61   :  { %v10409_v34 = vpop.eup %10408  ;;  %v3821_v32 = vmul.f32 %v10407_v52, %v13477_v48  ;;  %v3719_v36 = vadd.f32 %v3718_v13, %v13395_v31  ;;  %v3657_v31 = vadd.f32 %v13451_v58, %v3412_v10 }
 0xb62   :  { %v3822_v28 = vmul.f32 %v10409_v34, %v13477_v48  ;;  %v3827_v53 = vmul.f32 %v3717_v60, %v3717_v60  ;;  %v3659_v48 = vadd.f32 %v13455_v55, %v3412_v10 }
 0xb63   :  { %v3828_v22 = vmul.f32 %v3719_v36, %v3719_v36  ;;  %v3722_v62 = vpop.f32.mrb[130].mxu1  ;;  %v13539_v12 = vadd.f32 %v3821_v32, %v3651_v19 }
 0xb64   :  { %v10411_v29 = vpop.eup %10410  ;;  %10418 = vtanh.f32 %v3827_v53  ;;  %v3723_v4 = vadd.f32 %v3722_v62, %v13397_v0  ;;  %v3724_v49 = vpop.f32.mrb[131].mxu1  ;;  %v13542_v14 = vadd.f32 %v3822_v28, %v3653_v43 }
 0xb65   :  { %v10413_v15 = vpop.eup %10412  ;;  %10420 = vtanh.f32 %v3828_v22  ;;  %v3725_v54 = vadd.f32 %v3724_v49, %v13397_v0  ;;  %v3823_v61 = vmul.f32 %v10411_v29, %v3805_v56  ;;  %v3663_v0 = vadd.f32 %v13457_v57, %v13469_v3  ;;  %v3865_v22 = vpop.permute.xlu0 %3864 }
 0xb66   :  { %v3829_v18 = vmul.f32 %v3723_v4, %v3723_v4  ;;  %v3824_v5 = vmul.f32 %v10413_v15, %v3805_v56 }
 0xb67   :  { %v3830_v27 = vmul.f32 %v3725_v54, %v3725_v54  ;;  %v13547_v1 = vadd.f32 %v3823_v61, %v3657_v31  ;;  %v3728_v50 = vpop.f32.mrb[132].mxu1 }
 0xb68   :  { %v10415_v33 = vpop.eup %10414  ;;  %10422 = vtanh.f32 %v3829_v18  ;;  %v13549_v38 = vadd.f32 %v3824_v5, %v3659_v48  ;;  %v3729_v21 = vadd.f32 %v3728_v50, %v13413_v35  ;;  %v3730_v58 = vpop.f32.mrb[133].mxu1 }
 0xb69   :  { %v10417_v59 = vpop.eup %10416  ;;  %10424 = vtanh.f32 %v3830_v27  ;;  %v3731_v55 = vadd.f32 %v3730_v58, %v13413_v35  ;;  %v3825_v10 = vmul.f32 %v10415_v33, %v3809_v25  ;;  %v3869_v58 = vpop.permute.xlu0 %3868 }
 0xb6a   :  { %v3831_v52 = vmul.f32 %v3729_v21, %v3729_v21  ;;  %v3826_v60 = vmul.f32 %v10417_v59, %v3809_v25 }
 0xb6b   :  { %v3832_v13 = vmul.f32 %v3731_v55, %v3731_v55  ;;  %v13557_v56 = vadd.f32 %v3825_v10, %v3663_v0  ;;  %v3734_v34 = vpop.f32.mrb[134].mxu1 }
 0xb6c   :  { %10426 = vtanh.f32 %v3831_v52  ;;  %v13559_v19 = vadd.f32 %v3826_v60, %v3665_v17  ;;  %v3735_v32 = vadd.f32 %v3734_v34, %v13401_v46  ;;  %v3736_v36 = vpop.f32.mrb[135].mxu1 }
 0xb6d   :  { %10428 = vtanh.f32 %v3832_v13  ;;  %v3737_v57 = vadd.f32 %v3736_v36, %v13401_v46 }
 0xb6e   :  { %v10419_v35 = vpop.eup %10418  ;;  %v3833_v43 = vmul.f32 %v3735_v32, %v3735_v32 }
 0xb6f   :  { %v10421_v28 = vpop.eup %10420  ;;  %v3834_v53 = vmul.f32 %v3737_v57, %v3737_v57  ;;  %v3740_v20 = vpop.f32.mrb[136].mxu1  ;;  %v3891_v3 = vmul.f32 %v10419_v35, %v13423_v40 }
 0xb70   :  { %10430 = vtanh.f32 %v3833_v43  ;;  %v3741_v62 = vadd.f32 %v3740_v20, %v13427_v45  ;;  %v3742_v29 = vpop.f32.mrb[137].mxu1  ;;  %v3892_v4 = vmul.f32 %v10421_v28, %v13423_v40 }
 0xb71   :  { %10432 = vtanh.f32 %v3834_v53  ;;  %v3743_v49 = vadd.f32 %v3742_v29, %v13427_v45  ;;  %v13568_v15 = vadd.f32 %v13475_v47, %v3891_v3 }
 0xb72   :  { %v10423_v46 = vpop.eup %10422  ;;  %v3835_v31 = vmul.f32 %v3741_v62, %v3741_v62  ;;  %v13571_v54 = vadd.f32 %v13479_v23, %v3892_v4 }
 0xb73   :  { %v10425_v61 = vpop.eup %10424  ;;  %v3836_v48 = vmul.f32 %v3743_v49, %v3743_v49  ;;  %v3746_v18 = vpop.f32.mrb[138].mxu1  ;;  %v3971_v5 = vmul.f32 %v13568_v15, %v13568_v15  ;;  %v3893_v25 = vmul.f32 %v10423_v46, %v3865_v22 }
 0xb74   :  { %10434 = vtanh.f32 %v3835_v31  ;;  %v3747_v40 = vadd.f32 %v3746_v18, %v13405_v26  ;;  %v3748_v27 = vpop.f32.mrb[139].mxu1  ;;  %v3939_v45 = vadd.f32 %v13571_v54, %v13568_v15  ;;  %v3972_v47 = vmul.f32 %v13571_v54, %v13571_v54  ;;  %v3877_v31 = vpop.permute.xlu0 %3876 }
 0xb75   :  { %10436 = vtanh.f32 %v3836_v48  ;;  %v3749_v23 = vadd.f32 %v3748_v27, %v13405_v26  ;;  %v3894_v50 = vmul.f32 %v10425_v61, %v3865_v22  ;;  %v13582_v33 = vadd.f32 %v13489_v63, %v3893_v25 }
 0xb76   :  { %v10427_v21 = vpop.eup %10426  ;;  %v3837_v59 = vmul.f32 %v3747_v40, %v3747_v40  ;;  %3940 = vadd.xlane.f32.xlu1 %v3939_v45  ;;  %v3987_v0 = vadd.f32 %v3972_v47, %v3971_v5 }
 0xb77   :  { %v10429_v55 = vpop.eup %10428  ;;  %v3838_v10 = vmul.f32 %v3749_v23, %v3749_v23  ;;  %v3752_v17 = vpop.f32.mrb[140].mxu1  ;;  %v13585_v52 = vadd.f32 %v13492_v39, %v3894_v50  ;;  %v3973_v60 = vmul.f32 %v13582_v33, %v13582_v33  ;;  %v3895_v13 = vmul.f32 %v10427_v21, %v3869_v58 }
 0xb78   :  { %10438 = vtanh.f32 %v3837_v59  ;;  %v3753_v26 = vadd.f32 %v3752_v17, %v13447_v44  ;;  %v3754_v63 = vpop.f32.mrb[141].mxu1  ;;  %3988 = vadd.xlane.f32.xlu0 %v3987_v0  ;;  %v3896_v34 = vmul.f32 %v10429_v55, %v3869_v58  ;;  %v3885_v17 = vpop.permute.xlu0 %3884 }
 0xb79   :  { %10440 = vtanh.f32 %v3838_v10  ;;  %v3755_v32 = vadd.f32 %v3754_v63, %v13447_v44  ;;  %v3974_v36 = vmul.f32 %v13585_v52, %v13585_v52  ;;  %v3942_v39 = vadd.f32 %v13585_v52, %v13582_v33 }
 0xb7a   :  { %v10431_v57 = vpop.eup %10430  ;;  %v3839_v35 = vmul.f32 %v3753_v26, %v3753_v26  ;;  %v13596_v43 = vadd.f32 %v13503_v7, %v3895_v13  ;;  %v13599_v28 = vadd.f32 %v13506_v51, %v3896_v34 }
 0xb7b   :  { %v10433_v53 = vpop.eup %10432  ;;  %v3840_v20 = vmul.f32 %v3755_v32, %v3755_v32  ;;  %v3758_v3 = vpop.f32.mrb[142].mxu1  ;;  %v3990_v22 = vadd.f32 %v3974_v36, %v3973_v60  ;;  %v3897_v44 = vmul.f32 %v10431_v57, %v13461_v11 }
 0xb7c   :  { %10442 = vtanh.f32 %v3839_v35  ;;  %v3759_v62 = vadd.f32 %v3758_v3, %v13409_v41  ;;  %v3760_v29 = vpop.f32.mrb[143].mxu1  ;;  %3943 = vadd.xlane.f32.xlu0 %v3942_v39  ;;  %v3898_v4 = vmul.f32 %v10433_v53, %v13461_v11  ;;  %v3945_v51 = vadd.f32 %v13599_v28, %v13596_v43  ;;  %v3889_v57 = vpop.permute.xlu1 %3888 }
 0xb7d   :  { %10444 = vtanh.f32 %v3840_v20  ;;  %v3761_v7 = vadd.f32 %v3760_v29, %v13409_v41  ;;  %3991 = vadd.xlane.f32.xlu1 %v3990_v22  ;;  %v13608_v49 = vadd.f32 %v13515_v42, %v3897_v44  ;;  %v3975_v18 = vmul.f32 %v13596_v43, %v13596_v43 }
 0xb7e   :  { %v10435_v46 = vpop.eup %10434  ;;  %v3841_v61 = vmul.f32 %v3759_v62, %v3759_v62  ;;  %v13611_v48 = vadd.f32 %v13518_v2, %v3898_v4  ;;  %v3976_v11 = vmul.f32 %v13599_v28, %v13599_v28 }
 0xb7f   :  { %v10437_v41 = vpop.eup %10436  ;;  %v3842_v5 = vmul.f32 %v3761_v7, %v3761_v7  ;;  %v3899_v25 = vmul.f32 %v10435_v46, %v3877_v31  ;;  %v3977_v40 = vmul.f32 %v13608_v49, %v13608_v49 }
 0xb80   :  { %10446 = vtanh.f32 %v3841_v61  ;;  %3946 = vadd.xlane.f32.xlu0 %v3945_v51  ;;  %v3948_v42 = vadd.f32 %v13611_v48, %v13608_v49  ;;  %v3978_v2 = vmul.f32 %v13611_v48, %v13611_v48  ;;  %v3900_v27 = vmul.f32 %v10437_v41, %v3877_v31 }
 0xb81   :  { %10448 = vtanh.f32 %v3842_v5  ;;  %v13624_v45 = vadd.f32 %v13527_v37, %v3899_v25  ;;  %v3993_v23 = vadd.f32 %v3976_v11, %v3975_v18 }
 0xb82   :  { %v10439_v47 = vpop.eup %10438  ;;  %3949 = vadd.xlane.f32.xlu1 %v3948_v42  ;;  %v13627_v21 = vadd.f32 %v13530_v6, %v3900_v27  ;;  %v3996_v59 = vadd.f32 %v3978_v2, %v3977_v40 }
 0xb83   :  { %v10441_v50 = vpop.eup %10440  ;;  %v3901_v58 = vmul.f32 %v10439_v47, %v13500_v9  ;;  %v3979_v6 = vmul.f32 %v13624_v45, %v13624_v45 }
 0xb84   :  { %3994 = vadd.xlane.f32.xlu0 %v3993_v23  ;;  %v3902_v0 = vmul.f32 %v10441_v50, %v13500_v9  ;;  %v3951_v37 = vadd.f32 %v13627_v21, %v13624_v45  ;;  %v3980_v13 = vmul.f32 %v13627_v21, %v13627_v21 }
 0xb85   :  { %v13632_v55 = vadd.f32 %v13539_v12, %v3901_v58 }
 0xb86   :  { %v10443_v10 = vpop.eup %10442  ;;  %3997 = vadd.xlane.f32.xlu1 %v3996_v59  ;;  %v13637_v60 = vadd.f32 %v13542_v14, %v3902_v0  ;;  %v3999_v35 = vadd.f32 %v3980_v13, %v3979_v6 }
 0xb87   :  { %v10445_v26 = vpop.eup %10444  ;;  %v3903_v9 = vmul.f32 %v10443_v10, %v3885_v17  ;;  %v3981_v63 = vmul.f32 %v13632_v55, %v13632_v55 }
 0xb88   :  { %3952 = vadd.xlane.f32.xlu0 %v3951_v37  ;;  %v3954_v12 = vadd.f32 %v13637_v60, %v13632_v55  ;;  %v3982_v34 = vmul.f32 %v13637_v60, %v13637_v60  ;;  %v3904_v14 = vmul.f32 %v10445_v26, %v3885_v17 }
 0xb89   :  { %v13650_v32 = vadd.f32 %v13547_v1, %v3903_v9 }
 0xb8a   :  { %v10447_v36 = vpop.eup %10446  ;;  %3955 = vadd.xlane.f32.xlu1 %v3954_v12  ;;  %v13653_v39 = vadd.f32 %v13549_v38, %v3904_v14  ;;  %v4002_v22 = vadd.f32 %v3982_v34, %v3981_v63 }
 0xb8b   :  { %v10449_v53 = vpop.eup %10448  ;;  %v3905_v20 = vmul.f32 %v10447_v36, %v3889_v57  ;;  %v3983_v29 = vmul.f32 %v13650_v32, %v13650_v32 }
 0xb8c   :  { %v3906_v3 = vmul.f32 %v10449_v53, %v3889_v57  ;;  %4000 = vadd.xlane.f32.xlu0 %v3999_v35  ;;  %v3957_v1 = vadd.f32 %v13653_v39, %v13650_v32  ;;  %v3984_v38 = vmul.f32 %v13653_v39, %v13653_v39  ;;  %v13676_v35 = vld [vmem:[%s15975_s7] sm:$0xff] }
 0xb8d   :  { %v13656_v44 = vadd.f32 %v13557_v56, %v3905_v20 }
 0xb8e   :  { %v13659_v62 = vadd.f32 %v13559_v19, %v3906_v3  ;;  %4003 = vadd.xlane.f32.xlu1 %v4002_v22  ;;  %v4005_v7 = vadd.f32 %v3984_v38, %v3983_v29 }
 0xb8f   :  { %v3985_v56 = vmul.f32 %v13656_v44, %v13656_v44 }
 0xb90   :  { %3958 = vadd.xlane.f32.xlu0 %v3957_v1  ;;  %v3960_v4 = vadd.f32 %v13659_v62, %v13656_v44  ;;  %v3986_v19 = vmul.f32 %v13659_v62, %v13659_v62 }
 0xb92   :  { %3961 = vadd.xlane.f32.xlu1 %v3960_v4  ;;  %v4008_v51 = vadd.f32 %v3986_v19, %v3985_v56 }
 0xb94   :  { %4006 = vadd.xlane.f32.xlu0 %v4005_v7 }
 0xb96   :  { %4009 = vadd.xlane.f32.xlu1 %v4008_v51 }
 0xc03   :  { %v3941_v46 = vpop.xlane.xlu1 %3940 }
 0xc04   :  { %v3963_v31 = vmul.f32 0.00390625, %v3941_v46 }
 0xc05   :  { %v3989_v61 = vpop.xlane.xlu0 %3988 }
 0xc06   :  { %v4019_v18 = vmul.f32 %v3963_v31, %v3963_v31  ;;  %v4011_v11 = vmul.f32 0.00390625, %v3989_v61  ;;  %v13686_v61 = vld [vmem:[%s15975_s7 + $0x8] sm:$0xff] }
 0xc08   :  { %v4027_v41 = vsub.f32 %v4011_v11, %v4019_v18 }
 0xc09   :  { %v3944_v5 = vpop.xlane.xlu0 %3943 }
 0xc0a   :  { %v4035_v25 = vadd.f32 1e-05, %v4027_v41  ;;  %v3964_v42 = vmul.f32 0.00390625, %v3944_v5  ;;  %v3992_v40 = vpop.xlane.xlu1 %3991 }
 0xc0b   :  { %v4012_v27 = vmul.f32 0.00390625, %v3992_v40 }
 0xc0c   :  { %10450 = vrsqrt.f32 %v4035_v25  ;;  %v4020_v2 = vmul.f32 %v3964_v42, %v3964_v42 }
 0xc0d   :  { %v3947_v47 = vpop.xlane.xlu0 %3946 }
 0xc0e   :  { %v4028_v23 = vsub.f32 %v4012_v27, %v4020_v2  ;;  %v3965_v50 = vmul.f32 0.00390625, %v3947_v47 }
 0xc0f   :  { %v3950_v58 = vpop.xlane.xlu1 %3949 }
 0xc10   :  { %v4036_v59 = vadd.f32 1e-05, %v4028_v23  ;;  %v3966_v0 = vmul.f32 0.00390625, %v3950_v58  ;;  %v4021_v17 = vmul.f32 %v3965_v50, %v3965_v50 }
 0xc11   :  { %v3995_v10 = vpop.xlane.xlu0 %3994 }
 0xc12   :  { %10452 = vrsqrt.f32 %v4036_v59  ;;  %v4013_v37 = vmul.f32 0.00390625, %v3995_v10  ;;  %v4022_v13 = vmul.f32 %v3966_v0, %v3966_v0  ;;  %v13693_v10 = vld [vmem:[%s15975_s7 + $0x10] sm:$0xff] }
 0xc13   :  { %v3998_v6 = vpop.xlane.xlu1 %3997 }
 0xc14   :  { %v4029_v26 = vsub.f32 %v4013_v37, %v4021_v17  ;;  %v4014_v9 = vmul.f32 0.00390625, %v3998_v6 }
 0xc15   :  { %v3953_v12 = vpop.xlane.xlu0 %3952 }
 0xc16   :  { %v10451_v63 = vpop.eup %10450  ;;  %v4037_v34 = vadd.f32 1e-05, %v4029_v26  ;;  %v4030_v14 = vsub.f32 %v4014_v9, %v4022_v13  ;;  %v3967_v36 = vmul.f32 0.00390625, %v3953_v12  ;;  %v13699_v9 = vld [vmem:[%s15975_s7 + $0x18] sm:$0xff] }
 0xc17   :  { %v3956_v57 = vpop.xlane.xlu1 %3955  ;;  %v13679_v53 = vmul.f32 %v13676_v35, %v10451_v63 }
 0xc18   :  { %10454 = vrsqrt.f32 %v4037_v34  ;;  %v4038_v20 = vadd.f32 1e-05, %v4030_v14  ;;  %v3968_v3 = vmul.f32 0.00390625, %v3956_v57  ;;  %v4023_v29 = vmul.f32 %v3967_v36, %v3967_v36 }
 0xc19   :  { %v4001_v22 = vpop.xlane.xlu0 %4000  ;;  %v4059_v1 = vmul.f32 %v13679_v53, %v3963_v31 }
 0xc1a   :  { %10456 = vrsqrt.f32 %v4038_v20  ;;  %v4015_v38 = vmul.f32 0.00390625, %v4001_v22  ;;  %v4024_v19 = vmul.f32 %v3968_v3, %v3968_v3 }
 0xc1b   :  { %4075 = vrot.lane.b32.xlu0 %v4059_v1, %s10760_s25  ;;  %v4004_v4 = vpop.xlane.xlu1 %4003 }
 0xc1c   :  { %v10453_v56 = vpop.eup %10452  ;;  %v4031_v7 = vsub.f32 %v4015_v38, %v4023_v29  ;;  %v4016_v51 = vmul.f32 0.00390625, %v4004_v4  ;;  %v13713_v38 = vld [vmem:[%s15975_s7 + $0x28] sm:$0xff] }
 0xc1d   :  { %v3959_v46 = vpop.xlane.xlu0 %3958  ;;  %v4052_v18 = vmul.f32 %v13686_v61, %v10453_v56 }
 0xc1e   :  { %v4039_v11 = vadd.f32 1e-05, %v4031_v7  ;;  %v4032_v31 = vsub.f32 %v4016_v51, %v4024_v19  ;;  %v3969_v41 = vmul.f32 0.00390625, %v3959_v46  ;;  %v13721_v19 = vld [vmem:[%s15975_s7 + $0x30] sm:$0xff]  ;;  %v13727_v46 = vld [vmem:[%s15975_s7 + $0x38] sm:$0xff] }
 0xc1f   :  { %v3962_v5 = vpop.xlane.xlu1 %3961  ;;  %v4060_v25 = vmul.f32 %v4052_v18, %v3964_v42 }
 0xc20   :  { %10458 = vrsqrt.f32 %v4039_v11  ;;  %v4040_v40 = vadd.f32 1e-05, %v4032_v31  ;;  %v3970_v2 = vmul.f32 0.00390625, %v3962_v5  ;;  %v4025_v23 = vmul.f32 %v3969_v41, %v3969_v41 }
 0xc21   :  { %v4007_v27 = vpop.xlane.xlu0 %4006  ;;  %4077 = vrot.lane.b32.xlu1 %v4060_v25, %s10760_s25 }
 0xc22   :  { %v10455_v47 = vpop.eup %10454  ;;  %10460 = vrsqrt.f32 %v4040_v40  ;;  %v4017_v58 = vmul.f32 0.00390625, %v4007_v27  ;;  %v4026_v42 = vmul.f32 %v3970_v2, %v3970_v2 }
 0xc23   :  { %v4010_v59 = vpop.xlane.xlu1 %4009  ;;  %v4053_v17 = vmul.f32 %v13693_v10, %v10455_v47 }
 0xc24   :  { %v10457_v37 = vpop.eup %10456  ;;  %v4033_v6 = vsub.f32 %v4017_v58, %v4025_v23  ;;  %v4018_v13 = vmul.f32 0.00390625, %v4010_v59 }
 0xc25   :  { %v4061_v26 = vmul.f32 %v4053_v17, %v3965_v50  ;;  %v4054_v12 = vmul.f32 %v13699_v9, %v10457_v37  ;;  %v13707_v50 = vld [vmem:[%s15975_s7 + $0x20] sm:$0xff] }
 0xc26   :  { %v4041_v63 = vadd.f32 1e-05, %v4033_v6  ;;  %v4034_v34 = vsub.f32 %v4018_v13, %v4026_v42  ;;  %v10768_v6 = vmov 5   ;;  %v10690_v13 = vld [vmem:[%s15975_s7 + $0x40] sm:$0xff] }
 0xc27   :  { %4079 = vrot.lane.b32.xlu1 %v4061_v26, %s10760_s25  ;;  %v4062_v14 = vmul.f32 %v4054_v12, %v3966_v0  ;;  %v10691_v26 = vld [vmem:[%s15975_s7 + $0x48] sm:$0xff] }
 0xc28   :  { %10462 = vrsqrt.f32 %v4041_v63  ;;  %v4042_v57 = vadd.f32 1e-05, %v4034_v34  ;;  %v10693_v63 = vld [vmem:[%s15975_s7 + $0x50] sm:$0xff]  ;;  %v10694_v34 = vld [vmem:[%s15975_s7 + $0x88] sm:$0xff] }
 0xc29   :  { %4081 = vrot.lane.b32.xlu0 %v4062_v14, %s10760_s25  ;;  %v10695_v14 = vld [vmem:[%s15975_s7 + $0x90] sm:$0xff] }
 0xc2a   :  { %v10459_v20 = vpop.eup %10458  ;;  %10464 = vrsqrt.f32 %v4042_v57  ;;  %v10696_v57 = vld [vmem:[%s15975_s7 + $0x58] sm:$0xff] }
 0xc2b   :  { %v4055_v22 = vmul.f32 %v13707_v50, %v10459_v20  ;;  %v10697_v20 = vld [vmem:[%s15975_s7 + $0x60] sm:$0xff] }
 0xc2c   :  { %v10461_v1 = vpop.eup %10460 }
 0xc2d   :  { %v4063_v29 = vmul.f32 %v4055_v22, %v3967_v36  ;;  %v4056_v0 = vmul.f32 %v13713_v38, %v10461_v1  ;;  %v10699_v1 = vld [vmem:[%s15975_s7 + $0xa0] sm:$0xff] }
 0xc2f   :  { %4083 = vrot.lane.b32.xlu1 %v4063_v29, %s10760_s25  ;;  %v4064_v4 = vmul.f32 %v4056_v0, %v3968_v3  ;;  %v10700_v29 = vld [vmem:[%s15975_s7 + $0x68] sm:$0xff] }
 0xc31   :  { %4085 = vrot.lane.b32.xlu0 %v4064_v4, %s10760_s25  ;;  %v10702_v4 = vld [vmem:[%s15975_s7 + $0xa8] sm:$0xff] }
 0xc32   :  { %v10463_v56 = vpop.eup %10462 }
 0xc33   :  { %v4057_v36 = vmul.f32 %v13721_v19, %v10463_v56  ;;  %v10703_v56 = vld [vmem:[%s15975_s7 + $0xb0] sm:$0xff] }
 0xc34   :  { %v10465_v7 = vpop.eup %10464 }
 0xc35   :  { %v4065_v51 = vmul.f32 %v4057_v36, %v3969_v41  ;;  %v4058_v11 = vmul.f32 %v13727_v46, %v10465_v7  ;;  %v13804_v7 = vld [vmem:[%s15975_s7 + $0xb8] sm:$0xff] }
 0xc37   :  { %4087 = vrot.lane.b32.xlu1 %v4065_v51, %s10760_s25  ;;  %v4066_v3 = vmul.f32 %v4058_v11, %v3970_v2  ;;  %v10769_v51 = vmov 12  }
 0xc39   :  { %4089 = vrot.lane.b32.xlu0 %v4066_v3, %s10760_s25 }
 0xc3b   :  { %4109 = vperm.xlu1 %10035, %v13679_v53  }
 0xc3d   :  { %4114 = vperm.xlu0 %10036, %v4052_v18  }
 0xc3f   :  { %4124 = vperm.xlu1 %10035, %v4054_v12   ;;  %v10692_v12 = vld [vmem:[%s15975_s7 + $0x80] sm:$0xff] }
 0xc41   :  { %4119 = vperm.xlu0 %10036, %v4053_v17  }
 0xc43   :  { %4129 = vperm.xlu1 %10035, %v4055_v22   ;;  %v10698_v22 = vld [vmem:[%s15975_s7 + $0x98] sm:$0xff] }
 0xc45   :  { %4134 = vperm.xlu0 %10036, %v4056_v0   ;;  %v13785_v0 = vld [vmem:[%s15975_s7 + $0x70] sm:$0xff] }
 0xc47   :  { %10037 = vset.pattern.permute.xlu1 %v10761_v30 }
 0xc49   :  { %10038 = vset.pattern.permute.xlu0 %v10761_v30 }
 0xc8d   :  { %v4076_v31 = vpop.permute.xlu0 %4075 }
 0xc8e   :  { %v4099_v41 = vsub.f32 %v13676_v35, %v4076_v31 }
 0xc90   :  { %4165 = vperm.xlu1 %10037, %v4099_v41  }
 0xc93   :  { %v4078_v5 = vpop.permute.xlu1 %4077 }
 0xc94   :  { %v4100_v25 = vsub.f32 %v13686_v61, %v4078_v5 }
 0xc96   :  { %4170 = vperm.xlu1 %10037, %v4100_v25  }
 0xc99   :  { %v4080_v40 = vpop.permute.xlu1 %4079 }
 0xc9a   :  { %v4101_v53 = vsub.f32 %v13693_v10, %v4080_v40  ;;  %10040 = vset.pattern.permute.xlu1 %v10759_v8 }
 0xc9b   :  { %v4082_v18 = vpop.permute.xlu0 %4081  ;;  %4144 = vperm.xlu1 %10040, %v4058_v11  }
 0xc9c   :  { %4175 = vperm.xlu0 %10038, %v4101_v53   ;;  %v4102_v2 = vsub.f32 %v13699_v9, %v4082_v18 }
 0xc9f   :  { %10041 = vset.pattern.permute.xlu1 %v10761_v30 }
 0xca0   :  { %4180 = vperm.xlu1 %10041, %v4102_v2   ;;  %10039 = vset.pattern.permute.xlu0 %v10759_v8 }
 0xca1   :  { %4139 = vperm.xlu0 %10039, %v4057_v36   ;;  %v4084_v27 = vpop.permute.xlu1 %4083  ;;  %v13797_v36 = vld [vmem:[%s15975_s7 + $0x78] sm:$0xff] }
 0xca2   :  { %v4103_v47 = vsub.f32 %v13707_v50, %v4084_v27 }
 0xca3   :  { %v4086_v23 = vpop.permute.xlu0 %4085 }
 0xca4   :  { %4185 = vperm.xlu1 %10041, %v4103_v47   ;;  %v4104_v58 = vsub.f32 %v13713_v38, %v4086_v23 }
 0xca5   :  { %10042 = vset.pattern.permute.xlu0 %v10761_v30 }
 0xca8   :  { %4190 = vperm.xlu1 %10041, %v4104_v58  }
 0xca9   :  { %v4088_v59 = vpop.permute.xlu1 %4087 }
 0xcaa   :  { %v4105_v17 = vsub.f32 %v13721_v19, %v4088_v59 }
 0xcab   :  { %v4090_v37 = vpop.permute.xlu0 %4089 }
 0xcac   :  { %v4106_v42 = vsub.f32 %v13727_v46, %v4090_v37  ;;  %4195 = vperm.xlu0 %10042, %v4105_v17  }
 0xcae   :  { %4200 = vperm.xlu1 %10041, %v4106_v42  }
 0xcb0   :  { %10044 = vset.pattern.permute.xlu0 %v10768_v6 }
 0xcb1   :  { %4281 = vperm.xlu0 %10044, %v10691_v26  }
 0xcb2   :  { %10043 = vset.pattern.permute.xlu1 %v10768_v6 }
 0xcb3   :  { %4277 = vperm.xlu1 %10043, %v10690_v13  }
 0xcb5   :  { %4285 = vperm.xlu0 %10044, %v10693_v63  }
 0xcb7   :  { %4309 = vperm.xlu1 %10043, %v10692_v12  }
 0xcb9   :  { %4317 = vperm.xlu0 %10044, %v10695_v14  }
 0xcba   :  { %v4110_v11 = vpop.permute.xlu1 %4109 }
 0xcbb   :  { %4313 = vperm.xlu1 %10043, %v10694_v34   ;;  %v4147_v40 = vmul.f32 %v4110_v11, %v13568_v15  ;;  %v4148_v53 = vmul.f32 %v4110_v11, %v13571_v54 }
 0xcbc   :  { %v4115_v31 = vpop.permute.xlu0 %4114 }
 0xcbd   :  { %4293 = vperm.xlu0 %10044, %v10697_v20   ;;  %v4149_v18 = vmul.f32 %v4115_v31, %v13582_v33  ;;  %v4150_v2 = vmul.f32 %v4115_v31, %v13585_v52 }
 0xcbe   :  { %v4125_v3 = vpop.permute.xlu1 %4124 }
 0xcbf   :  { %4289 = vperm.xlu1 %10043, %v10696_v57   ;;  %v4153_v33 = vmul.f32 %v4125_v3, %v13608_v49  ;;  %v4154_v52 = vmul.f32 %v4125_v3, %v13611_v48 }
 0xcc0   :  { %v4120_v25 = vpop.permute.xlu0 %4119 }
 0xcc1   :  { %4325 = vperm.xlu0 %10044, %v10699_v1  }
 0xcc2   :  { %v4130_v41 = vpop.permute.xlu1 %4129 }
 0xcc3   :  { %4321 = vperm.xlu1 %10043, %v10698_v22   ;;  %v4155_v49 = vmul.f32 %v4130_v41, %v13624_v45 }
 0xcc4   :  { %v4135_v42 = vpop.permute.xlu0 %4134 }
 0xcc5   :  { %4301 = vperm.xlu0 %10044, %v13785_v0   ;;  %v4158_v48 = vmul.f32 %v4135_v42, %v13637_v60 }
 0xcc7   :  { %4297 = vperm.xlu1 %10043, %v10700_v29  }
 0xcc9   :  { %4333 = vperm.xlu0 %10044, %v10703_v56  }
 0xccb   :  { %4329 = vperm.xlu1 %10043, %v10702_v4  }
 0xccd   :  { %4245 = vperm.xlu0 %10044, %v13676_v35  }
 0xccf   :  { %4305 = vperm.xlu1 %10043, %v13797_v36  }
 0xcd1   :  { %4257 = vperm.xlu0 %10044, %v13699_v9  }
 0xcd3   :  { %4337 = vperm.xlu1 %10043, %v13804_v7  }
 0xcd5   :  { %4265 = vperm.xlu0 %10044, %v13713_v38  }
 0xcd7   :  { %4249 = vperm.xlu1 %10043, %v13686_v61  }
 0xcd9   :  { %4273 = vperm.xlu0 %10044, %v13727_v46  }
 0xcdb   :  { %10045 = vset.pattern.permute.xlu1 %v10769_v51 }
 0xcdc   :  { %4642 = vperm.xlu1 %10045, %v10691_v26   ;;  %v4152_v26 = vmul.f32 %v4120_v25, %v13599_v28  ;;  %v4157_v28 = vmul.f32 %v4135_v42, %v13632_v55  ;;  %v16121_v42 = vld [vmem:[#allocation11_spill] sm:$0xff] }
 0xcdd   :  { %10051 = vset.pattern.permute.xlu0 %v10769_v51 }
 0xcde   :  { %4638 = vperm.xlu0 %10051, %v10690_v13   ;;  %v4151_v13 = vmul.f32 %v4120_v25, %v13596_v43  ;;  %v4156_v43 = vmul.f32 %v4130_v41, %v13627_v21 }
 0xce0   :  { %4718 = vperm.xlu1 %10045, %v10692_v12  }
 0xce2   :  { %4722 = vperm.xlu0 %10051, %v10694_v34  }
 0xce4   :  { %10046 = vset.pattern.permute.xlu1 %v10768_v6 }
 0xce5   :  { %4253 = vperm.xlu1 %10046, %v13693_v10  }
 0xce6   :  { %4726 = vperm.xlu0 %10051, %v10695_v14  }
 0xce9   :  { %10047 = vset.pattern.permute.xlu1 %v10769_v51 }
 0xcea   :  { %4646 = vperm.xlu1 %10047, %v10693_v63   ;;  %4734 = vperm.xlu0 %10051, %v10699_v1  }
 0xcee   :  { %4650 = vperm.xlu1 %10047, %v10696_v57   ;;  %4742 = vperm.xlu0 %10051, %v10703_v56  }
 0xcf2   :  { %4730 = vperm.xlu1 %10047, %v10698_v22  }
 0xcf6   :  { %10048 = vset.pattern.permute.xlu1 %v10768_v6 }
 0xcf7   :  { %4261 = vperm.xlu1 %10048, %v13707_v50  }
 0xcfb   :  { %10049 = vset.pattern.permute.xlu1 %v10769_v51 }
 0xcfc   :  { %4654 = vperm.xlu1 %10049, %v10697_v20  }
 0xd00   :  { %4658 = vperm.xlu1 %10049, %v10700_v29  }
 0xd04   :  { %4738 = vperm.xlu1 %10049, %v10702_v4  }
 0xd08   :  { %10050 = vset.pattern.permute.xlu1 %v10768_v6 }
 0xd09   :  { %4269 = vperm.xlu1 %10050, %v13721_v19  }
 0xd0d   :  { %10052 = vset.pattern.permute.xlu1 %v10769_v51 }
 0xd0e   :  { %4662 = vperm.xlu1 %10052, %v13785_v0  }
 0xd0f   :  { %v4166_v5 = vpop.permute.xlu1 %4165 }
 0xd10   :  { %v4203_v47 = vadd.f32 %v4166_v5, %v4147_v40  ;;  %v4204_v23 = vadd.f32 %v4166_v5, %v4148_v53 }
 0xd12   :  { %4666 = vperm.xlu1 %10052, %v13797_v36   ;;  %v8917_v36 = vld [vmem:[%s15971_s3 + $0x310] sm:$0xff] }
 0xd15   :  { %v4171_v27 = vpop.permute.xlu1 %4170 }
 0xd16   :  { %v4205_v58 = vadd.f32 %v4171_v27, %v4149_v18  ;;  %v4206_v59 = vadd.f32 %v4171_v27, %v4150_v2  ;;  %4746 = vperm.xlu1 %10052, %v13804_v7   ;;  %v16117_v7 = vld [vmem:[#allocation7_spill] sm:$0xff]  ;;  %v16118_v27 = vld [vmem:[#allocation8_spill] sm:$0xff] }
 0xd18   :  { %v9522_v17 = vpack.c.bf16 %v4205_v58, %v4203_v47  ;;  %v9520_v37 = vpack.c.bf16 %v4206_v59, %v4204_v23  ;;  %v8918_v47 = vld [vmem:[%s15971_s3 + $0x318] sm:$0xff]  ;;  %v8919_v23 = vld [vmem:[%s15971_s3 + $0x320] sm:$0xff]  ;;  %v16120_v59 = vld [vmem:[#allocation10_spill] sm:$0xff] }
 0xd19   :  { %v16119_v58 = vld [vmem:[#allocation9_spill] sm:$0xff] }
 0xd1a   :  { %9521 = vmatprep.subr.bf16.mxu0 %v9520_v37  ;;  %v4145_v15 = vpop.permute.xlu1 %4144  ;;  %v8921_v37 = vld [vmem:[%s15971_s3 + $0x330] sm:$0xff] }
 0xd1b   :  { %9523 = vmatpush1.bf16.msra.mxu0 %v9522_v17  ;;  %v4176_v54 = vpop.permute.xlu0 %4175  ;;  %v4161_v45 = vmul.f32 %v4145_v15, %v13656_v44  ;;  %v4162_v21 = vmul.f32 %v4145_v15, %v13659_v62  ;;  %v8915_v44 = vld [vmem:[%s15971_s3 + $0x300] sm:$0xff]  ;;  %v8920_v17 = vld [vmem:[%s15971_s3 + $0x328] sm:$0xff] }
 0xd1c   :  { %v4207_v63 = vadd.f32 %v4176_v54, %v4151_v13  ;;  %v4208_v34 = vadd.f32 %v4176_v54, %v4152_v26  ;;  %v16122_v15 = vld [vmem:[#allocation12_spill] sm:$0xff]  ;;  %v16124_v13 = vld [vmem:[#allocation15_spill] sm:$0xff]  ;;  %v8924_v26 = vld [vmem:[%s15971_s3 + $0x348] sm:$0xff] }
 0xd1d   :  { %v8922_v54 = vld [vmem:[%s15971_s3 + $0x338] sm:$0xff] }
 0xd1f   :  { %v4181_v12 = vpop.permute.xlu1 %4180 }
 0xd20   :  { %v4209_v14 = vadd.f32 %v4181_v12, %v4153_v33  ;;  %v4210_v57 = vadd.f32 %v4181_v12, %v4154_v52  ;;  %v4140_v29 = vpop.permute.xlu0 %4139  ;;  %v8923_v33 = vld [vmem:[%s15971_s3 + $0x340] sm:$0xff]  ;;  %v16123_v52 = vld [vmem:[#allocation14_spill] sm:$0xff] }
 0xd21   :  { %v4159_v55 = vmul.f32 %v4140_v29, %v13650_v32  ;;  %v4160_v60 = vmul.f32 %v4140_v29, %v13653_v39  ;;  %v16115_v32 = vld [vmem:[#allocation5_spill] sm:$0xff]  ;;  %v8925_v12 = vld [vmem:[%s15971_s3 + $0x350] sm:$0xff] }
 0xd22   :  { %v9526_v20 = vpack.c.bf16 %v4209_v14, %v4207_v63  ;;  %v9524_v22 = vpack.c.bf16 %v4210_v57, %v4208_v34  ;;  %v8916_v39 = vld [vmem:[%s15971_s3 + $0x308] sm:$0xff]  ;;  %v16126_v34 = vld [vmem:[#allocation20_spill] sm:$0xff] }
 0xd23   :  { %v4186_v1 = vpop.permute.xlu1 %4185  ;;  %v16125_v63 = vld [vmem:[#allocation18_spill] sm:$0xff]  ;;  %v8926_v14 = vld [vmem:[%s15971_s3 + $0x358] sm:$0xff]  ;;  %v8927_v57 = vld [vmem:[%s15971_s3 + $0x360] sm:$0xff] }
 0xd24   :  { %9525 = vmatprep.subr.bf16.mxu0 %v9524_v22  ;;  %v4211_v6 = vadd.f32 %v4186_v1, %v4155_v49  ;;  %v4212_v56 = vadd.f32 %v4186_v1, %v4156_v43  ;;  %v16128_v22 = vld [vmem:[#allocation25_spill] sm:$0xff]  ;;  %v8929_v49 = vld [vmem:[%s15971_s3 + $0x370] sm:$0xff] }
 0xd25   :  { %9527 = vmatpush1.bf16.msra.mxu0 %v9526_v20  ;;  %v16127_v20 = vld [vmem:[#allocation23_spill] sm:$0xff]  ;;  %v8928_v1 = vld [vmem:[%s15971_s3 + $0x368] sm:$0xff]  ;;  %v8931_v29 = vld [vmem:[%s15971_s3 + $0x380] sm:$0xff] }
 0xd26   :  { %v16129_v43 = vld [vmem:[#allocation26_spill] sm:$0xff] }
 0xd27   :  { %v4191_v4 = vpop.permute.xlu1 %4190 }
 0xd28   :  { %v4213_v11 = vadd.f32 %v4191_v4, %v4157_v28  ;;  %v4214_v3 = vadd.f32 %v4191_v4, %v4158_v48  ;;  %v16130_v28 = vld [vmem:[#allocation27_spill] sm:$0xff]  ;;  %v16131_v4 = vld [vmem:[#allocation28_spill] sm:$0xff] }
 0xd29   :  { %v8930_v48 = vld [vmem:[%s15971_s3 + $0x378] sm:$0xff] }
 0xd2a   :  { %v9530_v31 = vpack.c.bf16 %v4213_v11, %v4211_v6  ;;  %v9528_v5 = vpack.c.bf16 %v4214_v3, %v4212_v56  ;;  %v8932_v6 = vld [vmem:[%s15971_s3 + $0x388] sm:$0xff]  ;;  %v8933_v56 = vld [vmem:[%s15971_s3 + $0x390] sm:$0xff]  ;;  %v8934_v11 = vld [vmem:[%s15971_s3 + $0x398] sm:$0xff] }
 0xd2b   :  { %v4196_v25 = vpop.permute.xlu0 %4195  ;;  %v8935_v3 = vld [vmem:[%s15971_s3 + $0x3a0] sm:$0xff] }
 0xd2c   :  { %9529 = vmatprep.subr.bf16.mxu0 %v9528_v5  ;;  %v4215_v51 = vadd.f32 %v4196_v25, %v4159_v55  ;;  %v4216_v41 = vadd.f32 %v4196_v25, %v4160_v60  ;;  %v8937_v5 = vld [vmem:[%s15971_s3 + $0x3b0] sm:$0xff]  ;;  %v8938_v25 = vld [vmem:[%s15971_s3 + $0x3b8] sm:$0xff] }
 0xd2d   :  { %9531 = vmatpush1.bf16.msra.mxu0 %v9530_v31  ;;  %v4201_v0 = vpop.permute.xlu1 %4200  ;;  %v8936_v31 = vld [vmem:[%s15971_s3 + $0x3a8] sm:$0xff]  ;;  %v5657_v55 = vld [vmem:[%s15972_s4 + $0xd0] sm:$0xff]  ;;  %v5658_v60 = vld [vmem:[%s15972_s4 + $0xd8] sm:$0xff] }
 0xd2e   :  { %v4217_v40 = vadd.f32 %v4201_v0, %v4161_v45  ;;  %v4218_v53 = vadd.f32 %v4201_v0, %v4162_v21  ;;  %v5655_v45 = vld [vmem:[%s15972_s4 + $0xc0] sm:$0xff]  ;;  %v5656_v21 = vld [vmem:[%s15972_s4 + $0xc8] sm:$0xff] }
 0xd2f   :  { %v5659_v0 = vld [vmem:[%s15972_s4 + $0xe0] sm:$0xff] }
 0xd30   :  { %v9534_v18 = vpack.c.bf16 %v4217_v40, %v4215_v51  ;;  %v9532_v2 = vpack.c.bf16 %v4218_v53, %v4216_v41  ;;  %v10770_v51 = vmov 16   ;;  %v5660_v41 = vld [vmem:[%s15972_s4 + $0xe8] sm:$0xff] }
 0xd31   :  { %10053 = vset.pattern.permute.xlu1 %v10770_v51  ;;  %10054 = vset.pattern.permute.xlu0 %v10770_v51 }
 0xd32   :  { %9533 = vmatprep.subr.bf16.mxu0 %v9532_v2  ;;  %5664 = vperm.xlu1 %10053, %v13676_v35   ;;  %v5661_v35 = vld [vmem:[%s15972_s4 + $0xf0] sm:$0xff] }
 0xd33   :  { %9535 = vmatpush1.bf16.msra.mxu0 %v9534_v18  ;;  %5668 = vperm.xlu0 %10054, %v13686_v61   ;;  %v5662_v61 = vld [vmem:[%s15972_s4 + $0xf8] sm:$0xff]  ;;  %v4282_v18 = vpop.permute.xlu0 %4281 }
 0xd34   :  { %9554 = vmatprep.subr.msk.bf16.mxu0 %vm10842_vm1, %v16115_v32 }
 0xd36   :  { %8939 = vmatmul.mubr.msk.f32.vlgmr.msra.gmra.mrb[96].mxu0 %vm907_vm2, %v8915_v44  ;;  %5672 = vperm.xlu1 %10053, %v13693_v10   ;;  %v4278_v10 = vpop.permute.xlu1 %4277 }
 0xd37   :  { %4482 = vmatprep.mubr.f32.mxu0 %v16114_v24  ;;  %5680 = vperm.xlu0 %10054, %v13707_v50   ;;  %v4286_v44 = vpop.permute.xlu0 %4285 }
 0xd3a   :  { %8940 = vmatmul.mubr.msk.f32.gmra.mrb[98].mxu0 %vm907_vm2, %v8916_v39  ;;  %5676 = vperm.xlu1 %10053, %v13699_v9   ;;  %v14059_v9 = vpop.permute.xlu1 %4309 }
 0xd3b   :  { %4488 = vmatprep.mubr.f32.mxu0 %v16114_v24  ;;  %5688 = vperm.xlu0 %10054, %v13721_v19   ;;  %v14077_v32 = vpop.permute.xlu0 %4317 }
 0xd3c   :  { %9557 = vmatpush3.bf16.xpose.msk.msra.mxu0 %vm10842_vm1, %v16117_v7 }
 0xd3d   :  { %9560 = vmatprep.subr.msk.bf16.mxu0 %vm10842_vm1, %v16118_v27 }
 0xd3e   :  { %8941 = vmatmul.mubr.msk.f32.gmra.mrb[100].mxu0 %vm907_vm2, %v8917_v36  ;;  %5684 = vperm.xlu1 %10053, %v13713_v38   ;;  %v14061_v50 = vpop.permute.xlu1 %4313 }
 0xd3f   :  { %4494 = vmatprep.mubr.f32.mxu0 %v16114_v24  ;;  %10055 = vset.pattern.permute.xlu0 %v10759_v8  ;;  %v14081_v7 = vpop.permute.xlu0 %4293 }
 0xd42   :  { %8942 = vmatmul.mubr.msk.f32.gmra.mrb[102].mxu0 %vm907_vm2, %v8918_v47  ;;  %5692 = vperm.xlu1 %10053, %v13727_v46   ;;  %v14063_v38 = vpop.permute.xlu1 %4289 }
 0xd43   :  { %4500 = vmatprep.mubr.f32.mxu0 %v16114_v24 }
 0xd44   :  { %9563 = vmatpush3.bf16.xpose.msk.msra.mxu0 %vm10842_vm1, %v16119_v58 }
 0xd45   :  { %9566 = vmatprep.subr.msk.bf16.mxu0 %vm10842_vm1, %v16120_v59  ;;  %v14091_v59 = vpop.permute.xlu0 %4325 }
 0xd46   :  { %8943 = vmatmul.mubr.msk.f32.gmra.mrb[104].mxu0 %vm907_vm2, %v8919_v23  ;;  %10056 = vset.pattern.permute.xlu1 %v10759_v8  ;;  %v14065_v19 = vpop.permute.xlu1 %4321 }
 0xd47   :  { %4506 = vmatprep.mubr.f32.mxu0 %v16114_v24 }
 0xd4a   :  { %8944 = vmatmul.mubr.msk.f32.gmra.mrb[106].mxu0 %vm907_vm2, %v8920_v17  ;;  %v14067_v40 = vpop.permute.xlu1 %4297 }
 0xd4b   :  { %4512 = vmatprep.mubr.f32.mxu0 %v16114_v24 }
 0xd4c   :  { %9569 = vmatpush3.bf16.xpose.msk.msra.mxu0 %vm10842_vm1, %v16121_v42 }
 0xd4d   :  { %9572 = vmatprep.subr.msk.bf16.mxu0 %vm10842_vm1, %v16122_v15 }
 0xd4e   :  { %8945 = vmatmul.mubr.msk.f32.gmra.mrb[108].mxu0 %vm907_vm2, %v8921_v37  ;;  %v14069_v53 = vpop.permute.xlu1 %4329 }
 0xd4f   :  { %4518 = vmatprep.mubr.f32.mxu0 %v16114_v24 }
 0xd52   :  { %8946 = vmatmul.mubr.msk.f32.gmra.mrb[110].mxu0 %vm907_vm2, %v8922_v54  ;;  %v14071_v46 = vpop.permute.xlu1 %4305  ;;  %v14101_v54 = vpop.permute.xlu0 %4301 }
 0xd53   :  { %4524 = vmatprep.mubr.f32.mxu0 %v16114_v24 }
 0xd54   :  { %9575 = vmatpush3.bf16.xpose.msk.msra.mxu0 %vm10842_vm1, %v16123_v52 }
 0xd55   :  { %9578 = vmatprep.subr.msk.bf16.mxu0 %vm10842_vm1, %v16124_v13 }
 0xd56   :  { %8947 = vmatmul.mubr.msk.f32.gmra.mrb[112].mxu0 %vm907_vm2, %v8923_v33  ;;  %v14073_v2 = vpop.permute.xlu1 %4337 }
 0xd57   :  { %4530 = vmatprep.mubr.f32.mxu0 %v16114_v24 }
 0xd5a   :  { %8948 = vmatmul.mubr.msk.f32.gmra.mrb[114].mxu0 %vm907_vm2, %v8924_v26  ;;  %v14075_v8 = vpop.permute.xlu1 %4249 }
 0xd5b   :  { %4536 = vmatprep.mubr.f32.mxu0 %v16114_v24 }
 0xd5c   :  { %9581 = vmatpush3.bf16.xpose.msk.msra.mxu0 %vm10842_vm1, %v16125_v63 }
 0xd5d   :  { %9584 = vmatprep.subr.msk.bf16.mxu0 %vm10842_vm1, %v16126_v34 }
 0xd5e   :  { %8949 = vmatmul.mubr.msk.f32.gmra.mrb[116].mxu0 %vm907_vm2, %v8925_v12  ;;  %v14079_v39 = vpop.permute.xlu1 %4642  ;;  %v14111_v12 = vpop.permute.xlu0 %4333 }
 0xd5f   :  { %4542 = vmatprep.mubr.f32.mxu0 %v16114_v24 }
 0xd62   :  { %8950 = vmatmul.mubr.msk.f32.gmra.mrb[118].mxu0 %vm907_vm2, %v8926_v14  ;;  %v14087_v23 = vpop.permute.xlu1 %4718 }
 0xd63   :  { %4548 = vmatprep.mubr.f32.mxu0 %v16114_v24 }
 0xd64   :  { %9587 = vmatpush3.bf16.xpose.msk.msra.mxu0 %vm10842_vm1, %v16127_v20  ;;  %v4246_v20 = vpop.permute.xlu0 %4245 }
 0xd65   :  { %9590 = vmatprep.subr.msk.bf16.mxu0 %vm10842_vm1, %v16128_v22 }
 0xd66   :  { %8951 = vmatmul.mubr.msk.f32.gmra.mrb[120].mxu0 %vm907_vm2, %v8927_v57  ;;  %v14097_v42 = vpop.permute.xlu1 %4253 }
 0xd67   :  { %4554 = vmatprep.mubr.f32.mxu0 %v16114_v24 }
 0xd6a   :  { %8952 = vmatmul.mubr.msk.f32.gmra.mrb[122].mxu0 %vm907_vm2, %v8928_v1  ;;  %v14107_v13 = vpop.permute.xlu1 %4646 }
 0xd6b   :  { %4560 = vmatprep.mubr.f32.mxu0 %v16114_v24 }
 0xd6c   :  { %9593 = vmatpush3.bf16.xpose.msk.msra.mxu0 %vm10842_vm1, %v16129_v43  ;;  %v14127_v43 = vpop.permute.xlu0 %4257 }
 0xd6d   :  { %9596 = vmatprep.subr.msk.bf16.mxu0 %vm10842_vm1, %v16130_v28 }
 0xd6e   :  { %8953 = vmatmul.mubr.msk.f32.gmra.mrb[124].mxu0 %vm907_vm2, %v8929_v49  ;;  %v14117_v14 = vpop.permute.xlu1 %4650 }
 0xd6f   :  { %4566 = vmatprep.mubr.f32.mxu0 %v16114_v24 }
 0xd72   :  { %8954 = vmatmul.mubr.msk.f32.gmra.mrb[126].mxu0 %vm907_vm2, %v8930_v48  ;;  %v14125_v49 = vpop.permute.xlu1 %4730 }
 0xd73   :  { %4572 = vmatprep.mubr.f32.mxu0 %v16114_v24 }
 0xd74   :  { %9599 = vmatpush3.bf16.xpose.msk.msra.mxu0 %vm10842_vm1, %v16131_v4 }
 0xd76   :  { %8955 = vmatmul.mubr.msk.f32.gmra.mrb[128].mxu0 %vm907_vm2, %v8931_v29 }
 0xd77   :  { %4578 = vmatprep.mubr.f32.mxu0 %v16114_v24 }
 0xd7a   :  { %8956 = vmatmul.mubr.msk.f32.gmra.mrb[130].mxu0 %vm907_vm2, %v8932_v6  ;;  %v14129_v6 = vpop.permute.xlu0 %4265 }
 0xd7b   :  { %4584 = vmatprep.mubr.f32.mxu0 %v16114_v24 }
 0xd7e   :  { %8957 = vmatmul.mubr.msk.f32.gmra.mrb[132].mxu0 %vm907_vm2, %v8933_v56 }
 0xd7f   :  { %4590 = vmatprep.mubr.f32.mxu0 %v16114_v24 }
 0xd82   :  { %8958 = vmatmul.mubr.msk.f32.gmra.mrb[134].mxu0 %vm907_vm2, %v8934_v11  ;;  %v14131_v11 = vpop.permute.xlu1 %4261 }
 0xd83   :  { %4596 = vmatprep.mubr.f32.mxu0 %v16114_v24 }
 0xd86   :  { %8959 = vmatmul.mubr.msk.f32.gmra.mrb[136].mxu0 %vm907_vm2, %v8935_v3 }
 0xd87   :  { %4602 = vmatprep.mubr.f32.mxu0 %v16114_v24 }
 0xd8a   :  { %8960 = vmatmul.mubr.msk.f32.gmra.mrb[138].mxu0 %vm907_vm2, %v8936_v31 }
 0xd8b   :  { %4608 = vmatprep.mubr.f32.mxu0 %v16114_v24 }
 0xd8e   :  { %8961 = vmatmul.mubr.msk.f32.gmra.mrb[140].mxu0 %vm907_vm2, %v8937_v5 }
 0xd8f   :  { %4614 = vmatprep.mubr.f32.mxu0 %v16114_v24 }
 0xd92   :  { %8962 = vmatmul.mubr.msk.f32.gmra.mrb[142].mxu0 %vm907_vm2, %v8938_v25  ;;  %v14133_v25 = vpop.permute.xlu0 %4273 }
 0xd93   :  { %9301 = vmatprep.mubr.msk.f32.mxu0 %vm233_vm0, %v5655_v45 }
 0xd96   :  { %9302 = vmatmul.mubr.msk.f32.vlgmr.msra.gmra.mrb[144].mxu0 %vm233_vm0, %v5655_v45  ;;  %v4639_v51 = vpop.permute.xlu0 %4638 }
 0xd97   :  { %9303 = vmatprep.mubr.msk.f32.mxu0 %vm233_vm0, %v5656_v21 }
 0xd9a   :  { %9304 = vmatmul.mubr.msk.f32.gmra.mrb[146].mxu0 %vm233_vm0, %v5656_v21 }
 0xd9b   :  { %9305 = vmatprep.mubr.msk.f32.mxu0 %vm233_vm0, %v5657_v55 }
 0xd9e   :  { %9306 = vmatmul.mubr.msk.f32.gmra.mrb[148].mxu0 %vm233_vm0, %v5657_v55 }
 0xd9f   :  { %9307 = vmatprep.mubr.msk.f32.mxu0 %vm233_vm0, %v5658_v60 }
 0xda2   :  { %9308 = vmatmul.mubr.msk.f32.gmra.mrb[150].mxu0 %vm233_vm0, %v5658_v60 }
 0xda3   :  { %9309 = vmatprep.mubr.msk.f32.mxu0 %vm233_vm0, %v5659_v0 }
 0xda6   :  { %9310 = vmatmul.mubr.msk.f32.gmra.mrb[152].mxu0 %vm233_vm0, %v5659_v0  ;;  %v14135_v0 = vpop.permute.xlu1 %4654 }
 0xda7   :  { %9311 = vmatprep.mubr.msk.f32.mxu0 %vm233_vm0, %v5660_v41 }
 0xdaa   :  { %9312 = vmatmul.mubr.msk.f32.gmra.mrb[154].mxu0 %vm233_vm0, %v5660_v41 }
 0xdab   :  { %9313 = vmatprep.mubr.msk.f32.mxu0 %vm233_vm0, %v5661_v35 }
 0xdae   :  { %9314 = vmatmul.mubr.msk.f32.gmra.mrb[156].mxu0 %vm233_vm0, %v5661_v35 }
 0xdaf   :  { %9315 = vmatprep.mubr.msk.f32.mxu0 %vm233_vm0, %v5662_v61 }
 0xdb2   :  { %9316 = vmatmul.mubr.msk.f32.gmra.mrb[158].mxu0 %vm233_vm0, %v5662_v61 }
 0xdb3   :  { %6072 = vmatprep.mubr.f32.mxu0 %v16114_v24 }
 0xe09   :  { %v4478_v62 = vpop.f32.mrb[96].mxu0 }
 0xe0a   :  { %v4480_v36 = vpop.f32.mrb[97].mxu0 }
 0xe0d   :  { %v14083_v27 = vpop.f32.mrb[98].mxu0 }
 0xe0e   :  { %v14085_v47 = vpop.f32.mrb[99].mxu0 }
 0xe11   :  { %v14089_v58 = vpop.f32.mrb[100].mxu0 }
 0xe12   :  { %v14093_v17 = vpop.f32.mrb[101].mxu0 }
 0xe15   :  { %v14095_v37 = vpop.f32.mrb[102].mxu0 }
 0xe16   :  { %v14099_v15 = vpop.f32.mrb[103].mxu0 }
 0xe19   :  { %v14103_v33 = vpop.f32.mrb[104].mxu0 }
 0xe1a   :  { %v14105_v52 = vpop.f32.mrb[105].mxu0 }
 0xe1d   :  { %v14109_v26 = vpop.f32.mrb[106].mxu0 }
 0xe1e   :  { %v14113_v63 = vpop.f32.mrb[107].mxu0 }
 0xe21   :  { %v14115_v34 = vpop.f32.mrb[108].mxu0 }
 0xe22   :  { %v14119_v57 = vpop.f32.mrb[109].mxu0 }
 0xe25   :  { %v14121_v22 = vpop.f32.mrb[110].mxu0 }
 0xe26   :  { %v14123_v1 = vpop.f32.mrb[111].mxu0 }
 0xe29   :  { %v4526_v28 = vpop.f32.mrb[112].mxu0 }
 0xe2a   :  { %v4527_v48 = vadd.f32 %v4526_v28, %v4278_v10  ;;  %v4528_v29 = vpop.f32.mrb[113].mxu0 }
 0xe2b   :  { %v4529_v4 = vadd.f32 %v4528_v29, %v4278_v10 }
 0xe2c   :  { %10466 = vtanh.f32 %v4527_v48 }
 0xe2d   :  { %10468 = vtanh.f32 %v4529_v4  ;;  %v4532_v56 = vpop.f32.mrb[114].mxu0  ;;  %v4481_v4 = vadd.f32 %v4480_v36, %v4246_v20 }
 0xe2e   :  { %v4533_v3 = vadd.f32 %v4532_v56, %v4282_v18  ;;  %v4534_v31 = vpop.f32.mrb[115].mxu0 }
 0xe2f   :  { %v4535_v5 = vadd.f32 %v4534_v31, %v4282_v18  ;;  %v4479_v18 = vadd.f32 %v4478_v62, %v4246_v20  ;;  %v4485_v62 = vadd.f32 %v14083_v27, %v14075_v8  ;;  %v4487_v20 = vadd.f32 %v14085_v47, %v14075_v8 }
 0xe30   :  { %10470 = vtanh.f32 %v4533_v3 }
 0xe31   :  { %10472 = vtanh.f32 %v4535_v5  ;;  %v4538_v45 = vpop.f32.mrb[116].mxu0  ;;  %v14141_v5 = vpop.permute.xlu1 %4658 }
 0xe32   :  { %v4539_v21 = vadd.f32 %v4538_v45, %v4286_v44  ;;  %v4540_v55 = vpop.f32.mrb[117].mxu0 }
 0xe33   :  { %v4541_v60 = vadd.f32 %v4540_v55, %v4286_v44 }
 0xe34   :  { %10474 = vtanh.f32 %v4539_v21 }
 0xe35   :  { %10476 = vtanh.f32 %v4541_v60  ;;  %v4544_v41 = vpop.f32.mrb[118].mxu0  ;;  %v14164_v47 = vpop.permute.xlu1 %4738 }
 0xe36   :  { %v10467_v35 = vpop.eup %10466  ;;  %v4545_v61 = vadd.f32 %v4544_v41, %v14063_v38  ;;  %v4546_v10 = vpop.f32.mrb[119].mxu0 }
 0xe37   :  { %v10469_v28 = vpop.eup %10468  ;;  %v4669_v48 = vmul.f32 %v10467_v35, %v4639_v51  ;;  %v4547_v29 = vadd.f32 %v4546_v10, %v14063_v38 }
 0xe38   :  { %10478 = vtanh.f32 %v4545_v61  ;;  %v4670_v56 = vmul.f32 %v10469_v28, %v4639_v51 }
 0xe39   :  { %v14139_v3 = vadd.f32 %v4669_v48, %v4479_v18  ;;  %10480 = vtanh.f32 %v4547_v29  ;;  %v4550_v44 = vpop.f32.mrb[120].mxu0 }
 0xe3a   :  { %v10471_v31 = vpop.eup %10470  ;;  %v14143_v45 = vadd.f32 %v4670_v56, %v4481_v4  ;;  %v4551_v21 = vadd.f32 %v4550_v44, %v14081_v7  ;;  %v4552_v55 = vpop.f32.mrb[121].mxu0 }
 0xe3b   :  { %v10473_v60 = vpop.eup %10472  ;;  %v4671_v38 = vmul.f32 %v10471_v31, %v14079_v39  ;;  %v4553_v36 = vadd.f32 %v4552_v55, %v14081_v7  ;;  %v4491_v7 = vadd.f32 %v14089_v58, %v14097_v42 }
 0xe3c   :  { %v4672_v51 = vmul.f32 %v10473_v60, %v14079_v39  ;;  %10482 = vtanh.f32 %v4551_v21  ;;  %v4493_v39 = vadd.f32 %v14093_v17, %v14097_v42 }
 0xe3d   :  { %10484 = vtanh.f32 %v4553_v36  ;;  %v4556_v41 = vpop.f32.mrb[122].mxu0  ;;  %v14153_v35 = vadd.f32 %v4671_v38, %v4485_v62 }
 0xe3e   :  { %v10475_v61 = vpop.eup %10474  ;;  %v4557_v10 = vadd.f32 %v4556_v41, %v14067_v40  ;;  %v4558_v28 = vpop.f32.mrb[123].mxu0  ;;  %v14156_v18 = vadd.f32 %v4672_v51, %v4487_v20 }
 0xe3f   :  { %v10477_v27 = vpop.eup %10476  ;;  %v4673_v48 = vmul.f32 %v10475_v61, %v14107_v13  ;;  %v4559_v8 = vadd.f32 %v4558_v28, %v14067_v40  ;;  %v4497_v40 = vadd.f32 %v14095_v37, %v14127_v43  ;;  %v4270_v20 = vpop.permute.xlu1 %4269 }
 0xe40   :  { %v4674_v29 = vmul.f32 %v10477_v27, %v14107_v13  ;;  %10486 = vtanh.f32 %v4557_v10  ;;  %v4499_v13 = vadd.f32 %v14099_v15, %v14127_v43  ;;  %v4505_v43 = vadd.f32 %v14105_v52, %v14131_v11 }
 0xe41   :  { %10488 = vtanh.f32 %v4559_v8  ;;  %v4562_v4 = vpop.f32.mrb[124].mxu0  ;;  %v14167_v56 = vadd.f32 %v4673_v48, %v4491_v7 }
 0xe42   :  { %v10479_v44 = vpop.eup %10478  ;;  %v4563_v31 = vadd.f32 %v4562_v4, %v14101_v54  ;;  %v4564_v58 = vpop.f32.mrb[125].mxu0  ;;  %v14170_v21 = vadd.f32 %v4674_v29, %v4493_v39 }
 0xe43   :  { %v10481_v55 = vpop.eup %10480  ;;  %v4675_v17 = vmul.f32 %v10479_v44, %v14117_v14  ;;  %v4565_v42 = vadd.f32 %v4564_v58, %v14101_v54  ;;  %v4503_v54 = vadd.f32 %v14103_v33, %v14131_v11  ;;  %v4663_v39 = vpop.permute.xlu1 %4662 }
 0xe44   :  { %v4676_v60 = vmul.f32 %v10481_v55, %v14117_v14  ;;  %10490 = vtanh.f32 %v4563_v31 }
 0xe45   :  { %10492 = vtanh.f32 %v4565_v42  ;;  %v4568_v62 = vpop.f32.mrb[126].mxu0  ;;  %v14179_v38 = vadd.f32 %v4675_v17, %v4497_v40 }
 0xe46   :  { %v10483_v36 = vpop.eup %10482  ;;  %v4569_v51 = vadd.f32 %v4568_v62, %v14071_v46  ;;  %v4570_v41 = vpop.f32.mrb[127].mxu0  ;;  %v14182_v37 = vadd.f32 %v4676_v60, %v4499_v13 }
 0xe47   :  { %v10485_v61 = vpop.eup %10484  ;;  %v4677_v15 = vmul.f32 %v10483_v36, %v14135_v0  ;;  %v4571_v14 = vadd.f32 %v4570_v41, %v14071_v46  ;;  %v4509_v46 = vadd.f32 %v14109_v26, %v14129_v6  ;;  %v4667_v36 = vpop.permute.xlu1 %4666 }
 0xe48   :  { %v4678_v10 = vmul.f32 %v10485_v61, %v14135_v0  ;;  %10494 = vtanh.f32 %v4569_v51  ;;  %v4511_v0 = vadd.f32 %v14113_v63, %v14129_v6 }
 0xe49   :  { %10496 = vtanh.f32 %v4571_v14  ;;  %v4574_v28 = vpop.f32.mrb[128].mxu0  ;;  %v14191_v27 = vadd.f32 %v4677_v15, %v4503_v54 }
 0xe4a   :  { %v10487_v7 = vpop.eup %10486  ;;  %v4575_v48 = vadd.f32 %v4574_v28, %v14059_v9  ;;  %v4576_v8 = vpop.f32.mrb[129].mxu0  ;;  %v14194_v33 = vadd.f32 %v4678_v10, %v4505_v43  ;;  %v4523_v10 = vadd.f32 %v14123_v1, %v14133_v25 }
 0xe4b   :  { %v10489_v29 = vpop.eup %10488  ;;  %v4679_v52 = vmul.f32 %v10487_v7, %v14141_v5  ;;  %v4577_v11 = vadd.f32 %v4576_v8, %v14059_v9  ;;  %v4515_v9 = vadd.f32 %v14115_v34, %v4270_v20 }
 0xe4c   :  { %v4680_v4 = vmul.f32 %v10489_v29, %v14141_v5  ;;  %v4685_v44 = vmul.f32 %v4575_v48, %v4575_v48  ;;  %v4517_v5 = vadd.f32 %v14119_v57, %v4270_v20  ;;  %v4723_v48 = vpop.permute.xlu0 %4722 }
 0xe4d   :  { %v4686_v31 = vmul.f32 %v4577_v11, %v4577_v11  ;;  %v4580_v58 = vpop.f32.mrb[130].mxu0  ;;  %v14203_v55 = vadd.f32 %v4679_v52, %v4509_v46 }
 0xe4e   :  { %v10491_v40 = vpop.eup %10490  ;;  %10498 = vtanh.f32 %v4685_v44  ;;  %v4581_v17 = vadd.f32 %v4580_v58, %v14061_v50  ;;  %v4582_v42 = vpop.f32.mrb[131].mxu0  ;;  %v14206_v26 = vadd.f32 %v4680_v4, %v4511_v0 }
 0xe4f   :  { %v10493_v13 = vpop.eup %10492  ;;  %10500 = vtanh.f32 %v4686_v31  ;;  %v4583_v63 = vadd.f32 %v4582_v42, %v14061_v50  ;;  %v4681_v6 = vmul.f32 %v10491_v40, %v4663_v39  ;;  %v4521_v50 = vadd.f32 %v14121_v22, %v14133_v25 }
 0xe50   :  { %v4687_v60 = vmul.f32 %v4581_v17, %v4581_v17  ;;  %v4682_v62 = vmul.f32 %v10493_v13, %v4663_v39  ;;  %v4727_v17 = vpop.permute.xlu0 %4726 }
 0xe51   :  { %v4688_v51 = vmul.f32 %v4583_v63, %v4583_v63  ;;  %v14211_v41 = vadd.f32 %v4681_v6, %v4515_v9  ;;  %v4586_v61 = vpop.f32.mrb[132].mxu0 }
 0xe52   :  { %v10495_v54 = vpop.eup %10494  ;;  %10502 = vtanh.f32 %v4687_v60  ;;  %v14213_v15 = vadd.f32 %v4682_v62, %v4517_v5  ;;  %v4587_v14 = vadd.f32 %v4586_v61, %v14077_v32  ;;  %v4588_v34 = vpop.f32.mrb[133].mxu0 }
 0xe53   :  { %v10497_v43 = vpop.eup %10496  ;;  %10504 = vtanh.f32 %v4688_v51  ;;  %v4589_v57 = vadd.f32 %v4588_v34, %v14077_v32  ;;  %v4683_v20 = vmul.f32 %v10495_v54, %v4667_v36 }
 0xe54   :  { %v4689_v28 = vmul.f32 %v4587_v14, %v4587_v14  ;;  %v4684_v7 = vmul.f32 %v10497_v43, %v4667_v36 }
 0xe55   :  { %v4690_v8 = vmul.f32 %v4589_v57, %v4589_v57  ;;  %v14221_v39 = vadd.f32 %v4683_v20, %v4521_v50  ;;  %v4592_v29 = vpop.f32.mrb[134].mxu0  ;;  %v4735_v57 = vpop.permute.xlu0 %4734 }
 0xe56   :  { %10506 = vtanh.f32 %v4689_v28  ;;  %v14223_v46 = vadd.f32 %v4684_v7, %v4523_v10  ;;  %v4593_v52 = vadd.f32 %v4592_v29, %v14065_v19  ;;  %v4594_v22 = vpop.f32.mrb[135].mxu0 }
 0xe57   :  { %10508 = vtanh.f32 %v4690_v8  ;;  %v4595_v32 = vadd.f32 %v4594_v22, %v14065_v19 }
 0xe58   :  { %v10499_v11 = vpop.eup %10498  ;;  %v4691_v0 = vmul.f32 %v4593_v52, %v4593_v52 }
 0xe59   :  { %v10501_v4 = vpop.eup %10500  ;;  %v4692_v1 = vmul.f32 %v4595_v32, %v4595_v32  ;;  %v4598_v25 = vpop.f32.mrb[136].mxu0  ;;  %v4749_v44 = vmul.f32 %v10499_v11, %v14087_v23 }
 0xe5a   :  { %10510 = vtanh.f32 %v4691_v0  ;;  %v4599_v31 = vadd.f32 %v4598_v25, %v14091_v59  ;;  %v4600_v58 = vpop.f32.mrb[137].mxu0  ;;  %v4750_v40 = vmul.f32 %v10501_v4, %v14087_v23  ;;  %v14262_v32 = vpop.permute.xlu1 %4746 }
 0xe5b   :  { %10512 = vtanh.f32 %v4692_v1  ;;  %v4601_v42 = vadd.f32 %v4600_v58, %v14091_v59  ;;  %v14232_v13 = vadd.f32 %v14139_v3, %v4749_v44 }
 0xe5c   :  { %v10503_v19 = vpop.eup %10502  ;;  %v4693_v9 = vmul.f32 %v4599_v31, %v4599_v31  ;;  %v14235_v63 = vadd.f32 %v14143_v45, %v4750_v40 }
 0xe5d   :  { %v10505_v6 = vpop.eup %10504  ;;  %v4694_v5 = vmul.f32 %v4601_v42, %v4601_v42  ;;  %v4604_v60 = vpop.f32.mrb[138].mxu0  ;;  %v4751_v62 = vmul.f32 %v10503_v19, %v4723_v48  ;;  %v4829_v36 = vmul.f32 %v14232_v13, %v14232_v13 }
 0xe5e   :  { %10514 = vtanh.f32 %v4693_v9  ;;  %v4605_v23 = vadd.f32 %v4604_v60, %v14069_v53  ;;  %v4606_v51 = vpop.f32.mrb[139].mxu0  ;;  %v4797_v59 = vadd.f32 %v14235_v63, %v14232_v13  ;;  %v4752_v3 = vmul.f32 %v10505_v6, %v4723_v48  ;;  %v4743_v42 = vpop.permute.xlu0 %4742 }
 0xe5f   :  { %10516 = vtanh.f32 %v4694_v5  ;;  %v4607_v61 = vadd.f32 %v4606_v51, %v14069_v53  ;;  %v14244_v45 = vadd.f32 %v14153_v35, %v4751_v62  ;;  %v4830_v54 = vmul.f32 %v14235_v63, %v14235_v63  ;;  %v5665_v6 = vpop.permute.xlu1 %5664 }
 0xe60   :  { %v10507_v14 = vpop.eup %10506  ;;  %v4695_v34 = vmul.f32 %v4605_v23, %v4605_v23  ;;  %4798 = vadd.xlane.f32.xlu0 %v4797_v59  ;;  %v14249_v43 = vadd.f32 %v14156_v18, %v4752_v3 }
 0xe61   :  { %v10509_v50 = vpop.eup %10508  ;;  %v4696_v20 = vmul.f32 %v4607_v61, %v4607_v61  ;;  %v4610_v10 = vpop.f32.mrb[140].mxu0  ;;  %v4845_v28 = vadd.f32 %v4830_v54, %v4829_v36  ;;  %v4831_v53 = vmul.f32 %v14244_v45, %v14244_v45  ;;  %v4753_v7 = vmul.f32 %v10507_v14, %v4727_v17 }
 0xe62   :  { %10518 = vtanh.f32 %v4695_v34  ;;  %v4611_v35 = vadd.f32 %v4610_v10, %v14111_v12  ;;  %v4612_v48 = vpop.f32.mrb[141].mxu0  ;;  %v4800_v8 = vadd.f32 %v14249_v43, %v14244_v45  ;;  %v4832_v18 = vmul.f32 %v14249_v43, %v14249_v43 }
 0xe63   :  { %10520 = vtanh.f32 %v4696_v20  ;;  %v4613_v29 = vadd.f32 %v4612_v48, %v14111_v12  ;;  %v4754_v52 = vmul.f32 %v10509_v50, %v4727_v17  ;;  %v14260_v22 = vadd.f32 %v14167_v56, %v4753_v7  ;;  %v5669_v50 = vpop.permute.xlu0 %5668 }
 0xe64   :  { %v10511_v11 = vpop.eup %10510  ;;  %v4697_v0 = vmul.f32 %v4611_v35, %v4611_v35  ;;  %4801 = vadd.xlane.f32.xlu1 %v4800_v8  ;;  %4846 = vadd.xlane.f32.xlu0 %v4845_v28  ;;  %v4848_v40 = vadd.f32 %v4832_v18, %v4831_v53  ;;  %v5673_v8 = vpop.permute.xlu1 %5672 }
 0xe65   :  { %v10513_v4 = vpop.eup %10512  ;;  %v4698_v1 = vmul.f32 %v4613_v29, %v4613_v29  ;;  %v4616_v25 = vpop.f32.mrb[142].mxu0  ;;  %v14265_v44 = vadd.f32 %v14170_v21, %v4754_v52  ;;  %v4833_v31 = vmul.f32 %v14260_v22, %v14260_v22  ;;  %v4755_v12 = vmul.f32 %v10511_v11, %v14125_v49 }
 0xe66   :  { %10522 = vtanh.f32 %v4697_v0  ;;  %v4617_v56 = vadd.f32 %v4616_v25, %v14073_v2  ;;  %v4618_v58 = vpop.f32.mrb[143].mxu0  ;;  %v4756_v17 = vmul.f32 %v10513_v4, %v14125_v49 }
 0xe67   :  { %10524 = vtanh.f32 %v4698_v1  ;;  %v4619_v19 = vadd.f32 %v4618_v58, %v14073_v2  ;;  %v4803_v21 = vadd.f32 %v14265_v44, %v14260_v22  ;;  %v4834_v9 = vmul.f32 %v14265_v44, %v14265_v44 }
 0xe68   :  { %v10515_v5 = vpop.eup %10514  ;;  %v4699_v60 = vmul.f32 %v4617_v56, %v4617_v56  ;;  %4849 = vadd.xlane.f32.xlu0 %v4848_v40  ;;  %v14278_v62 = vadd.f32 %v14179_v38, %v4755_v12  ;;  %v14281_v36 = vadd.f32 %v14182_v37, %v4756_v17 }
 0xe69   :  { %v10517_v49 = vpop.eup %10516  ;;  %v4700_v23 = vmul.f32 %v4619_v19, %v4619_v19  ;;  %4804 = vadd.xlane.f32.xlu1 %v4803_v21  ;;  %v4851_v2 = vadd.f32 %v4834_v9, %v4833_v31  ;;  %v4757_v51 = vmul.f32 %v10515_v5, %v4735_v57  ;;  %v5785_v59 = vpop.f32.mrb[144].mxu0 }
 0xe6a   :  { %10526 = vtanh.f32 %v4699_v60  ;;  %v4806_v3 = vadd.f32 %v14281_v36, %v14278_v62  ;;  %v4835_v61 = vmul.f32 %v14278_v62, %v14278_v62  ;;  %v4836_v38 = vmul.f32 %v14281_v36, %v14281_v36  ;;  %v5787_v54 = vpop.f32.mrb[145].mxu0 }
 0xe6b   :  { %10528 = vtanh.f32 %v4700_v23  ;;  %v4758_v37 = vmul.f32 %v10517_v49, %v4735_v57  ;;  %v14290_v14 = vadd.f32 %v14191_v27, %v4757_v51  ;;  %v5786_v34 = vadd.f32 %v5785_v59, %v5665_v6 }
 0xe6c   :  { %v10519_v20 = vpop.eup %10518  ;;  %4807 = vadd.xlane.f32.xlu0 %v4806_v3  ;;  %v5788_v10 = vadd.f32 %v5787_v54, %v5665_v6  ;;  %v4854_v53 = vadd.f32 %v4836_v38, %v4835_v61 }
 0xe6d   :  { %v10521_v28 = vpop.eup %10520  ;;  %4852 = vadd.xlane.f32.xlu1 %v4851_v2  ;;  %v14293_v7 = vadd.f32 %v14194_v33, %v4758_v37  ;;  %v4837_v35 = vmul.f32 %v14290_v14, %v14290_v14  ;;  %v4759_v48 = vmul.f32 %v10519_v20, %v14164_v47  ;;  %v5791_v57 = vpop.f32.mrb[146].mxu0  ;;  %v5832_v18 = vmax.f32 %v5786_v34, 0.0 }
 0xe6e   :  { %v4760_v27 = vmul.f32 %v10521_v28, %v14164_v47  ;;  %v5833_v29 = vmax.f32 %v5788_v10, 0.0  ;;  %v5792_v52 = vadd.f32 %v5791_v57, %v5669_v50  ;;  %v5793_v11 = vpop.f32.mrb[147].mxu0  ;;  %v5677_v2 = vpop.permute.xlu1 %5676 }
 0xe6f   :  { %v4809_v0 = vadd.f32 %v14293_v7, %v14290_v14  ;;  %v4838_v33 = vmul.f32 %v14293_v7, %v14293_v7  ;;  %v14304_v4 = vadd.f32 %v14203_v55, %v4759_v48  ;;  %v5794_v1 = vadd.f32 %v5793_v11, %v5669_v50 }
 0xe70   :  { %v10523_v25 = vpop.eup %10522  ;;  %4855 = vadd.xlane.f32.xlu0 %v4854_v53  ;;  %v14307_v31 = vadd.f32 %v14206_v26, %v4760_v27  ;;  %v5834_v47 = vmax.f32 %v5792_v52, 0.0 }
 0xe71   :  { %v10525_v12 = vpop.eup %10524  ;;  %4810 = vadd.xlane.f32.xlu1 %v4809_v0  ;;  %v4857_v56 = vadd.f32 %v4838_v33, %v4837_v35  ;;  %v4839_v58 = vmul.f32 %v14304_v4, %v14304_v4  ;;  %v4761_v40 = vmul.f32 %v10523_v25, %v4743_v42  ;;  %v5835_v17 = vmax.f32 %v5794_v1, 0.0  ;;  %v5797_v19 = vpop.f32.mrb[148].mxu0 }
 0xe72   :  { %v4812_v55 = vadd.f32 %v14307_v31, %v14304_v4  ;;  %v4840_v21 = vmul.f32 %v14307_v31, %v14307_v31  ;;  %v4762_v9 = vmul.f32 %v10525_v12, %v4743_v42  ;;  %v9602_v6 = vpack.c.bf16 %v5834_v47, %v5832_v18  ;;  %v5799_v26 = vpop.f32.mrb[149].mxu0  ;;  %v5681_v35 = vpop.permute.xlu0 %5680 }
 0xe73   :  { %v14316_v5 = vadd.f32 %v14211_v41, %v4761_v40  ;;  %v9600_v60 = vpack.c.bf16 %v5835_v17, %v5833_v29  ;;  %v5798_v49 = vadd.f32 %v5797_v19, %v5673_v8  ;;  %v5800_v23 = vadd.f32 %v5799_v26, %v5673_v8  ;;  %v5685_v33 = vpop.permute.xlu1 %5684 }
 0xe74   :  { %v10527_v51 = vpop.eup %10526  ;;  %4813 = vadd.xlane.f32.xlu0 %v4812_v55  ;;  %v14319_v59 = vadd.f32 %v14213_v15, %v4762_v9  ;;  %v4860_v38 = vadd.f32 %v4840_v21, %v4839_v58 }
 0xe75   :  { %v10529_v3 = vpop.eup %10528  ;;  %4858 = vadd.xlane.f32.xlu1 %v4857_v56  ;;  %v4763_v61 = vmul.f32 %v10527_v51, %v14262_v32  ;;  %v4841_v42 = vmul.f32 %v14316_v5, %v14316_v5  ;;  %v5803_v54 = vpop.f32.mrb[150].mxu0  ;;  %9601 = vmatprep.subr.bf16.mxu0 %v9600_v60  ;;  %v5836_v34 = vmax.f32 %v5798_v49, 0.0  ;;  %v5837_v28 = vmax.f32 %v5800_v23, 0.0 }
 0xe76   :  { %v4764_v41 = vmul.f32 %v10529_v3, %v14262_v32  ;;  %v4815_v37 = vadd.f32 %v14319_v59, %v14316_v5  ;;  %v5805_v50 = vpop.f32.mrb[151].mxu0  ;;  %v5804_v20 = vadd.f32 %v5803_v54, %v5677_v2  ;;  %9603 = vmatpush1.bf16.msra.mxu0 %v9602_v6  ;;  %v4842_v10 = vmul.f32 %v14319_v59, %v14319_v59  ;;  %v5689_v19 = vpop.permute.xlu0 %5688 }
 0xe77   :  { %v14328_v15 = vadd.f32 %v14221_v39, %v4763_v61  ;;  %v5806_v53 = vadd.f32 %v5805_v50, %v5677_v2  ;;  %v5693_v23 = vpop.permute.xlu1 %5692 }
 0xe78   :  { %v14333_v48 = vadd.f32 %v14223_v46, %v4764_v41  ;;  %4861 = vadd.xlane.f32.xlu0 %v4860_v38  ;;  %v5838_v32 = vmax.f32 %v5804_v20, 0.0  ;;  %v4863_v0 = vadd.f32 %v4842_v10, %v4841_v42  ;;  %v5848_v20 = vld [vmem:[%s15973_s5] sm:$0xff]  ;;  %v5849_v10 = vld [vmem:[%s15973_s5 + $0x8] sm:$0xff] }
 0xe79   :  { %4816 = vadd.xlane.f32.xlu1 %v4815_v37  ;;  %v4843_v57 = vmul.f32 %v14328_v15, %v14328_v15  ;;  %v5839_v8 = vmax.f32 %v5806_v53, 0.0  ;;  %v5809_v27 = vpop.f32.mrb[152].mxu0  ;;  %v5851_v53 = vld [vmem:[%s15973_s5 + $0x18] sm:$0xff] }
 0xe7a   :  { %v4818_v39 = vadd.f32 %v14333_v48, %v14328_v15  ;;  %v4844_v18 = vmul.f32 %v14333_v48, %v14333_v48  ;;  %v9606_v29 = vpack.c.bf16 %v5838_v32, %v5836_v34  ;;  %v5811_v52 = vpop.f32.mrb[153].mxu0  ;;  %v5810_v11 = vadd.f32 %v5809_v27, %v5681_v35  ;;  %v5853_v32 = vld [vmem:[%s15973_s5 + $0x28] sm:$0xff]  ;;  %v5856_v27 = vld [vmem:[%s15973_s5 + $0x40] sm:$0xff] }
 0xe7b   :  { %v5812_v46 = vadd.f32 %v5811_v52, %v5681_v35  ;;  %v9604_v1 = vpack.c.bf16 %v5839_v8, %v5837_v28  ;;  %v5850_v28 = vld [vmem:[%s15973_s5 + $0x10] sm:$0xff]  ;;  %v5852_v35 = vld [vmem:[%s15973_s5 + $0x20] sm:$0xff]  ;;  %v5855_v8 = vld [vmem:[%s15973_s5 + $0x38] sm:$0xff] }
 0xe7c   :  { %4819 = vadd.xlane.f32.xlu0 %v4818_v39  ;;  %v4866_v47 = vadd.f32 %v4844_v18, %v4843_v57  ;;  %v5840_v12 = vmax.f32 %v5810_v11, 0.0  ;;  %v5854_v57 = vld [vmem:[%s15973_s5 + $0x30] sm:$0xff]  ;;  %v5857_v39 = vld [vmem:[%s15973_s5 + $0x48] sm:$0xff] }
 0xe7d   :  { %4864 = vadd.xlane.f32.xlu1 %v4863_v0  ;;  %v5815_v25 = vpop.f32.mrb[154].mxu0  ;;  %9605 = vmatprep.subr.bf16.mxu0 %v9604_v1  ;;  %v5841_v40 = vmax.f32 %v5812_v46, 0.0  ;;  %v5858_v18 = vld [vmem:[%s15973_s5 + $0x50] sm:$0xff] }
 0xe7e   :  { %v5817_v56 = vpop.f32.mrb[155].mxu0  ;;  %v5816_v58 = vadd.f32 %v5815_v25, %v5685_v33  ;;  %9607 = vmatpush1.bf16.msra.mxu0 %v9606_v29  ;;  %v5859_v29 = vld [vmem:[%s15973_s5 + $0x58] sm:$0xff] }
 0xe7f   :  { %v5818_v17 = vadd.f32 %v5817_v56, %v5685_v33 }
 0xe80   :  { %4867 = vadd.xlane.f32.xlu0 %v4866_v47  ;;  %v5842_v55 = vmax.f32 %v5816_v58, 0.0 }
 0xe81   :  { %v5843_v21 = vmax.f32 %v5818_v17, 0.0  ;;  %v5821_v9 = vpop.f32.mrb[156].mxu0 }
 0xe82   :  { %v9610_v6 = vpack.c.bf16 %v5842_v55, %v5840_v12  ;;  %v5823_v26 = vpop.f32.mrb[157].mxu0  ;;  %v5822_v60 = vadd.f32 %v5821_v9, %v5689_v19  ;;  %v5860_v12 = vld [vmem:[%s15973_s5 + $0x60] sm:$0xff]  ;;  %v5861_v9 = vld [vmem:[%s15973_s5 + $0x68] sm:$0xff] }
 0xe83   :  { %v5824_v49 = vadd.f32 %v5823_v26, %v5689_v19  ;;  %v9608_v2 = vpack.c.bf16 %v5843_v21, %v5841_v40 }
 0xe84   :  { %v5844_v3 = vmax.f32 %v5822_v60, 0.0 }
 0xe85   :  { %v5827_v51 = vpop.f32.mrb[158].mxu0  ;;  %9609 = vmatprep.subr.bf16.mxu0 %v9608_v2  ;;  %v5845_v42 = vmax.f32 %v5824_v49, 0.0 }
 0xe86   :  { %v5829_v61 = vpop.f32.mrb[159].mxu0  ;;  %v5828_v38 = vadd.f32 %v5827_v51, %v5693_v23  ;;  %9611 = vmatpush1.bf16.msra.mxu0 %v9610_v6  ;;  %v5862_v51 = vld [vmem:[%s15973_s5 + $0x70] sm:$0xff] }
 0xe87   :  { %v5830_v54 = vadd.f32 %v5829_v61, %v5693_v23 }
 0xe88   :  { %v5846_v41 = vmax.f32 %v5828_v38, 0.0 }
 0xe89   :  { %v5847_v37 = vmax.f32 %v5830_v54, 0.0 }
 0xe8a   :  { %v9614_v34 = vpack.c.bf16 %v5846_v41, %v5844_v3 }
 0xe8b   :  { %v9612_v50 = vpack.c.bf16 %v5847_v37, %v5845_v42 }
 0xe8d   :  { %9613 = vmatprep.subr.bf16.mxu0 %v9612_v50  ;;  %v5863_v50 = vld [vmem:[%s15973_s5 + $0x78] sm:$0xff] }
 0xe8e   :  { %9615 = vmatpush1.bf16.msra.mxu0 %v9614_v34 }
 0xe91   :  { %9051 = vmatmul.mubr.msk.f32.vlgmr.msra.gmra.mrb[160].mxu0 %vm907_vm2, %v5848_v20 }
 0xe92   :  { %6078 = vmatprep.mubr.f32.mxu0 %v16114_v24 }
 0xe95   :  { %9052 = vmatmul.mubr.msk.f32.gmra.mrb[162].mxu0 %vm907_vm2, %v5849_v10 }
 0xe96   :  { %6084 = vmatprep.mubr.f32.mxu0 %v16114_v24 }
 0xe99   :  { %9053 = vmatmul.mubr.msk.f32.gmra.mrb[164].mxu0 %vm907_vm2, %v5850_v28 }
 0xe9a   :  { %6090 = vmatprep.mubr.f32.mxu0 %v16114_v24 }
 0xe9d   :  { %9054 = vmatmul.mubr.msk.f32.gmra.mrb[166].mxu0 %vm907_vm2, %v5851_v53 }
 0xe9e   :  { %6096 = vmatprep.mubr.f32.mxu0 %v16114_v24 }
 0xea1   :  { %9055 = vmatmul.mubr.msk.f32.gmra.mrb[168].mxu0 %vm907_vm2, %v5852_v35 }
 0xea2   :  { %6102 = vmatprep.mubr.f32.mxu0 %v16114_v24 }
 0xea5   :  { %9056 = vmatmul.mubr.msk.f32.gmra.mrb[170].mxu0 %vm907_vm2, %v5853_v32 }
 0xea6   :  { %6108 = vmatprep.mubr.f32.mxu0 %v16114_v24 }
 0xea9   :  { %9057 = vmatmul.mubr.msk.f32.gmra.mrb[172].mxu0 %vm907_vm2, %v5854_v57 }
 0xeaa   :  { %6114 = vmatprep.mubr.f32.mxu0 %v16114_v24 }
 0xead   :  { %9058 = vmatmul.mubr.msk.f32.gmra.mrb[174].mxu0 %vm907_vm2, %v5855_v8  ;;  %v14436_v8 = vld [vmem:[%s15975_s7] sm:$0xff] }
 0xeae   :  { %6120 = vmatprep.mubr.f32.mxu0 %v16114_v24 }
 0xeb1   :  { %9059 = vmatmul.mubr.msk.f32.gmra.mrb[176].mxu0 %vm907_vm2, %v5856_v27 }
 0xeb2   :  { %6126 = vmatprep.mubr.f32.mxu0 %v16114_v24 }
 0xeb5   :  { %9060 = vmatmul.mubr.msk.f32.gmra.mrb[178].mxu0 %vm907_vm2, %v5857_v39 }
 0xeb6   :  { %6132 = vmatprep.mubr.f32.mxu0 %v16114_v24 }
 0xeb9   :  { %9061 = vmatmul.mubr.msk.f32.gmra.mrb[180].mxu0 %vm907_vm2, %v5858_v18 }
 0xeba   :  { %6138 = vmatprep.mubr.f32.mxu0 %v16114_v24 }
 0xebd   :  { %9062 = vmatmul.mubr.msk.f32.gmra.mrb[182].mxu0 %vm907_vm2, %v5859_v29 }
 0xebe   :  { %6144 = vmatprep.mubr.f32.mxu0 %v16114_v24 }
 0xec1   :  { %9063 = vmatmul.mubr.msk.f32.gmra.mrb[184].mxu0 %vm907_vm2, %v5860_v12  ;;  %v14446_v12 = vld [vmem:[%s15975_s7 + $0x8] sm:$0xff] }
 0xec2   :  { %6150 = vmatprep.mubr.f32.mxu0 %v16114_v24 }
 0xec5   :  { %9064 = vmatmul.mubr.msk.f32.gmra.mrb[186].mxu0 %vm907_vm2, %v5861_v9 }
 0xec6   :  { %6156 = vmatprep.mubr.f32.mxu0 %v16114_v24 }
 0xec9   :  { %9065 = vmatmul.mubr.msk.f32.gmra.mrb[188].mxu0 %vm907_vm2, %v5862_v51 }
 0xeca   :  { %6162 = vmatprep.mubr.f32.mxu0 %v16114_v24 }
 0xecd   :  { %9066 = vmatmul.mubr.msk.f32.gmra.mrb[190].mxu0 %vm907_vm2, %v5863_v50 }
 0xece   :  { %6759 = vmatprep.mubr.f32.mxu0 %v16114_v24 }
 0xeed   :  { %v4799_v52 = vpop.xlane.xlu0 %4798 }
 0xeee   :  { %v4821_v11 = vmul.f32 0.00390625, %v4799_v52 }
 0xef0   :  { %v4877_v33 = vmul.f32 %v4821_v11, %v4821_v11 }
 0xef1   :  { %v4847_v0 = vpop.xlane.xlu0 %4846  ;;  %v4802_v46 = vpop.xlane.xlu1 %4801 }
 0xef2   :  { %v4869_v1 = vmul.f32 0.00390625, %v4847_v0  ;;  %v14401_v25 = vmul.f32 0.00390625, %v4802_v46 }
 0xef4   :  { %v4885_v47 = vsub.f32 %v4869_v1, %v4877_v33  ;;  %v4878_v40 = vmul.f32 %v14401_v25, %v14401_v25 }
 0xef5   :  { %v4850_v56 = vpop.xlane.xlu0 %4849 }
 0xef6   :  { %v4893_v58 = vadd.f32 1e-05, %v4885_v47  ;;  %v4870_v17 = vmul.f32 0.00390625, %v4850_v56  ;;  %v4805_v19 = vpop.xlane.xlu1 %4804 }
 0xef7   :  { %v14410_v55 = vmul.f32 0.00390625, %v4805_v19 }
 0xef8   :  { %10530 = vrsqrt.f32 %v4893_v58  ;;  %v4886_v21 = vsub.f32 %v4870_v17, %v4878_v40 }
 0xef9   :  { %v4808_v6 = vpop.xlane.xlu0 %4807  ;;  %v4879_v23 = vmul.f32 %v14410_v55, %v14410_v55 }
 0xefa   :  { %v4894_v26 = vadd.f32 1e-05, %v4886_v21  ;;  %v14416_v60 = vmul.f32 0.00390625, %v4808_v6  ;;  %v4853_v49 = vpop.xlane.xlu1 %4852 }
 0xefb   :  { %v4871_v2 = vmul.f32 0.00390625, %v4853_v49  ;;  %v14454_v49 = vld [vmem:[%s15975_s7 + $0x10] sm:$0xff] }
 0xefc   :  { %10532 = vrsqrt.f32 %v4894_v26  ;;  %v4880_v38 = vmul.f32 %v14416_v60, %v14416_v60  ;;  %16132 = vst [vmem:[#allocation37_spill] sm:$0xff] %v14454_v49 }
 0xefd   :  { %v4887_v3 = vsub.f32 %v4871_v2, %v4879_v23  ;;  %v4856_v61 = vpop.xlane.xlu0 %4855 }
 0xefe   :  { %v4872_v42 = vmul.f32 0.00390625, %v4856_v61  ;;  %v4811_v54 = vpop.xlane.xlu1 %4810 }
 0xeff   :  { %v4895_v41 = vadd.f32 1e-05, %v4887_v3  ;;  %v4825_v37 = vmul.f32 0.00390625, %v4811_v54  ;;  %v14461_v54 = vld [vmem:[%s15975_s7 + $0x18] sm:$0xff] }
 0xf00   :  { %v4888_v34 = vsub.f32 %v4872_v42, %v4880_v38 }
 0xf01   :  { %10534 = vrsqrt.f32 %v4895_v41  ;;  %v4814_v20 = vpop.xlane.xlu0 %4813  ;;  %v4881_v32 = vmul.f32 %v4825_v37, %v4825_v37 }
 0xf02   :  { %v10531_v10 = vpop.eup %10530  ;;  %v4896_v28 = vadd.f32 1e-05, %v4888_v34  ;;  %v4826_v53 = vmul.f32 0.00390625, %v4814_v20  ;;  %v4859_v35 = vpop.xlane.xlu1 %4858 }
 0xf03   :  { %v4873_v57 = vmul.f32 0.00390625, %v4859_v35  ;;  %v14439_v27 = vmul.f32 %v14436_v8, %v10531_v10 }
 0xf04   :  { %10536 = vrsqrt.f32 %v4896_v28  ;;  %v4882_v0 = vmul.f32 %v4826_v53, %v4826_v53 }
 0xf05   :  { %v4889_v39 = vsub.f32 %v4873_v57, %v4881_v32  ;;  %v4862_v18 = vpop.xlane.xlu0 %4861  ;;  %v4917_v29 = vmul.f32 %v14439_v27, %v4821_v11  ;;  %v14476_v57 = vld [vmem:[%s15975_s7 + $0x28] sm:$0xff] }
 0xf06   :  { %v10533_v52 = vpop.eup %10532  ;;  %v4874_v46 = vmul.f32 0.00390625, %v4862_v18  ;;  %v4817_v33 = vpop.xlane.xlu1 %4816  ;;  %16134 = vst [vmem:[#allocation31_spill] sm:$0xff] %v14476_v57 }
 0xf07   :  { %v4897_v1 = vadd.f32 1e-05, %v4889_v39  ;;  %v4827_v47 = vmul.f32 0.00390625, %v4817_v33  ;;  %4933 = vrot.lane.b32.xlu1 %v4917_v29, %s10760_s25  ;;  %v4910_v56 = vmul.f32 %v14446_v12, %v10533_v52  ;;  %v14484_v29 = vld [vmem:[%s15975_s7 + $0x30] sm:$0xff] }
 0xf08   :  { %v4890_v58 = vsub.f32 %v4874_v46, %v4882_v0  ;;  %v14490_v46 = vld [vmem:[%s15975_s7 + $0x38] sm:$0xff] }
 0xf09   :  { %10538 = vrsqrt.f32 %v4897_v1  ;;  %v4820_v40 = vpop.xlane.xlu0 %4819  ;;  %v4918_v11 = vmul.f32 %v4910_v56, %v14401_v25  ;;  %v4883_v6 = vmul.f32 %v4827_v47, %v4827_v47  ;;  %16135 = vst [vmem:[#allocation34_spill] sm:$0xff] %v14490_v46 }
 0xf0a   :  { %v4898_v17 = vadd.f32 1e-05, %v4890_v58  ;;  %v4828_v19 = vmul.f32 0.00390625, %v4820_v40  ;;  %v4865_v21 = vpop.xlane.xlu1 %4864 }
 0xf0b   :  { %v10535_v9 = vpop.eup %10534  ;;  %v4875_v26 = vmul.f32 0.00390625, %v4865_v21  ;;  %4935 = vrot.lane.b32.xlu0 %v4918_v11, %s10760_s25 }
 0xf0c   :  { %10540 = vrsqrt.f32 %v4898_v17  ;;  %v4911_v23 = vmul.f32 %v14454_v49, %v10535_v9  ;;  %v4884_v25 = vmul.f32 %v4828_v19, %v4828_v19 }
 0xf0d   :  { %v4891_v2 = vsub.f32 %v4875_v26, %v4883_v6  ;;  %v4868_v51 = vpop.xlane.xlu0 %4867 }
 0xf0e   :  { %v10537_v3 = vpop.eup %10536  ;;  %v4876_v61 = vmul.f32 0.00390625, %v4868_v51  ;;  %v4919_v38 = vmul.f32 %v4911_v23, %v14410_v55  ;;  %v14470_v55 = vld [vmem:[%s15975_s7 + $0x20] sm:$0xff] }
 0xf0f   :  { %v4899_v42 = vadd.f32 1e-05, %v4891_v2  ;;  %v4912_v41 = vmul.f32 %v14461_v54, %v10537_v3  ;;  %16133 = vst [vmem:[#allocation13_spill] sm:$0xff] %v14470_v55  ;;  %v5864_v51 = vld [vmem:[%s15975_s7] sm:$0xff]  ;;  %v10771_v3 = vmov 17  }
 0xf10   :  { %v4892_v34 = vsub.f32 %v4876_v61, %v4884_v25  ;;  %4937 = vrot.lane.b32.xlu1 %v4919_v38, %s10760_s25  ;;  %v5865_v25 = vld [vmem:[%s15975_s7 + $0x8] sm:$0xff]  ;;  %v5867_v61 = vld [vmem:[%s15975_s7 + $0x18] sm:$0xff]  ;;  %v5866_v38 = vld [vmem:[%s15975_s7 + $0x10] sm:$0xff] }
 0xf11   :  { %10542 = vrsqrt.f32 %v4899_v42  ;;  %v4920_v50 = vmul.f32 %v4912_v41, %v14416_v60  ;;  %v5869_v42 = vld [vmem:[%s15975_s7 + $0x28] sm:$0xff] }
 0xf12   :  { %v4900_v20 = vadd.f32 1e-05, %v4892_v34  ;;  %v5871_v34 = vld [vmem:[%s15975_s7 + $0x38] sm:$0xff] }
 0xf13   :  { %v10539_v10 = vpop.eup %10538 }
 0xf14   :  { %10544 = vrsqrt.f32 %v4900_v20  ;;  %4939 = vrot.lane.b32.xlu1 %v4920_v50, %s10760_s25  ;;  %v4913_v28 = vmul.f32 %v14470_v55, %v10539_v10  ;;  %v5870_v50 = vld [vmem:[%s15975_s7 + $0x30] sm:$0xff]  ;;  %v5873_v20 = vld [vmem:[%s15975_s7 + $0x48] sm:$0xff]  ;;  %v5872_v10 = vld [vmem:[%s15975_s7 + $0x40] sm:$0xff] }
 0xf16   :  { %v10541_v35 = vpop.eup %10540  ;;  %v4921_v32 = vmul.f32 %v4913_v28, %v4825_v37 }
 0xf17   :  { %v4914_v60 = vmul.f32 %v14476_v57, %v10541_v35  ;;  %v5874_v35 = vld [vmem:[%s15975_s7 + $0x50] sm:$0xff] }
 0xf18   :  { %4941 = vrot.lane.b32.xlu0 %v4921_v32, %s10760_s25  ;;  %v5877_v32 = vld [vmem:[%s15975_s7 + $0x68] sm:$0xff] }
 0xf19   :  { %v4922_v39 = vmul.f32 %v4914_v60, %v4826_v53 }
 0xf1b   :  { %v10543_v18 = vpop.eup %10542  ;;  %4943 = vrot.lane.b32.xlu1 %v4922_v39, %s10760_s25  ;;  %v5876_v39 = vld [vmem:[%s15975_s7 + $0x60] sm:$0xff] }
 0xf1c   :  { %v4915_v37 = vmul.f32 %v14484_v29, %v10543_v18 }
 0xf1e   :  { %v10545_v52 = vpop.eup %10544  ;;  %v4923_v0 = vmul.f32 %v4915_v37, %v4827_v47 }
 0xf1f   :  { %v4916_v33 = vmul.f32 %v14490_v46, %v10545_v52 }
 0xf20   :  { %4945 = vrot.lane.b32.xlu0 %v4923_v0, %s10760_s25 }
 0xf21   :  { %v4924_v53 = vmul.f32 %v4916_v33, %v4828_v19 }
 0xf23   :  { %4947 = vrot.lane.b32.xlu1 %v4924_v53, %s10760_s25 }
 0xf24   :  { %4967 = vperm.xlu0 %10055, %v14439_v27  }
 0xf27   :  { %4972 = vperm.xlu1 %10056, %v4910_v56  }
 0xf28   :  { %4987 = vperm.xlu0 %10055, %v4913_v28   ;;  %v5875_v28 = vld [vmem:[%s15975_s7 + $0x58] sm:$0xff] }
 0xf2b   :  { %4977 = vperm.xlu1 %10056, %v4911_v23  }
 0xf2c   :  { %10058 = vset.pattern.permute.xlu0 %v10761_v30 }
 0xf2f   :  { %4982 = vperm.xlu1 %10056, %v4912_v41   ;;  %v5868_v41 = vld [vmem:[%s15975_s7 + $0x20] sm:$0xff] }
 0xf33   :  { %4992 = vperm.xlu1 %10056, %v4914_v60  }
 0xf37   :  { %4997 = vperm.xlu1 %10056, %v4915_v37   ;;  %v5879_v37 = vld [vmem:[%s15975_s7 + $0x78] sm:$0xff] }
 0xf3b   :  { %5002 = vperm.xlu1 %10056, %v4916_v33   ;;  %v5878_v33 = vld [vmem:[%s15975_s7 + $0x70] sm:$0xff] }
 0xf3f   :  { %10057 = vset.pattern.permute.xlu1 %v10761_v30 }
 0xf64   :  { %v14545_v60 = vpop.f32.mrb[160].mxu0 }
 0xf65   :  { %v14550_v18 = vpop.f32.mrb[161].mxu0 }
 0xf68   :  { %v14555_v52 = vpop.f32.mrb[162].mxu0 }
 0xf69   :  { %v14557_v0 = vpop.f32.mrb[163].mxu0 }
 0xf6c   :  { %v14562_v53 = vpop.f32.mrb[164].mxu0 }
 0xf79   :  { %v4934_v1 = vpop.permute.xlu1 %4933 }
 0xf7a   :  { %v4957_v47 = vsub.f32 %v14436_v8, %v4934_v1  ;;  %v14564_v1 = vpop.f32.mrb[165].mxu0 }
 0xf7c   :  { %5023 = vperm.xlu1 %10057, %v4957_v47   ;;  %v14566_v47 = vpop.f32.mrb[166].mxu0 }
 0xf7d   :  { %v4936_v58 = vpop.permute.xlu0 %4935 }
 0xf7e   :  { %v4958_v40 = vsub.f32 %v14446_v12, %v4936_v58  ;;  %v14568_v58 = vpop.f32.mrb[167].mxu0 }
 0xf80   :  { %5028 = vperm.xlu0 %10058, %v4958_v40   ;;  %v16136_v40 = vmov 0  }
 0xf82   :  { %v4938_v27 = vpop.permute.xlu1 %4937 }
 0xf83   :  { %v4959_v56 = vsub.f32 %v14454_v49, %v4938_v27  ;;  %v14571_v27 = vpop.f32.mrb[168].mxu0 }
 0xf85   :  { %5033 = vperm.xlu0 %10058, %v4959_v56   ;;  %v14573_v56 = vpop.f32.mrb[169].mxu0 }
 0xf86   :  { %v4940_v11 = vpop.permute.xlu1 %4939  ;;  %16137 = vst [vmem:[#allocation35_spill] sm:$0xff] %v14573_v56 }
 0xf87   :  { %v4960_v17 = vsub.f32 %v14461_v54, %v4940_v11  ;;  %v14575_v11 = vpop.f32.mrb[170].mxu0 }
 0xf89   :  { %5038 = vperm.xlu1 %10057, %v4960_v17   ;;  %v14577_v17 = vpop.f32.mrb[171].mxu0 }
 0xf8a   :  { %v4942_v19 = vpop.permute.xlu0 %4941 }
 0xf8b   :  { %v4961_v21 = vsub.f32 %v14470_v55, %v4942_v19  ;;  %v14579_v19 = vpop.f32.mrb[172].mxu0 }
 0xf8c   :  { %16138 = vst [vmem:[#allocation29_spill] sm:$0xff] %v14579_v19 }
 0xf8d   :  { %5043 = vperm.xlu1 %10057, %v4961_v21   ;;  %v4944_v30 = vpop.permute.xlu1 %4943  ;;  %v14581_v21 = vpop.f32.mrb[173].mxu0 }
 0xf8e   :  { %v4962_v9 = vsub.f32 %v14476_v57, %v4944_v30  ;;  %16139 = vst [vmem:[#allocation32_spill] sm:$0xff] %v14581_v21  ;;  %v14583_v30 = vpop.f32.mrb[174].mxu0 }
 0xf8f   :  { %16140 = vst [vmem:[#allocation19_spill] sm:$0xff] %v14583_v30 }
 0xf90   :  { %5048 = vperm.xlu0 %10058, %v4962_v9   ;;  %v14585_v9 = vpop.f32.mrb[175].mxu0 }
 0xf91   :  { %16141 = vst [vmem:[#allocation36_spill] sm:$0xff] %v14585_v9 }
 0xf92   :  { %v4946_v6 = vpop.permute.xlu0 %4945 }
 0xf93   :  { %v4963_v26 = vsub.f32 %v14484_v29, %v4946_v6  ;;  %v14587_v6 = vpop.f32.mrb[176].mxu0 }
 0xf94   :  { %16142 = vst [vmem:[#allocation16_spill] sm:$0xff] %v14587_v6 }
 0xf95   :  { %5053 = vperm.xlu0 %10058, %v4963_v26   ;;  %v4948_v23 = vpop.permute.xlu1 %4947  ;;  %v14589_v26 = vpop.f32.mrb[177].mxu0 }
 0xf96   :  { %v4964_v2 = vsub.f32 %v14490_v46, %v4948_v23  ;;  %16143 = vst [vmem:[#allocation38_spill] sm:$0xff] %v14589_v26  ;;  %v14591_v23 = vpop.f32.mrb[178].mxu0  ;;  %v14657_v46 = vld [vmem:[%s15975_s7 + $0x58] sm:$0xff] }
 0xf97   :  { %16144 = vst [vmem:[#allocation33_spill] sm:$0xff] %v14591_v23  ;;  %v14721_v26 = vld [vmem:[%s15975_s7 + $0xb8] sm:$0xff] }
 0xf98   :  { %5058 = vperm.xlu1 %10057, %v4964_v2   ;;  %v14593_v2 = vpop.f32.mrb[179].mxu0  ;;  %16162 = vst [vmem:[#allocation23_spill] sm:$0xff] %v14721_v26 }
 0xf99   :  { %10059 = vset.pattern.permute.xlu0 %v10771_v3  ;;  %16145 = vst [vmem:[#allocation17_spill] sm:$0xff] %v14593_v2 }
 0xf9a   :  { %5882 = vperm.xlu0 %10059, %v5864_v51   ;;  %v14595_v51 = vpop.f32.mrb[180].mxu0 }
 0xf9b   :  { %16146 = vst [vmem:[#allocation30_spill] sm:$0xff] %v14595_v51  ;;  %v14707_v51 = vld [vmem:[%s15975_s7 + $0x78] sm:$0xff] }
 0xf9c   :  { %10060 = vset.pattern.permute.xlu1 %v10771_v3  ;;  %v14597_v3 = vpop.f32.mrb[181].mxu0  ;;  %16160 = vst [vmem:[#allocation18_spill] sm:$0xff] %v14707_v51 }
 0xf9d   :  { %5887 = vperm.xlu1 %10060, %v5865_v25   ;;  %16147 = vst [vmem:[#allocation24_spill] sm:$0xff] %v14597_v3  ;;  %v14599_v25 = vpop.f32.mrb[182].mxu0  ;;  %v14701_v3 = vld [vmem:[%s15975_s7 + $0x70] sm:$0xff] }
 0xf9e   :  { %5897 = vperm.xlu0 %10059, %v5867_v61   ;;  %16148 = vst [vmem:[#allocation21_spill] sm:$0xff] %v14599_v25  ;;  %v14601_v61 = vpop.f32.mrb[183].mxu0  ;;  %v14715_v25 = vld [vmem:[%s15975_s7 + $0xb0] sm:$0xff] }
 0xf9f   :  { %16149 = vst [vmem:[#allocation22_spill] sm:$0xff] %v14601_v61  ;;  %16161 = vst [vmem:[#allocation20_spill] sm:$0xff] %v14715_v25 }
 0xfa1   :  { %5892 = vperm.xlu1 %10060, %v5866_v38   ;;  %v14603_v38 = vpop.f32.mrb[184].mxu0 }
 0xfa2   :  { %5907 = vperm.xlu0 %10059, %v5869_v42   ;;  %16150 = vst [vmem:[#allocation5_spill] sm:$0xff] %v14603_v38  ;;  %v14605_v42 = vpop.f32.mrb[185].mxu0 }
 0xfa3   :  { %16151 = vst [vmem:[#allocation6_spill] sm:$0xff] %v14605_v42  ;;  %v14681_v42 = vld [vmem:[%s15975_s7 + $0x68] sm:$0xff]  ;;  %v4968_v61 = vpop.permute.xlu0 %4967 }
 0xfa4   :  { %v5006_v23 = vmul.f32 %v4968_v61, %v14235_v63 }
 0xfa5   :  { %5902 = vperm.xlu1 %10060, %v5868_v41   ;;  %v14607_v41 = vpop.f32.mrb[186].mxu0 }
 0xfa6   :  { %5917 = vperm.xlu0 %10059, %v5871_v34   ;;  %16152 = vst [vmem:[#allocation7_spill] sm:$0xff] %v14607_v41  ;;  %v14609_v34 = vpop.f32.mrb[187].mxu0  ;;  %v14695_v41 = vld [vmem:[%s15975_s7 + $0xa8] sm:$0xff] }
 0xfa7   :  { %16153 = vst [vmem:[#allocation8_spill] sm:$0xff] %v14609_v34  ;;  %v14689_v34 = vld [vmem:[%s15975_s7 + $0xa0] sm:$0xff]  ;;  %v4988_v57 = vpop.permute.xlu0 %4987 }
 0xfa8   :  { %16159 = vst [vmem:[#allocation15_spill] sm:$0xff] %v14689_v34 }
 0xfa9   :  { %5912 = vperm.xlu1 %10060, %v5870_v50   ;;  %v14611_v50 = vpop.f32.mrb[188].mxu0 }
 0xfaa   :  { %5927 = vperm.xlu0 %10059, %v5873_v20   ;;  %16154 = vst [vmem:[#allocation9_spill] sm:$0xff] %v14611_v50  ;;  %v14613_v20 = vpop.f32.mrb[189].mxu0  ;;  %v14669_v50 = vld [vmem:[%s15975_s7 + $0x98] sm:$0xff] }
 0xfab   :  { %16155 = vst [vmem:[#allocation10_spill] sm:$0xff] %v14613_v20  ;;  %v14663_v20 = vld [vmem:[%s15975_s7 + $0x90] sm:$0xff] }
 0xfad   :  { %5922 = vperm.xlu1 %10060, %v5872_v10   ;;  %v14618_v10 = vld [vmem:[%s15976_s8 + $0x60] sm:$0xff] }
 0xfae   :  { %5937 = vperm.xlu0 %10059, %v5875_v28   ;;  %16156 = vst [vmem:[#allocation11_spill] sm:$0xff] %v14618_v10  ;;  %v14620_v28 = vpop.f32.mrb[190].mxu0 }
 0xfaf   :  { %16157 = vst [vmem:[#allocation12_spill] sm:$0xff] %v14620_v28  ;;  %v14675_v28 = vld [vmem:[%s15975_s7 + $0x60] sm:$0xff] }
 0xfb1   :  { %5932 = vperm.xlu1 %10060, %v5874_v35   ;;  %v14623_v35 = vpop.f32.mrb[191].mxu0 }
 0xfb2   :  { %5947 = vperm.xlu0 %10059, %v5877_v32   ;;  %16158 = vst [vmem:[#allocation14_spill] sm:$0xff] %v14623_v35  ;;  %v16018_v32 = vmov 6  }
 0xfb5   :  { %5942 = vperm.xlu1 %10060, %v5876_v39   ;;  %v14630_v39 = vld [vmem:[%s15975_s7 + $0x48] sm:$0xff] }
 0xfb6   :  { %5957 = vperm.xlu0 %10059, %v5879_v37   ;;  %v10715_v37 = vld [vmem:[%s15975_s7 + $0x40] sm:$0xff] }
 0xfb9   :  { %5952 = vperm.xlu1 %10060, %v5878_v33   ;;  %v4973_v33 = vpop.permute.xlu1 %4972 }
 0xfba   :  { %10062 = vset.pattern.permute.xlu0 %v16018_v32  ;;  %v5007_v21 = vmul.f32 %v4973_v33, %v14244_v45  ;;  %v5008_v19 = vmul.f32 %v4973_v33, %v14249_v43 }
 0xfbb   :  { %5135 = vperm.xlu0 %10062, %v10715_v37  }
 0xfbd   :  { %10061 = vset.pattern.permute.xlu1 %v16136_v40  ;;  %v14639_v40 = vld [vmem:[%s15975_s7 + $0x80] sm:$0xff] }
 0xfbe   :  { %6517 = vperm.xlu1 %10061, %v14618_v10   ;;  %v4978_v10 = vpop.permute.xlu1 %4977 }
 0xfbf   :  { %v5009_v45 = vmul.f32 %v4978_v10, %v14260_v22  ;;  %v5010_v43 = vmul.f32 %v4978_v10, %v14265_v44  ;;  %v5013_v22 = vmul.f32 %v4988_v57, %v14290_v14 }
 0xfc2   :  { %10063 = vset.pattern.permute.xlu1 %v16018_v32  ;;  %v14645_v32 = vld [vmem:[%s15975_s7 + $0x88] sm:$0xff]  ;;  %v4983_v35 = vpop.permute.xlu1 %4982 }
 0xfc3   :  { %5139 = vperm.xlu1 %10063, %v14630_v39   ;;  %5171 = vperm.xlu0 %10062, %v14645_v32  }
 0xfc6   :  { %v14684_v38 = vpop.permute.xlu1 %4992 }
 0xfc7   :  { %5167 = vperm.xlu1 %10063, %v14639_v40   ;;  %5147 = vperm.xlu0 %10062, %v14657_v46  }
 0xfcb   :  { %5143 = vperm.xlu1 %10063, %v14651_v16   ;;  %5179 = vperm.xlu0 %10062, %v14669_v50  }
 0xfcf   :  { %5175 = vperm.xlu1 %10063, %v14663_v20   ;;  %5155 = vperm.xlu0 %10062, %v14681_v42  }
 0xfd3   :  { %5151 = vperm.xlu1 %10063, %v14675_v28   ;;  %5187 = vperm.xlu0 %10062, %v14695_v41  }
 0xfd7   :  { %5183 = vperm.xlu1 %10063, %v14689_v34   ;;  %5163 = vperm.xlu0 %10062, %v14707_v51   ;;  %v14710_v34 = vpop.permute.xlu1 %4997  ;;  %v16030_v51 = vmov 13  }
 0xfdb   :  { %5159 = vperm.xlu1 %10063, %v14701_v3   ;;  %5195 = vperm.xlu0 %10062, %v14721_v26   ;;  %v14724_v6 = vpop.permute.xlu1 %5002  ;;  %v16163_v26 = vmov 6  }
 0xfdf   :  { %5191 = vperm.xlu1 %10063, %v14715_v25   ;;  %5111 = vperm.xlu0 %10062, %v14454_v49   ;;  %v5005_v25 = vmul.f32 %v4968_v61, %v14232_v13  ;;  %v16164_v13 = vmov 13  }
 0xfe3   :  { %10064 = vset.pattern.permute.xlu1 %v16030_v51  ;;  %5119 = vperm.xlu0 %10062, %v14470_v55  }
 0xfe4   :  { %5496 = vperm.xlu1 %10064, %v10715_v37  }
 0xfe7   :  { %5127 = vperm.xlu0 %10062, %v14484_v29  }
 0xfe8   :  { %10065 = vset.pattern.permute.xlu1 %v16163_v26 }
 0xfe9   :  { %5103 = vperm.xlu1 %10065, %v14436_v8  }
 0xfeb   :  { %10075 = vset.pattern.permute.xlu0 %v16164_v13 }
 0xfec   :  { %5500 = vperm.xlu0 %10075, %v14630_v39  }
 0xfed   :  { %5107 = vperm.xlu1 %10065, %v14446_v12  }
 0xff0   :  { %5576 = vperm.xlu0 %10075, %v14639_v40  }
 0xff1   :  { %10066 = vset.pattern.permute.xlu1 %v16164_v13 }
 0xff2   :  { %5580 = vperm.xlu1 %10066, %v14645_v32  }
 0xff4   :  { %5504 = vperm.xlu0 %10075, %v14651_v16   ;;  %v5018_v16 = vmul.f32 %v14710_v34, %v14319_v59 }
 0xff6   :  { %5508 = vperm.xlu1 %10066, %v14657_v46  }
 0xff8   :  { %5588 = vperm.xlu0 %10075, %v14669_v50  }
 0xffa   :  { %10067 = vset.pattern.permute.xlu1 %v16163_v26 }
 0xffb   :  { %v5024_v2 = vpop.permute.xlu1 %5023  ;;  %5115 = vperm.xlu1 %10067, %v14461_v54  }
 0xffc   :  { %v5061_v51 = vadd.f32 %v5024_v2, %v5005_v25  ;;  %v5062_v49 = vadd.f32 %v5024_v2, %v5006_v23  ;;  %5512 = vperm.xlu0 %10075, %v14675_v28  }
 0xfff   :  { %v5029_v9 = vpop.permute.xlu0 %5028  ;;  %10068 = vset.pattern.permute.xlu1 %v16164_v13 }
0x1000   :  { %v5063_v37 = vadd.f32 %v5029_v9, %v5007_v21  ;;  %v5064_v30 = vadd.f32 %v5029_v9, %v5008_v19  ;;  %v5011_v21 = vmul.f32 %v4983_v35, %v14278_v62  ;;  %v5012_v19 = vmul.f32 %v4983_v35, %v14281_v36  ;;  %5584 = vperm.xlu1 %10068, %v14663_v20  }
0x1001   :  { %v5014_v62 = vmul.f32 %v4988_v57, %v14293_v7  ;;  %v5015_v36 = vmul.f32 %v14684_v38, %v14304_v4  ;;  %v5017_v4 = vmul.f32 %v14710_v34, %v14316_v5  ;;  %v5019_v57 = vmul.f32 %v14724_v6, %v14328_v15  ;;  %5596 = vperm.xlu0 %10075, %v14695_v41  }
0x1002   :  { %v9536_v55 = vpack.c.bf16 %v5064_v30, %v5062_v49  ;;  %v9538_v56 = vpack.c.bf16 %v5063_v37, %v5061_v51  ;;  %v5016_v51 = vmul.f32 %v14684_v38, %v14307_v31  ;;  %v5020_v38 = vmul.f32 %v14724_v6, %v14333_v48  ;;  %v8963_v6 = vld [vmem:[%s15971_s3 + $0x3c0] sm:$0xff] }
0x1003   :  { %v10774_v15 = vmov 18  }
0x1004   :  { %9537 = vmatprep.subr.bf16.mxu1 %v9536_v55  ;;  %v5034_v63 = vpop.permute.xlu0 %5033  ;;  %10069 = vset.pattern.permute.xlu1 %v10774_v15 }
0x1005   :  { %9539 = vmatpush1.bf16.msra.mxu1 %v9538_v56  ;;  %v5065_v55 = vadd.f32 %v5034_v63, %v5009_v45  ;;  %v5066_v56 = vadd.f32 %v5034_v63, %v5010_v43  ;;  %6210 = vperm.xlu1 %10069, %v14436_v8  }
0x1006   :  { %5520 = vperm.xlu0 %10075, %v14701_v3  }
0x1008   :  { %v5039_v49 = vpop.permute.xlu1 %5038 }
0x1009   :  { %v5067_v30 = vadd.f32 %v5039_v49, %v5011_v21  ;;  %v5068_v9 = vadd.f32 %v5039_v49, %v5012_v19  ;;  %6214 = vperm.xlu1 %10069, %v14446_v12  }
0x100b   :  { %v9540_v23 = vpack.c.bf16 %v5068_v9, %v5066_v56  ;;  %v9542_v2 = vpack.c.bf16 %v5067_v30, %v5065_v55 }
0x100c   :  { %v5044_v44 = vpop.permute.xlu1 %5043 }
0x100d   :  { %9541 = vmatprep.subr.bf16.mxu1 %v9540_v23  ;;  %v5069_v61 = vadd.f32 %v5044_v44, %v5013_v22  ;;  %v5070_v10 = vadd.f32 %v5044_v44, %v5014_v62  ;;  %10070 = vset.pattern.permute.xlu1 %v16164_v13  ;;  %v16165_v22 = vld [vmem:[#allocation35_spill] sm:$0xff] }
0x100e   :  { %9543 = vmatpush1.bf16.msra.mxu1 %v9542_v2  ;;  %5516 = vperm.xlu1 %10070, %v14681_v42  }
0x100f   :  { %v5049_v25 = vpop.permute.xlu0 %5048 }
0x1010   :  { %v5071_v35 = vadd.f32 %v5049_v25, %v5015_v36  ;;  %v5072_v46 = vadd.f32 %v5049_v25, %v5016_v51  ;;  %v16166_v25 = vld [vmem:[#allocation19_spill] sm:$0xff] }
0x1012   :  { %v9544_v14 = vpack.c.bf16 %v5072_v46, %v5070_v10  ;;  %v9546_v7 = vpack.c.bf16 %v5071_v35, %v5069_v61  ;;  %v16167_v10 = vld [vmem:[#allocation36_spill] sm:$0xff]  ;;  %v16168_v35 = vld [vmem:[#allocation23_spill] sm:$0xff]  ;;  %10071 = vset.pattern.permute.xlu1 %v16163_v26 }
0x1013   :  { %5604 = vperm.xlu0 %10075, %v16168_v35  }
0x1014   :  { %9545 = vmatprep.subr.bf16.mxu1 %v9544_v14  ;;  %v5054_v31 = vpop.permute.xlu0 %5053 }
0x1015   :  { %9547 = vmatpush1.bf16.msra.mxu1 %v9546_v7  ;;  %v5073_v32 = vadd.f32 %v5054_v31, %v5017_v4  ;;  %v5074_v5 = vadd.f32 %v5054_v31, %v5018_v16  ;;  %v16169_v16 = vld [vmem:[#allocation29_spill] sm:$0xff] }
0x1017   :  { %v5059_v50 = vpop.permute.xlu1 %5058  ;;  %10079 = vset.pattern.permute.xlu0 %v10774_v15 }
0x1018   :  { %v5075_v39 = vadd.f32 %v5059_v50, %v5019_v57  ;;  %v5076_v33 = vadd.f32 %v5059_v50, %v5020_v38  ;;  %v16170_v38 = vld [vmem:[#allocation32_spill] sm:$0xff]  ;;  %6234 = vperm.xlu0 %10079, %v14484_v29  }
0x1019   :  { %v5883_v40 = vpop.permute.xlu0 %5882 }
0x101a   :  { %v9548_v37 = vpack.c.bf16 %v5076_v33, %v5074_v5  ;;  %v9550_v63 = vpack.c.bf16 %v5075_v39, %v5073_v32  ;;  %v6075_v59 = vadd.f32 %v14545_v60, %v5883_v40  ;;  %v6077_v34 = vadd.f32 %v14550_v18, %v5883_v40  ;;  %v16171_v33 = vld [vmem:[#allocation33_spill] sm:$0xff] }
0x101c   :  { %9549 = vmatprep.subr.bf16.mxu1 %v9548_v37  ;;  %v5888_v48 = vpop.permute.xlu1 %5887  ;;  %v6169_v20 = vmax.f32 %v6075_v59, 0.0  ;;  %v6170_v28 = vmax.f32 %v6077_v34, 0.0  ;;  %v16172_v37 = vld [vmem:[#allocation17_spill] sm:$0xff] }
0x101d   :  { %9551 = vmatpush1.bf16.msra.mxu1 %v9550_v63  ;;  %v6081_v60 = vadd.f32 %v14555_v52, %v5888_v48  ;;  %v6083_v18 = vadd.f32 %v14557_v0, %v5888_v48  ;;  %v5898_v45 = vpop.permute.xlu0 %5897  ;;  %v8964_v52 = vld [vmem:[%s15971_s3 + $0x3c8] sm:$0xff]  ;;  %v16173_v48 = vld [vmem:[#allocation31_spill] sm:$0xff] }
0x101e   :  { %v6093_v43 = vadd.f32 %v14566_v47, %v5898_v45  ;;  %v6095_v8 = vadd.f32 %v14568_v58, %v5898_v45  ;;  %5123 = vperm.xlu1 %10071, %v16173_v48  }
0x101f   :  { %v6171_v21 = vmax.f32 %v6081_v60, 0.0  ;;  %v6172_v41 = vmax.f32 %v6083_v18, 0.0  ;;  %v16174_v18 = vld [vmem:[#allocation16_spill] sm:$0xff] }
0x1020   :  { %8987 = vmatmul.mubr.msk.f32.vlgmr.msra.gmra.mrb[144].mxu1 %vm907_vm2, %v8963_v6  ;;  %v6175_v19 = vmax.f32 %v6093_v43, 0.0  ;;  %v5893_v49 = vpop.permute.xlu1 %5892  ;;  %v6176_v12 = vmax.f32 %v6095_v8, 0.0  ;;  %v16175_v43 = vld [vmem:[#allocation38_spill] sm:$0xff] }
0x1021   :  { %5340 = vmatprep.mubr.f32.mxu1 %v16114_v24  ;;  %v9618_v0 = vpack.c.bf16 %v6171_v21, %v6169_v20  ;;  %v6087_v47 = vadd.f32 %v14562_v53, %v5893_v49  ;;  %v6089_v58 = vadd.f32 %v14564_v1, %v5893_v49  ;;  %v9616_v55 = vpack.c.bf16 %v6172_v41, %v6170_v28  ;;  %v5908_v56 = vpop.permute.xlu0 %5907  ;;  %v8965_v53 = vld [vmem:[%s15971_s3 + $0x3d0] sm:$0xff]  ;;  %v8967_v20 = vld [vmem:[%s15971_s3 + $0x3e0] sm:$0xff] }
0x1022   :  { %v6105_v3 = vadd.f32 %v14575_v11, %v5908_v56  ;;  %v6107_v30 = vadd.f32 %v14577_v17, %v5908_v56  ;;  %10072 = vset.pattern.permute.xlu1 %v16164_v13 }
0x1023   :  { %v6173_v9 = vmax.f32 %v6087_v47, 0.0  ;;  %v6174_v23 = vmax.f32 %v6089_v58, 0.0  ;;  %9617 = vmatprep.subr.bf16.mxu1 %v9616_v55  ;;  %v16178_v55 = vmov 2  }
0x1024   :  { %8988 = vmatmul.mubr.msk.f32.gmra.mrb[146].mxu1 %vm907_vm2, %v8964_v52  ;;  %v5903_v2 = vpop.permute.xlu1 %5902  ;;  %v6179_v11 = vmax.f32 %v6105_v3, 0.0  ;;  %v6180_v36 = vmax.f32 %v6107_v30, 0.0  ;;  %v16177_v52 = vld [vmem:[#allocation22_spill] sm:$0xff]  ;;  %10081 = vset.pattern.permute.xlu0 %v16178_v55  ;;  %v16194_v55 = vld [vmem:[#allocation13_spill] sm:$0xff] }
0x1025   :  { %5346 = vmatprep.mubr.f32.mxu1 %v16114_v24  ;;  %v9622_v1 = vpack.c.bf16 %v6175_v19, %v6173_v9  ;;  %9619 = vmatpush1.bf16.msra.mxu1 %v9618_v0  ;;  %v6099_v17 = vadd.f32 %v14571_v27, %v5903_v2  ;;  %v6101_v44 = vadd.f32 %v16165_v22, %v5903_v2  ;;  %v5918_v62 = vpop.permute.xlu0 %5917  ;;  %v8966_v27 = vld [vmem:[%s15971_s3 + $0x3d8] sm:$0xff]  ;;  %v16176_v19 = vld [vmem:[#allocation21_spill] sm:$0xff]  ;;  %v16179_v9 = vld [vmem:[#allocation30_spill] sm:$0xff] }
0x1026   :  { %v9620_v51 = vpack.c.bf16 %v6176_v12, %v6174_v23  ;;  %v6117_v61 = vadd.f32 %v16166_v25, %v5918_v62  ;;  %v6119_v42 = vadd.f32 %v16167_v10, %v5918_v62  ;;  %v8968_v12 = vld [vmem:[%s15971_s3 + $0x3e8] sm:$0xff]  ;;  %v16180_v2 = vld [vmem:[#allocation24_spill] sm:$0xff]  ;;  %v16181_v22 = vld [vmem:[#allocation7_spill] sm:$0xff] }
0x1027   :  { %v6177_v46 = vmax.f32 %v6099_v17, 0.0  ;;  %v6178_v14 = vmax.f32 %v6101_v44, 0.0  ;;  %v16182_v62 = vld [vmem:[#allocation8_spill] sm:$0xff] }
0x1028   :  { %8989 = vmatmul.mubr.msk.f32.gmra.mrb[148].mxu1 %vm907_vm2, %v8965_v53  ;;  %9621 = vmatprep.subr.bf16.mxu1 %v9620_v51  ;;  %v5913_v7 = vpop.permute.xlu1 %5912  ;;  %v6183_v31 = vmax.f32 %v6117_v61, 0.0  ;;  %v6184_v5 = vmax.f32 %v6119_v42, 0.0  ;;  %v16183_v51 = vld [vmem:[#allocation15_spill] sm:$0xff] }
0x1029   :  { %5352 = vmatprep.mubr.f32.mxu1 %v16114_v24  ;;  %v9626_v4 = vpack.c.bf16 %v6179_v11, %v6177_v46  ;;  %9623 = vmatpush1.bf16.msra.mxu1 %v9622_v1  ;;  %v6111_v57 = vadd.f32 %v16169_v16, %v5913_v7  ;;  %v6113_v50 = vadd.f32 %v16170_v38, %v5913_v7  ;;  %v5928_v32 = vpop.permute.xlu0 %5927  ;;  %v8969_v42 = vld [vmem:[%s15971_s3 + $0x3f0] sm:$0xff]  ;;  %v16186_v38 = vld [vmem:[#allocation12_spill] sm:$0xff] }
0x102a   :  { %v9624_v39 = vpack.c.bf16 %v6180_v36, %v6178_v14  ;;  %v6129_v40 = vadd.f32 %v16171_v33, %v5928_v32  ;;  %v6131_v63 = vadd.f32 %v16172_v37, %v5928_v32  ;;  %5592 = vperm.xlu1 %10072, %v16183_v51   ;;  %v16184_v14 = vld [vmem:[#allocation5_spill] sm:$0xff]  ;;  %v16187_v32 = vld [vmem:[#allocation14_spill] sm:$0xff] }
0x102b   :  { %v6181_v59 = vmax.f32 %v6111_v57, 0.0  ;;  %v6182_v34 = vmax.f32 %v6113_v50, 0.0  ;;  %v6202_v51 = vld [vmem:[%s15974_s6 + $0x8] sm:$0xff] }
0x102c   :  { %8990 = vmatmul.mubr.msk.f32.gmra.mrb[150].mxu1 %vm907_vm2, %v8966_v27  ;;  %9625 = vmatprep.subr.bf16.mxu1 %v9624_v39  ;;  %v5923_v6 = vpop.permute.xlu1 %5922  ;;  %v6187_v60 = vmax.f32 %v6129_v40, 0.0  ;;  %v6188_v41 = vmax.f32 %v6131_v63, 0.0  ;;  %v16185_v27 = vld [vmem:[#allocation6_spill] sm:$0xff]  ;;  %v16188_v40 = vld [vmem:[#allocation37_spill] sm:$0xff] }
0x102d   :  { %5358 = vmatprep.mubr.f32.mxu1 %v16114_v24  ;;  %v9630_v28 = vpack.c.bf16 %v6183_v31, %v6181_v59  ;;  %9627 = vmatpush1.bf16.msra.mxu1 %v9626_v4  ;;  %v6123_v45 = vadd.f32 %v16174_v18, %v5923_v6  ;;  %v6125_v8 = vadd.f32 %v16175_v43, %v5923_v6  ;;  %v5938_v21 = vpop.permute.xlu0 %5937  ;;  %v8970_v59 = vld [vmem:[%s15971_s3 + $0x3f8] sm:$0xff] }
0x102e   :  { %v9628_v29 = vpack.c.bf16 %v6184_v5, %v6182_v34  ;;  %v6141_v49 = vadd.f32 %v16176_v19, %v5938_v21  ;;  %v6143_v0 = vadd.f32 %v16177_v52, %v5938_v21  ;;  %10073 = vset.pattern.permute.xlu1 %v10774_v15  ;;  %v8971_v21 = vld [vmem:[%s15971_s3 + $0x400] sm:$0xff]  ;;  %v16191_v19 = vld [vmem:[#allocation18_spill] sm:$0xff] }
0x102f   :  { %v6185_v47 = vmax.f32 %v6123_v45, 0.0  ;;  %v6186_v58 = vmax.f32 %v6125_v8, 0.0  ;;  %6218 = vperm.xlu1 %10073, %v16188_v40   ;;  %v8973_v52 = vld [vmem:[%s15971_s3 + $0x410] sm:$0xff] }
0x1030   :  { %8991 = vmatmul.mubr.msk.f32.gmra.mrb[152].mxu1 %vm907_vm2, %v8967_v20  ;;  %9629 = vmatprep.subr.bf16.mxu1 %v9628_v29  ;;  %v5933_v56 = vpop.permute.xlu1 %5932  ;;  %v6191_v30 = vmax.f32 %v6141_v49, 0.0  ;;  %v6192_v11 = vmax.f32 %v6143_v0, 0.0  ;;  %v16189_v20 = vld [vmem:[#allocation9_spill] sm:$0xff]  ;;  %v10775_v49 = vmov 0.0|0.0   ;;  %v16192_v0 = vld [vmem:[#allocation34_spill] sm:$0xff] }
0x1031   :  { %5364 = vmatprep.mubr.f32.mxu1 %v16114_v24  ;;  %v9634_v3 = vpack.c.bf16 %v6187_v60, %v6185_v47  ;;  %9631 = vmatpush1.bf16.msra.mxu1 %v9630_v28  ;;  %v6135_v23 = vadd.f32 %v16179_v9, %v5933_v56  ;;  %v6137_v53 = vadd.f32 %v16180_v2, %v5933_v56  ;;  %v5948_v1 = vpop.permute.xlu0 %5947  ;;  %v16190_v60 = vld [vmem:[#allocation10_spill] sm:$0xff]  ;;  %v8974_v47 = vld [vmem:[%s15971_s3 + $0x418] sm:$0xff]  ;;  %v8983_v2 = vld [vmem:[%s15971_s3 + $0x460] sm:$0xff] }
0x1032   :  { %v9632_v17 = vpack.c.bf16 %v6188_v41, %v6186_v58  ;;  %v6153_v44 = vadd.f32 %v16181_v22, %v5948_v1  ;;  %v6155_v36 = vadd.f32 %v16182_v62, %v5948_v1  ;;  %v16193_v58 = vld [vmem:[#allocation20_spill] sm:$0xff]  ;;  %v8981_v9 = vld [vmem:[%s15971_s3 + $0x450] sm:$0xff]  ;;  %v6508_v22 = vld [vmem:[%s15968_s0 + $0x8] sm:$0xff] }
0x1033   :  { %v6189_v25 = vmax.f32 %v6135_v23, 0.0  ;;  %v6190_v61 = vmax.f32 %v6137_v53, 0.0  ;;  %6222 = vperm.xlu1 %10073, %v14461_v54   ;;  %v8972_v54 = vld [vmem:[%s15971_s3 + $0x408] sm:$0xff]  ;;  %v8978_v56 = vld [vmem:[%s15971_s3 + $0x438] sm:$0xff]  ;;  %v8985_v1 = vld [vmem:[%s15971_s3 + $0x470] sm:$0xff] }
0x1034   :  { %8992 = vmatmul.mubr.msk.f32.gmra.mrb[154].mxu1 %vm907_vm2, %v8968_v12  ;;  %9633 = vmatprep.subr.bf16.mxu1 %v9632_v17  ;;  %v5943_v10 = vpop.permute.xlu1 %5942  ;;  %v6195_v46 = vmax.f32 %v6153_v44, 0.0  ;;  %v6196_v16 = vmax.f32 %v6155_v36, 0.0  ;;  %v16195_v12 = vmov 1   ;;  %v8982_v23 = vld [vmem:[%s15971_s3 + $0x458] sm:$0xff]  ;;  %v8984_v53 = vld [vmem:[%s15971_s3 + $0x468] sm:$0xff]  ;;  %v6507_v17 = vld [vmem:[%s15968_s0] sm:$0xff] }
0x1035   :  { %5370 = vmatprep.mubr.f32.mxu1 %v16114_v24  ;;  %v9638_v35 = vpack.c.bf16 %v6191_v30, %v6189_v25  ;;  %9635 = vmatpush1.bf16.msra.mxu1 %v9634_v3  ;;  %v6147_v7 = vadd.f32 %v16184_v14, %v5943_v10  ;;  %v6149_v4 = vadd.f32 %v16185_v27, %v5943_v10  ;;  %v5958_v31 = vpop.permute.xlu0 %5957  ;;  %v8979_v3 = vld [vmem:[%s15971_s3 + $0x440] sm:$0xff]  ;;  %v8980_v30 = vld [vmem:[%s15971_s3 + $0x448] sm:$0xff]  ;;  %v6509_v25 = vld [vmem:[%s15968_s0 + $0x10] sm:$0xff] }
0x1036   :  { %v9636_v57 = vpack.c.bf16 %v6192_v11, %v6190_v61  ;;  %v6165_v50 = vadd.f32 %v16186_v38, %v5958_v31  ;;  %v6167_v5 = vadd.f32 %v16187_v32, %v5958_v31  ;;  %v8986_v11 = vld [vmem:[%s15971_s3 + $0x478] sm:$0xff]  ;;  %v6201_v44 = vld [vmem:[%s15974_s6] sm:$0xff]  ;;  %v9649_v62 = vpack.c.bf16 %v6508_v22, %v6507_v17  ;;  %v6203_v10 = vld [vmem:[%s15974_s6 + $0x10] sm:$0xff] }
0x1037   :  { %v6193_v39 = vmax.f32 %v6147_v7, 0.0  ;;  %v6194_v33 = vmax.f32 %v6149_v4, 0.0  ;;  %10074 = vset.pattern.permute.xlu1 %v16164_v13  ;;  %v6510_v61 = vld [vmem:[%s15968_s0 + $0x18] sm:$0xff]  ;;  %v6512_v14 = vld [vmem:[%s15968_s0 + $0x28] sm:$0xff]  ;;  %v6205_v7 = vld [vmem:[%s15974_s6 + $0x20] sm:$0xff] }
0x1038   :  { %8993 = vmatmul.mubr.msk.f32.gmra.mrb[156].mxu1 %vm907_vm2, %v8969_v42  ;;  %9637 = vmatprep.subr.bf16.mxu1 %v9636_v57  ;;  %v6199_v37 = vmax.f32 %v6165_v50, 0.0  ;;  %v5953_v63 = vpop.permute.xlu1 %5952  ;;  %v6200_v6 = vmax.f32 %v6167_v5, 0.0  ;;  %v9653_v42 = vpack.c.bf16 %v6510_v61, %v6509_v25  ;;  %v6206_v4 = vld [vmem:[%s15974_s6 + $0x28] sm:$0xff]  ;;  %v6513_v31 = vld [vmem:[%s15968_s0 + $0x30] sm:$0xff]  ;;  %v6208_v50 = vld [vmem:[%s15974_s6 + $0x38] sm:$0xff] }
0x1039   :  { %5376 = vmatprep.mubr.f32.mxu1 %v16114_v24  ;;  %v9642_v34 = vpack.c.bf16 %v6195_v46, %v6193_v39  ;;  %9639 = vmatpush1.bf16.msra.mxu1 %v9638_v35  ;;  %v6159_v28 = vadd.f32 %v16189_v20, %v5953_v63  ;;  %v6161_v18 = vadd.f32 %v16190_v60, %v5953_v63  ;;  %v6204_v35 = vld [vmem:[%s15974_s6 + $0x18] sm:$0xff]  ;;  %v6511_v46 = vld [vmem:[%s15968_s0 + $0x20] sm:$0xff]  ;;  %v6207_v57 = vld [vmem:[%s15974_s6 + $0x30] sm:$0xff]  ;;  %v6371_v60 = vlaneseq  ;;  %s8683_s6 = sshll.u32 %s10778_s29, 4  ;;  %s8684_s6 = int_to_ptr.vmem [resolvable:$true] %s8683_s6 }
0x103a   :  { %v9640_v45 = vpack.c.bf16 %v6196_v16, %v6194_v33  ;;  %5524 = vperm.xlu1 %10074, %v16191_v19   ;;  %v9657_v27 = vpack.c.bf16 %v6512_v14, %v6511_v46  ;;  %v6514_v16 = vld [vmem:[%s15968_s0 + $0x38] sm:$0xff]  ;;  %v6492_v32 = vld [vmem:[%s15976_s8] sm:$0xff]  ;;  %s10730_s30 = scalar_lea.vmem %s8684_s6, 32  ;;  %p10735_p1 = scmp.lt.s32.totalorder %s8684_s6, %s8684_s6 }
0x103b   :  { %v6197_v43 = vmax.f32 %v6159_v28, 0.0  ;;  %v6198_v8 = vmax.f32 %v6161_v18, 0.0  ;;  %v9661_v38 = vpack.c.bf16 %v6514_v16, %v6513_v31  ;;  %p10731_p0 = scmp.ne.s32.totalorder %s8684_s6, %s10730_s30  ;;  %p10736_p2 = scmp.lt.s32.totalorder %s10730_s30, %s10730_s30 }
0x103c   :  { %8994 = vmatmul.mubr.msk.f32.gmra.mrb[158].mxu1 %vm907_vm2, %v8970_v59  ;;  %9641 = vmatprep.subr.bf16.mxu1 %v9640_v45  ;;  %v15056_v45 = vshrl.u32 %v6371_v60, 7 }
0x103d   :  { %5382 = vmatprep.mubr.f32.mxu1 %v16114_v24  ;;  %v9646_v41 = vpack.c.bf16 %v6199_v37, %v6197_v43  ;;  %9643 = vmatpush1.bf16.msra.mxu1 %v9642_v34  ;;  %v9644_v29 = vpack.c.bf16 %v6200_v6, %v6198_v8  ;;  %v15032_v5 = vpop.permute.xlu1 %6517  ;;  %v15048_v6 = vpop.permute.xlu0 %5135  ;;  %v6370_v8 = vld [vmem:[%s15969_s1] sm:$0xf]  ;;  %p10737_p3 = por %p10736_p2, %p10735_p1 }
0x103e   :  { %10076 = vset.pattern.permute.xlu1 %v16163_v26  ;;  %v8975_v26 = vld [vmem:[%s15971_s3 + $0x420] sm:$0xff]  ;;  %v6434_v19 = vsub.s32 3, %v15056_v45 }
0x103f   :  { %9645 = vmatprep.subr.bf16.mxu1 %v9644_v29  ;;  %5131 = vperm.xlu1 %10076, %v16192_v0   ;;  %v6430_v29 = vsub.s32 1, %v15056_v45  ;;  %p10738_p4 = pnand %p10737_p3, %p10731_p0 }
0x1040   :  { %8995 = vmatmul.mubr.msk.f32.gmra.mrb[160].mxu1 %vm907_vm2, %v8971_v21  ;;  %v6382_v21 = vsub.s32 0, %v15056_v45 }
0x1041   :  { %5388 = vmatprep.mubr.f32.mxu1 %v16114_v24  ;;  %9647 = vmatpush1.bf16.msra.mxu1 %v9646_v41  ;;  %v6386_v41 = vsub.s32 2, %v15056_v45 }
0x1042   :  { %9648 = vmatprep.subr.bf16.mxu1 %v10775_v49  ;;  %v15034_v39 = vpop.permute.xlu1 %5139  ;;  %v15052_v28 = vpop.permute.xlu0 %5171 }
0x1043   :  { %10077 = vset.pattern.permute.xlu1 %v16164_v13  ;;  %v8976_v13 = vld [vmem:[%s15971_s3 + $0x428] sm:$0xff] }
0x1044   :  { %8996 = vmatmul.mubr.msk.f32.gmra.mrb[162].mxu1 %vm907_vm2, %v8972_v54  ;;  %5600 = vperm.xlu1 %10077, %v16193_v58   ;;  %v15068_v54 = vadd.s32 8, %v15056_v45  ;;  %v15071_v58 = vadd.s32 16, %v15056_v45 }
0x1045   :  { %5394 = vmatprep.mubr.f32.mxu1 %v16114_v24 }
0x1046   :  { %v15036_v33 = vpop.permute.xlu1 %5167  ;;  %v15058_v43 = vpop.permute.xlu0 %5147 }
0x1048   :  { %8997 = vmatmul.mubr.msk.f32.gmra.mrb[164].mxu1 %vm907_vm2, %v8973_v52  ;;  %10078 = vset.pattern.permute.xlu1 %v10774_v15  ;;  %v8977_v15 = vld [vmem:[%s15971_s3 + $0x430] sm:$0xff]  ;;  %v6383_v52 = vrot.slane %v6370_v8, %v6382_v21 }
0x1049   :  { %5400 = vmatprep.mubr.f32.mxu1 %v16114_v24  ;;  %6226 = vperm.xlu1 %10078, %v16194_v55  }
0x104a   :  { %v15038_v40 = vpop.permute.xlu1 %5143 }
0x104c   :  { %8998 = vmatmul.mubr.msk.f32.gmra.mrb[166].mxu1 %vm907_vm2, %v8974_v47  ;;  %v6435_v47 = vrot.slane %v6370_v8, %v6434_v19 }
0x104d   :  { %5406 = vmatprep.mubr.f32.mxu1 %v16114_v24  ;;  %6230 = vperm.xlu1 %10078, %v16173_v48   ;;  %v16196_v48 = vld [vmem:[#allocation11_spill] sm:$0xff] }
0x104e   :  { %v15040_v37 = vpop.permute.xlu1 %5175 }
0x1050   :  { %8999 = vmatmul.mubr.msk.f32.gmra.mrb[168].mxu1 %vm907_vm2, %v8975_v26  ;;  %v15074_v26 = vadd.s32 24, %v15056_v45 }
0x1051   :  { %5412 = vmatprep.mubr.f32.mxu1 %v16114_v24  ;;  %6238 = vperm.xlu1 %10078, %v16192_v0   ;;  %v6431_v0 = vrot.slane %v6370_v8, %v6430_v29 }
0x1052   :  { %v15042_v63 = vpop.permute.xlu1 %5151 }
0x1054   :  { %9000 = vmatmul.mubr.msk.f32.gmra.mrb[170].mxu1 %vm907_vm2, %v8976_v13 }
0x1055   :  { %5418 = vmatprep.mubr.f32.mxu1 %v16114_v24  ;;  %10080 = vset.pattern.permute.xlu1 %v16195_v12  ;;  %v15086_v12 = vadd.s32 40, %v15056_v45 }
0x1056   :  { %7137 = vperm.xlu1 %10080, %v16196_v48   ;;  %v15044_v59 = vpop.permute.xlu1 %5183  ;;  %v15088_v48 = vpop.permute.xlu0 %5179 }
0x1058   :  { %9001 = vmatmul.mubr.msk.f32.gmra.mrb[172].mxu1 %vm907_vm2, %v8977_v15  ;;  %v15080_v15 = vrot.slane %v6383_v52, %v6382_v21 }
0x1059   :  { %5424 = vmatprep.mubr.f32.mxu1 %v16114_v24 }
0x105a   :  { %v15046_v34 = vpop.permute.xlu1 %5159  ;;  %vm6396_vm8 = vcmp.eq.s32.totalorder %v15056_v45, %v15080_v15  ;;  %vm6398_vm9 = vcmp.eq.s32.totalorder %v15068_v54, %v15080_v15  ;;  %v15142_v61 = vpop.permute.xlu0 %5155 }
0x105b   :  { %v6412_v17 = vsel %vm6396_vm8, 1.0, %v16114_v24  ;;  %v6414_v22 = vsel %vm6398_vm9, 1.0, %v16114_v24 }
0x105c   :  { %9002 = vmatmul.mubr.msk.f32.gmra.mrb[174].mxu1 %vm907_vm2, %v8978_v56  ;;  %v15083_v56 = vadd.s32 32, %v15056_v45 }
0x105d   :  { %5430 = vmatprep.mubr.f32.mxu1 %v16114_v24 }
0x105e   :  { %v15050_v20 = vpop.permute.xlu1 %5191 }
0x1060   :  { %9003 = vmatmul.mubr.msk.f32.gmra.mrb[176].mxu1 %vm907_vm2, %v8979_v3  ;;  %v15090_v3 = vrot.slane %v6435_v47, %v6430_v29 }
0x1061   :  { %5436 = vmatprep.mubr.f32.mxu1 %v16114_v24 }
0x1062   :  { %vm6445_vm10 = vcmp.eq.s32.totalorder %v15056_v45, %v15090_v3  ;;  %vm6447_vm11 = vcmp.eq.s32.totalorder %v15068_v54, %v15090_v3  ;;  %vm6449_vm0 = vcmp.eq.s32.totalorder %v15071_v58, %v15090_v3  ;;  %vm6451_vm1 = vcmp.eq.s32.totalorder %v15074_v26, %v15090_v3 }
0x1063   :  { %v15054_v18 = vpop.permute.xlu1 %5496 }
0x1064   :  { %9004 = vmatmul.mubr.msk.f32.gmra.mrb[178].mxu1 %vm907_vm2, %v8980_v30  ;;  %v15092_v30 = vrot.slane %v6431_v0, %v6430_v29 }
0x1065   :  { %5442 = vmatprep.mubr.f32.mxu1 %v16114_v24 }
0x1066   :  { %vm6444_vm12 = vcmp.eq.s32.totalorder %v15056_v45, %v15092_v30  ;;  %vm6446_vm13 = vcmp.eq.s32.totalorder %v15068_v54, %v15092_v30 }
0x1067   :  { %v6462_v25 = vsel %vm6446_vm13, 1.0, %v16114_v24 }
0x1068   :  { %9005 = vmatmul.mubr.msk.f32.gmra.mrb[180].mxu1 %vm907_vm2, %v8981_v9  ;;  %v15076_v55 = vpop.permute.xlu1 %5103  ;;  %v15095_v9 = vadd.s32 48, %v15056_v45 }
0x1069   :  { %5448 = vmatprep.mubr.f32.mxu1 %v16114_v24 }
0x106c   :  { %9006 = vmatmul.mubr.msk.f32.gmra.mrb[182].mxu1 %vm907_vm2, %v8982_v23  ;;  %v15098_v23 = vadd.s32 56, %v15056_v45  ;;  %v15128_v36 = vpop.permute.xlu1 %5107 }
0x106d   :  { %5454 = vmatprep.mubr.f32.mxu1 %v16114_v24 }
0x106e   :  { %16199 = vst [vmem:[#allocation25_spill] sm:$0xff] %v15098_v23 }
0x1070   :  { %9007 = vmatmul.mubr.msk.f32.gmra.mrb[184].mxu1 %vm907_vm2, %v8983_v2 }
0x1071   :  { %5460 = vmatprep.mubr.f32.mxu1 %v16114_v24 }
0x1074   :  { %9008 = vmatmul.mubr.msk.f32.gmra.mrb[186].mxu1 %vm907_vm2, %v8984_v53 }
0x1075   :  { %5466 = vmatprep.mubr.f32.mxu1 %v16114_v24 }
0x1078   :  { %9009 = vmatmul.mubr.msk.f32.gmra.mrb[188].mxu1 %vm907_vm2, %v8985_v1  ;;  %v6461_v1 = vsel %vm6445_vm10, 1.0, %v16114_v24 }
0x1079   :  { %5472 = vmatprep.mubr.f32.mxu1 %v16114_v24 }
0x107c   :  { %9010 = vmatmul.mubr.msk.f32.gmra.mrb[190].mxu1 %vm907_vm2, %v8986_v11  ;;  %v6463_v11 = vsel %vm6447_vm11, 1.0, %v16114_v24 }
0x107d   :  { %6305 = vmatprep.mubr.f32.mxu1 %v16114_v24 }
0x1080   :  { %6306 = vmatmul.mubr.f32.vlgmr.msra.gmra.mrb[144].mxu1 %v6201_v44 }
0x1081   :  { %9651 = vmatpush3.bf16.xpose.msk.msra.mxu1 %vm14962_vm4, %v9649_v62  ;;  %6311 = vmatprep.mubr.f32.mxu1 %v16114_v24 }
0x1082   :  { %9652 = vmatprep.subr.bf16.mxu1 %v10775_v49 }
0x1084   :  { %6312 = vmatmul.mubr.f32.gmra.mrb[146].mxu1 %v6202_v51  ;;  %v6460_v51 = vsel %vm6444_vm12, 1.0, %v16114_v24 }
0x1085   :  { %6317 = vmatprep.mubr.f32.mxu1 %v16114_v24 }
0x1088   :  { %6318 = vmatmul.mubr.f32.gmra.mrb[148].mxu1 %v6203_v10 }
0x1089   :  { %9655 = vmatpush3.bf16.xpose.msk.msra.mxu1 %vm14962_vm4, %v9653_v42  ;;  %6323 = vmatprep.mubr.f32.mxu1 %v16114_v24  ;;  %v6476_v42 = vsub.f32 %v6412_v17, %v6460_v51 }
0x108a   :  { %9656 = vmatprep.subr.bf16.mxu1 %v10775_v49 }
0x108c   :  { %6324 = vmatmul.mubr.f32.gmra.mrb[150].mxu1 %v6204_v35  ;;  %v6478_v35 = vsub.f32 %v6414_v22, %v6462_v25 }
0x108d   :  { %6329 = vmatprep.mubr.f32.mxu1 %v16114_v24 }
0x1090   :  { %6330 = vmatmul.mubr.f32.gmra.mrb[152].mxu1 %v6205_v7  ;;  %v15155_v7 = vpack.c.bf16 %v6478_v35, %v6476_v42 }
0x1091   :  { %9659 = vmatpush3.bf16.xpose.msk.msra.mxu1 %vm14962_vm4, %v9657_v27  ;;  %6335 = vmatprep.mubr.f32.mxu1 %v16114_v24  ;;  %v6465_v27 = vsel %vm6449_vm0, 1.0, %v16114_v24 }
0x1092   :  { %9660 = vmatprep.subr.bf16.mxu1 %v10775_v49  ;;  %v6387_v49 = vrot.slane %v6370_v8, %v6386_v41  ;;  %16201 = vst [vmem:[#allocation27_spill] sm:$0xff] %v15155_v7  ;;  %v15191_v41 = vpop.permute.xlu0 %5187 }
0x1094   :  { %6336 = vmatmul.mubr.f32.gmra.mrb[154].mxu1 %v6206_v4  ;;  %v15078_v13 = vrot.slane %v6387_v49, %v6382_v21  ;;  %v6467_v4 = vsel %vm6451_vm1, 1.0, %v16114_v24 }
0x1095   :  { %6341 = vmatprep.mubr.f32.mxu1 %v16114_v24 }
0x1096   :  { %vm6397_vm6 = vcmp.eq.s32.totalorder %v15056_v45, %v15078_v13  ;;  %vm6399_vm7 = vcmp.eq.s32.totalorder %v15068_v54, %v15078_v13  ;;  %vm6401_vm14 = vcmp.eq.s32.totalorder %v15071_v58, %v15078_v13  ;;  %vm6403_vm15 = vcmp.eq.s32.totalorder %v15074_v26, %v15078_v13  ;;  %v15237_v35 = vpop.permute.xlu0 %5163 }
0x1097   :  { %v6413_v2 = vsel %vm6397_vm6, 1.0, %v16114_v24  ;;  %v6415_v53 = vsel %vm6399_vm7, 1.0, %v16114_v24  ;;  %v6417_v46 = vsel %vm6401_vm14, 1.0, %v16114_v24  ;;  %v6419_v14 = vsel %vm6403_vm15, 1.0, %v16114_v24 }
0x1098   :  { %6342 = vmatmul.mubr.f32.gmra.mrb[156].mxu1 %v6207_v57  ;;  %v6477_v44 = vsub.f32 %v6413_v2, %v6461_v1  ;;  %v6479_v62 = vsub.f32 %v6415_v53, %v6463_v11  ;;  %v6481_v31 = vsub.f32 %v6417_v46, %v6465_v27  ;;  %v6483_v16 = vsub.f32 %v6419_v14, %v6467_v4 }
0x1099   :  { %9663 = vmatpush3.bf16.xpose.msk.msra.mxu1 %vm14962_vm4, %v9661_v38  ;;  %6347 = vmatprep.mubr.f32.mxu1 %v16114_v24  ;;  %vm6402_vm4 = vcmp.eq.s32.totalorder %v15074_v26, %v15080_v15  ;;  %vm6448_vm6 = vcmp.eq.s32.totalorder %v15071_v58, %v15092_v30  ;;  %vm6450_vm7 = vcmp.eq.s32.totalorder %v15074_v26, %v15092_v30 }
0x109a   :  { %9363 = vmatprep.subr.mxu1 %v16114_v24  ;;  %v15144_v10 = vpack.c.bf16 %v6479_v62, %v6477_v44  ;;  %v6418_v38 = vsel %vm6402_vm4, 1.0, %v16114_v24  ;;  %vm6405_vm8 = vcmp.eq.s32.totalorder %v15083_v56, %v15078_v13  ;;  %vm6407_vm9 = vcmp.eq.s32.totalorder %v15086_v12, %v15078_v13 }
0x109b   :  { %v6464_v60 = vsel %vm6448_vm6, 1.0, %v16114_v24  ;;  %v6466_v8 = vsel %vm6450_vm7, 1.0, %v16114_v24  ;;  %v6421_v21 = vsel %vm6405_vm8, 1.0, %v16114_v24  ;;  %v6423_v49 = vsel %vm6407_vm9, 1.0, %v16114_v24 }
0x109c   :  { %6348 = vmatmul.mubr.f32.gmra.mrb[158].mxu1 %v6208_v50  ;;  %16200 = vst [vmem:[#allocation26_spill] sm:$0xff] %v15144_v10  ;;  %9665 = vmatprep.subr.bf16.mxu0 %v15144_v10  ;;  %v15178_v50 = vpop.permute.xlu1 %5580  ;;  %v6482_v19 = vsub.f32 %v6418_v38, %v6466_v8  ;;  %vm6453_vm14 = vcmp.eq.s32.totalorder %v15083_v56, %v15090_v3 }
0x109d   :  { %9360 = vmatprep.mubr.msk.f32.mxu1 %vm16034_vm5, %v16114_v24  ;;  %9667 = vmatpush1.bf16.msra.mxu0 %v15155_v7  ;;  %vm6455_vm15 = vcmp.eq.s32.totalorder %v15086_v12, %v15090_v3  ;;  %v6469_v52 = vsel %vm6453_vm14, 1.0, %v16114_v24  ;;  %vm6406_vm4 = vcmp.eq.s32.totalorder %v15086_v12, %v15080_v15  ;;  %vm16037_vm8 = vcmp.eq.s32.totalorder %v15083_v56, %v15092_v30 }
0x109e   :  { %v6471_v47 = vsel %vm6455_vm15, 1.0, %v16114_v24  ;;  %v6485_v2 = vsub.f32 %v6421_v21, %v6469_v52  ;;  %v6422_v11 = vsel %vm6406_vm4, 1.0, %v16114_v24  ;;  %vm16036_vm9 = vcmp.eq.s32.totalorder %v15086_v12, %v15092_v30 }
0x109f   :  { %v6487_v1 = vsub.f32 %v6423_v49, %v6471_v47  ;;  %v6468_v17 = vsel %vm16037_vm8, 1.0, %v16114_v24  ;;  %v6470_v22 = vsel %vm16036_vm9, 1.0, %v16114_v24  ;;  %vm6411_vm4 = vcmp.eq.s32.totalorder %v15098_v23, %v15078_v13 }
0x10a0   :  { %9361 = vmatmul.mubr.msk.f32.vlgmr.msra.gmra.mrb[192].mxu1 %vm6520_vm3, %v6492_v32  ;;  %vm6400_vm3 = vcmp.eq.s32.totalorder %v15071_v58, %v15080_v15  ;;  %v15180_v32 = vpack.c.bf16 %v6483_v16, %v6481_v31  ;;  %v15232_v44 = vpop.permute.xlu1 %5508  ;;  %v6486_v25 = vsub.f32 %v6422_v11, %v6470_v22  ;;  %v6427_v46 = vsel %vm6411_vm4, 1.0, %v16114_v24 }
0x10a1   :  { %9365 = vmatprep.mubr.msk.f32.mxu1 %vm16034_vm5, %v16114_v24  ;;  %v6416_v57 = vsel %vm6400_vm3, 1.0, %v16114_v24  ;;  %vm6404_vm3 = vcmp.eq.s32.totalorder %v15083_v56, %v15080_v15  ;;  %v15234_v62 = vpack.c.bf16 %v6487_v1, %v6485_v2  ;;  %vm16038_vm5 = vcmp.eq.s32.totalorder %v15095_v9, %v15090_v3  ;;  %v15278_v2 = vpop.permute.xlu0 %5195 }
0x10a2   :  { %16202 = vst [vmem:[#allocation28_spill] sm:$0xff] %v15180_v32  ;;  %v6480_v29 = vsub.f32 %v6416_v57, %v6464_v60  ;;  %9669 = vmatprep.subr.bf16.mxu0 %v15180_v32  ;;  %v6420_v53 = vsel %vm6404_vm3, 1.0, %v16114_v24  ;;  %vm6409_vm3 = vcmp.eq.s32.totalorder %v15095_v9, %v15078_v13  ;;  %vm6459_vm9 = vcmp.eq.s32.totalorder %v15098_v23, %v15090_v3 }
0x10a3   :  { %16204 = vst [vmem:[#allocation19_spill] sm:$0xff] %v15234_v62  ;;  %v6484_v51 = vsub.f32 %v6420_v53, %v6468_v17  ;;  %v6425_v42 = vsel %vm6409_vm3, 1.0, %v16114_v24  ;;  %vm6408_vm8 = vcmp.eq.s32.totalorder %v15095_v9, %v15080_v15  ;;  %v6473_v27 = vsel %vm16038_vm5, 1.0, %v16114_v24 }
0x10a4   :  { %v15207_v0 = vpack.c.bf16 %v6482_v19, %v6480_v29  ;;  %v6475_v4 = vsel %vm6459_vm9, 1.0, %v16114_v24  ;;  %vm6410_vm3 = vcmp.eq.s32.totalorder %v15098_v23, %v15080_v15  ;;  %v6489_v16 = vsub.f32 %v6425_v42, %v6473_v27  ;;  %v15276_v19 = vpop.permute.xlu1 %5115 }
0x10a5   :  { %v15247_v14 = vpack.c.bf16 %v6486_v25, %v6484_v51  ;;  %v6491_v57 = vsub.f32 %v6427_v46, %v6475_v4  ;;  %v6424_v38 = vsel %vm6408_vm8, 1.0, %v16114_v24  ;;  %v6426_v60 = vsel %vm6410_vm3, 1.0, %v16114_v24  ;;  %v15286_v22 = vpop.permute.xlu0 %5111  ;;  %vm15535_vm3 = vmpackc.low %vm6447_vm11, %vm6445_vm10 }
0x10a6   :  { %16203 = vst [vmem:[#allocation35_spill] sm:$0xff] %v15207_v0  ;;  %9671 = vmatpush1.bf16.msra.mxu0 %v15207_v0  ;;  %vm6456_vm4 = vcmp.eq.s32.totalorder %v15095_v9, %v15092_v30  ;;  %vm6458_vm5 = vcmp.eq.s32.totalorder %v15098_v23, %v15092_v30  ;;  %vm16057_vm8 = vcmask 64512   ;;  %vm15561_vm10 = vmpackc.low %vm6451_vm1, %vm6449_vm0  ;;  %vm16219_vm0 = vcmp.eq.s32.totalorder %v15086_v12, %v15092_v30 }
0x10a7   :  { %9673 = vmatprep.subr.bf16.mxu0 %v15234_v62  ;;  %16205 = vst [vmem:[#allocation36_spill] sm:$0xff] %v15247_v14  ;;  %v15266_v8 = vpack.c.bf16 %v6491_v57, %v6489_v16  ;;  %v6472_v15 = vsel %vm6456_vm4, 1.0, %v16114_v24  ;;  %v6474_v21 = vsel %vm6458_vm5, 1.0, %v16114_v24  ;;  %vm15574_vm11 = vmpackc.low %vm6450_vm7, %vm6448_vm6  ;;  %vm16222_vm6 = vcmp.eq.s32.totalorder %v15095_v9, %v15090_v3 }
0x10a8   :  { %v6488_v49 = vsub.f32 %v6424_v38, %v6472_v15  ;;  %v6490_v52 = vsub.f32 %v6426_v60, %v6474_v21  ;;  %v15284_v17 = vpop.permute.xlu1 %5584  ;;  %vm15610_vm7 = vmpackc.low %vm6459_vm9, %vm16222_vm6 }
0x10a9   :  { %16206 = vst [vmem:[#allocation23_spill] sm:$0xff] %v15266_v8  ;;  %v15290_v4 = vpop.permute.xlu0 %5119 }
0x10aa   :  { %9675 = vmatpush1.bf16.msra.mxu0 %v15247_v14  ;;  %v15281_v53 = vpack.c.bf16 %v6490_v52, %v6488_v49 }
0x10ab   :  { %9677 = vmatprep.subr.bf16.mxu0 %v15266_v8 }
0x10ac   :  { %16207 = vst [vmem:[#allocation29_spill] sm:$0xff] %v15281_v53  ;;  %v15288_v46 = vpop.permute.xlu1 %6210 }
0x10ad   :  { %v15296_v60 = vpop.permute.xlu0 %5127 }
0x10ae   :  { %9679 = vmatpush1.bf16.msra.mxu0 %v15281_v53 }
0x10b0   :  { %v15294_v38 = vpop.permute.xlu1 %6214 }
0x10b1   :  { %v5501_v32 = vpop.permute.xlu0 %5500 }
0x10b4   :  { %v15307_v14 = vpop.permute.xlu1 %5516 }
0x10b8   :  { %v15316_v10 = vpop.permute.xlu1 %5123 }
0x1113   :  { %v5384_v13 = vpop.f32.mrb[160].mxu1 }
0x1114   :  { %v5386_v31 = vpop.f32.mrb[161].mxu1  ;;  %v5385_v15 = vadd.f32 %v5384_v13, %v15048_v6 }
0x1115   :  { %v5387_v49 = vadd.f32 %v5386_v31, %v15048_v6 }
0x1116   :  { %10546 = vtanh.f32 %v5385_v15 }
0x1117   :  { %v5390_v29 = vpop.f32.mrb[162].mxu1  ;;  %10548 = vtanh.f32 %v5387_v49  ;;  %v15319_v49 = vpop.permute.xlu0 %5576 }
0x1118   :  { %v5392_v47 = vpop.f32.mrb[163].mxu1  ;;  %v5391_v53 = vadd.f32 %v5390_v29, %v15034_v39 }
0x1119   :  { %v5393_v62 = vadd.f32 %v5392_v47, %v15034_v39 }
0x111a   :  { %10550 = vtanh.f32 %v5391_v53 }
0x111b   :  { %v5396_v1 = vpop.f32.mrb[164].mxu1  ;;  %10552 = vtanh.f32 %v5393_v62 }
0x111c   :  { %v5398_v11 = vpop.f32.mrb[165].mxu1  ;;  %v5397_v13 = vadd.f32 %v5396_v1, %v15038_v40 }
0x111d   :  { %v5399_v6 = vadd.f32 %v5398_v11, %v15038_v40 }
0x111e   :  { %10554 = vtanh.f32 %v5397_v13 }
0x111f   :  { %v5402_v51 = vpop.f32.mrb[166].mxu1  ;;  %10556 = vtanh.f32 %v5399_v6 }
0x1120   :  { %v5404_v25 = vpop.f32.mrb[167].mxu1  ;;  %v5403_v39 = vadd.f32 %v5402_v51, %v15058_v43 }
0x1121   :  { %v5405_v53 = vadd.f32 %v5404_v25, %v15058_v43  ;;  %v15326_v25 = vpop.permute.xlu1 %5592 }
0x1123   :  { %v5408_v42 = vpop.f32.mrb[168].mxu1 }
0x1124   :  { %v5410_v27 = vpop.f32.mrb[169].mxu1  ;;  %v5409_v51 = vadd.f32 %v5408_v42, %v15042_v63 }
0x1125   :  { %v5411_v6 = vadd.f32 %v5410_v27, %v15042_v63 }
0x1127   :  { %v5414_v16 = vpop.f32.mrb[170].mxu1 }
0x1128   :  { %v15292_v57 = vpop.f32.mrb[171].mxu1  ;;  %v5415_v27 = vadd.f32 %v5414_v16, %v15142_v61 }
0x1129   :  { %v5417_v16 = vadd.f32 %v15292_v57, %v15142_v61 }
0x112b   :  { %v15299_v21 = vpop.f32.mrb[172].mxu1 }
0x112c   :  { %v15302_v52 = vpop.f32.mrb[173].mxu1 }
0x112f   :  { %v15305_v8 = vpop.f32.mrb[174].mxu1 }
0x1130   :  { %v15310_v0 = vpop.f32.mrb[175].mxu1 }
0x1133   :  { %v5432_v31 = vpop.f32.mrb[176].mxu1 }
0x1134   :  { %v5433_v29 = vadd.f32 %v5432_v31, %v15036_v33  ;;  %v5434_v15 = vpop.f32.mrb[177].mxu1  ;;  %v10547_v31 = vpop.eup %10546 }
0x1135   :  { %v5435_v7 = vadd.f32 %v5434_v15, %v15036_v33  ;;  %v10549_v15 = vpop.eup %10548 }
0x1136   :  { %v5543_v47 = vmul.f32 %v5433_v29, %v5433_v29  ;;  %v10551_v29 = vpop.eup %10550  ;;  %v5528_v63 = vmul.f32 %v10549_v15, %v15054_v18 }
0x1137   :  { %v5544_v1 = vmul.f32 %v5435_v7, %v5435_v7  ;;  %v5438_v40 = vpop.f32.mrb[178].mxu1  ;;  %v10553_v42 = vpop.eup %10552 }
0x1138   :  { %10558 = vtanh.f32 %v5543_v47  ;;  %v5439_v62 = vadd.f32 %v5438_v40, %v15052_v28  ;;  %v5440_v11 = vpop.f32.mrb[179].mxu1 }
0x1139   :  { %10560 = vtanh.f32 %v5544_v1  ;;  %v5441_v33 = vadd.f32 %v5440_v11, %v15052_v28  ;;  %v5505_v1 = vpop.permute.xlu0 %5504 }
0x113a   :  { %10562 = vtanh.f32 %v5403_v39  ;;  %v5545_v13 = vmul.f32 %v5439_v62, %v5439_v62  ;;  %v5527_v39 = vmul.f32 %v10547_v31, %v15054_v18 }
0x113b   :  { %10564 = vtanh.f32 %v5405_v53  ;;  %v5546_v43 = vmul.f32 %v5441_v33, %v5441_v33  ;;  %v5444_v7 = vpop.f32.mrb[180].mxu1  ;;  %v5529_v53 = vmul.f32 %v10551_v29, %v5501_v32  ;;  %v15336_v29 = vpop.permute.xlu1 %6218 }
0x113c   :  { %10566 = vtanh.f32 %v5545_v13  ;;  %v5445_v47 = vadd.f32 %v5444_v7, %v15040_v37  ;;  %v5446_v40 = vpop.f32.mrb[181].mxu1  ;;  %v10555_v13 = vpop.eup %10554 }
0x113d   :  { %10568 = vtanh.f32 %v5546_v43  ;;  %v5447_v28 = vadd.f32 %v5446_v40, %v15040_v37  ;;  %v10557_v23 = vpop.eup %10556  ;;  %v5530_v37 = vmul.f32 %v10553_v42, %v5501_v32  ;;  %v9864_v15 = vadd.f32 %v5529_v53, %v15128_v36  ;;  %v15342_v40 = vpop.permute.xlu0 %5588 }
0x113e   :  { %10570 = vtanh.f32 %v5409_v51  ;;  %v5547_v62 = vmul.f32 %v5445_v47, %v5445_v47  ;;  %v9856_v51 = vadd.f32 %v5527_v39, %v15076_v55  ;;  %v9860_v47 = vadd.f32 %v5528_v63, %v15076_v55 }
0x113f   :  { %10572 = vtanh.f32 %v5411_v6  ;;  %v5548_v11 = vmul.f32 %v5447_v28, %v5447_v28  ;;  %v5450_v33 = vpop.f32.mrb[182].mxu1  ;;  %v5531_v39 = vmul.f32 %v10555_v13, %v5505_v1  ;;  %v5532_v57 = vmul.f32 %v10557_v23, %v5505_v1 }
0x1140   :  { %10574 = vtanh.f32 %v5547_v62  ;;  %v5451_v7 = vadd.f32 %v5450_v33, %v15088_v48  ;;  %v5452_v43 = vpop.f32.mrb[183].mxu1  ;;  %v9868_v55 = vadd.f32 %v5530_v37, %v15128_v36  ;;  %v5421_v13 = vadd.f32 %v15299_v21, %v15046_v34  ;;  %v15358_v37 = vpop.permute.xlu1 %6222 }
0x1141   :  { %10576 = vtanh.f32 %v5548_v11  ;;  %v5453_v31 = vadd.f32 %v5452_v43, %v15088_v48  ;;  %v5423_v23 = vadd.f32 %v15302_v52, %v15046_v34  ;;  %v9872_v36 = vadd.f32 %v5531_v39, %v15286_v22 }
0x1142   :  { %v10559_v18 = vpop.eup %10558  ;;  %v5549_v6 = vmul.f32 %v5451_v7, %v5451_v7  ;;  %10578 = vtanh.f32 %v5415_v27  ;;  %v5427_v39 = vadd.f32 %v15305_v8, %v15237_v35 }
0x1143   :  { %v10561_v28 = vpop.eup %10560  ;;  %v5550_v32 = vmul.f32 %v5453_v31, %v5453_v31  ;;  %v5456_v42 = vpop.f32.mrb[184].mxu1  ;;  %v5607_v48 = vmul.f32 %v10559_v18, %v15319_v49 }
0x1144   :  { %v10563_v62 = vpop.eup %10562  ;;  %10580 = vtanh.f32 %v5549_v6  ;;  %v5457_v11 = vadd.f32 %v5456_v42, %v15044_v59  ;;  %v5458_v33 = vpop.f32.mrb[185].mxu1  ;;  %v5608_v61 = vmul.f32 %v10561_v28, %v15319_v49  ;;  %v9876_v6 = vadd.f32 %v5532_v57, %v15286_v22 }
0x1145   :  { %v10565_v53 = vpop.eup %10564  ;;  %10582 = vtanh.f32 %v5550_v32  ;;  %v5459_v63 = vadd.f32 %v5458_v33, %v15044_v59  ;;  %v15349_v27 = vadd.f32 %v9856_v51, %v5607_v48  ;;  %v5513_v28 = vpop.permute.xlu0 %5512  ;;  %v5533_v52 = vmul.f32 %v10563_v62, %v15232_v44 }
0x1146   :  { %v10567_v7 = vpop.eup %10566  ;;  %10584 = vtanh.f32 %v5417_v16  ;;  %v5551_v43 = vmul.f32 %v5457_v11, %v5457_v11  ;;  %v15353_v31 = vadd.f32 %v9860_v47, %v5608_v61 }
0x1147   :  { %v10569_v18 = vpop.eup %10568  ;;  %v5552_v49 = vmul.f32 %v5459_v63, %v5459_v63  ;;  %v5462_v1 = vpop.f32.mrb[186].mxu1  ;;  %v5609_v59 = vmul.f32 %v10567_v7, %v15178_v50  ;;  %v5534_v63 = vmul.f32 %v10565_v53, %v15232_v44 }
0x1148   :  { %v10571_v51 = vpop.eup %10570  ;;  %10586 = vtanh.f32 %v5551_v43  ;;  %v5463_v16 = vadd.f32 %v5462_v1, %v15191_v41  ;;  %v5464_v21 = vpop.f32.mrb[187].mxu1  ;;  %v5610_v47 = vmul.f32 %v10569_v18, %v15178_v50  ;;  %v5429_v50 = vadd.f32 %v15310_v0, %v15237_v35 }
0x1149   :  { %v10573_v32 = vpop.eup %10572  ;;  %10588 = vtanh.f32 %v5552_v49  ;;  %v5465_v34 = vadd.f32 %v5464_v21, %v15191_v41  ;;  %v15366_v42 = vadd.f32 %v9864_v15, %v5609_v59  ;;  %v5535_v43 = vmul.f32 %v10571_v51, %v5513_v28  ;;  %v5597_v1 = vpop.permute.xlu0 %5596 }
0x114a   :  { %v10575_v48 = vpop.eup %10574  ;;  %10590 = vtanh.f32 %v5421_v13  ;;  %v5553_v11 = vmul.f32 %v5463_v16, %v5463_v16  ;;  %v15370_v33 = vadd.f32 %v9868_v55, %v5610_v47  ;;  %v15379_v13 = vpop.permute.xlu1 %5524  ;;  %v9884_v47 = vadd.f32 %v5534_v63, %v15276_v19 }
0x114b   :  { %v10577_v22 = vpop.eup %10576  ;;  %10592 = vtanh.f32 %v5423_v23  ;;  %v5554_v61 = vmul.f32 %v5465_v34, %v5465_v34  ;;  %v5468_v57 = vpop.f32.mrb[188].mxu1  ;;  %v5611_v41 = vmul.f32 %v10575_v48, %v15284_v17  ;;  %v5536_v23 = vmul.f32 %v10573_v32, %v5513_v28 }
0x114c   :  { %10594 = vtanh.f32 %v5553_v11  ;;  %v5469_v15 = vadd.f32 %v5468_v57, %v15050_v20  ;;  %v5470_v62 = vpop.f32.mrb[189].mxu1  ;;  %v5612_v8 = vmul.f32 %v10577_v22, %v15284_v17  ;;  %v10579_v7 = vpop.eup %10578  ;;  %v9888_v32 = vadd.f32 %v5535_v43, %v15290_v4 }
0x114d   :  { %10596 = vtanh.f32 %v5554_v61  ;;  %v5471_v55 = vadd.f32 %v5470_v62, %v15050_v20  ;;  %v15381_v0 = vadd.f32 %v9872_v36, %v5611_v41  ;;  %v9880_v20 = vadd.f32 %v5533_v52, %v15276_v19  ;;  %v5521_v63 = vpop.permute.xlu0 %5520 }
0x114e   :  { %v10581_v35 = vpop.eup %10580  ;;  %10598 = vtanh.f32 %v5427_v39  ;;  %v5555_v18 = vmul.f32 %v5469_v15, %v5469_v15  ;;  %v15383_v49 = vadd.f32 %v9876_v6, %v5612_v8  ;;  %v9858_v52 = vadd.f32 %v15349_v27, %v15288_v46  ;;  %v5132_v61 = vpop.permute.xlu1 %5131 }
0x114f   :  { %v10583_v59 = vpop.eup %10582  ;;  %10600 = vtanh.f32 %v5429_v50  ;;  %v5556_v44 = vmul.f32 %v5471_v55, %v5471_v55  ;;  %v5474_v17 = vpop.f32.mrb[190].mxu1  ;;  %v5613_v53 = vmul.f32 %v10581_v35, %v15342_v40  ;;  %v9892_v11 = vadd.f32 %v5536_v23, %v15290_v4 }
0x1150   :  { %v10585_v16 = vpop.eup %10584  ;;  %10602 = vtanh.f32 %v5555_v18  ;;  %v5475_v36 = vadd.f32 %v5474_v17, %v15278_v2  ;;  %v5476_v51 = vpop.f32.mrb[191].mxu1  ;;  %v5614_v21 = vmul.f32 %v10583_v59, %v15342_v40  ;;  %v5537_v40 = vmul.f32 %v10579_v7, %v15307_v14 }
0x1151   :  { %10604 = vtanh.f32 %v5556_v44  ;;  %v5477_v6 = vadd.f32 %v5476_v51, %v15278_v2  ;;  %v9881_v28 = vadd.f32 %v9880_v20, %v5613_v53  ;;  %v9862_v2 = vadd.f32 %v15353_v31, %v15288_v46 }
0x1152   :  { %v10587_v34 = vpop.eup %10586  ;;  %v5557_v48 = vmul.f32 %v5475_v36, %v5475_v36  ;;  %v15394_v39 = vadd.f32 %v9884_v47, %v5614_v21  ;;  %v5538_v15 = vmul.f32 %v10585_v16, %v15307_v14  ;;  %v9866_v46 = vadd.f32 %v15366_v42, %v15294_v38  ;;  %v5601_v44 = vpop.permute.xlu1 %5600 }
0x1153   :  { %v10589_v22 = vpop.eup %10588  ;;  %v5558_v50 = vmul.f32 %v5477_v6, %v5477_v6  ;;  %v6307_v19 = vpop.f32.mrb[144].mxu1  ;;  %v5615_v57 = vmul.f32 %v10587_v34, %v15326_v25  ;;  %v9896_v14 = vadd.f32 %v5537_v40, %v15316_v10  ;;  %v9870_v23 = vadd.f32 %v15370_v33, %v15294_v38 }
0x1154   :  { %v10591_v41 = vpop.eup %10590  ;;  %10606 = vtanh.f32 %v5557_v48  ;;  %v15402_v27 = vadd.f32 %v9858_v52, %v6307_v19  ;;  %v6309_v62 = vpop.f32.mrb[145].mxu1  ;;  %v5616_v4 = vmul.f32 %v10589_v22, %v15326_v25  ;;  %v9900_v53 = vadd.f32 %v5538_v15, %v15316_v10 }
0x1155   :  { %v10593_v8 = vpop.eup %10592  ;;  %10608 = vtanh.f32 %v5558_v50  ;;  %v15405_v7 = vadd.f32 %v9862_v2, %v6309_v62  ;;  %v9889_v55 = vadd.f32 %v9888_v32, %v5615_v57  ;;  %v5539_v25 = vmul.f32 %v10591_v41, %v5521_v63  ;;  %v5605_v62 = vpop.permute.xlu0 %5604 }
0x1156   :  { %v10595_v43 = vpop.eup %10594  ;;  %v9893_v31 = vadd.f32 %v9892_v11, %v5616_v4  ;;  %v5540_v51 = vmul.f32 %v10593_v8, %v5521_v63  ;;  %v9874_v32 = vadd.f32 %v15381_v0, %v15336_v29  ;;  %v9878_v10 = vadd.f32 %v15383_v49, %v15336_v29  ;;  %v6227_v2 = vpop.permute.xlu1 %6226 }
0x1157   :  { %v10597_v35 = vpop.eup %10596  ;;  %v6313_v18 = vpop.f32.mrb[146].mxu1  ;;  %v5617_v59 = vmul.f32 %v10595_v43, %v5597_v1  ;;  %v9882_v15 = vadd.f32 %v9881_v28, %v15358_v37 }
0x1158   :  { %v10599_v17 = vpop.eup %10598  ;;  %v15413_v20 = vadd.f32 %v9866_v46, %v6313_v18  ;;  %v6315_v16 = vpop.f32.mrb[147].mxu1  ;;  %v5618_v36 = vmul.f32 %v10597_v35, %v5597_v1  ;;  %v9904_v1 = vadd.f32 %v5539_v25, %v15296_v60  ;;  %v9908_v19 = vadd.f32 %v5540_v51, %v15296_v60 }
0x1159   :  { %v10601_v42 = vpop.eup %10600  ;;  %v15415_v21 = vadd.f32 %v9870_v23, %v6315_v16  ;;  %v9897_v47 = vadd.f32 %v9896_v14, %v5617_v59  ;;  %v5541_v34 = vmul.f32 %v10599_v17, %v15379_v13  ;;  %v9890_v23 = vadd.f32 %v9889_v55, %v6227_v2 }
0x115a   :  { %v10603_v6 = vpop.eup %10602  ;;  %v9901_v38 = vadd.f32 %v9900_v53, %v5618_v36  ;;  %v5542_v11 = vmul.f32 %v10601_v42, %v15379_v13  ;;  %v9886_v13 = vadd.f32 %v15394_v39, %v15358_v37  ;;  %v9894_v28 = vadd.f32 %v9893_v31, %v6227_v2  ;;  %v6231_v25 = vpop.permute.xlu1 %6230  ;;  %v15458_v2 = vld [vmem:[%s15976_s8 + $0x8] sm:$0xff] }
0x115b   :  { %v10605_v33 = vpop.eup %10604  ;;  %v6319_v48 = vpop.f32.mrb[148].mxu1  ;;  %v5619_v52 = vmul.f32 %v10603_v6, %v5601_v44  ;;  %v9912_v63 = vadd.f32 %v5541_v34, %v5132_v61  ;;  %v9898_v37 = vadd.f32 %v9897_v47, %v6231_v25 }
0x115c   :  { %v15424_v22 = vadd.f32 %v9874_v32, %v6319_v48  ;;  %v6321_v40 = vpop.f32.mrb[149].mxu1  ;;  %v5620_v50 = vmul.f32 %v10605_v33, %v5601_v44  ;;  %v9916_v43 = vadd.f32 %v5542_v11, %v5132_v61  ;;  %v9902_v39 = vadd.f32 %v9901_v38, %v6231_v25  ;;  %v6235_v36 = vpop.permute.xlu0 %6234 }
0x115d   :  { %v15427_v0 = vadd.f32 %v9878_v10, %v6321_v40  ;;  %v9905_v57 = vadd.f32 %v9904_v1, %v5619_v52 }
0x115e   :  { %v10607_v41 = vpop.eup %10606  ;;  %v9909_v29 = vadd.f32 %v9908_v19, %v5620_v50  ;;  %v6239_v31 = vpop.permute.xlu1 %6238 }
0x115f   :  { %v10609_v49 = vpop.eup %10608  ;;  %v6325_v4 = vpop.f32.mrb[150].mxu1  ;;  %v5621_v8 = vmul.f32 %v10607_v41, %v5605_v62  ;;  %v9906_v32 = vadd.f32 %v9905_v57, %v6235_v36 }
0x1160   :  { %v15432_v46 = vadd.f32 %v9882_v15, %v6325_v4  ;;  %v6327_v60 = vpop.f32.mrb[151].mxu1  ;;  %v5622_v35 = vmul.f32 %v10609_v49, %v5605_v62  ;;  %v9910_v55 = vadd.f32 %v9909_v29, %v6235_v36  ;;  %v15469_v29 = vld [vmem:[%s15976_s8 + $0x20] sm:$0xff]  ;;  %v15477_v49 = vld [vmem:[%s15976_s8 + $0x28] sm:$0xff]  ;;  %v15493_v4 = vld [vmem:[%s15976_s8 + $0x38] sm:$0xff] }
0x1161   :  { %v15434_v14 = vadd.f32 %v9886_v13, %v6327_v60  ;;  %v9913_v18 = vadd.f32 %v9912_v63, %v5621_v8  ;;  %v15485_v63 = vld [vmem:[%s15976_s8 + $0x30] sm:$0xff]  ;;  %v15501_v13 = vld [vmem:[%s15976_s8 + $0x40] sm:$0xff]  ;;  %v15509_v8 = vld [vmem:[%s15976_s8 + $0x48] sm:$0xff] }
0x1162   :  { %v9917_v59 = vadd.f32 %v9916_v43, %v5622_v35  ;;  %v15517_v43 = vld [vmem:[%s15976_s8 + $0x50] sm:$0xff]  ;;  %v15525_v60 = vld [vmem:[%s15976_s8 + $0x58] sm:$0xff] }
0x1163   :  { %v6331_v44 = vpop.f32.mrb[152].mxu1  ;;  %v9914_v52 = vadd.f32 %v9913_v18, %v6239_v31  ;;  %v16058_v18 = vmov 1.0|1.0  }
0x1164   :  { %v15436_v17 = vadd.f32 %v9890_v23, %v6331_v44  ;;  %v6333_v53 = vpop.f32.mrb[153].mxu1  ;;  %v9918_v1 = vadd.f32 %v9917_v59, %v6239_v31 }
0x1165   :  { %v15438_v16 = vadd.f32 %v9894_v28, %v6333_v53 }
0x1167   :  { %v6337_v61 = vpop.f32.mrb[154].mxu1 }
0x1168   :  { %v15440_v51 = vadd.f32 %v9898_v37, %v6337_v61  ;;  %v6339_v42 = vpop.f32.mrb[155].mxu1 }
0x1169   :  { %v15442_v6 = vadd.f32 %v9902_v39, %v6339_v42 }
0x116b   :  { %v6343_v33 = vpop.f32.mrb[156].mxu1 }
0x116c   :  { %v15444_v34 = vadd.f32 %v9906_v32, %v6343_v33  ;;  %v6345_v48 = vpop.f32.mrb[157].mxu1 }
0x116d   :  { %v15446_v10 = vadd.f32 %v9910_v55, %v6345_v48 }
0x116f   :  { %v6349_v47 = vpop.f32.mrb[158].mxu1 }
0x1170   :  { %v15448_v38 = vadd.f32 %v9914_v52, %v6349_v47  ;;  %v6351_v11 = vpop.f32.mrb[159].mxu1 }
0x1171   :  { %v15450_v40 = vadd.f32 %v9918_v1, %v6351_v11 }
0x1173   :  { %v6614_v50 = vpop.f32.mrb[192].mxu1 }
0x1174   :  { %v15453_v19 = vadd.f32 %v6614_v50, %v15032_v5  ;;  %v9362_v57 = vpop.f32.mrb[193].mxu1 }
0x1176   :  { %9364 = vmatpush3.msra.mxu1 %v15453_v19 }
0x1177   :  { %9366 = vmatmul.mubr.msk.f32.vlgmr.msra.gmra.mrb[194].mxu1 %vm16057_vm8, %v15458_v2 }
0x1178   :  { %6854 = vmatprep.mubr.f32.mxu1 %v16114_v24 }
0x124a   :  { %v6688_v41 = vpop.f32.mrb[194].mxu1 }
0x124b   :  { %9077 = vmatmul.mubr.msk.f32.vlgmr.msra.gmra.mrb[192].mxu0 %vm907_vm2, %v6688_v41  ;;  %v9367_v15 = vpop.f32.mrb[195].mxu1 }
0x124c   :  { %6986 = vmatprep.mubr.f32.mxu0 %v16114_v24 }
0x131e   :  { %v6761_v5 = vpop.f32.mrb[192].mxu0 }
0x131f   :  { %v6763_v62 = vpop.f32.mrb[193].mxu0 }
0x1320   :  { %6790 = vmatprep.subr.mxu1 %v6763_v62 }
0x1321   :  { %6791 = vmatpush1.msra.mxu1 %v6761_v5 }
0x1322   :  { %9078 = vmatmul.mubr.msk.f32.vlgmr.msra.gmra.mrb[196].mxu1 %vm16057_vm8, %v15469_v29  ;;  %9697 = vmatprep.subr.msk.bf16.mxu1 %vm15535_vm3, %v16058_v18 }
0x1323   :  { %6860 = vmatprep.mubr.f32.mxu1 %v16114_v24 }
0x1326   :  { %9079 = vmatmul.mubr.msk.f32.gmra.mrb[198].mxu1 %vm16057_vm8, %v15477_v49 }
0x1327   :  { %6866 = vmatprep.mubr.f32.mxu1 %v16114_v24 }
0x132a   :  { %9080 = vmatmul.mubr.msk.f32.gmra.mrb[200].mxu1 %vm16057_vm8, %v15485_v63 }
0x132b   :  { %6872 = vmatprep.mubr.f32.mxu1 %v16114_v24 }
0x132e   :  { %9081 = vmatmul.mubr.msk.f32.gmra.mrb[202].mxu1 %vm16057_vm8, %v15493_v4 }
0x132f   :  { %6878 = vmatprep.mubr.f32.mxu1 %v16114_v24 }
0x1332   :  { %9082 = vmatmul.mubr.msk.f32.gmra.mrb[204].mxu1 %vm16057_vm8, %v15501_v13 }
0x1333   :  { %6884 = vmatprep.mubr.f32.mxu1 %v16114_v24 }
0x1336   :  { %9083 = vmatmul.mubr.msk.f32.gmra.mrb[206].mxu1 %vm16057_vm8, %v15509_v8 }
0x1337   :  { %6890 = vmatprep.mubr.f32.mxu1 %v16114_v24 }
0x133a   :  { %9084 = vmatmul.mubr.msk.f32.gmra.mrb[208].mxu1 %vm16057_vm8, %v15517_v43 }
0x133b   :  { %6896 = vmatprep.mubr.f32.mxu1 %v16114_v24 }
0x133e   :  { %9085 = vmatmul.mubr.msk.f32.gmra.mrb[210].mxu1 %vm16057_vm8, %v15525_v60  ;;  %vm15548_vm8 = vmpackc.low %vm6446_vm13, %vm6444_vm12  ;;  %vm16218_vm13 = vcmp.eq.s32.totalorder %v15083_v56, %v15092_v30 }
0x133f   :  { %9699 = vmatpush1.bf16.xpose.msk.msra.mxu1 %vm15548_vm8, %v16058_v18  ;;  %vm15584_vm12 = vmpackc.low %vm6455_vm15, %vm6453_vm14  ;;  %vm16229_vm15 = vcmask 64512  }
0x1340   :  { %9701 = vmatprep.subr.msk.bf16.mxu1 %vm15561_vm10, %v16058_v18  ;;  %vm15600_vm1 = vmpackc.low %vm16219_vm0, %vm16218_vm13 }
0x1341   :  { %vm15626_vm14 = vmpackc.low %vm6458_vm5, %vm6456_vm4  ;;  %vm16228_vm5 = vmmov 0  }
0x1342   :  { %vm16230_vm9 = vmmov %vm16229_vm15 }
0x1343   :  { %vm16239_vm4 = vmmov %vm16230_vm9 }
0x1344   :  { %vm16240_vm13 = vmmov %vm16239_vm4 }
0x1345   :  { %vm16241_vm0 = vmmov %vm16239_vm4 }
0x1346   :  { %vm16242_vm6 = vmmov %vm16241_vm0 }
0x1347   :  { %9703 = vmatpush1.bf16.xpose.msk.msra.mxu1 %vm15574_vm11, %v16058_v18 }
0x1348   :  { %9705 = vmatprep.subr.msk.bf16.mxu1 %vm15584_vm12, %v16058_v18 }
0x134f   :  { %9707 = vmatpush1.bf16.xpose.msk.msra.mxu1 %vm15600_vm1, %v16058_v18 }
0x1350   :  { %9709 = vmatprep.subr.msk.bf16.mxu1 %vm15610_vm7, %v16058_v18 }
0x1357   :  { %9711 = vmatpush1.bf16.xpose.msk.msra.mxu1 %vm15626_vm14, %v16058_v18 }
0x13f5   :  { %v6856_v12 = vpop.f32.mrb[196].mxu1 }
0x13f6   :  { %v6858_v3 = vpop.f32.mrb[197].mxu1  ;;  %v6903_v25 = vmul.f32 %v15402_v27, %v6856_v12 }
0x13f7   :  { %v6904_v9 = vmul.f32 %v15405_v7, %v6858_v3 }
0x13f9   :  { %v6862_v44 = vpop.f32.mrb[198].mxu1 }
0x13fa   :  { %v6905_v53 = vmul.f32 %v15413_v20, %v6862_v44  ;;  %v6864_v37 = vpop.f32.mrb[199].mxu1 }
0x13fb   :  { %v6906_v30 = vmul.f32 %v15415_v21, %v6864_v37 }
0x13fc   :  { %v9682_v39 = vpack.c.bf16 %v6905_v53, %v6903_v25 }
0x13fd   :  { %v9680_v61 = vpack.c.bf16 %v6906_v30, %v6904_v9  ;;  %v6868_v36 = vpop.f32.mrb[200].mxu1 }
0x13fe   :  { %v6870_v42 = vpop.f32.mrb[201].mxu1  ;;  %v6907_v55 = vmul.f32 %v15424_v22, %v6868_v36 }
0x13ff   :  { %9681 = vmatprep.subr.bf16.mxu0 %v9680_v61  ;;  %v6908_v48 = vmul.f32 %v15427_v0, %v6870_v42 }
0x1400   :  { %9683 = vmatpush1.bf16.msra.mxu0 %v9682_v39 }
0x1401   :  { %v6874_v32 = vpop.f32.mrb[202].mxu1 }
0x1402   :  { %v6909_v33 = vmul.f32 %v15432_v46, %v6874_v32  ;;  %v6876_v31 = vpop.f32.mrb[203].mxu1  ;;  %v15652_v32 = vld [vmem:[%s15973_s5 + $0x80] sm:$0xff] }
0x1403   :  { %v6910_v52 = vmul.f32 %v15434_v14, %v6876_v31 }
0x1404   :  { %v9686_v1 = vpack.c.bf16 %v6909_v33, %v6907_v55  ;;  %v15664_v55 = vld [vmem:[%s15976_s8 + $0x10] sm:$0xff] }
0x1405   :  { %v9684_v47 = vpack.c.bf16 %v6910_v52, %v6908_v48  ;;  %v6880_v11 = vpop.f32.mrb[204].mxu1 }
0x1406   :  { %v6882_v50 = vpop.f32.mrb[205].mxu1  ;;  %v6911_v41 = vmul.f32 %v15436_v17, %v6880_v11 }
0x1407   :  { %9685 = vmatprep.subr.bf16.mxu0 %v9684_v47  ;;  %v6912_v62 = vmul.f32 %v15438_v16, %v6882_v50 }
0x1408   :  { %9687 = vmatpush1.bf16.msra.mxu0 %v9686_v1  ;;  %v15671_v1 = vpop.permute.xlu1 %7137 }
0x1409   :  { %v6886_v57 = vpop.f32.mrb[206].mxu1 }
0x140a   :  { %v6913_v15 = vmul.f32 %v15440_v51, %v6886_v57  ;;  %v6888_v5 = vpop.f32.mrb[207].mxu1  ;;  %v16231_v57 = vld [vmem:[#allocation26_spill] sm:$0xff] }
0x140b   :  { %v6914_v26 = vmul.f32 %v15442_v6, %v6888_v5  ;;  %v16234_v5 = vld [vmem:[#allocation35_spill] sm:$0xff] }
0x140c   :  { %v9690_v12 = vpack.c.bf16 %v6913_v15, %v6911_v41  ;;  %v16232_v41 = vld [vmem:[#allocation27_spill] sm:$0xff]  ;;  %v16233_v15 = vld [vmem:[#allocation28_spill] sm:$0xff] }
0x140d   :  { %v9688_v3 = vpack.c.bf16 %v6914_v26, %v6912_v62  ;;  %v6892_v44 = vpop.f32.mrb[208].mxu1  ;;  %v16235_v62 = vld [vmem:[#allocation19_spill] sm:$0xff]  ;;  %v16236_v26 = vld [vmem:[#allocation36_spill] sm:$0xff] }
0x140e   :  { %v6894_v25 = vpop.f32.mrb[209].mxu1  ;;  %v6915_v37 = vmul.f32 %v15444_v34, %v6892_v44 }
0x140f   :  { %9689 = vmatprep.subr.bf16.mxu0 %v9688_v3  ;;  %v6916_v39 = vmul.f32 %v15446_v10, %v6894_v25  ;;  %v16238_v3 = vld [vmem:[#allocation29_spill] sm:$0xff] }
0x1410   :  { %9691 = vmatpush1.bf16.msra.mxu0 %v9690_v12  ;;  %v16237_v12 = vld [vmem:[#allocation23_spill] sm:$0xff] }
0x1411   :  { %v6898_v53 = vpop.f32.mrb[210].mxu1 }
0x1412   :  { %v6917_v9 = vmul.f32 %v15448_v38, %v6898_v53  ;;  %v6900_v30 = vpop.f32.mrb[211].mxu1 }
0x1413   :  { %v6918_v61 = vmul.f32 %v15450_v40, %v6900_v30 }
0x1414   :  { %v9694_v36 = vpack.c.bf16 %v6917_v9, %v6915_v37 }
0x1415   :  { %v9692_v42 = vpack.c.bf16 %v6918_v61, %v6916_v39 }
0x1417   :  { %9693 = vmatprep.subr.bf16.mxu0 %v9692_v42 }
0x1418   :  { %9695 = vmatpush1.bf16.msra.mxu0 %v9694_v36 }
0x1419   :  { %9368 = vmatprep.subr.mxu0 %v16114_v24 }
0x141b   :  { %9086 = vmatmul.mubr.msk.f32.vlgmr.msra.gmra.mrb[194].mxu0 %vm907_vm2, %v15652_v32 }
0x141c   :  { %9369 = vmatpush3.msra.mxu0 %v15453_v19  ;;  %9370 = vmatprep.mubr.msk.f32.mxu0 %vm16228_vm5, %v16114_v24 }
0x141d   :  { %9373 = vmatprep.subr.mxu0 %v16114_v24 }
0x141f   :  { %9371 = vmatmul.mubr.msk.f32.vlgmr.msra.gmra.mrb[196].mxu0 %vm16229_vm15, %v15664_v55  ;;  %vm16243_vm15 = vmmov %vm16241_vm0 }
0x1420   :  { %9375 = vmatprep.mubr.msk.f32.mxu0 %vm16228_vm5, %v16114_v24 }
0x14ee   :  { %v6988_v33 = vpop.f32.mrb[194].mxu0 }
0x14ef   :  { %v6990_v31 = vpop.f32.mrb[195].mxu0 }
0x14f0   :  { %7130 = vmatprep.mubr.f32.mxu1 %v6990_v31 }
0x14f1   :  { %7131 = vmatmul.mubr.f32.vlgmr.msra.gmra.mrb[212].mxu1 %v6988_v33 }
0x14f2   :  { %7349 = vmatprep.mubr.f32.mxu1 %v16114_v24  ;;  %v7062_v19 = vpop.f32.mrb[196].mxu0 }
0x14f3   :  { %v9372_v48 = vpop.f32.mrb[197].mxu0 }
0x15c4   :  { %v7132_v52 = vpop.f32.mrb[212].mxu1 }
0x15c5   :  { %v7133_v47 = vadd.f32 %v7132_v52, %v7062_v19  ;;  %v7134_v11 = vpop.f32.mrb[213].mxu1 }
0x15c7   :  { %v15674_v50 = vadd.f32 %v15671_v1, %v7133_v47 }
0x15c9   :  { %9374 = vmatpush3.msra.mxu0 %v15674_v50 }
0x15ca   :  { %9376 = vmatmul.mubr.msk.f32.vlgmr.msra.gmra.mrb[198].mxu0 %vm16230_vm9, %v15458_v2  ;;  %9713 = vmatprep.subr.bf16.mxu0 %v16231_v57  ;;  %vm16244_vm9 = vmmov %vm16241_vm0 }
0x15cb   :  { %9715 = vmatpush1.bf16.msra.mxu0 %v16232_v41  ;;  %7278 = vmatprep.mubr.f32.mxu0 %v16114_v24 }
0x15cc   :  { %9717 = vmatprep.subr.bf16.mxu0 %v16233_v15 }
0x15cf   :  { %9719 = vmatpush1.bf16.msra.mxu0 %v16234_v5 }
0x15d0   :  { %9721 = vmatprep.subr.bf16.mxu0 %v16235_v62 }
0x15d3   :  { %9723 = vmatpush1.bf16.msra.mxu0 %v16236_v26 }
0x15d4   :  { %9725 = vmatprep.subr.bf16.mxu0 %v16237_v12 }
0x15d7   :  { %9727 = vmatpush1.bf16.msra.mxu0 %v16238_v3 }
0x169d   :  { %v7207_v44 = vpop.f32.mrb[198].mxu0 }
0x169e   :  { %9105 = vmatmul.mubr.msk.f32.vlgmr.msra.gmra.mrb[200].mxu0 %vm907_vm2, %v7207_v44  ;;  %v9377_v25 = vpop.f32.mrb[199].mxu0 }
0x169f   :  { %7478 = vmatprep.mubr.f32.mxu0 %v16114_v24 }
0x1771   :  { %v7280_v53 = vpop.f32.mrb[200].mxu0 }
0x1772   :  { %v7282_v37 = vpop.f32.mrb[201].mxu0 }
0x1773   :  { %7285 = vmatprep.subr.mxu1 %v7282_v37 }
0x1774   :  { %7286 = vmatpush1.msra.mxu1 %v7280_v53 }
0x1775   :  { %9106 = vmatmul.mubr.msk.f32.vlgmr.msra.gmra.mrb[214].mxu1 %vm16239_vm4, %v15469_v29  ;;  %9745 = vmatprep.subr.msk.bf16.mxu1 %vm15535_vm3, %v16058_v18  ;;  %vm16245_vm4 = vmmov %vm16241_vm0 }
0x1776   :  { %7355 = vmatprep.mubr.f32.mxu1 %v16114_v24 }
0x1779   :  { %9107 = vmatmul.mubr.msk.f32.gmra.mrb[216].mxu1 %vm16240_vm13, %v15477_v49  ;;  %vm16246_vm13 = vmmov %vm16241_vm0 }
0x177a   :  { %7361 = vmatprep.mubr.f32.mxu1 %v16114_v24 }
0x177b   :  { %9747 = vmatpush1.bf16.xpose.msk.msra.mxu1 %vm15548_vm8, %v16058_v18 }
0x177c   :  { %9749 = vmatprep.subr.msk.bf16.mxu1 %vm15561_vm10, %v16058_v18 }
0x177d   :  { %9108 = vmatmul.mubr.msk.f32.gmra.mrb[218].mxu1 %vm16241_vm0, %v15485_v63 }
0x177e   :  { %7367 = vmatprep.mubr.f32.mxu1 %v16114_v24 }
0x1781   :  { %9109 = vmatmul.mubr.msk.f32.gmra.mrb[220].mxu1 %vm16242_vm6, %v15493_v4  ;;  %vm16247_vm6 = vmmov %vm16241_vm0 }
0x1782   :  { %7373 = vmatprep.mubr.f32.mxu1 %v16114_v24 }
0x1783   :  { %9751 = vmatpush1.bf16.xpose.msk.msra.mxu1 %vm15574_vm11, %v16058_v18 }
0x1784   :  { %9753 = vmatprep.subr.msk.bf16.mxu1 %vm15584_vm12, %v16058_v18 }
0x1785   :  { %9110 = vmatmul.mubr.msk.f32.gmra.mrb[222].mxu1 %vm16243_vm15, %v15501_v13  ;;  %vm16248_vm15 = vmmov %vm16241_vm0 }
0x1786   :  { %7379 = vmatprep.mubr.f32.mxu1 %v16114_v24 }
0x1789   :  { %9111 = vmatmul.mubr.msk.f32.gmra.mrb[224].mxu1 %vm16244_vm9, %v15509_v8  ;;  %vm16250_vm9 = vmmov %vm16241_vm0 }
0x178a   :  { %7385 = vmatprep.mubr.f32.mxu1 %v16114_v24 }
0x178b   :  { %9755 = vmatpush1.bf16.xpose.msk.msra.mxu1 %vm15600_vm1, %v16058_v18 }
0x178c   :  { %9757 = vmatprep.subr.msk.bf16.mxu1 %vm15610_vm7, %v16058_v18 }
0x178d   :  { %9112 = vmatmul.mubr.msk.f32.gmra.mrb[226].mxu1 %vm16245_vm4, %v15517_v43  ;;  %vm16251_vm4 = vmmov %vm16241_vm0 }
0x178e   :  { %7391 = vmatprep.mubr.f32.mxu1 %v16114_v24 }
0x1791   :  { %9113 = vmatmul.mubr.msk.f32.gmra.mrb[228].mxu1 %vm16246_vm13, %v15525_v60  ;;  %vm16252_vm13 = vmmov %vm16241_vm0 }
0x1793   :  { %9759 = vmatpush1.bf16.xpose.msk.msra.mxu1 %vm15626_vm14, %v16058_v18 }
0x1794   :  { %9761 = vmatprep.subr.bf16.mxu1 %v16231_v57 }
0x1848   :  { %v7351_v9 = vpop.f32.mrb[214].mxu1 }
0x1849   :  { %v7353_v30 = vpop.f32.mrb[215].mxu1  ;;  %v7398_v61 = vmul.f32 %v15402_v27, %v7351_v9 }
0x184a   :  { %v7399_v33 = vmul.f32 %v15405_v7, %v7353_v30 }
0x184c   :  { %v7357_v39 = vpop.f32.mrb[216].mxu1 }
0x184d   :  { %v7400_v36 = vmul.f32 %v15413_v20, %v7357_v39  ;;  %v7359_v42 = vpop.f32.mrb[217].mxu1 }
0x184e   :  { %v7401_v31 = vmul.f32 %v15415_v21, %v7359_v42 }
0x184f   :  { %v9730_v19 = vpack.c.bf16 %v7400_v36, %v7398_v61 }
0x1850   :  { %v9728_v48 = vpack.c.bf16 %v7401_v31, %v7399_v33  ;;  %v7363_v52 = vpop.f32.mrb[218].mxu1 }
0x1851   :  { %v7365_v47 = vpop.f32.mrb[219].mxu1  ;;  %v7402_v44 = vmul.f32 %v15424_v22, %v7363_v52 }
0x1852   :  { %9729 = vmatprep.subr.bf16.mxu0 %v9728_v48  ;;  %v7403_v37 = vmul.f32 %v15427_v0, %v7365_v47 }
0x1853   :  { %9731 = vmatpush1.bf16.msra.mxu0 %v9730_v19 }
0x1854   :  { %v7369_v11 = vpop.f32.mrb[220].mxu1 }
0x1855   :  { %v7404_v25 = vmul.f32 %v15432_v46, %v7369_v11  ;;  %v7371_v53 = vpop.f32.mrb[221].mxu1 }
0x1856   :  { %v7405_v9 = vmul.f32 %v15434_v14, %v7371_v53 }
0x1857   :  { %v9734_v39 = vpack.c.bf16 %v7404_v25, %v7402_v44 }
0x1858   :  { %v9732_v30 = vpack.c.bf16 %v7405_v9, %v7403_v37  ;;  %v7375_v18 = vpop.f32.mrb[222].mxu1 }
0x1859   :  { %v7377_v42 = vpop.f32.mrb[223].mxu1  ;;  %v7406_v36 = vmul.f32 %v15436_v17, %v7375_v18 }
0x185a   :  { %9733 = vmatprep.subr.bf16.mxu0 %v9732_v30  ;;  %v7407_v19 = vmul.f32 %v15438_v16, %v7377_v42 }
0x185b   :  { %9735 = vmatpush1.bf16.msra.mxu0 %v9734_v39 }
0x185c   :  { %v7381_v61 = vpop.f32.mrb[224].mxu1 }
0x185d   :  { %v7408_v33 = vmul.f32 %v15440_v51, %v7381_v61  ;;  %v7383_v31 = vpop.f32.mrb[225].mxu1 }
0x185e   :  { %v7409_v48 = vmul.f32 %v15442_v6, %v7383_v31 }
0x185f   :  { %v9738_v52 = vpack.c.bf16 %v7408_v33, %v7406_v36 }
0x1860   :  { %v9736_v47 = vpack.c.bf16 %v7409_v48, %v7407_v19  ;;  %v7387_v11 = vpop.f32.mrb[226].mxu1 }
0x1861   :  { %v7389_v53 = vpop.f32.mrb[227].mxu1  ;;  %v7410_v25 = vmul.f32 %v15444_v34, %v7387_v11 }
0x1862   :  { %9737 = vmatprep.subr.bf16.mxu0 %v9736_v47  ;;  %v7411_v18 = vmul.f32 %v15446_v10, %v7389_v53 }
0x1863   :  { %9739 = vmatpush1.bf16.msra.mxu0 %v9738_v52 }
0x1864   :  { %v7393_v44 = vpop.f32.mrb[228].mxu1 }
0x1865   :  { %v7412_v37 = vmul.f32 %v15448_v38, %v7393_v44  ;;  %v7395_v9 = vpop.f32.mrb[229].mxu1 }
0x1866   :  { %v7413_v39 = vmul.f32 %v15450_v40, %v7395_v9 }
0x1867   :  { %v9742_v30 = vpack.c.bf16 %v7412_v37, %v7410_v25  ;;  %v16249_v25 = vmov 1.0|1.0  }
0x1868   :  { %v9740_v42 = vpack.c.bf16 %v7413_v39, %v7411_v18 }
0x186a   :  { %9741 = vmatprep.subr.bf16.mxu0 %v9740_v42 }
0x186b   :  { %9743 = vmatpush1.bf16.msra.mxu0 %v9742_v30 }
0x186c   :  { %9378 = vmatprep.subr.mxu0 %v16114_v24 }
0x186e   :  { %9114 = vmatmul.mubr.msk.f32.vlgmr.msra.gmra.mrb[202].mxu0 %vm907_vm2, %v15652_v32 }
0x186f   :  { %9379 = vmatpush3.msra.mxu0 %v15674_v50  ;;  %9380 = vmatprep.mubr.msk.f32.mxu0 %vm16228_vm5, %v16114_v24 }
0x1870   :  { %9383 = vmatprep.subr.mxu0 %v16114_v24 }
0x1872   :  { %9381 = vmatmul.mubr.msk.f32.vlgmr.msra.gmra.mrb[204].mxu0 %vm16241_vm0, %v15664_v55 }
0x1873   :  { %9385 = vmatprep.mubr.msk.f32.mxu0 %vm16228_vm5, %v16114_v24 }
0x1941   :  { %v7480_v61 = vpop.f32.mrb[202].mxu0 }
0x1942   :  { %v7482_v36 = vpop.f32.mrb[203].mxu0 }
0x1943   :  { %7619 = vmatprep.mubr.f32.mxu1 %v7482_v36 }
0x1944   :  { %7620 = vmatmul.mubr.f32.vlgmr.msra.gmra.mrb[230].mxu1 %v7480_v61 }
0x1945   :  { %v7551_v33 = vpop.f32.mrb[204].mxu0  ;;  %9763 = vmatpush1.bf16.msra.mxu1 %v16232_v41  ;;  %7763 = vmatprep.mubr.f32.mxu1 %v16114_v24 }
0x1946   :  { %v9382_v50 = vpop.f32.mrb[205].mxu0  ;;  %9765 = vmatprep.subr.bf16.mxu1 %v16233_v15 }
0x1949   :  { %9767 = vmatpush1.bf16.msra.mxu1 %v16234_v5 }
0x194a   :  { %9769 = vmatprep.subr.bf16.mxu1 %v16235_v62 }
0x194d   :  { %9771 = vmatpush1.bf16.msra.mxu1 %v16236_v26 }
0x194e   :  { %9773 = vmatprep.subr.bf16.mxu1 %v16237_v12 }
0x1951   :  { %9775 = vmatpush1.bf16.msra.mxu1 %v16238_v3 }
0x1a17   :  { %v7621_v31 = vpop.f32.mrb[230].mxu1 }
0x1a18   :  { %v7622_v19 = vadd.f32 %v7621_v31, %v7551_v33  ;;  %v7623_v48 = vpop.f32.mrb[231].mxu1 }
0x1a1a   :  { %v15774_v52 = vadd.f32 %v7622_v19, %v15671_v1 }
0x1a1c   :  { %9384 = vmatpush3.msra.mxu0 %v15774_v52 }
0x1a1d   :  { %9386 = vmatmul.mubr.msk.f32.vlgmr.msra.gmra.mrb[206].mxu0 %vm16247_vm6, %v15458_v2  ;;  %vm16253_vm6 = vmmov %vm16241_vm0 }
0x1a1e   :  { %7834 = vmatprep.mubr.f32.mxu0 %v16114_v24 }
0x1af0   :  { %v7692_v47 = vpop.f32.mrb[206].mxu0 }
0x1af1   :  { %9133 = vmatmul.mubr.msk.f32.vlgmr.msra.gmra.mrb[232].mxu1 %vm907_vm2, %v7692_v47  ;;  %v9387_v11 = vpop.f32.mrb[207].mxu0 }
0x1af2   :  { %7963 = vmatprep.mubr.f32.mxu1 %v16114_v24 }
0x1bc4   :  { %v7765_v53 = vpop.f32.mrb[232].mxu1 }
0x1bc5   :  { %v7767_v44 = vpop.f32.mrb[233].mxu1 }
0x1bc6   :  { %7770 = vmatprep.subr.mxu0 %v7767_v44 }
0x1bc7   :  { %7771 = vmatpush1.msra.mxu0 %v7765_v53 }
0x1bc8   :  { %9134 = vmatmul.mubr.msk.f32.vlgmr.msra.gmra.mrb[208].mxu0 %vm16248_vm15, %v15469_v29  ;;  %9793 = vmatprep.subr.msk.bf16.mxu0 %vm15535_vm3, %v16249_v25  ;;  %vm16254_vm15 = vmmov %vm16241_vm0 }
0x1bc9   :  { %7840 = vmatprep.mubr.f32.mxu0 %v16114_v24 }
0x1bcc   :  { %9135 = vmatmul.mubr.msk.f32.gmra.mrb[210].mxu0 %vm16250_vm9, %v15477_v49  ;;  %vm16255_vm9 = vmmov %vm16241_vm0 }
0x1bcd   :  { %7846 = vmatprep.mubr.f32.mxu0 %v16114_v24 }
0x1bce   :  { %9795 = vmatpush1.bf16.xpose.msk.msra.mxu0 %vm15548_vm8, %v16249_v25 }
0x1bcf   :  { %9797 = vmatprep.subr.msk.bf16.mxu0 %vm15561_vm10, %v16249_v25 }
0x1bd0   :  { %9136 = vmatmul.mubr.msk.f32.gmra.mrb[212].mxu0 %vm16251_vm4, %v15485_v63  ;;  %vm16256_vm4 = vmmov %vm16241_vm0 }
0x1bd1   :  { %7852 = vmatprep.mubr.f32.mxu0 %v16114_v24 }
0x1bd4   :  { %9137 = vmatmul.mubr.msk.f32.gmra.mrb[214].mxu0 %vm16252_vm13, %v15493_v4  ;;  %vm16257_vm13 = vmmov %vm16241_vm0 }
0x1bd5   :  { %7858 = vmatprep.mubr.f32.mxu0 %v16114_v24 }
0x1bd6   :  { %9799 = vmatpush1.bf16.xpose.msk.msra.mxu0 %vm15574_vm11, %v16249_v25 }
0x1bd7   :  { %9801 = vmatprep.subr.msk.bf16.mxu0 %vm15584_vm12, %v16249_v25 }
0x1bd8   :  { %9138 = vmatmul.mubr.msk.f32.gmra.mrb[216].mxu0 %vm16241_vm0, %v15501_v13 }
0x1bd9   :  { %7864 = vmatprep.mubr.f32.mxu0 %v16114_v24 }
0x1bdc   :  { %9139 = vmatmul.mubr.msk.f32.gmra.mrb[218].mxu0 %vm16253_vm6, %v15509_v8  ;;  %vm16258_vm6 = vmmov %vm16241_vm0 }
0x1bdd   :  { %7870 = vmatprep.mubr.f32.mxu0 %v16114_v24 }
0x1bde   :  { %9803 = vmatpush1.bf16.xpose.msk.msra.mxu0 %vm15600_vm1, %v16249_v25 }
0x1bdf   :  { %9805 = vmatprep.subr.msk.bf16.mxu0 %vm15610_vm7, %v16249_v25 }
0x1be0   :  { %9140 = vmatmul.mubr.msk.f32.gmra.mrb[220].mxu0 %vm16254_vm15, %v15517_v43  ;;  %vm16259_vm15 = vmmov %vm16241_vm0 }
0x1be1   :  { %7876 = vmatprep.mubr.f32.mxu0 %v16114_v24 }
0x1be4   :  { %9141 = vmatmul.mubr.msk.f32.gmra.mrb[222].mxu0 %vm16255_vm9, %v15525_v60 }
0x1be6   :  { %9807 = vmatpush1.bf16.xpose.msk.msra.mxu0 %vm15626_vm14, %v16249_v25 }
0x1be7   :  { %9809 = vmatprep.subr.bf16.mxu0 %v16231_v57 }
0x1c9b   :  { %v7836_v37 = vpop.f32.mrb[208].mxu0 }
0x1c9c   :  { %v7838_v9 = vpop.f32.mrb[209].mxu0  ;;  %v7883_v39 = vmul.f32 %v15402_v27, %v7836_v37 }
0x1c9d   :  { %v7884_v61 = vmul.f32 %v15405_v7, %v7838_v9 }
0x1c9f   :  { %v7842_v18 = vpop.f32.mrb[210].mxu0 }
0x1ca0   :  { %v7885_v30 = vmul.f32 %v15413_v20, %v7842_v18  ;;  %v7844_v42 = vpop.f32.mrb[211].mxu0 }
0x1ca1   :  { %v7886_v36 = vmul.f32 %v15415_v21, %v7844_v42 }
0x1ca2   :  { %v9778_v33 = vpack.c.bf16 %v7885_v30, %v7883_v39 }
0x1ca3   :  { %v9776_v50 = vpack.c.bf16 %v7886_v36, %v7884_v61  ;;  %v7848_v31 = vpop.f32.mrb[212].mxu0 }
0x1ca4   :  { %v7850_v19 = vpop.f32.mrb[213].mxu0  ;;  %v7887_v57 = vmul.f32 %v15424_v22, %v7848_v31 }
0x1ca5   :  { %9777 = vmatprep.subr.bf16.mxu1 %v9776_v50  ;;  %v7888_v53 = vmul.f32 %v15427_v0, %v7850_v19 }
0x1ca6   :  { %9779 = vmatpush1.bf16.msra.mxu1 %v9778_v33 }
0x1ca7   :  { %v7854_v48 = vpop.f32.mrb[214].mxu0 }
0x1ca8   :  { %v7889_v47 = vmul.f32 %v15432_v46, %v7854_v48  ;;  %v7856_v11 = vpop.f32.mrb[215].mxu0 }
0x1ca9   :  { %v7890_v44 = vmul.f32 %v15434_v14, %v7856_v11 }
0x1caa   :  { %v9782_v37 = vpack.c.bf16 %v7889_v47, %v7887_v57 }
0x1cab   :  { %v9780_v9 = vpack.c.bf16 %v7890_v44, %v7888_v53  ;;  %v7860_v18 = vpop.f32.mrb[216].mxu0 }
0x1cac   :  { %v7862_v42 = vpop.f32.mrb[217].mxu0  ;;  %v7891_v30 = vmul.f32 %v15436_v17, %v7860_v18 }
0x1cad   :  { %9781 = vmatprep.subr.bf16.mxu1 %v9780_v9  ;;  %v7892_v33 = vmul.f32 %v15438_v16, %v7862_v42 }
0x1cae   :  { %9783 = vmatpush1.bf16.msra.mxu1 %v9782_v37 }
0x1caf   :  { %v7866_v39 = vpop.f32.mrb[218].mxu0 }
0x1cb0   :  { %v7893_v61 = vmul.f32 %v15440_v51, %v7866_v39  ;;  %v7868_v36 = vpop.f32.mrb[219].mxu0 }
0x1cb1   :  { %v7894_v50 = vmul.f32 %v15442_v6, %v7868_v36 }
0x1cb2   :  { %v9786_v31 = vpack.c.bf16 %v7893_v61, %v7891_v30 }
0x1cb3   :  { %v9784_v19 = vpack.c.bf16 %v7894_v50, %v7892_v33  ;;  %v7872_v48 = vpop.f32.mrb[220].mxu0 }
0x1cb4   :  { %v7874_v11 = vpop.f32.mrb[221].mxu0  ;;  %v7895_v47 = vmul.f32 %v15444_v34, %v7872_v48 }
0x1cb5   :  { %9785 = vmatprep.subr.bf16.mxu1 %v9784_v19  ;;  %v7896_v37 = vmul.f32 %v15446_v10, %v7874_v11 }
0x1cb6   :  { %9787 = vmatpush1.bf16.msra.mxu1 %v9786_v31 }
0x1cb7   :  { %v7878_v57 = vpop.f32.mrb[222].mxu0 }
0x1cb8   :  { %v7897_v53 = vmul.f32 %v15448_v38, %v7878_v57  ;;  %v7880_v44 = vpop.f32.mrb[223].mxu0 }
0x1cb9   :  { %v7898_v9 = vmul.f32 %v15450_v40, %v7880_v44 }
0x1cba   :  { %v9790_v18 = vpack.c.bf16 %v7897_v53, %v7895_v47 }
0x1cbb   :  { %v9788_v42 = vpack.c.bf16 %v7898_v9, %v7896_v37 }
0x1cbd   :  { %9789 = vmatprep.subr.bf16.mxu1 %v9788_v42 }
0x1cbe   :  { %9791 = vmatpush1.bf16.msra.mxu1 %v9790_v18 }
0x1cbf   :  { %9388 = vmatprep.subr.mxu1 %v16114_v24 }
0x1cc1   :  { %9142 = vmatmul.mubr.msk.f32.vlgmr.msra.gmra.mrb[234].mxu1 %vm907_vm2, %v15652_v32 }
0x1cc2   :  { %9389 = vmatpush3.msra.mxu1 %v15774_v52  ;;  %9390 = vmatprep.mubr.msk.f32.mxu1 %vm16228_vm5, %v16114_v24 }
0x1cc3   :  { %9393 = vmatprep.subr.mxu1 %v16114_v24 }
0x1cc5   :  { %9391 = vmatmul.mubr.msk.f32.vlgmr.msra.gmra.mrb[236].mxu1 %vm16256_vm4, %v15664_v55 }
0x1cc6   :  { %9395 = vmatprep.mubr.msk.f32.mxu1 %vm16228_vm5, %v16114_v24 }
0x1d94   :  { %v7965_v39 = vpop.f32.mrb[234].mxu1 }
0x1d95   :  { %v7967_v30 = vpop.f32.mrb[235].mxu1 }
0x1d96   :  { %8104 = vmatprep.mubr.f32.mxu0 %v7967_v30 }
0x1d97   :  { %8105 = vmatmul.mubr.f32.vlgmr.msra.gmra.mrb[224].mxu0 %v7965_v39 }
0x1d98   :  { %v8036_v61 = vpop.f32.mrb[236].mxu1  ;;  %9811 = vmatpush1.bf16.msra.mxu0 %v16232_v41  ;;  %8248 = vmatprep.mubr.f32.mxu0 %v16114_v24 }
0x1d99   :  { %v9392_v52 = vpop.f32.mrb[237].mxu1  ;;  %9813 = vmatprep.subr.bf16.mxu0 %v16233_v15 }
0x1d9c   :  { %9815 = vmatpush1.bf16.msra.mxu0 %v16234_v5 }
0x1d9d   :  { %9817 = vmatprep.subr.bf16.mxu0 %v16235_v62 }
0x1da0   :  { %9819 = vmatpush1.bf16.msra.mxu0 %v16236_v26 }
0x1da1   :  { %9821 = vmatprep.subr.bf16.mxu0 %v16237_v12 }
0x1da4   :  { %9823 = vmatpush1.bf16.msra.mxu0 %v16238_v3 }
0x1e6a   :  { %v8106_v36 = vpop.f32.mrb[224].mxu0 }
0x1e6b   :  { %v8107_v33 = vadd.f32 %v8106_v36, %v8036_v61  ;;  %v8108_v50 = vpop.f32.mrb[225].mxu0 }
0x1e6d   :  { %v15866_v41 = vadd.f32 %v8107_v33, %v15671_v1 }
0x1e6f   :  { %9394 = vmatpush3.msra.mxu1 %v15866_v41 }
0x1e70   :  { %9396 = vmatmul.mubr.msk.f32.vlgmr.msra.gmra.mrb[238].mxu1 %vm16257_vm13, %v15458_v2 }
0x1e71   :  { %8319 = vmatprep.mubr.f32.mxu1 %v16114_v24 }
0x1f43   :  { %v8177_v15 = vpop.f32.mrb[238].mxu1 }
0x1f44   :  { %9161 = vmatmul.mubr.msk.f32.vlgmr.msra.gmra.mrb[226].mxu0 %vm907_vm2, %v8177_v15  ;;  %v9397_v5 = vpop.f32.mrb[239].mxu1 }
0x1f45   :  { %8448 = vmatprep.mubr.f32.mxu0 %v16114_v24 }
0x2017   :  { %v8250_v62 = vpop.f32.mrb[226].mxu0 }
0x2018   :  { %v8252_v26 = vpop.f32.mrb[227].mxu0 }
0x2019   :  { %8255 = vmatprep.subr.mxu1 %v8252_v26 }
0x201a   :  { %8256 = vmatpush1.msra.mxu1 %v8250_v62 }
0x201b   :  { %9162 = vmatmul.mubr.msk.f32.vlgmr.msra.gmra.mrb[240].mxu1 %vm16241_vm0, %v15469_v29  ;;  %9841 = vmatprep.subr.msk.bf16.mxu1 %vm15535_vm3, %v16249_v25  ;;  %vm16260_vm3 = vmmov %vm16241_vm0 }
0x201c   :  { %8325 = vmatprep.mubr.f32.mxu1 %v16114_v24 }
0x201f   :  { %9163 = vmatmul.mubr.msk.f32.gmra.mrb[242].mxu1 %vm16258_vm6, %v15477_v49 }
0x2020   :  { %8331 = vmatprep.mubr.f32.mxu1 %v16114_v24 }
0x2021   :  { %9843 = vmatpush1.bf16.xpose.msk.msra.mxu1 %vm15548_vm8, %v16249_v25  ;;  %vm16261_vm8 = vmmov %vm16241_vm0 }
0x2022   :  { %9845 = vmatprep.subr.msk.bf16.mxu1 %vm15561_vm10, %v16249_v25  ;;  %vm16262_vm10 = vmmov %vm16241_vm0 }
0x2023   :  { %9164 = vmatmul.mubr.msk.f32.gmra.mrb[244].mxu1 %vm16259_vm15, %v15485_v63 }
0x2024   :  { %8337 = vmatprep.mubr.f32.mxu1 %v16114_v24 }
0x2027   :  { %9165 = vmatmul.mubr.msk.f32.gmra.mrb[246].mxu1 %vm16260_vm3, %v15493_v4 }
0x2028   :  { %8343 = vmatprep.mubr.f32.mxu1 %v16114_v24 }
0x2029   :  { %9847 = vmatpush1.bf16.xpose.msk.msra.mxu1 %vm15574_vm11, %v16249_v25  ;;  %vm16263_vm11 = vmmov %vm16241_vm0 }
0x202a   :  { %9849 = vmatprep.subr.msk.bf16.mxu1 %vm15584_vm12, %v16249_v25  ;;  %vm16264_vm12 = vmmov %vm16241_vm0 }
0x202b   :  { %9166 = vmatmul.mubr.msk.f32.gmra.mrb[248].mxu1 %vm16261_vm8, %v15501_v13 }
0x202c   :  { %8349 = vmatprep.mubr.f32.mxu1 %v16114_v24 }
0x202f   :  { %9167 = vmatmul.mubr.msk.f32.gmra.mrb[250].mxu1 %vm16262_vm10, %v15509_v8 }
0x2030   :  { %8355 = vmatprep.mubr.f32.mxu1 %v16114_v24 }
0x2031   :  { %9851 = vmatpush1.bf16.xpose.msk.msra.mxu1 %vm15600_vm1, %v16249_v25  ;;  %vm16265_vm1 = vmmov %vm16241_vm0 }
0x2032   :  { %9853 = vmatprep.subr.msk.bf16.mxu1 %vm15610_vm7, %v16249_v25  ;;  %vm8675_vm7 = vcmask 517120  }
0x2033   :  { %9168 = vmatmul.mubr.msk.f32.gmra.mrb[252].mxu1 %vm16263_vm11, %v15517_v43 }
0x2034   :  { %8361 = vmatprep.mubr.f32.mxu1 %v16114_v24 }
0x2037   :  { %9169 = vmatmul.mubr.msk.f32.gmra.mrb[254].mxu1 %vm16264_vm12, %v15525_v60 }
0x2039   :  { %9855 = vmatpush1.bf16.xpose.msk.msra.mxu1 %vm15626_vm14, %v16249_v25 }
0x20ee   :  { %v8321_v2 = vpop.f32.mrb[240].mxu1 }
0x20ef   :  { %v8323_v29 = vpop.f32.mrb[241].mxu1  ;;  %v8368_v63 = vmul.f32 %v15402_v27, %v8321_v2 }
0x20f0   :  { %v8369_v8 = vmul.f32 %v15405_v7, %v8323_v29 }
0x20f2   :  { %v8327_v49 = vpop.f32.mrb[242].mxu1 }
0x20f3   :  { %v8370_v4 = vmul.f32 %v15413_v20, %v8327_v49  ;;  %v8329_v13 = vpop.f32.mrb[243].mxu1 }
0x20f4   :  { %v8371_v43 = vmul.f32 %v15415_v21, %v8329_v13 }
0x20f5   :  { %v9826_v35 = vpack.c.bf16 %v8370_v4, %v8368_v63 }
0x20f6   :  { %v9824_v23 = vpack.c.bf16 %v8371_v43, %v8369_v8  ;;  %v8333_v59 = vpop.f32.mrb[244].mxu1 }
0x20f7   :  { %v8335_v60 = vpop.f32.mrb[245].mxu1  ;;  %v8372_v54 = vmul.f32 %v15424_v22, %v8333_v59 }
0x20f8   :  { %9825 = vmatprep.subr.bf16.mxu0 %v9824_v23  ;;  %v8373_v27 = vmul.f32 %v15427_v0, %v8335_v60 }
0x20f9   :  { %9827 = vmatpush1.bf16.msra.mxu0 %v9826_v35 }
0x20fa   :  { %v8339_v45 = vpop.f32.mrb[246].mxu1 }
0x20fb   :  { %v8374_v58 = vmul.f32 %v15432_v46, %v8339_v45  ;;  %v8341_v28 = vpop.f32.mrb[247].mxu1 }
0x20fc   :  { %v8375_v20 = vmul.f32 %v15434_v14, %v8341_v28 }
0x20fd   :  { %v9830_v56 = vpack.c.bf16 %v8374_v58, %v8372_v54 }
0x20fe   :  { %v9828_v7 = vpack.c.bf16 %v8375_v20, %v8373_v27  ;;  %v8345_v12 = vpop.f32.mrb[248].mxu1 }
0x20ff   :  { %v8347_v21 = vpop.f32.mrb[249].mxu1  ;;  %v8376_v25 = vmul.f32 %v15436_v17, %v8345_v12 }
0x2100   :  { %9829 = vmatprep.subr.bf16.mxu0 %v9828_v7  ;;  %v8377_v22 = vmul.f32 %v15438_v16, %v8347_v21 }
0x2101   :  { %9831 = vmatpush1.bf16.msra.mxu0 %v9830_v56 }
0x2102   :  { %v8351_v3 = vpop.f32.mrb[250].mxu1 }
0x2103   :  { %v8378_v31 = vmul.f32 %v15440_v51, %v8351_v3  ;;  %v8353_v19 = vpop.f32.mrb[251].mxu1 }
0x2104   :  { %v8379_v46 = vmul.f32 %v15442_v6, %v8353_v19 }
0x2105   :  { %v9834_v48 = vpack.c.bf16 %v8378_v31, %v8376_v25 }
0x2106   :  { %v9832_v0 = vpack.c.bf16 %v8379_v46, %v8377_v22  ;;  %v8357_v11 = vpop.f32.mrb[252].mxu1 }
0x2107   :  { %v8359_v14 = vpop.f32.mrb[253].mxu1  ;;  %v8380_v47 = vmul.f32 %v15444_v34, %v8357_v11 }
0x2108   :  { %9833 = vmatprep.subr.bf16.mxu0 %v9832_v0  ;;  %v8381_v17 = vmul.f32 %v15446_v10, %v8359_v14 }
0x2109   :  { %9835 = vmatpush1.bf16.msra.mxu0 %v9834_v48 }
0x210a   :  { %v8363_v57 = vpop.f32.mrb[254].mxu1 }
0x210b   :  { %v8382_v53 = vmul.f32 %v15448_v38, %v8363_v57  ;;  %v8365_v44 = vpop.f32.mrb[255].mxu1 }
0x210c   :  { %v8383_v51 = vmul.f32 %v15450_v40, %v8365_v44  ;;  %v6505_v40 = vld [vmem:[%s15976_s8 + $0x60] sm:$0x3] }
0x210d   :  { %v9838_v37 = vpack.c.bf16 %v8382_v53, %v8380_v47  ;;  %8598 = vperm.xlu0 %10081, %v6505_v40  }
0x210e   :  { %v9836_v16 = vpack.c.bf16 %v8383_v51, %v8381_v17 }
0x2110   :  { %9837 = vmatprep.subr.bf16.mxu0 %v9836_v16 }
0x2111   :  { %9839 = vmatpush1.bf16.msra.mxu0 %v9838_v37 }
0x2112   :  { %9398 = vmatprep.subr.mxu0 %v16114_v24 }
0x2114   :  { %9170 = vmatmul.mubr.msk.f32.vlgmr.msra.gmra.mrb[228].mxu0 %vm907_vm2, %v15652_v32  ;;  %vm16266_vm2 = vmmov %vm16241_vm0 }
0x2115   :  { %9399 = vmatpush3.msra.mxu0 %v15866_v41  ;;  %9400 = vmatprep.mubr.msk.f32.mxu0 %vm16228_vm5, %v16114_v24 }
0x2116   :  { %9403 = vmatprep.subr.mxu0 %v16114_v24 }
0x2118   :  { %9401 = vmatmul.mubr.msk.f32.vlgmr.msra.gmra.mrb[230].mxu0 %vm16265_vm1, %v15664_v55 }
0x2119   :  { %9405 = vmatprep.mubr.msk.f32.mxu0 %vm16228_vm5, %v16114_v24  ;;  %v6495_v24 = vld [vmem:[%s15976_s8 + $0x18] sm:$0x3] }
0x218c   :  { %v8599_v55 = vpop.permute.xlu0 %8598 }
0x21e7   :  { %v8450_v6 = vpop.f32.mrb[228].mxu0 }
0x21e8   :  { %v8452_v34 = vpop.f32.mrb[229].mxu0 }
0x21e9   :  { %8589 = vmatprep.mubr.f32.mxu1 %v8452_v34 }
0x21ea   :  { %8590 = vmatmul.mubr.f32.vlgmr.msra.gmra.mrb[0].mxu1 %v8450_v6 }
0x21eb   :  { %v8521_v10 = vpop.f32.mrb[230].mxu0 }
0x21ec   :  { %v9402_v38 = vpop.f32.mrb[231].mxu0 }
0x22bd   :  { %v8591_v32 = vpop.f32.mrb[0].mxu1 }
0x22be   :  { %v8592_v9 = vadd.f32 %v8591_v32, %v8521_v10  ;;  %v8593_v18 = vpop.f32.mrb[1].mxu1 }
0x22c0   :  { %v8595_v42 = vadd.f32 %v8592_v9, %v15671_v1 }
0x22c2   :  { %9404 = vmatpush3.msra.mxu0 %v8595_v42 }
0x22c3   :  { %9406 = vmatmul.mubr.msk.f32.vlgmr.msra.gmra.mrb[232].mxu0 %vm16266_vm2, %v6495_v24 }
0x2396   :  { %v8670_v39 = vpop.f32.mrb[232].mxu0 }
0x2397   :  { %v8671_v30 = vadd.f32 %v8670_v39, %v8599_v55  ;;  %v9407_v61 = vpop.f32.mrb[233].mxu0 }
0x2399   :  { %v8674_v52 = vmax.f32 %v8671_v30, 0.0 }
0x239b   :  { %8676 = vst.msk [vmem:[#allocation2] sm:$0x3] %vm8675_vm7, %v8674_v52 }
0x239c   :  { %10741 = shalt.err (!%p10738_p4)
}
0x239d   :  { %s10742_s10 = scalar_lea.hbm %s15977_s9, 32 }
0x239e   :  { %p10743_p5 = scmp.ne.s32.totalorder %s15977_s9, %s10742_s10  ;;  %p10746_p6 = scmp.lt.u32.totalorder %s10742_s10, %s15977_s9 }
0x23a0   :  { %p10748_p7 = pnand %p10746_p6, %p10743_p5 }
0x23a2   :  { %10751 = shalt.err (!%p10748_p7)
}
0x23a3   :  { %8686 = dma.vmem_to_hbm [thread:$0]  %s8684_s6, 32, %s15977_s9, [#allocation3]  }
0x23a4   :  { %10752 = dma.done.wait [#allocation3], 32  }
0x23a5   :  { %10753 = vsyncadd [#allocation3], 4294967264 }
0x23a6   :  { %8690 = vsyncpa [#allocation3], 1 }

</bundles_post_ra>
